<compile_context>
chip_gen: v5e
topology: v5e:2x2
jax: 0.10.0
libtpu: 0.0.40
codegen_flags: <defaults>
</compile_context>

<pallas_src>
import math

import jax
import jax.numpy as jnp
import numpy as np
from jax.experimental import pallas as pl
from jax.experimental.pallas import tpu as pltpu


def _round_up(x, m):
    return (x + m - 1) // m * m


def pos_embed_kernel(x_ref, r_ref, cos_ref, id_ref, o_ref):
    """One row-tile of the packed positional embedding.

    x_ref   : (tm, GC)   GC = group*C packed input lanes (multiple of 128)
    r_ref   : (GC, GF)   bf16 one-hot matrix; column weight = freq (sin lanes),
                         freq/2 (cos lanes), 1 (identity lanes)
    cos_ref : (1, GF)    1.0 on cos lanes, else 0.0
    id_ref  : (1, GF)    1.0 on identity lanes, else 0.0
    o_ref   : (tm, GF)   GF = group*C*(2*N_freqs+1) packed output lanes
    """
    x = x_ref[...].astype(jnp.float32)

    # Exact 3-way bf16 split of x (each chunk is exactly bf16-representable),
    # so every bf16 MXU pass below is exact and the f32 sum reconstructs
    # weight*x bit-exactly (all weights are powers of two).
    x_hi = x.astype(jnp.bfloat16)
    r1 = x - x_hi.astype(jnp.float32)
    x_mid = r1.astype(jnp.bfloat16)
    x_lo = (r1 - x_mid.astype(jnp.float32)).astype(jnp.bfloat16)

    r = r_ref[...]
    wide = jnp.dot(x_hi, r, preferred_element_type=jnp.float32)
    wide = wide + jnp.dot(x_mid, r, preferred_element_type=jnp.float32)
    wide = wide + jnp.dot(x_lo, r, preferred_element_type=jnp.float32)
    # wide[:, q] == freq*x on sin lanes, (freq/2)*x on cos lanes, x on id lanes.

    s = jnp.sin(wide)                        # single transcendental pass (EUP)
    cos_val = 1.0 - 2.0 * s * s              # cos(2t) = 1 - 2 sin(t)^2  (VPU)
    feats = jnp.where(cos_ref[...] > 0.5, cos_val, s)
    out = jnp.where(id_ref[...] > 0.5, wide, feats)
    o_ref[...] = out.astype(o_ref.dtype)     # one aligned full-width store


def _build_tables(C, N_freqs, group):
    """Constant tables, passed to pallas_call as inputs (not captured)."""
    feat = C * (2 * N_freqs + 1)
    GC, GF = group * C, group * feat
    q = np.arange(GF)
    f = q % feat                     # feature index within an original row
    j = f // C                       # 0 = identity, then (sin, cos) pairs
    c = f % C                        # channel
    src = (q // feat) * C + c        # source packed-input lane
    i = np.maximum(j - 1, 0) // 2    # frequency index
    is_id = j == 0
    is_cos = (~is_id) & (((j - 1) % 2) == 1)
    w = np.where(is_id, 1.0, np.where(is_cos, 2.0 ** (i - 1), 2.0 ** i))
    R = np.zeros((GC, GF), np.float32)
    R[src, q] = w                    # powers of two: exact in bf16
    return (jnp.asarray(R, dtype=jnp.bfloat16),
            jnp.asarray(is_cos.astype(np.float32).reshape(1, GF)),
            jnp.asarray(is_id.astype(np.float32).reshape(1, GF)))


def position_embedding(x, N_freqs=10, *, tm=None):
    """JAX/Pallas equivalent of PositionEmbedding.forward(x)."""
    in_shape = x.shape
    C = int(in_shape[-1])
    M = int(np.prod(in_shape[:-1])) if len(in_shape) > 1 else 1
    feat = C * (2 * N_freqs + 1)
    itemsize = jnp.dtype(x.dtype).itemsize

    # Rows packed per block row so group*C is a multiple of 128 (lane-dense).
    group = 128 // math.gcd(C, 128)
    if group * C * group * feat > (4 << 20):
        group = 1  # TODO(synk): lane-sparse fallback for unusual channel counts
    GC, GF = group * C, group * feat

    M_pad = _round_up(M, group)                 # pad only to pack granularity
    x2 = x.reshape(M, C)
    if M_pad != M:
        x2 = jnp.pad(x2, ((0, M_pad - M), (0, 0)))
    Mp = M_pad // group
    xp = x2.reshape(Mp, GC)                     # free reshape (contiguous)

    R, cos_row, id_row = _build_tables(C, N_freqs, group)

    # Row-tile sizing: 128-lane-aware VMEM budget (double-buffered in/out
    # blocks + ~5 f32 temporaries of the wide tensor), capped so the grid has
    # >= 4 steps when possible (v7x megacore sharding).
    if tm is None:
        bytes_per_row = 2 * GC * 4 + 2 * GF * itemsize + 5 * GF * 4
        tm = (24 << 20) // max(bytes_per_row, 1)
    tm = int(tm)
    tm = min(tm, _round_up(max(-(-Mp // 4), 8), 8))
    tm = max(8, (tm // 8) * 8)
    tm = min(tm, 1024)
    if Mp <= tm:
        tm = Mp                                  # single block == array dims
    grid_m = (Mp + tm - 1) // tm                 # ragged last block is masked

    out_p = pl.pallas_call(
        pos_embed_kernel,
        out_shape=jax.ShapeDtypeStruct((Mp, GF), x.dtype),
        grid=(grid_m,),
        in_specs=[
            pl.BlockSpec((tm, GC), lambda i: (i, 0)),
            pl.BlockSpec((GC, GF), lambda i: (0, 0)),   # fetched once, reused
            pl.BlockSpec((1, GF), lambda i: (0, 0)),
            pl.BlockSpec((1, GF), lambda i: (0, 0)),
        ],
        out_specs=pl.BlockSpec((tm, GF), lambda i: (i, 0)),
        compiler_params=pltpu.CompilerParams(
            dimension_semantics=("parallel",),
            vmem_limit_bytes=48 * 1024 * 1024,
        ),
        cost_estimate=pl.CostEstimate(
            flops=2 * 3 * Mp * GC * GF + 6 * Mp * GF,
            transcendentals=Mp * GF,
            bytes_accessed=(M_pad * (C + feat) * itemsize
                            + GC * GF * 2 + 2 * GF * 4),
        ),
    )(xp, R, cos_row, id_row)

    out2 = out_p.reshape(M_pad, feat)            # free reshape
    if M_pad != M:
        out2 = out2[:M]
    return out2.reshape(*in_shape[:-1], feat)


def position_embedding_ref(x, N_freqs=10):
    """Pure-JAX reference (mirrors the PyTorch forward exactly)."""
    outs = [x]
    for i in range(N_freqs):
        f = 2.0 ** i
        outs.append(jnp.sin(f * x))
        outs.append(jnp.cos(f * x))
    return jnp.concatenate(outs, axis=-1)


if __name__ == "__main__":
    N_freqs = 10

    # Module-consistent small shape: (batch=2, seq=64, in_channels=4).
    x = jax.random.normal(jax.random.PRNGKey(0), (2, 64, 4), dtype=jnp.float32)
    out = jax.block_until_ready(position_embedding(x, N_freqs=N_freqs))
    ref = position_embedding_ref(x, N_freqs=N_freqs)
    expected_shape = (2, 64, 4 * (2 * N_freqs + 1))
    assert out.shape == expected_shape, (out.shape, expected_shape)
    # atol 2e-5: covers the <=4e-7 double-angle rounding on cos lanes plus a
    # couple of ulps of sin-implementation noise; freq*x itself is bit-exact.
    np.testing.assert_allclose(np.asarray(out), np.asarray(ref), rtol=1e-5, atol=2e-5)

    # Ragged leading dim (M=15, not a multiple of the 32-row pack) to exercise
    # the pad-to-group + slice path.
    x_r = jax.random.normal(jax.random.PRNGKey(1), (3, 5, 4), dtype=jnp.float32)
    out_r = jax.block_until_ready(position_embedding(x_r, N_freqs=N_freqs))
    ref_r = position_embedding_ref(x_r, N_freqs=N_freqs)
    np.testing.assert_allclose(np.asarray(out_r), np.asarray(ref_r), rtol=1e-5, atol=2e-5)

    print("KERNEL_OK")
</pallas_src>

<mosaic_0001>
module attributes {stable_mosaic.version = 11 : i64} {
  func.func @pos_embed_kernel(%arg0: i32, %arg1: memref<4x128xf32, #tpu.memory_space<vmem>>, %arg2: memref<128x2688xbf16, #tpu.memory_space<vmem>>, %arg3: memref<1x2688xf32, #tpu.memory_space<vmem>>, %arg4: memref<1x2688xf32, #tpu.memory_space<vmem>>, %arg5: memref<4x2688xf32, #tpu.memory_space<vmem>>) attributes {dimension_semantics = [#tpu.dimension_semantics<parallel>], iteration_bounds = array<i64: 1>, scalar_prefetch = 0 : i64, scratch_operands = 0 : i64, tpu.core_type = #tpu.core_type<tc>, window_params = [{transform_indices = @transform_0, window_bounds = array<i64: 4, 128>}, {pipeline_mode = #tpu.pipeline_mode<synchronous>, transform_indices = @transform_1, window_bounds = array<i64: 128, 2688>}, {pipeline_mode = #tpu.pipeline_mode<synchronous>, transform_indices = @transform_2, window_bounds = array<i64: 1, 2688>}, {pipeline_mode = #tpu.pipeline_mode<synchronous>, transform_indices = @transform_3, window_bounds = array<i64: 1, 2688>}, {transform_indices = @transform_4, window_bounds = array<i64: 4, 2688>}]} {
    %c0 = arith.constant 0 : index
    %c0_0 = arith.constant 0 : index
    %0 = vector.load %arg1[%c0, %c0_0] : memref<4x128xf32, #tpu.memory_space<vmem>>, vector<4x128xf32>
    %1 = arith.truncf %0 : vector<4x128xf32> to vector<4x128xbf16>
    %2 = arith.extf %1 : vector<4x128xbf16> to vector<4x128xf32>
    %3 = arith.subf %0, %2 : vector<4x128xf32>
    %4 = arith.truncf %3 : vector<4x128xf32> to vector<4x128xbf16>
    %5 = arith.extf %4 : vector<4x128xbf16> to vector<4x128xf32>
    %6 = arith.subf %3, %5 : vector<4x128xf32>
    %7 = arith.truncf %6 : vector<4x128xf32> to vector<4x128xbf16>
    %c0_1 = arith.constant 0 : index
    %c0_2 = arith.constant 0 : index
    %8 = vector.load %arg2[%c0_1, %c0_2] : memref<128x2688xbf16, #tpu.memory_space<vmem>>, vector<128x2688xbf16>
    %cst = arith.constant dense<0.000000e+00> : vector<4x2688xf32>
    %9 = tpu.matmul %1, %8, %cst {dimension_numbers = #tpu.dot_dimension_numbers<[1], [0], [0], [1], [0, 0, 1, 1], [], []>} : vector<4x128xbf16>, vector<128x2688xbf16>, vector<4x2688xf32> -> vector<4x2688xf32>
    %cst_3 = arith.constant dense<0.000000e+00> : vector<4x2688xf32>
    %10 = tpu.matmul %4, %8, %cst_3 {dimension_numbers = #tpu.dot_dimension_numbers<[1], [0], [0], [1], [0, 0, 1, 1], [], []>} : vector<4x128xbf16>, vector<128x2688xbf16>, vector<4x2688xf32> -> vector<4x2688xf32>
    %11 = arith.addf %9, %10 : vector<4x2688xf32>
    %cst_4 = arith.constant dense<0.000000e+00> : vector<4x2688xf32>
    %12 = tpu.matmul %7, %8, %cst_4 {dimension_numbers = #tpu.dot_dimension_numbers<[1], [0], [0], [1], [0, 0, 1, 1], [], []>} : vector<4x128xbf16>, vector<128x2688xbf16>, vector<4x2688xf32> -> vector<4x2688xf32>
    %13 = arith.addf %11, %12 : vector<4x2688xf32>
    %14 = math.sin %13 : vector<4x2688xf32>
    %cst_5 = arith.constant 2.000000e+00 : f32
    %15 = vector.broadcast %cst_5 : f32 to vector<4x2688xf32>
    %16 = arith.mulf %15, %14 : vector<4x2688xf32>
    %17 = arith.mulf %16, %14 : vector<4x2688xf32>
    %cst_6 = arith.constant 1.000000e+00 : f32
    %18 = vector.broadcast %cst_6 : f32 to vector<4x2688xf32>
    %19 = arith.subf %18, %17 : vector<4x2688xf32>
    %c0_7 = arith.constant 0 : index
    %c0_8 = arith.constant 0 : index
    %20 = vector.load %arg3[%c0_7, %c0_8] : memref<1x2688xf32, #tpu.memory_space<vmem>>, vector<1x2688xf32>
    %cst_9 = arith.constant 5.000000e-01 : f32
    %21 = vector.broadcast %cst_9 : f32 to vector<1x2688xf32>
    %22 = arith.cmpf ogt, %20, %21 : vector<1x2688xf32>
    %23 = vector.shape_cast %22 : vector<1x2688xi1> to vector<1x2688xi1>
    %24 = vector.broadcast %23 : vector<1x2688xi1> to vector<4x2688xi1>
    %25 = arith.select %24, %19, %14 : vector<4x2688xi1>, vector<4x2688xf32>
    %c0_10 = arith.constant 0 : index
    %c0_11 = arith.constant 0 : index
    %26 = vector.load %arg4[%c0_10, %c0_11] : memref<1x2688xf32, #tpu.memory_space<vmem>>, vector<1x2688xf32>
    %cst_12 = arith.constant 5.000000e-01 : f32
    %27 = vector.broadcast %cst_12 : f32 to vector<1x2688xf32>
    %28 = arith.cmpf ogt, %26, %27 : vector<1x2688xf32>
    %29 = vector.shape_cast %28 : vector<1x2688xi1> to vector<1x2688xi1>
    %30 = vector.broadcast %29 : vector<1x2688xi1> to vector<4x2688xi1>
    %31 = arith.select %30, %13, %25 : vector<4x2688xi1>, vector<4x2688xf32>
    %c0_13 = arith.constant 0 : index
    %c0_14 = arith.constant 0 : index
    %32 = vector.load %arg5[%c0_13, %c0_14] : memref<4x2688xf32, #tpu.memory_space<vmem>>, vector<4x2688xf32>
    tpu.vector_store %arg5[%c0_13, %c0_14], %31 {strides = array<i32>} : memref<4x2688xf32, #tpu.memory_space<vmem>>, vector<4x2688xf32>,
    return
  }
  func.func @transform_0(%arg0: i32) -> (i32, i32) {
    %c0_i32 = arith.constant 0 : i32
    %c0_i32_0 = arith.constant 0 : i32
    return %arg0, %c0_i32 : i32, i32
  }
  func.func @transform_1(%arg0: i32) -> (i32, i32) {
    %c0_i32 = arith.constant 0 : i32
    %c0_i32_0 = arith.constant 0 : i32
    %c0_i32_1 = arith.constant 0 : i32
    return %c0_i32, %c0_i32_0 : i32, i32
  }
  func.func @transform_2(%arg0: i32) -> (i32, i32) {
    %c0_i32 = arith.constant 0 : i32
    %c0_i32_0 = arith.constant 0 : i32
    %c0_i32_1 = arith.constant 0 : i32
    return %c0_i32, %c0_i32_0 : i32, i32
  }
  func.func @transform_3(%arg0: i32) -> (i32, i32) {
    %c0_i32 = arith.constant 0 : i32
    %c0_i32_0 = arith.constant 0 : i32
    %c0_i32_1 = arith.constant 0 : i32
    return %c0_i32, %c0_i32_0 : i32, i32
  }
  func.func @transform_4(%arg0: i32) -> (i32, i32) {
    %c0_i32 = arith.constant 0 : i32
    %c0_i32_0 = arith.constant 0 : i32
    return %arg0, %c0_i32 : i32, i32
  }
}

</mosaic_0001>

<bundles_post_ra>
// kernel: tpu_custom_call.1
= control target key start
LH: loop header
LB: loop body
LE: loop exit
PB: predicated region body
PF: predicated region fallthrough
CT: control target
= control target key end

     0   :  { %9 = vsyncpa [#allocation3], 0  ;;  %s10570_s0 = inlined_call_operand.hbm [shape: f32[4,128], index: 0, kind: input, shape index: {}]   ;;  %s10571_s1 = inlined_call_operand.hbm [shape: bf16[128,2688], index: 1, kind: input, shape index: {}]   ;;  %s10572_s2 = inlined_call_operand.hbm [shape: f32[1,2688], index: 2, kind: input, shape index: {}]   ;;  %s10573_s3 = inlined_call_operand.hbm [shape: f32[1,2688], index: 3, kind: input, shape index: {}]   ;;  %s10574_s4 = inlined_call_operand.hbm [shape: f32[4,2688], index: 4, kind: output, shape index: {}]  }
   0x1   :  { %10 = vsyncpa [#allocation6], 0 }
   0x2   :  { %11 = vsyncpa [#allocation9], 0  ;;  %s28_s17 = sshll.u32 %s10571_s1, 4  ;;  %s29_s17 = int_to_ptr.hbm [resolvable:$true] %s28_s17 }
   0x3   :  { %12 = vsyncpa [#allocation4], 0  ;;  %s6535_s18 = smov [#allocation5]   ;;  %s18_s22 = sshll.u32 %s10570_s0, 4  ;;  %s19_s22 = int_to_ptr.hbm [resolvable:$true] %s18_s22 }
   0x4   :  { %s30_s19 = sshll.u32 %s6535_s18, 4  ;;  %s6536_s23 = smov 1344   ;;  %s31_s19 = int_to_ptr.vmem [resolvable:$true] %s30_s19 }
   0x5   :  { %s6537_s24 = smov 84   ;;  %s6538_s25 = smov [#allocation2]  }
   0x6   :  { %36 = dma.hbm_to_vmem [thread:$0]  %s29_s17, 21504, %s31_s19, [#allocation6], %s6536_s23, %s6536_s23, %s6537_s24  }
   0x7   :  { %s20_s26 = sshll.u32 %s6538_s25, 4  ;;  %s42_s29 = sshll.u32 %s10572_s2, 4  ;;  %s21_s26 = int_to_ptr.vmem [resolvable:$true] %s20_s26  ;;  %s43_s29 = int_to_ptr.hbm [resolvable:$true] %s42_s29 }
   0x8   :  { %23 = dma.hbm_to_vmem [thread:$0]  %s19_s22, 64, %s21_s26, [#allocation3]  }
   0x9   :  { %s53_s5 = sshll.u32 %s10573_s3, 4  ;;  %s6539_s6 = smov [#allocation7]   ;;  %s54_s5 = int_to_ptr.hbm [resolvable:$true] %s53_s5 }
   0xa   :  { %s44_s7 = sshll.u32 %s6539_s6, 4  ;;  %s6540_s0 = smov [#allocation8]   ;;  %s45_s7 = int_to_ptr.vmem [resolvable:$true] %s44_s7 }
   0xb   :  { %47 = dma.hbm_to_vmem [thread:$0]  %s43_s29, 336, %s45_s7, [#allocation6]  }
   0xc   :  { %s55_s8 = sshll.u32 %s6540_s0, 4  ;;  %s56_s8 = int_to_ptr.vmem [resolvable:$true] %s55_s8 }
   0xd   :  { %58 = dma.hbm_to_vmem [thread:$0]  %s54_s5, 336, %s56_s8, [#allocation9]  }
   0xe   :  { %6527 = dma.done.wait [#allocation3], 64  }
   0xf   :  { %6528 = vsyncadd [#allocation3], 4294967232 }
  0x10   :  { %6529 = dma.done.wait [#allocation6], 21840  }
  0x11   :  { %6530 = vsyncadd [#allocation6], 4294945456 }
  0x12   :  { %6531 = dma.done.wait [#allocation9], 336  }
  0x13   :  { %6532 = vsyncadd [#allocation9], 4294966960  ;;  %v6080_v0 = vld [vmem:[#allocation5 + $0x498] sm:$0xf]  ;;  %v6382_v1 = vld [vmem:[#allocation5 + $0x4e8] sm:$0xf0] }
  0x14   :  { %v6372_v2 = vld [vmem:[#allocation5 + $0x49c] sm:$0xf]  ;;  %v6586_v3 = vor.u32 %v6382_v1, %v6080_v0  ;;  %v6082_v4 = vld [vmem:[#allocation5 + $0x4ec] sm:$0xf0]  ;;  %v6088_v5 = vld [vmem:[#allocation5 + $0x4a0] sm:$0xf] }
  0x15   :  { %v6383_v6 = vld [vmem:[#allocation5 + $0x4f0] sm:$0xf0]  ;;  %v6588_v7 = vor.u32 %v6372_v2, %v6082_v4  ;;  %v6373_v9 = vld [vmem:[#allocation5 + $0x4a4] sm:$0xf]  ;;  %v6090_v10 = vld [vmem:[#allocation5 + $0x4f4] sm:$0xf0] }
  0x16   :  { %v6590_v8 = vor.u32 %v6383_v6, %v6088_v5  ;;  %v5996_v11 = vld [vmem:[#allocation5 + $0x3f0] sm:$0xf]  ;;  %1107 = vmatpush.bf16.msra.mxu0 %v6586_v3  ;;  %v6593_v12 = vor.u32 %v6373_v9, %v6090_v10  ;;  %v6361_v13 = vld [vmem:[#allocation5 + $0x440] sm:$0xf0]  ;;  %v6351_v14 = vld [vmem:[#allocation5 + $0x3f4] sm:$0xf] }
  0x17   :  { %v5998_v15 = vld [vmem:[#allocation5 + $0x444] sm:$0xf0]  ;;  %1120 = vmatpush.bf16.msra.mxu1 %v6588_v7  ;;  %v6597_v16 = vor.u32 %v6361_v13, %v5996_v11  ;;  %v6004_v18 = vld [vmem:[#allocation5 + $0x3f8] sm:$0xf]  ;;  %v6362_v19 = vld [vmem:[#allocation5 + $0x448] sm:$0xf0] }
  0x18   :  { %1133 = vmatpush.bf16.msra.mxu2 %v6590_v8  ;;  %v6599_v17 = vor.u32 %v6351_v14, %v5998_v15  ;;  %v6352_v20 = vld [vmem:[#allocation5 + $0x3fc] sm:$0xf]  ;;  %1146 = vmatpush.bf16.msra.mxu3 %v6593_v12  ;;  %v6602_v21 = vor.u32 %v6362_v19, %v6004_v18  ;;  %v6006_v22 = vld [vmem:[#allocation5 + $0x44c] sm:$0xf0]  ;;  %v5912_v23 = vld [vmem:[#allocation5 + $0x348] sm:$0xf] }
  0x19   :  { %v6340_v24 = vld [vmem:[#allocation5 + $0x398] sm:$0xf0]  ;;  %v6604_v25 = vor.u32 %v6352_v20, %v6006_v22  ;;  %v6330_v26 = vld [vmem:[#allocation5 + $0x34c] sm:$0xf]  ;;  %v5914_v27 = vld [vmem:[#allocation5 + $0x39c] sm:$0xf0] }
  0x1a   :  { %v5920_v28 = vld [vmem:[#allocation5 + $0x350] sm:$0xf]  ;;  %1108 = vmatpush.bf16.msra.mxu0 %v6597_v16  ;;  %v6607_v29 = vor.u32 %v6340_v24, %v5912_v23  ;;  %v6341_v30 = vld [vmem:[#allocation5 + $0x3a0] sm:$0xf0]  ;;  %v6331_v31 = vld [vmem:[#allocation5 + $0x354] sm:$0xf]  ;;  %v6611_v33 = vor.u32 %v6330_v26, %v5914_v27 }
  0x1b   :  { %v5922_v32 = vld [vmem:[#allocation5 + $0x3a4] sm:$0xf0]  ;;  %1121 = vmatpush.bf16.msra.mxu1 %v6599_v17  ;;  %v6613_v34 = vor.u32 %v6341_v30, %v5920_v28  ;;  %v5828_v35 = vld [vmem:[#allocation5 + $0x2a0] sm:$0xf]  ;;  %v6319_v36 = vld [vmem:[#allocation5 + $0x2f0] sm:$0xf0] }
  0x1c   :  { %1134 = vmatpush.bf16.msra.mxu2 %v6602_v21  ;;  %v6309_v37 = vld [vmem:[#allocation5 + $0x2a4] sm:$0xf]  ;;  %1147 = vmatpush.bf16.msra.mxu3 %v6604_v25  ;;  %v6616_v38 = vor.u32 %v6331_v31, %v5922_v32  ;;  %v5830_v39 = vld [vmem:[#allocation5 + $0x2f4] sm:$0xf0]  ;;  %v5836_v40 = vld [vmem:[#allocation5 + $0x2a8] sm:$0xf]  ;;  %v6619_v44 = vor.u32 %v6319_v36, %v5828_v35 }
  0x1d   :  { %v6320_v41 = vld [vmem:[#allocation5 + $0x2f8] sm:$0xf0]  ;;  %v6310_v42 = vld [vmem:[#allocation5 + $0x2ac] sm:$0xf]  ;;  %v5838_v43 = vld [vmem:[#allocation5 + $0x2fc] sm:$0xf0]  ;;  %v6623_v45 = vor.u32 %v6309_v37, %v5830_v39 }
  0x1e   :  { %1109 = vmatpush.bf16.msra.mxu0 %v6607_v29  ;;  %v6625_v46 = vor.u32 %v6320_v41, %v5836_v40  ;;  %v5744_v47 = vld [vmem:[#allocation5 + $0x1f8] sm:$0xf]  ;;  %v6298_v48 = vld [vmem:[#allocation5 + $0x248] sm:$0xf0]  ;;  %v6288_v49 = vld [vmem:[#allocation5 + $0x1fc] sm:$0xf]  ;;  %v6628_v50 = vor.u32 %v6310_v42, %v5838_v43 }
  0x1f   :  { %1122 = vmatpush.bf16.msra.mxu1 %v6611_v33  ;;  %v5746_v51 = vld [vmem:[#allocation5 + $0x24c] sm:$0xf0]  ;;  %v5752_v52 = vld [vmem:[#allocation5 + $0x200] sm:$0xf]  ;;  %v6299_v53 = vld [vmem:[#allocation5 + $0x250] sm:$0xf0]  ;;  %v6631_v56 = vor.u32 %v6298_v48, %v5744_v47 }
  0x20   :  { %1135 = vmatpush.bf16.msra.mxu2 %v6613_v34  ;;  %10831 = vst [vmem:[#allocation15_spill] sm:$0xff] %v6625_v46  ;;  %1148 = vmatpush.bf16.msra.mxu3 %v6616_v38  ;;  %v6289_v54 = vld [vmem:[#allocation5 + $0x204] sm:$0xf]  ;;  %v5754_v55 = vld [vmem:[#allocation5 + $0x254] sm:$0xf0]  ;;  %v6635_v57 = vor.u32 %v6288_v49, %v5746_v51  ;;  %v6637_v58 = vor.u32 %v6299_v53, %v5752_v52  ;;  %s6548_s2 = smov [#allocation10]  }
  0x21   :  { %10832 = vst [vmem:[#allocation16_spill] sm:$0xff] %v6628_v50  ;;  %v5660_v59 = vld [vmem:[#allocation5 + $0x150] sm:$0xf]  ;;  %v6277_v60 = vld [vmem:[#allocation5 + $0x1a0] sm:$0xf0]  ;;  %v6640_v62 = vor.u32 %v6289_v54, %v5754_v55  ;;  %s5476_s3 = sshll.u32 %s6548_s2, 4  ;;  %s5477_s3 = int_to_ptr.vmem [resolvable:$true] %s5476_s3 }
  0x22   :  { %1110 = vmatpush.bf16.msra.mxu0 %v6619_v44  ;;  %10833 = vst [vmem:[#allocation17_spill] sm:$0xff] %v6637_v58  ;;  %v6267_v61 = vld [vmem:[#allocation5 + $0x154] sm:$0xf]  ;;  %v5662_v63 = vld [vmem:[#allocation5 + $0x1a4] sm:$0xf0]  ;;  %v6643_v5 = vor.u32 %v6277_v60, %v5660_v59  ;;  %s5478_s11 = sshll.u32 %s10574_s4, 4  ;;  %s5479_s11 = int_to_ptr.hbm [resolvable:$true] %s5478_s11 }
  0x23   :  { %1123 = vmatpush.bf16.msra.mxu1 %v6623_v45  ;;  %10834 = vst [vmem:[#allocation18_spill] sm:$0xff] %v6640_v62  ;;  %v5668_v0 = vld [vmem:[#allocation5 + $0x158] sm:$0xf]  ;;  %v6278_v1 = vld [vmem:[#allocation5 + $0x1a8] sm:$0xf0]  ;;  %v6647_v6 = vor.u32 %v6267_v61, %v5662_v63 }
  0x24   :  { %1136 = vmatpush.bf16.msra.mxu2 %v6625_v46  ;;  %1149 = vmatpush.bf16.msra.mxu3 %v6628_v50  ;;  %v6268_v2 = vld [vmem:[#allocation5 + $0x15c] sm:$0xf]  ;;  %v5670_v4 = vld [vmem:[#allocation5 + $0x1ac] sm:$0xf0]  ;;  %v6649_v9 = vor.u32 %v6278_v1, %v5668_v0  ;;  %v5576_v10 = vld [vmem:[#allocation5 + $0xa8] sm:$0xf] }
  0x25   :  { %v6256_v11 = vld [vmem:[#allocation5 + $0xf8] sm:$0xf0]  ;;  %v6246_v13 = vld [vmem:[#allocation5 + $0xac] sm:$0xf]  ;;  %v6652_v14 = vor.u32 %v6268_v2, %v5670_v4  ;;  %v5578_v15 = vld [vmem:[#allocation5 + $0xfc] sm:$0xf0] }
  0x26   :  { %1111 = vmatpush.bf16.msra.mxu0 %v6631_v56  ;;  %10835 = vst [vmem:[#allocation19_spill] sm:$0xff] %v6649_v9  ;;  %v5584_v18 = vld [vmem:[#allocation5 + $0xb0] sm:$0xf]  ;;  %v6257_v19 = vld [vmem:[#allocation5 + $0x100] sm:$0xf0]  ;;  %v6655_v23 = vor.u32 %v6256_v11, %v5576_v10  ;;  %v6659_v27 = vor.u32 %v6246_v13, %v5578_v15 }
  0x27   :  { %1124 = vmatpush.bf16.msra.mxu1 %v6635_v57  ;;  %10836 = vst [vmem:[#allocation20_spill] sm:$0xff] %v6652_v14  ;;  %v6247_v20 = vld [vmem:[#allocation5 + $0xb4] sm:$0xf]  ;;  %v5586_v22 = vld [vmem:[#allocation5 + $0x104] sm:$0xf0]  ;;  %v6661_v28 = vor.u32 %v6257_v19, %v5584_v18 }
  0x28   :  { %1137 = vmatpush.bf16.msra.mxu2 %v6637_v58  ;;  %1150 = vmatpush.bf16.msra.mxu3 %v6640_v62  ;;  %v5492_v24 = vld [vmem:[#allocation5] sm:$0xf]  ;;  %v6235_v26 = vld [vmem:[#allocation5 + $0x50] sm:$0xf0]  ;;  %v6225_v30 = vld [vmem:[#allocation5 + $0x4] sm:$0xf]  ;;  %v6664_v35 = vor.u32 %v6247_v20, %v5586_v22 }
  0x29   :  { %10837 = vst [vmem:[#allocation21_spill] sm:$0xff] %v6661_v28  ;;  %v5494_v31 = vld [vmem:[#allocation5 + $0x54] sm:$0xf0]  ;;  %v5500_v32 = vld [vmem:[#allocation5 + $0x8] sm:$0xf]  ;;  %v6667_v43 = vor.u32 %v6235_v26, %v5492_v24 }
  0x2a   :  { %1112 = vmatpush.bf16.msra.mxu0 %v6643_v5  ;;  %10838 = vst [vmem:[#allocation22_spill] sm:$0xff] %v6664_v35  ;;  %v6236_v36 = vld [vmem:[#allocation5 + $0x58] sm:$0xf0]  ;;  %v6226_v37 = vld [vmem:[#allocation5 + $0xc] sm:$0xf]  ;;  %v6671_v51 = vor.u32 %v6225_v30, %v5494_v31 }
  0x2b   :  { %1125 = vmatpush.bf16.msra.mxu1 %v6647_v6  ;;  %v5502_v39 = vld [vmem:[#allocation5 + $0x5c] sm:$0xf0]  ;;  %v6096_v40 = vld [vmem:[#allocation5 + $0x4a8] sm:$0xf]  ;;  %v6384_v41 = vld [vmem:[#allocation5 + $0x4f8] sm:$0xf0]  ;;  %v6673_v52 = vor.u32 %v6236_v36, %v5500_v32 }
  0x2c   :  { %1138 = vmatpush.bf16.msra.mxu2 %v6649_v9  ;;  %1151 = vmatpush.bf16.msra.mxu3 %v6652_v14  ;;  %v6374_v42 = vld [vmem:[#allocation5 + $0x4ac] sm:$0xf]  ;;  %v6098_v47 = vld [vmem:[#allocation5 + $0x4fc] sm:$0xf0]  ;;  %v6104_v48 = vld [vmem:[#allocation5 + $0x4b0] sm:$0xf]  ;;  %v6676_v55 = vor.u32 %v6226_v37, %v5502_v39  ;;  %v6678_v59 = vor.u32 %v6384_v41, %v6096_v40 }
  0x2d   :  { %v6385_v49 = vld [vmem:[#allocation5 + $0x500] sm:$0xf0]  ;;  %10839 = vst [vmem:[#allocation23_spill] sm:$0xff] %v6673_v52  ;;  %v6375_v53 = vld [vmem:[#allocation5 + $0x4b4] sm:$0xf]  ;;  %v6680_v60 = vor.u32 %v6374_v42, %v6098_v47 }
  0x2e   :  { %1113 = vmatpush.bf16.msra.mxu0 %v6655_v23  ;;  %v6106_v54 = vld [vmem:[#allocation5 + $0x504] sm:$0xf0]  ;;  %10840 = vst [vmem:[#allocation24_spill] sm:$0xff] %v6676_v55  ;;  %v6682_v61 = vor.u32 %v6385_v49, %v6104_v48  ;;  %v6012_v63 = vld [vmem:[#allocation5 + $0x400] sm:$0xf] }
  0x2f   :  { %1126 = vmatpush.bf16.msra.mxu1 %v6659_v27  ;;  %v6363_v0 = vld [vmem:[#allocation5 + $0x450] sm:$0xf0]  ;;  %v6353_v1 = vld [vmem:[#allocation5 + $0x404] sm:$0xf]  ;;  %v6685_v2 = vor.u32 %v6375_v53, %v6106_v54  ;;  %v6014_v4 = vld [vmem:[#allocation5 + $0x454] sm:$0xf0] }
  0x30   :  { %1139 = vmatpush.bf16.msra.mxu2 %v6661_v28  ;;  %1152 = vmatpush.bf16.msra.mxu3 %v6664_v35  ;;  %10841 = vst [vmem:[#allocation25_spill] sm:$0xff] %v6682_v61  ;;  %v6020_v10 = vld [vmem:[#allocation5 + $0x408] sm:$0xf]  ;;  %v6364_v11 = vld [vmem:[#allocation5 + $0x458] sm:$0xf0]  ;;  %v6691_v18 = vor.u32 %v6363_v0, %v6012_v63  ;;  %v6695_v19 = vor.u32 %v6353_v1, %v6014_v4 }
  0x31   :  { %10842 = vst [vmem:[#allocation26_spill] sm:$0xff] %v6685_v2  ;;  %v6354_v13 = vld [vmem:[#allocation5 + $0x40c] sm:$0xf]  ;;  %v6022_v15 = vld [vmem:[#allocation5 + $0x45c] sm:$0xf0]  ;;  %v6697_v20 = vor.u32 %v6364_v11, %v6020_v10 }
  0x32   :  { %1114 = vmatpush.bf16.msra.mxu0 %v6667_v43  ;;  %v5928_v22 = vld [vmem:[#allocation5 + $0x358] sm:$0xf]  ;;  %v6342_v24 = vld [vmem:[#allocation5 + $0x3a8] sm:$0xf0]  ;;  %v6332_v26 = vld [vmem:[#allocation5 + $0x35c] sm:$0xf]  ;;  %v6700_v30 = vor.u32 %v6354_v13, %v6022_v15 }
  0x33   :  { %1127 = vmatpush.bf16.msra.mxu1 %v6671_v51  ;;  %10843 = vst [vmem:[#allocation27_spill] sm:$0xff] %v6697_v20  ;;  %v5930_v31 = vld [vmem:[#allocation5 + $0x3ac] sm:$0xf0]  ;;  %v5936_v32 = vld [vmem:[#allocation5 + $0x360] sm:$0xf]  ;;  %v6703_v40 = vor.u32 %v6342_v24, %v5928_v22 }
  0x34   :  { %1140 = vmatpush.bf16.msra.mxu2 %v6673_v52  ;;  %1153 = vmatpush.bf16.msra.mxu3 %v6676_v55  ;;  %10844 = vst [vmem:[#allocation28_spill] sm:$0xff] %v6700_v30  ;;  %v6343_v36 = vld [vmem:[#allocation5 + $0x3b0] sm:$0xf0]  ;;  %v6333_v37 = vld [vmem:[#allocation5 + $0x364] sm:$0xf]  ;;  %v6707_v42 = vor.u32 %v6332_v26, %v5930_v31 }
  0x35   :  { %v5938_v39 = vld [vmem:[#allocation5 + $0x3b4] sm:$0xf0]  ;;  %v75_v41 = vld [vmem:[#allocation2] sm:$0xf]  ;;  %v6709_v47 = vor.u32 %v6343_v36, %v5936_v32  ;;  %v5844_v48 = vld [vmem:[#allocation5 + $0x2b0] sm:$0xf] }
  0x36   :  { %1159 = vmatpush.bf16.msrb.mxu0 %v6678_v59  ;;  %v6321_v49 = vld [vmem:[#allocation5 + $0x300] sm:$0xf0]  ;;  %v6311_v53 = vld [vmem:[#allocation5 + $0x2b4] sm:$0xf]  ;;  %v6711_v54 = vpack.c.bf16 %v75_v41, %v75_v41  ;;  %v6714_v63 = vor.u32 %v6333_v37, %v5938_v39  ;;  %v5846_v0 = vld [vmem:[#allocation5 + $0x304] sm:$0xf0] }
  0x37   :  { %1172 = vmatpush.bf16.msrb.mxu1 %v6680_v60  ;;  %10845 = vst [vmem:[#allocation29_spill] sm:$0xff] %v6709_v47  ;;  %v5852_v1 = vld [vmem:[#allocation5 + $0x2b8] sm:$0xf]  ;;  %v6322_v4 = vld [vmem:[#allocation5 + $0x308] sm:$0xf0]  ;;  %v6718_v15 = vor.u32 %v6321_v49, %v5844_v48  ;;  %v6722_v22 = vor.u32 %v6311_v53, %v5846_v0 }
  0x38   :  { %1185 = vmatpush.bf16.msrb.mxu2 %v6682_v61  ;;  %1198 = vmatpush.bf16.msrb.mxu3 %v6685_v2  ;;  %10846 = vst [vmem:[#allocation30_spill] sm:$0xff] %v6714_v63  ;;  %v6312_v10 = vld [vmem:[#allocation5 + $0x2bc] sm:$0xf]  ;;  %v5854_v11 = vld [vmem:[#allocation5 + $0x30c] sm:$0xf0]  ;;  %v77_v13 = vunpack.c.l.bf16 %v6711_v54  ;;  %v6724_v24 = vor.u32 %v6322_v4, %v5852_v1 }
  0x39   :  { %10847 = vst [vmem:[#allocation31_spill] sm:$0xff] %v6718_v15  ;;  %v5760_v26 = vld [vmem:[#allocation5 + $0x208] sm:$0xf]  ;;  %v6300_v31 = vld [vmem:[#allocation5 + $0x258] sm:$0xf0]  ;;  %v6729_v37 = vor.u32 %v6312_v10, %v5854_v11 }
  0x3a   :  { %1160 = vmatpush.bf16.msrb.mxu0 %v6691_v18  ;;  %10848 = vst [vmem:[#allocation32_spill] sm:$0xff] %v6722_v22  ;;  %v6290_v32 = vld [vmem:[#allocation5 + $0x20c] sm:$0xf]  ;;  %v6726_v36 = vsub.f32 %v75_v41, %v77_v13  ;;  %v5762_v39 = vld [vmem:[#allocation5 + $0x25c] sm:$0xf0]  ;;  %v6736_v0 = vor.u32 %v6300_v31, %v5760_v26 }
  0x3b   :  { %1173 = vmatpush.bf16.msrb.mxu1 %v6695_v19  ;;  %10849 = vst [vmem:[#allocation33_spill] sm:$0xff] %v6724_v24  ;;  %v5768_v48 = vld [vmem:[#allocation5 + $0x210] sm:$0xf]  ;;  %v6301_v49 = vld [vmem:[#allocation5 + $0x260] sm:$0xf0]  ;;  %v6740_v41 = vor.u32 %v6290_v32, %v5762_v39 }
  0x3c   :  { %1186 = vmatpush.bf16.msrb.mxu2 %v6697_v20  ;;  %1199 = vmatpush.bf16.msrb.mxu3 %v6700_v30  ;;  %10850 = vst [vmem:[#allocation34_spill] sm:$0xff] %v6726_v36  ;;  %v6291_v30 = vld [vmem:[#allocation5 + $0x214] sm:$0xf]  ;;  %v5770_v2 = vld [vmem:[#allocation5 + $0x264] sm:$0xf0]  ;;  %v6733_v53 = vpack.c.bf16 %v6726_v36, %v6726_v36  ;;  %v6742_v1 = vor.u32 %v6301_v49, %v5768_v48 }
  0x3d   :  { %10851 = vst [vmem:[#allocation35_spill] sm:$0xff] %v6729_v37  ;;  %v5676_v4 = vld [vmem:[#allocation5 + $0x160] sm:$0xf]  ;;  %v6279_v10 = vld [vmem:[#allocation5 + $0x1b0] sm:$0xf0]  ;;  %v6745_v13 = vor.u32 %v6291_v30, %v5770_v2 }
  0x3e   :  { %1161 = vmatpush.bf16.msrb.mxu0 %v6703_v40  ;;  %10852 = vst [vmem:[#allocation36_spill] sm:$0xff] %v6736_v0  ;;  %v6269_v11 = vld [vmem:[#allocation5 + $0x164] sm:$0xf]  ;;  %v5678_v36 = vld [vmem:[#allocation5 + $0x1b4] sm:$0xf0]  ;;  %1141 = vmatmul.bf16.vlgmr.msra.gmra.mxu2 %v6733_v53  ;;  %v6751_v32 = vor.u32 %v6279_v10, %v5676_v4 }
  0x3f   :  { %1174 = vmatpush.bf16.msrb.mxu1 %v6707_v42  ;;  %10853 = vst [vmem:[#allocation37_spill] sm:$0xff] %v6740_v41  ;;  %v6280_v55 = vld [vmem:[#allocation5 + $0x1b8] sm:$0xf0]  ;;  %v6270_v26 = vld [vmem:[#allocation5 + $0x16c] sm:$0xf]  ;;  %1115 = vmatmul.bf16.vlgmr.msra.gmra.mxu0 %v6733_v53  ;;  %v6756_v2 = vor.u32 %v6269_v11, %v5678_v36 }
  0x40   :  { %1187 = vmatpush.bf16.msrb.mxu2 %v6709_v47  ;;  %1200 = vmatpush.bf16.msrb.mxu3 %v6714_v63  ;;  %10854 = vst [vmem:[#allocation38_spill] sm:$0xff] %v6742_v1  ;;  %v5684_v63 = vld [vmem:[#allocation5 + $0x168] sm:$0xf]  ;;  %v5686_v31 = vld [vmem:[#allocation5 + $0x1bc] sm:$0xf0] }
  0x41   :  { %10855 = vst [vmem:[#allocation39_spill] sm:$0xff] %v6745_v13  ;;  %1128 = vmatmul.bf16.vlgmr.msra.gmra.mxu1 %v6733_v53  ;;  %1154 = vmatmul.bf16.vlgmr.msra.gmra.mxu3 %v6733_v53  ;;  %v6758_v30 = vor.u32 %v6280_v55, %v5684_v63  ;;  %v5592_v39 = vld [vmem:[#allocation5 + $0xb8] sm:$0xf]  ;;  %v6258_v48 = vld [vmem:[#allocation5 + $0x108] sm:$0xf0] }
  0x42   :  { %1162 = vmatpush.bf16.msrb.mxu0 %v6718_v15  ;;  %10856 = vst [vmem:[#allocation40_spill] sm:$0xff] %v6751_v32  ;;  %v6248_v49 = vld [vmem:[#allocation5 + $0xbc] sm:$0xf]  ;;  %v5594_v35 = vld [vmem:[#allocation5 + $0x10c] sm:$0xf0] }
  0x43   :  { %1175 = vmatpush.bf16.msrb.mxu1 %v6722_v22  ;;  %10857 = vst [vmem:[#allocation41_spill] sm:$0xff] %v6756_v2  ;;  %v5600_v4 = vld [vmem:[#allocation5 + $0xc0] sm:$0xf]  ;;  %v6259_v10 = vld [vmem:[#allocation5 + $0x110] sm:$0xf0]  ;;  %v6768_v55 = vor.u32 %v6248_v49, %v5594_v35 }
  0x44   :  { %1188 = vmatpush.bf16.msrb.mxu2 %v6724_v24  ;;  %1201 = vmatpush.bf16.msrb.mxu3 %v6729_v37  ;;  %10858 = vst [vmem:[#allocation42_spill] sm:$0xff] %v6758_v30  ;;  %v6761_v37 = vor.u32 %v6270_v26, %v5686_v31  ;;  %v6249_v14 = vld [vmem:[#allocation5 + $0xc4] sm:$0xf]  ;;  %v5508_v36 = vld [vmem:[#allocation5 + $0x10] sm:$0xf]  ;;  %v6770_v63 = vor.u32 %v6259_v10, %v5600_v4 }
  0x45   :  { %v6237_v11 = vld [vmem:[#allocation5 + $0x60] sm:$0xf0]  ;;  %10861 = vst [vmem:[#allocation45_spill] sm:$0xff] %v6768_v55  ;;  %v6227_v26 = vld [vmem:[#allocation5 + $0x14] sm:$0xf] }
  0x46   :  { %1163 = vmatpush.bf16.msrb.mxu0 %v6736_v0  ;;  %10859 = vst [vmem:[#allocation43_spill] sm:$0xff] %v6761_v37  ;;  %v5602_v0 = vld [vmem:[#allocation5 + $0x114] sm:$0xf0]  ;;  %v5510_v31 = vld [vmem:[#allocation5 + $0x64] sm:$0xf0] }
  0x47   :  { %1176 = vmatpush.bf16.msrb.mxu1 %v6740_v41  ;;  %v6764_v41 = vor.u32 %v6258_v48, %v5592_v39  ;;  %10862 = vst [vmem:[#allocation46_spill] sm:$0xff] %v6770_v63  ;;  %v6228_v39 = vld [vmem:[#allocation5 + $0x1c] sm:$0xf]  ;;  %v5518_v48 = vld [vmem:[#allocation5 + $0x6c] sm:$0xf0]  ;;  %v6780_v10 = vor.u32 %v6227_v26, %v5510_v31 }
  0x48   :  { %1189 = vmatpush.bf16.msrb.mxu2 %v6742_v1  ;;  %1202 = vmatpush.bf16.msrb.mxu3 %v6745_v13  ;;  %v5516_v13 = vld [vmem:[#allocation5 + $0x18] sm:$0xf]  ;;  %v6773_v1 = vor.u32 %v6249_v14, %v5602_v0  ;;  %v6386_v24 = vld [vmem:[#allocation5 + $0x508] sm:$0xf0]  ;;  %v6376_v22 = vld [vmem:[#allocation5 + $0x4bc] sm:$0xf] }
  0x49   :  { %10860 = vst [vmem:[#allocation44_spill] sm:$0xff] %v6764_v41  ;;  %v6112_v62 = vld [vmem:[#allocation5 + $0x4b8] sm:$0xf]  ;;  %v6114_v35 = vld [vmem:[#allocation5 + $0x50c] sm:$0xf0] }
  0x4a   :  { %1164 = vmatpush.bf16.msrb.mxu0 %v6751_v32  ;;  %10863 = vst [vmem:[#allocation47_spill] sm:$0xff] %v6773_v1  ;;  %v6238_v32 = vld [vmem:[#allocation5 + $0x68] sm:$0xf0]  ;;  %v6120_v49 = vld [vmem:[#allocation5 + $0x4c0] sm:$0xf] }
  0x4b   :  { %1177 = vmatpush.bf16.msrb.mxu1 %v6756_v2  ;;  %v6387_v4 = vld [vmem:[#allocation5 + $0x510] sm:$0xf0]  ;;  %10865 = vst [vmem:[#allocation49_spill] sm:$0xff] %v6780_v10  ;;  %v6782_v14 = vor.u32 %v6238_v32, %v5516_v13  ;;  %v6377_v0 = vld [vmem:[#allocation5 + $0x4c4] sm:$0xf]  ;;  %v6785_v2 = vor.u32 %v6228_v39, %v5518_v48 }
  0x4c   :  { %1190 = vmatpush.bf16.msrb.mxu2 %v6758_v30  ;;  %1203 = vmatpush.bf16.msrb.mxu3 %v6761_v37  ;;  %v6776_v30 = vor.u32 %v6237_v11, %v5508_v36  ;;  %v6122_v37 = vld [vmem:[#allocation5 + $0x514] sm:$0xf0]  ;;  %v6789_v36 = vor.u32 %v6376_v22, %v6114_v35  ;;  %v6791_v11 = vor.u32 %v6387_v4, %v6120_v49  ;;  %v6028_v15 = vld [vmem:[#allocation5 + $0x410] sm:$0xf]  ;;  %v6355_v50 = vld [vmem:[#allocation5 + $0x414] sm:$0xf] }
  0x4d   :  { %10866 = vst [vmem:[#allocation50_spill] sm:$0xff] %v6782_v14  ;;  %v6794_v26 = vor.u32 %v6377_v0, %v6122_v37  ;;  %v6030_v13 = vld [vmem:[#allocation5 + $0x464] sm:$0xf0]  ;;  %v6036_v32 = vld [vmem:[#allocation5 + $0x418] sm:$0xf] }
  0x4e   :  { %1165 = vmatpush.bf16.msrb.mxu0 %v6764_v41  ;;  %10864 = vst [vmem:[#allocation48_spill] sm:$0xff] %v6776_v30  ;;  %v6787_v41 = vor.u32 %v6386_v24, %v6112_v62  ;;  %v6366_v31 = vld [vmem:[#allocation5 + $0x468] sm:$0xf0]  ;;  %v6356_v62 = vld [vmem:[#allocation5 + $0x41c] sm:$0xf]  ;;  %v6804_v37 = vor.u32 %v6355_v50, %v6030_v13 }
  0x4f   :  { %1178 = vmatpush.bf16.msrb.mxu1 %v6768_v55  ;;  %10867 = vst [vmem:[#allocation51_spill] sm:$0xff] %v6785_v2  ;;  %v6365_v55 = vld [vmem:[#allocation5 + $0x460] sm:$0xf0]  ;;  %v6038_v24 = vld [vmem:[#allocation5 + $0x46c] sm:$0xf0]  ;;  %v6806_v39 = vor.u32 %v6366_v31, %v6036_v32 }
  0x50   :  { %1191 = vmatpush.bf16.msrb.mxu2 %v6770_v63  ;;  %1204 = vmatpush.bf16.msrb.mxu3 %v6773_v1  ;;  %10868 = vst [vmem:[#allocation52_spill] sm:$0xff] %v6787_v41  ;;  %v6800_v22 = vor.u32 %v6365_v55, %v6028_v15  ;;  %v5944_v48 = vld [vmem:[#allocation5 + $0x368] sm:$0xf]  ;;  %v6344_v35 = vld [vmem:[#allocation5 + $0x3b8] sm:$0xf0]  ;;  %v6809_v4 = vor.u32 %v6356_v62, %v6038_v24 }
  0x51   :  { %10869 = vst [vmem:[#allocation53_spill] sm:$0xff] %v6789_v36  ;;  %v6334_v49 = vld [vmem:[#allocation5 + $0x36c] sm:$0xf]  ;;  %v5946_v0 = vld [vmem:[#allocation5 + $0x3bc] sm:$0xf0]  ;;  %v6815_v50 = vor.u32 %v6344_v35, %v5944_v48 }
  0x52   :  { %10870 = vst [vmem:[#allocation54_spill] sm:$0xff] %v6791_v11  ;;  %1166 = vmatpush.bf16.msrb.mxu0 %v6776_v30  ;;  %v6345_v1 = vld [vmem:[#allocation5 + $0x3c0] sm:$0xf0]  ;;  %v6335_v15 = vld [vmem:[#allocation5 + $0x374] sm:$0xf]  ;;  %v6820_v13 = vor.u32 %v6334_v49, %v5946_v0 }
  0x53   :  { %10871 = vst [vmem:[#allocation55_spill] sm:$0xff] %v6794_v26  ;;  %1179 = vmatpush.bf16.msrb.mxu1 %v6780_v10  ;;  %v5954_v55 = vld [vmem:[#allocation5 + $0x3c4] sm:$0xf0]  ;;  %v5860_v31 = vld [vmem:[#allocation5 + $0x2c0] sm:$0xf] }
  0x54   :  { %1192 = vmatpush.bf16.msrb.mxu2 %v6782_v14  ;;  %1205 = vmatpush.bf16.msrb.mxu3 %v6785_v2  ;;  %10872 = vst [vmem:[#allocation56_spill] sm:$0xff] %v6800_v22  ;;  %v5952_v2 = vld [vmem:[#allocation5 + $0x370] sm:$0xf]  ;;  %v6323_v62 = vld [vmem:[#allocation5 + $0x310] sm:$0xf0] }
  0x55   :  { %10873 = vst [vmem:[#allocation57_spill] sm:$0xff] %v6804_v37  ;;  %1167 = vmatmul.bf16.vlgmr.msrb.gmra.mxu0 %v6733_v53  ;;  %v6822_v32 = vor.u32 %v6345_v1, %v5952_v2  ;;  %v6313_v24 = vld [vmem:[#allocation5 + $0x2c4] sm:$0xf]  ;;  %v5868_v48 = vld [vmem:[#allocation5 + $0x2c8] sm:$0xf] }
  0x56   :  { %1211 = vmatpush.bf16.msra.mxu0 %v6787_v41  ;;  %10874 = vst [vmem:[#allocation58_spill] sm:$0xff] %v6806_v39  ;;  %1180 = vmatmul.bf16.vlgmr.msrb.gmra.mxu1 %v6733_v53  ;;  %v6324_v35 = vld [vmem:[#allocation5 + $0x318] sm:$0xf0]  ;;  %v5776_v49 = vld [vmem:[#allocation5 + $0x218] sm:$0xf] }
  0x57   :  { %1224 = vmatpush.bf16.msra.mxu1 %v6789_v36  ;;  %10875 = vst [vmem:[#allocation59_spill] sm:$0xff] %v6809_v4  ;;  %1193 = vmatmul.bf16.vlgmr.msrb.gmra.mxu2 %v6733_v53  ;;  %v5870_v36 = vld [vmem:[#allocation5 + $0x31c] sm:$0xf0]  ;;  %v6834_v2 = vor.u32 %v6324_v35, %v5868_v48  ;;  %v6302_v0 = vld [vmem:[#allocation5 + $0x268] sm:$0xf0] }
  0x58   :  { %1237 = vmatpush.bf16.msra.mxu2 %v6791_v11  ;;  %1250 = vmatpush.bf16.msra.mxu3 %v6794_v26  ;;  %10876 = vst [vmem:[#allocation60_spill] sm:$0xff] %v6815_v50  ;;  %v6825_v26 = vor.u32 %v6335_v15, %v5954_v55  ;;  %v6314_v11 = vld [vmem:[#allocation5 + $0x2cc] sm:$0xf]  ;;  %v6292_v15 = vld [vmem:[#allocation5 + $0x21c] sm:$0xf] }
  0x59   :  { %1206 = vmatmul.bf16.vlgmr.msrb.gmra.mxu3 %v6733_v53  ;;  %10877 = vst [vmem:[#allocation61_spill] sm:$0xff] %v6820_v13  ;;  %v6837_v55 = vor.u32 %v6314_v11, %v5870_v36  ;;  %v5692_v48 = vld [vmem:[#allocation5 + $0x170] sm:$0xf]  ;;  %v6281_v36 = vld [vmem:[#allocation5 + $0x1c0] sm:$0xf0] }
  0x5a   :  { %1212 = vmatpush.bf16.msra.mxu0 %v6800_v22  ;;  %10878 = vst [vmem:[#allocation62_spill] sm:$0xff] %v6822_v32  ;;  %v5862_v22 = vld [vmem:[#allocation5 + $0x314] sm:$0xf0]  ;;  %v6271_v11 = vld [vmem:[#allocation5 + $0x174] sm:$0xf] }
  0x5b   :  { %1225 = vmatpush.bf16.msra.mxu1 %v6804_v37  ;;  %10879 = vst [vmem:[#allocation63_spill] sm:$0xff] %v6825_v26  ;;  %v6828_v37 = vor.u32 %v6323_v62, %v5860_v31  ;;  %v6832_v1 = vor.u32 %v6313_v24, %v5862_v22  ;;  %v6293_v31 = vld [vmem:[#allocation5 + $0x224] sm:$0xf]  ;;  %v5786_v62 = vld [vmem:[#allocation5 + $0x274] sm:$0xf0] }
  0x5c   :  { %1238 = vmatpush.bf16.msra.mxu2 %v6806_v39  ;;  %1251 = vmatpush.bf16.msra.mxu3 %v6809_v4  ;;  %10882 = vst [vmem:[#allocation66_spill] sm:$0xff] %v6834_v2  ;;  %v5778_v4 = vld [vmem:[#allocation5 + $0x26c] sm:$0xf0]  ;;  %v5784_v39 = vld [vmem:[#allocation5 + $0x220] sm:$0xf]  ;;  %v6849_v35 = vor.u32 %v6293_v31, %v5786_v62 }
  0x5d   :  { %10880 = vst [vmem:[#allocation64_spill] sm:$0xff] %v6828_v37  ;;  %v6844_v22 = vor.u32 %v6292_v15, %v5778_v4  ;;  %v6260_v15 = vld [vmem:[#allocation5 + $0x118] sm:$0xf0]  ;;  %v6250_v31 = vld [vmem:[#allocation5 + $0xcc] sm:$0xf] }
  0x5e   :  { %1213 = vmatpush.bf16.msra.mxu0 %v6815_v50  ;;  %10881 = vst [vmem:[#allocation65_spill] sm:$0xff] %v6832_v1  ;;  %v6303_v50 = vld [vmem:[#allocation5 + $0x270] sm:$0xf0]  ;;  %v6128_v41 = vld [vmem:[#allocation5 + $0x4c8] sm:$0xf] }
  0x5f   :  { %1226 = vmatpush.bf16.msra.mxu1 %v6820_v13  ;;  %10883 = vst [vmem:[#allocation67_spill] sm:$0xff] %v6837_v55  ;;  %v6840_v13 = vor.u32 %v6302_v0, %v5776_v49  ;;  %v6846_v24 = vor.u32 %v6303_v50, %v5784_v39  ;;  %v6272_v49 = vld [vmem:[#allocation5 + $0x17c] sm:$0xf]  ;;  %v5702_v0 = vld [vmem:[#allocation5 + $0x1cc] sm:$0xf0] }
  0x60   :  { %1239 = vmatpush.bf16.msra.mxu2 %v6822_v32  ;;  %1252 = vmatpush.bf16.msra.mxu3 %v6825_v26  ;;  %10885 = vst [vmem:[#allocation69_spill] sm:$0xff] %v6844_v22  ;;  %v5694_v26 = vld [vmem:[#allocation5 + $0x1c4] sm:$0xf0]  ;;  %v5700_v32 = vld [vmem:[#allocation5 + $0x178] sm:$0xf]  ;;  %v6861_v62 = vor.u32 %v6272_v49, %v5702_v0 }
  0x61   :  { %10884 = vst [vmem:[#allocation68_spill] sm:$0xff] %v6840_v13  ;;  %v6856_v39 = vor.u32 %v6271_v11, %v5694_v26  ;;  %v5608_v50 = vld [vmem:[#allocation5 + $0xc8] sm:$0xf]  ;;  %v5524_v26 = vld [vmem:[#allocation5 + $0x20] sm:$0xf] }
  0x62   :  { %1214 = vmatpush.bf16.msra.mxu0 %v6828_v37  ;;  %10886 = vst [vmem:[#allocation70_spill] sm:$0xff] %v6846_v24  ;;  %v6282_v37 = vld [vmem:[#allocation5 + $0x1c8] sm:$0xf0]  ;;  %v6239_v11 = vld [vmem:[#allocation5 + $0x70] sm:$0xf0] }
  0x63   :  { %1227 = vmatpush.bf16.msra.mxu1 %v6832_v1  ;;  %10887 = vst [vmem:[#allocation71_spill] sm:$0xff] %v6849_v35  ;;  %v6852_v1 = vor.u32 %v6281_v36, %v5692_v48  ;;  %v6858_v4 = vor.u32 %v6282_v37, %v5700_v32  ;;  %v6251_v48 = vld [vmem:[#allocation5 + $0xd4] sm:$0xf]  ;;  %v5618_v36 = vld [vmem:[#allocation5 + $0x124] sm:$0xf0] }
  0x64   :  { %1240 = vmatpush.bf16.msra.mxu2 %v6834_v2  ;;  %1253 = vmatpush.bf16.msra.mxu3 %v6837_v55  ;;  %10889 = vst [vmem:[#allocation73_spill] sm:$0xff] %v6856_v39  ;;  %v5610_v55 = vld [vmem:[#allocation5 + $0x11c] sm:$0xf0]  ;;  %v5616_v2 = vld [vmem:[#allocation5 + $0xd0] sm:$0xf] }
  0x65   :  { %10888 = vst [vmem:[#allocation72_spill] sm:$0xff] %v6852_v1  ;;  %v6868_v37 = vor.u32 %v6250_v31, %v5610_v55  ;;  %v6229_v49 = vld [vmem:[#allocation5 + $0x24] sm:$0xf]  ;;  %v5526_v0 = vld [vmem:[#allocation5 + $0x74] sm:$0xf0] }
  0x66   :  { %1215 = vmatpush.bf16.msra.mxu0 %v6840_v13  ;;  %10890 = vst [vmem:[#allocation74_spill] sm:$0xff] %v6858_v4  ;;  %v6261_v13 = vld [vmem:[#allocation5 + $0x120] sm:$0xf0]  ;;  %v6388_v14 = vld [vmem:[#allocation5 + $0x518] sm:$0xf0]  ;;  %v6880_v31 = vor.u32 %v6229_v49, %v5526_v0 }
  0x67   :  { %1228 = vmatpush.bf16.msra.mxu1 %v6844_v22  ;;  %10891 = vst [vmem:[#allocation75_spill] sm:$0xff] %v6861_v62  ;;  %v6864_v22 = vor.u32 %v6260_v15, %v5608_v50  ;;  %v6870_v32 = vor.u32 %v6261_v13, %v5616_v2  ;;  %v6230_v50 = vld [vmem:[#allocation5 + $0x2c] sm:$0xf]  ;;  %v5534_v15 = vld [vmem:[#allocation5 + $0x7c] sm:$0xf0] }
  0x68   :  { %1241 = vmatpush.bf16.msra.mxu2 %v6846_v24  ;;  %1254 = vmatpush.bf16.msra.mxu3 %v6849_v35  ;;  %10893 = vst [vmem:[#allocation77_spill] sm:$0xff] %v6868_v37  ;;  %v5532_v35 = vld [vmem:[#allocation5 + $0x28] sm:$0xf]  ;;  %v6873_v24 = vor.u32 %v6251_v48, %v5618_v36  ;;  %v6378_v10 = vld [vmem:[#allocation5 + $0x4cc] sm:$0xf] }
  0x69   :  { %10892 = vst [vmem:[#allocation76_spill] sm:$0xff] %v6864_v22  ;;  %v6130_v55 = vld [vmem:[#allocation5 + $0x51c] sm:$0xf0]  ;;  %v6136_v13 = vld [vmem:[#allocation5 + $0x4d0] sm:$0xf] }
  0x6a   :  { %1216 = vmatpush.bf16.msra.mxu0 %v6852_v1  ;;  %10894 = vst [vmem:[#allocation78_spill] sm:$0xff] %v6870_v32  ;;  %v6240_v1 = vld [vmem:[#allocation5 + $0x78] sm:$0xf0]  ;;  %v6389_v2 = vld [vmem:[#allocation5 + $0x520] sm:$0xf0] }
  0x6b   :  { %1229 = vmatpush.bf16.msra.mxu1 %v6856_v39  ;;  %10895 = vst [vmem:[#allocation79_spill] sm:$0xff] %v6873_v24  ;;  %v6882_v48 = vor.u32 %v6240_v1, %v5532_v35  ;;  %v6379_v36 = vld [vmem:[#allocation5 + $0x4d4] sm:$0xf]  ;;  %v6885_v39 = vor.u32 %v6230_v50, %v5534_v15  ;;  %v6044_v30 = vld [vmem:[#allocation5 + $0x420] sm:$0xf] }
  0x6c   :  { %1242 = vmatpush.bf16.msra.mxu2 %v6858_v4  ;;  %1255 = vmatpush.bf16.msra.mxu3 %v6861_v62  ;;  %v6876_v4 = vor.u32 %v6239_v11, %v5524_v26  ;;  %10897 = vst [vmem:[#allocation81_spill] sm:$0xff] %v6880_v31  ;;  %v6138_v62 = vld [vmem:[#allocation5 + $0x524] sm:$0xf0]  ;;  %v6889_v26 = vor.u32 %v6378_v10, %v6130_v55  ;;  %v6357_v63 = vld [vmem:[#allocation5 + $0x424] sm:$0xf] }
  0x6d   :  { %10898 = vst [vmem:[#allocation82_spill] sm:$0xff] %v6882_v48  ;;  %v6891_v11 = vor.u32 %v6389_v2, %v6136_v13  ;;  %v6894_v49 = vor.u32 %v6379_v36, %v6138_v62  ;;  %v6046_v1 = vld [vmem:[#allocation5 + $0x474] sm:$0xf0]  ;;  %v6052_v35 = vld [vmem:[#allocation5 + $0x428] sm:$0xf] }
  0x6e   :  { %1217 = vmatpush.bf16.msra.mxu0 %v6864_v22  ;;  %10896 = vst [vmem:[#allocation80_spill] sm:$0xff] %v6876_v4  ;;  %v6887_v22 = vor.u32 %v6388_v14, %v6128_v41  ;;  %v6368_v0 = vld [vmem:[#allocation5 + $0x478] sm:$0xf0]  ;;  %v6358_v41 = vld [vmem:[#allocation5 + $0x42c] sm:$0xf]  ;;  %v6904_v62 = vor.u32 %v6357_v63, %v6046_v1 }
  0x6f   :  { %1230 = vmatpush.bf16.msra.mxu1 %v6868_v37  ;;  %10899 = vst [vmem:[#allocation83_spill] sm:$0xff] %v6885_v39  ;;  %v6367_v37 = vld [vmem:[#allocation5 + $0x470] sm:$0xf0]  ;;  %v6054_v14 = vld [vmem:[#allocation5 + $0x47c] sm:$0xf0]  ;;  %v6906_v50 = vor.u32 %v6368_v0, %v6052_v35 }
  0x70   :  { %1243 = vmatpush.bf16.msra.mxu2 %v6870_v32  ;;  %1256 = vmatpush.bf16.msra.mxu3 %v6873_v24  ;;  %10900 = vst [vmem:[#allocation84_spill] sm:$0xff] %v6887_v22  ;;  %v6900_v10 = vor.u32 %v6367_v37, %v6044_v30  ;;  %v5960_v15 = vld [vmem:[#allocation5 + $0x378] sm:$0xf]  ;;  %v6346_v55 = vld [vmem:[#allocation5 + $0x3c8] sm:$0xf0]  ;;  %v6909_v2 = vor.u32 %v6358_v41, %v6054_v14 }
  0x71   :  { %10901 = vst [vmem:[#allocation85_spill] sm:$0xff] %v6889_v26  ;;  %v6336_v13 = vld [vmem:[#allocation5 + $0x37c] sm:$0xf]  ;;  %v5962_v36 = vld [vmem:[#allocation5 + $0x3cc] sm:$0xf0]  ;;  %v6915_v63 = vor.u32 %v6346_v55, %v5960_v15 }
  0x72   :  { %10902 = vst [vmem:[#allocation86_spill] sm:$0xff] %v6891_v11  ;;  %1218 = vmatpush.bf16.msra.mxu0 %v6876_v4  ;;  %v6347_v24 = vld [vmem:[#allocation5 + $0x3d0] sm:$0xf0]  ;;  %v6337_v30 = vld [vmem:[#allocation5 + $0x384] sm:$0xf]  ;;  %v6920_v1 = vor.u32 %v6336_v13, %v5962_v36 }
  0x73   :  { %10903 = vst [vmem:[#allocation87_spill] sm:$0xff] %v6894_v49  ;;  %1231 = vmatpush.bf16.msra.mxu1 %v6880_v31  ;;  %v5970_v37 = vld [vmem:[#allocation5 + $0x3d4] sm:$0xf0]  ;;  %v5876_v0 = vld [vmem:[#allocation5 + $0x2d0] sm:$0xf] }
  0x74   :  { %1244 = vmatpush.bf16.msra.mxu2 %v6882_v48  ;;  %1257 = vmatpush.bf16.msra.mxu3 %v6885_v39  ;;  %10904 = vst [vmem:[#allocation88_spill] sm:$0xff] %v6900_v10  ;;  %v5968_v39 = vld [vmem:[#allocation5 + $0x380] sm:$0xf]  ;;  %v6325_v41 = vld [vmem:[#allocation5 + $0x320] sm:$0xf0] }
  0x75   :  { %10905 = vst [vmem:[#allocation89_spill] sm:$0xff] %v6904_v62  ;;  %1219 = vmatmul.bf16.vlgmr.msra.gmra.mxu0 %v6733_v53  ;;  %v6922_v35 = vor.u32 %v6347_v24, %v5968_v39  ;;  %v6315_v14 = vld [vmem:[#allocation5 + $0x2d4] sm:$0xf]  ;;  %v5884_v15 = vld [vmem:[#allocation5 + $0x2d8] sm:$0xf] }
  0x76   :  { %1263 = vmatpush.bf16.msrb.mxu0 %v6887_v22  ;;  %10906 = vst [vmem:[#allocation90_spill] sm:$0xff] %v6906_v50  ;;  %1232 = vmatmul.bf16.vlgmr.msra.gmra.mxu1 %v6733_v53  ;;  %v6326_v55 = vld [vmem:[#allocation5 + $0x328] sm:$0xf0]  ;;  %v5792_v13 = vld [vmem:[#allocation5 + $0x228] sm:$0xf] }
  0x77   :  { %1276 = vmatpush.bf16.msrb.mxu1 %v6889_v26  ;;  %10907 = vst [vmem:[#allocation91_spill] sm:$0xff] %v6909_v2  ;;  %1245 = vmatmul.bf16.vlgmr.msra.gmra.mxu2 %v6733_v53  ;;  %v5886_v26 = vld [vmem:[#allocation5 + $0x32c] sm:$0xf0]  ;;  %v6934_v39 = vor.u32 %v6326_v55, %v5884_v15  ;;  %v6304_v36 = vld [vmem:[#allocation5 + $0x278] sm:$0xf0] }
  0x78   :  { %1289 = vmatpush.bf16.msrb.mxu2 %v6891_v11  ;;  %1302 = vmatpush.bf16.msrb.mxu3 %v6894_v49  ;;  %10908 = vst [vmem:[#allocation92_spill] sm:$0xff] %v6915_v63  ;;  %v6925_v49 = vor.u32 %v6337_v30, %v5970_v37  ;;  %v6316_v11 = vld [vmem:[#allocation5 + $0x2dc] sm:$0xf]  ;;  %v6294_v30 = vld [vmem:[#allocation5 + $0x22c] sm:$0xf] }
  0x79   :  { %1258 = vmatmul.bf16.vlgmr.msra.gmra.mxu3 %v6733_v53  ;;  %10909 = vst [vmem:[#allocation93_spill] sm:$0xff] %v6920_v1  ;;  %v6937_v37 = vor.u32 %v6316_v11, %v5886_v26  ;;  %v5708_v15 = vld [vmem:[#allocation5 + $0x180] sm:$0xf]  ;;  %v6283_v26 = vld [vmem:[#allocation5 + $0x1d0] sm:$0xf0] }
  0x7a   :  { %1264 = vmatpush.bf16.msrb.mxu0 %v6900_v10  ;;  %10910 = vst [vmem:[#allocation94_spill] sm:$0xff] %v6922_v35  ;;  %v5878_v10 = vld [vmem:[#allocation5 + $0x324] sm:$0xf0]  ;;  %v6273_v11 = vld [vmem:[#allocation5 + $0x184] sm:$0xf] }
  0x7b   :  { %1277 = vmatpush.bf16.msrb.mxu1 %v6904_v62  ;;  %10911 = vst [vmem:[#allocation95_spill] sm:$0xff] %v6925_v49  ;;  %v6928_v62 = vor.u32 %v6325_v41, %v5876_v0  ;;  %v6932_v24 = vor.u32 %v6315_v14, %v5878_v10  ;;  %v6295_v0 = vld [vmem:[#allocation5 + $0x234] sm:$0xf]  ;;  %v5802_v41 = vld [vmem:[#allocation5 + $0x284] sm:$0xf0] }
  0x7c   :  { %1290 = vmatpush.bf16.msrb.mxu2 %v6906_v50  ;;  %1303 = vmatpush.bf16.msrb.mxu3 %v6909_v2  ;;  %10914 = vst [vmem:[#allocation98_spill] sm:$0xff] %v6934_v39  ;;  %v5794_v2 = vld [vmem:[#allocation5 + $0x27c] sm:$0xf0]  ;;  %v5800_v50 = vld [vmem:[#allocation5 + $0x230] sm:$0xf]  ;;  %v6949_v55 = vor.u32 %v6295_v0, %v5802_v41 }
  0x7d   :  { %10912 = vst [vmem:[#allocation96_spill] sm:$0xff] %v6928_v62  ;;  %v6944_v10 = vor.u32 %v6294_v30, %v5794_v2  ;;  %v6262_v30 = vld [vmem:[#allocation5 + $0x128] sm:$0xf0]  ;;  %v6252_v0 = vld [vmem:[#allocation5 + $0xdc] sm:$0xf] }
  0x7e   :  { %1265 = vmatpush.bf16.msrb.mxu0 %v6915_v63  ;;  %10913 = vst [vmem:[#allocation97_spill] sm:$0xff] %v6932_v24  ;;  %v6305_v63 = vld [vmem:[#allocation5 + $0x280] sm:$0xf0]  ;;  %v6144_v22 = vld [vmem:[#allocation5 + $0x4d8] sm:$0xf] }
  0x7f   :  { %1278 = vmatpush.bf16.msrb.mxu1 %v6920_v1  ;;  %10915 = vst [vmem:[#allocation99_spill] sm:$0xff] %v6937_v37  ;;  %v6940_v1 = vor.u32 %v6304_v36, %v5792_v13  ;;  %v6946_v14 = vor.u32 %v6305_v63, %v5800_v50  ;;  %v6274_v13 = vld [vmem:[#allocation5 + $0x18c] sm:$0xf]  ;;  %v5718_v36 = vld [vmem:[#allocation5 + $0x1dc] sm:$0xf0] }
  0x80   :  { %1291 = vmatpush.bf16.msrb.mxu2 %v6922_v35  ;;  %1304 = vmatpush.bf16.msrb.mxu3 %v6925_v49  ;;  %10917 = vst [vmem:[#allocation101_spill] sm:$0xff] %v6944_v10  ;;  %v5710_v49 = vld [vmem:[#allocation5 + $0x1d4] sm:$0xf0]  ;;  %v5716_v35 = vld [vmem:[#allocation5 + $0x188] sm:$0xf]  ;;  %v6961_v41 = vor.u32 %v6274_v13, %v5718_v36 }
  0x81   :  { %10916 = vst [vmem:[#allocation100_spill] sm:$0xff] %v6940_v1  ;;  %v6956_v50 = vor.u32 %v6273_v11, %v5710_v49  ;;  %v5624_v63 = vld [vmem:[#allocation5 + $0xd8] sm:$0xf]  ;;  %v5540_v49 = vld [vmem:[#allocation5 + $0x30] sm:$0xf] }
  0x82   :  { %1266 = vmatpush.bf16.msrb.mxu0 %v6928_v62  ;;  %10918 = vst [vmem:[#allocation102_spill] sm:$0xff] %v6946_v14  ;;  %v6284_v62 = vld [vmem:[#allocation5 + $0x1d8] sm:$0xf0]  ;;  %v6241_v11 = vld [vmem:[#allocation5 + $0x80] sm:$0xf0] }
  0x83   :  { %1279 = vmatpush.bf16.msrb.mxu1 %v6932_v24  ;;  %10919 = vst [vmem:[#allocation103_spill] sm:$0xff] %v6949_v55  ;;  %v6952_v24 = vor.u32 %v6283_v26, %v5708_v15  ;;  %v6958_v2 = vor.u32 %v6284_v62, %v5716_v35  ;;  %v6253_v15 = vld [vmem:[#allocation5 + $0xe4] sm:$0xf]  ;;  %v5634_v26 = vld [vmem:[#allocation5 + $0x134] sm:$0xf0] }
  0x84   :  { %1292 = vmatpush.bf16.msrb.mxu2 %v6934_v39  ;;  %1305 = vmatpush.bf16.msrb.mxu3 %v6937_v37  ;;  %10921 = vst [vmem:[#allocation105_spill] sm:$0xff] %v6956_v50  ;;  %v5626_v37 = vld [vmem:[#allocation5 + $0x12c] sm:$0xf0]  ;;  %v5632_v39 = vld [vmem:[#allocation5 + $0xe0] sm:$0xf] }
  0x85   :  { %10920 = vst [vmem:[#allocation104_spill] sm:$0xff] %v6952_v24  ;;  %v6968_v62 = vor.u32 %v6252_v0, %v5626_v37  ;;  %v6231_v13 = vld [vmem:[#allocation5 + $0x34] sm:$0xf]  ;;  %v5542_v36 = vld [vmem:[#allocation5 + $0x84] sm:$0xf0] }
  0x86   :  { %1267 = vmatpush.bf16.msrb.mxu0 %v6940_v1  ;;  %10922 = vst [vmem:[#allocation106_spill] sm:$0xff] %v6958_v2  ;;  %v6263_v1 = vld [vmem:[#allocation5 + $0x130] sm:$0xf0]  ;;  %v6390_v48 = vld [vmem:[#allocation5 + $0x528] sm:$0xf0]  ;;  %v6980_v0 = vor.u32 %v6231_v13, %v5542_v36 }
  0x87   :  { %1280 = vmatpush.bf16.msrb.mxu1 %v6944_v10  ;;  %10923 = vst [vmem:[#allocation107_spill] sm:$0xff] %v6961_v41  ;;  %v6964_v10 = vor.u32 %v6262_v30, %v5624_v63  ;;  %v6970_v35 = vor.u32 %v6263_v1, %v5632_v39  ;;  %v6232_v63 = vld [vmem:[#allocation5 + $0x3c] sm:$0xf]  ;;  %v5550_v30 = vld [vmem:[#allocation5 + $0x8c] sm:$0xf0] }
  0x88   :  { %1293 = vmatpush.bf16.msrb.mxu2 %v6946_v14  ;;  %1306 = vmatpush.bf16.msrb.mxu3 %v6949_v55  ;;  %10925 = vst [vmem:[#allocation109_spill] sm:$0xff] %v6968_v62  ;;  %v5548_v55 = vld [vmem:[#allocation5 + $0x38] sm:$0xf]  ;;  %v6973_v14 = vor.u32 %v6253_v15, %v5634_v26  ;;  %v6380_v31 = vld [vmem:[#allocation5 + $0x4dc] sm:$0xf] }
  0x89   :  { %10924 = vst [vmem:[#allocation108_spill] sm:$0xff] %v6964_v10  ;;  %v6146_v37 = vld [vmem:[#allocation5 + $0x52c] sm:$0xf0]  ;;  %v6152_v1 = vld [vmem:[#allocation5 + $0x4e0] sm:$0xf] }
  0x8a   :  { %1268 = vmatpush.bf16.msrb.mxu0 %v6952_v24  ;;  %10926 = vst [vmem:[#allocation110_spill] sm:$0xff] %v6970_v35  ;;  %v6242_v24 = vld [vmem:[#allocation5 + $0x88] sm:$0xf0]  ;;  %v6391_v39 = vld [vmem:[#allocation5 + $0x530] sm:$0xf0] }
  0x8b   :  { %1281 = vmatpush.bf16.msrb.mxu1 %v6956_v50  ;;  %10927 = vst [vmem:[#allocation111_spill] sm:$0xff] %v6973_v14  ;;  %v6982_v15 = vor.u32 %v6242_v24, %v5548_v55  ;;  %v6381_v26 = vld [vmem:[#allocation5 + $0x4e4] sm:$0xf]  ;;  %v6985_v50 = vor.u32 %v6232_v63, %v5550_v30  ;;  %v6060_v4 = vld [vmem:[#allocation5 + $0x430] sm:$0xf] }
  0x8c   :  { %1294 = vmatpush.bf16.msrb.mxu2 %v6958_v2  ;;  %1307 = vmatpush.bf16.msrb.mxu3 %v6961_v41  ;;  %v6976_v2 = vor.u32 %v6241_v11, %v5540_v49  ;;  %10929 = vst [vmem:[#allocation113_spill] sm:$0xff] %v6980_v0  ;;  %v6154_v41 = vld [vmem:[#allocation5 + $0x534] sm:$0xf0]  ;;  %v6989_v49 = vor.u32 %v6380_v31, %v6146_v37  ;;  %v6359_v32 = vld [vmem:[#allocation5 + $0x434] sm:$0xf] }
  0x8d   :  { %10930 = vst [vmem:[#allocation114_spill] sm:$0xff] %v6982_v15  ;;  %v6991_v11 = vor.u32 %v6391_v39, %v6152_v1  ;;  %v6994_v13 = vor.u32 %v6381_v26, %v6154_v41  ;;  %v6062_v24 = vld [vmem:[#allocation5 + $0x484] sm:$0xf0]  ;;  %v6068_v55 = vld [vmem:[#allocation5 + $0x438] sm:$0xf] }
  0x8e   :  { %1269 = vmatpush.bf16.msrb.mxu0 %v6964_v10  ;;  %10928 = vst [vmem:[#allocation112_spill] sm:$0xff] %v6976_v2  ;;  %v6987_v10 = vor.u32 %v6390_v48, %v6144_v22  ;;  %v6370_v36 = vld [vmem:[#allocation5 + $0x488] sm:$0xf0]  ;;  %v6360_v22 = vld [vmem:[#allocation5 + $0x43c] sm:$0xf]  ;;  %v7004_v41 = vor.u32 %v6359_v32, %v6062_v24 }
  0x8f   :  { %1282 = vmatpush.bf16.msrb.mxu1 %v6968_v62  ;;  %10931 = vst [vmem:[#allocation115_spill] sm:$0xff] %v6985_v50  ;;  %v6369_v62 = vld [vmem:[#allocation5 + $0x480] sm:$0xf0]  ;;  %v6070_v48 = vld [vmem:[#allocation5 + $0x48c] sm:$0xf0]  ;;  %v7006_v63 = vor.u32 %v6370_v36, %v6068_v55 }
  0x90   :  { %1295 = vmatpush.bf16.msrb.mxu2 %v6970_v35  ;;  %1308 = vmatpush.bf16.msrb.mxu3 %v6973_v14  ;;  %10932 = vst [vmem:[#allocation116_spill] sm:$0xff] %v6987_v10  ;;  %v7000_v31 = vor.u32 %v6369_v62, %v6060_v4  ;;  %v5976_v30 = vld [vmem:[#allocation5 + $0x388] sm:$0xf]  ;;  %v6348_v37 = vld [vmem:[#allocation5 + $0x3d8] sm:$0xf0]  ;;  %v7009_v39 = vor.u32 %v6360_v22, %v6070_v48 }
  0x91   :  { %10933 = vst [vmem:[#allocation117_spill] sm:$0xff] %v6989_v49  ;;  %v6338_v1 = vld [vmem:[#allocation5 + $0x38c] sm:$0xf]  ;;  %v5978_v26 = vld [vmem:[#allocation5 + $0x3dc] sm:$0xf0]  ;;  %v7015_v32 = vor.u32 %v6348_v37, %v5976_v30 }
  0x92   :  { %10934 = vst [vmem:[#allocation118_spill] sm:$0xff] %v6991_v11  ;;  %1270 = vmatpush.bf16.msrb.mxu0 %v6976_v2  ;;  %v6349_v14 = vld [vmem:[#allocation5 + $0x3e0] sm:$0xf0]  ;;  %v6339_v4 = vld [vmem:[#allocation5 + $0x394] sm:$0xf]  ;;  %v7020_v24 = vor.u32 %v6338_v1, %v5978_v26 }
  0x93   :  { %10935 = vst [vmem:[#allocation119_spill] sm:$0xff] %v6994_v13  ;;  %1283 = vmatpush.bf16.msrb.mxu1 %v6980_v0  ;;  %v5986_v62 = vld [vmem:[#allocation5 + $0x3e4] sm:$0xf0]  ;;  %v5892_v36 = vld [vmem:[#allocation5 + $0x2e0] sm:$0xf] }
  0x94   :  { %1296 = vmatpush.bf16.msrb.mxu2 %v6982_v15  ;;  %1309 = vmatpush.bf16.msrb.mxu3 %v6985_v50  ;;  %10936 = vst [vmem:[#allocation120_spill] sm:$0xff] %v7000_v31  ;;  %v5984_v50 = vld [vmem:[#allocation5 + $0x390] sm:$0xf]  ;;  %v6327_v22 = vld [vmem:[#allocation5 + $0x330] sm:$0xf0] }
  0x95   :  { %10937 = vst [vmem:[#allocation121_spill] sm:$0xff] %v7004_v41  ;;  %1271 = vmatmul.bf16.vlgmr.msrb.gmra.mxu0 %v6733_v53  ;;  %v7022_v55 = vor.u32 %v6349_v14, %v5984_v50  ;;  %v6317_v48 = vld [vmem:[#allocation5 + $0x2e4] sm:$0xf]  ;;  %v5900_v30 = vld [vmem:[#allocation5 + $0x2e8] sm:$0xf] }
  0x96   :  { %1315 = vmatpush.bf16.msra.mxu0 %v6987_v10  ;;  %10938 = vst [vmem:[#allocation122_spill] sm:$0xff] %v7006_v63  ;;  %1284 = vmatmul.bf16.vlgmr.msrb.gmra.mxu1 %v6733_v53  ;;  %v6328_v37 = vld [vmem:[#allocation5 + $0x338] sm:$0xf0]  ;;  %v5808_v1 = vld [vmem:[#allocation5 + $0x238] sm:$0xf] }
  0x97   :  { %1328 = vmatpush.bf16.msra.mxu1 %v6989_v49  ;;  %10939 = vst [vmem:[#allocation123_spill] sm:$0xff] %v7009_v39  ;;  %1297 = vmatmul.bf16.vlgmr.msrb.gmra.mxu2 %v6733_v53  ;;  %v5902_v49 = vld [vmem:[#allocation5 + $0x33c] sm:$0xf0]  ;;  %v7034_v50 = vor.u32 %v6328_v37, %v5900_v30  ;;  %v6306_v26 = vld [vmem:[#allocation5 + $0x288] sm:$0xf0] }
  0x98   :  { %1341 = vmatpush.bf16.msra.mxu2 %v6991_v11  ;;  %1354 = vmatpush.bf16.msra.mxu3 %v6994_v13  ;;  %10940 = vst [vmem:[#allocation124_spill] sm:$0xff] %v7015_v32  ;;  %v7025_v13 = vor.u32 %v6339_v4, %v5986_v62  ;;  %v6318_v11 = vld [vmem:[#allocation5 + $0x2ec] sm:$0xf]  ;;  %v6296_v4 = vld [vmem:[#allocation5 + $0x23c] sm:$0xf] }
  0x99   :  { %1310 = vmatmul.bf16.vlgmr.msrb.gmra.mxu3 %v6733_v53  ;;  %10941 = vst [vmem:[#allocation125_spill] sm:$0xff] %v7020_v24  ;;  %v7037_v62 = vor.u32 %v6318_v11, %v5902_v49  ;;  %v5724_v30 = vld [vmem:[#allocation5 + $0x190] sm:$0xf]  ;;  %v6285_v49 = vld [vmem:[#allocation5 + $0x1e0] sm:$0xf0] }
  0x9a   :  { %1316 = vmatpush.bf16.msra.mxu0 %v7000_v31  ;;  %10942 = vst [vmem:[#allocation126_spill] sm:$0xff] %v7022_v55  ;;  %v5894_v31 = vld [vmem:[#allocation5 + $0x334] sm:$0xf0]  ;;  %v6275_v11 = vld [vmem:[#allocation5 + $0x194] sm:$0xf] }
  0x9b   :  { %1329 = vmatpush.bf16.msra.mxu1 %v7004_v41  ;;  %10943 = vst [vmem:[#allocation127_spill] sm:$0xff] %v7025_v13  ;;  %v7028_v41 = vor.u32 %v6327_v22, %v5892_v36  ;;  %v7032_v14 = vor.u32 %v6317_v48, %v5894_v31  ;;  %v6297_v36 = vld [vmem:[#allocation5 + $0x244] sm:$0xf]  ;;  %v5818_v22 = vld [vmem:[#allocation5 + $0x294] sm:$0xf0] }
  0x9c   :  { %1342 = vmatpush.bf16.msra.mxu2 %v7006_v63  ;;  %1355 = vmatpush.bf16.msra.mxu3 %v7009_v39  ;;  %10946 = vst [vmem:[#allocation130_spill] sm:$0xff] %v7034_v50  ;;  %v5810_v39 = vld [vmem:[#allocation5 + $0x28c] sm:$0xf0]  ;;  %v5816_v63 = vld [vmem:[#allocation5 + $0x240] sm:$0xf]  ;;  %v7049_v37 = vor.u32 %v6297_v36, %v5818_v22 }
  0x9d   :  { %10944 = vst [vmem:[#allocation128_spill] sm:$0xff] %v7028_v41  ;;  %v7044_v31 = vor.u32 %v6296_v4, %v5810_v39  ;;  %v6264_v4 = vld [vmem:[#allocation5 + $0x138] sm:$0xf0]  ;;  %v6254_v36 = vld [vmem:[#allocation5 + $0xec] sm:$0xf] }
  0x9e   :  { %1317 = vmatpush.bf16.msra.mxu0 %v7015_v32  ;;  %10945 = vst [vmem:[#allocation129_spill] sm:$0xff] %v7032_v14  ;;  %v6307_v32 = vld [vmem:[#allocation5 + $0x290] sm:$0xf0]  ;;  %v6160_v10 = vld [vmem:[#allocation5 + $0x4e8] sm:$0xf] }
  0x9f   :  { %1330 = vmatpush.bf16.msra.mxu1 %v7020_v24  ;;  %10947 = vst [vmem:[#allocation131_spill] sm:$0xff] %v7037_v62  ;;  %v7040_v24 = vor.u32 %v6306_v26, %v5808_v1  ;;  %v7046_v48 = vor.u32 %v6307_v32, %v5816_v63  ;;  %v6276_v1 = vld [vmem:[#allocation5 + $0x19c] sm:$0xf]  ;;  %v5734_v26 = vld [vmem:[#allocation5 + $0x1ec] sm:$0xf0] }
  0xa0   :  { %1343 = vmatpush.bf16.msra.mxu2 %v7022_v55  ;;  %1356 = vmatpush.bf16.msra.mxu3 %v7025_v13  ;;  %10949 = vst [vmem:[#allocation133_spill] sm:$0xff] %v7044_v31  ;;  %v5726_v13 = vld [vmem:[#allocation5 + $0x1e4] sm:$0xf0]  ;;  %v5732_v55 = vld [vmem:[#allocation5 + $0x198] sm:$0xf]  ;;  %v7061_v22 = vor.u32 %v6276_v1, %v5734_v26 }
  0xa1   :  { %10948 = vst [vmem:[#allocation132_spill] sm:$0xff] %v7040_v24  ;;  %v7056_v63 = vor.u32 %v6275_v11, %v5726_v13  ;;  %v5640_v32 = vld [vmem:[#allocation5 + $0xe8] sm:$0xf]  ;;  %v5556_v13 = vld [vmem:[#allocation5 + $0x40] sm:$0xf] }
  0xa2   :  { %1318 = vmatpush.bf16.msra.mxu0 %v7028_v41  ;;  %10950 = vst [vmem:[#allocation134_spill] sm:$0xff] %v7046_v48  ;;  %v6286_v41 = vld [vmem:[#allocation5 + $0x1e8] sm:$0xf0]  ;;  %v6243_v11 = vld [vmem:[#allocation5 + $0x90] sm:$0xf0] }
  0xa3   :  { %1331 = vmatpush.bf16.msra.mxu1 %v7032_v14  ;;  %10951 = vst [vmem:[#allocation135_spill] sm:$0xff] %v7049_v37  ;;  %v7052_v14 = vor.u32 %v6285_v49, %v5724_v30  ;;  %v7058_v39 = vor.u32 %v6286_v41, %v5732_v55  ;;  %v6255_v30 = vld [vmem:[#allocation5 + $0xf4] sm:$0xf]  ;;  %v5650_v49 = vld [vmem:[#allocation5 + $0x144] sm:$0xf0] }
  0xa4   :  { %1344 = vmatpush.bf16.msra.mxu2 %v7034_v50  ;;  %1357 = vmatpush.bf16.msra.mxu3 %v7037_v62  ;;  %v5642_v62 = vld [vmem:[#allocation5 + $0x13c] sm:$0xf0]  ;;  %v5648_v50 = vld [vmem:[#allocation5 + $0xf0] sm:$0xf]  ;;  %v6233_v1 = vld [vmem:[#allocation5 + $0x44] sm:$0xf] }
  0xa5   :  { %10952 = vst [vmem:[#allocation136_spill] sm:$0xff] %v7052_v14  ;;  %v7068_v41 = vor.u32 %v6254_v36, %v5642_v62  ;;  %v5558_v26 = vld [vmem:[#allocation5 + $0x94] sm:$0xf0]  ;;  %v6392_v15 = vld [vmem:[#allocation5 + $0x538] sm:$0xf0] }
  0xa6   :  { %1319 = vmatpush.bf16.msra.mxu0 %v7040_v24  ;;  %10953 = vst [vmem:[#allocation137_spill] sm:$0xff] %v7058_v39  ;;  %v6265_v24 = vld [vmem:[#allocation5 + $0x140] sm:$0xf0]  ;;  %v7087_v36 = vor.u32 %v6392_v15, %v6160_v10  ;;  %v5992_v10 = vld [vmem:[#allocation5 + $0x398] sm:$0xf] }
  0xa7   :  { %1332 = vmatpush.bf16.msra.mxu1 %v7044_v31  ;;  %v7064_v31 = vor.u32 %v6264_v4, %v5640_v32  ;;  %v7070_v55 = vor.u32 %v6265_v24, %v5648_v50  ;;  %v6234_v32 = vld [vmem:[#allocation5 + $0x4c] sm:$0xf]  ;;  %v5566_v4 = vld [vmem:[#allocation5 + $0x9c] sm:$0xf0]  ;;  %v7080_v24 = vor.u32 %v6233_v1, %v5558_v26  ;;  %v5824_v26 = vld [vmem:[#allocation5 + $0x248] sm:$0xf] }
  0xa8   :  { %1345 = vmatpush.bf16.msra.mxu2 %v7046_v48  ;;  %1358 = vmatpush.bf16.msra.mxu3 %v7049_v37  ;;  %v7073_v37 = vor.u32 %v6255_v30, %v5650_v49  ;;  %v5564_v48 = vld [vmem:[#allocation5 + $0x48] sm:$0xf]  ;;  %v7085_v62 = vor.u32 %v6234_v32, %v5566_v4  ;;  %v6076_v30 = vld [vmem:[#allocation5 + $0x440] sm:$0xf]  ;;  %v6371_v49 = vld [vmem:[#allocation5 + $0x490] sm:$0xf0] }
  0xa9   :  { %10954 = vst [vmem:[#allocation138_spill] sm:$0xff] %v7070_v55  ;;  %v6350_v15 = vld [vmem:[#allocation5 + $0x3e8] sm:$0xf0]  ;;  %v6308_v32 = vld [vmem:[#allocation5 + $0x298] sm:$0xf0] }
  0xaa   :  { %1320 = vmatpush.bf16.msra.mxu0 %v7052_v14  ;;  %v6244_v14 = vld [vmem:[#allocation5 + $0x98] sm:$0xf0]  ;;  %v7116_v4 = vor.u32 %v6308_v32, %v5824_v26 }
  0xab   :  { %1333 = vmatpush.bf16.msra.mxu1 %v7056_v63  ;;  %v7082_v50 = vor.u32 %v6244_v14, %v5564_v48  ;;  %v7094_v14 = vor.u32 %v6371_v49, %v6076_v30  ;;  %v7103_v48 = vor.u32 %v6350_v15, %v5992_v10  ;;  %v5740_v30 = vld [vmem:[#allocation5 + $0x1a0] sm:$0xf]  ;;  %v6287_v49 = vld [vmem:[#allocation5 + $0x1f0] sm:$0xf0]  ;;  %v5656_v15 = vld [vmem:[#allocation5 + $0xf8] sm:$0xf] }
  0xac   :  { %1346 = vmatpush.bf16.msra.mxu2 %v7058_v39  ;;  %1359 = vmatpush.bf16.msra.mxu3 %v7061_v22  ;;  %v7076_v39 = vor.u32 %v6243_v11, %v5556_v13  ;;  %v5908_v13 = vld [vmem:[#allocation5 + $0x2f0] sm:$0xf]  ;;  %v6329_v11 = vld [vmem:[#allocation5 + $0x340] sm:$0xf0]  ;;  %v7122_v10 = vor.u32 %v6287_v49, %v5740_v30 }
  0xad   :  { %10955 = vst [vmem:[#allocation139_spill] sm:$0xff] %v7082_v50  ;;  %v7110_v1 = vor.u32 %v6329_v11, %v5908_v13  ;;  %v6266_v13 = vld [vmem:[#allocation5 + $0x148] sm:$0xf0]  ;;  %v5572_v30 = vld [vmem:[#allocation5 + $0x50] sm:$0xf] }
  0xae   :  { %1321 = vmatpush.bf16.msra.mxu0 %v7064_v31  ;;  %v7128_v11 = vor.u32 %v6266_v13, %v5656_v15  ;;  %v6245_v49 = vld [vmem:[#allocation5 + $0xa0] sm:$0xf0] }
  0xaf   :  { %1334 = vmatpush.bf16.msra.mxu1 %v7068_v41 }
  0xb0   :  { %1347 = vmatpush.bf16.msra.mxu2 %v7070_v55  ;;  %1360 = vmatpush.bf16.msra.mxu3 %v7073_v37 }
  0xb2   :  { %1322 = vmatpush.bf16.msra.mxu0 %v7076_v39 }
  0xb3   :  { %1335 = vmatpush.bf16.msra.mxu1 %v7080_v24 }
  0xb4   :  { %1348 = vmatpush.bf16.msra.mxu2 %v7082_v50  ;;  %1361 = vmatpush.bf16.msra.mxu3 %v7085_v62 }
  0xb5   :  { %1323 = vmatmul.bf16.vlgmr.msra.gmra.mxu0 %v6733_v53 }
  0xb6   :  { %1367 = vmatpush.bf16.msrb.mxu0 %v7087_v36  ;;  %1336 = vmatmul.bf16.vlgmr.msra.gmra.mxu1 %v6733_v53 }
  0xb7   :  { %1380 = vmatpush.bf16.msrb.mxu1 %v6586_v3  ;;  %1349 = vmatmul.bf16.vlgmr.msra.gmra.mxu2 %v6733_v53 }
  0xb8   :  { %1393 = vmatpush.bf16.msrb.mxu2 %v6588_v7  ;;  %1406 = vmatpush.bf16.msrb.mxu3 %v6590_v8 }
  0xb9   :  { %1362 = vmatmul.bf16.vlgmr.msra.gmra.mxu3 %v6733_v53 }
  0xba   :  { %1368 = vmatpush.bf16.msrb.mxu0 %v7094_v14 }
  0xbb   :  { %1381 = vmatpush.bf16.msrb.mxu1 %v6597_v16 }
  0xbc   :  { %1394 = vmatpush.bf16.msrb.mxu2 %v6599_v17  ;;  %1407 = vmatpush.bf16.msrb.mxu3 %v6602_v21  ;;  %v7132_v32 = vpop.f32.mrf.mxu0 }
  0xbd   :  { %10957 = vst [vmem:[#allocation141_spill] sm:$0xff] %v7132_v32  ;;  %v10964_v32 = vld [vmem:[#allocation32_spill] sm:$0xff] }
  0xbe   :  { %1369 = vmatpush.bf16.msrb.mxu0 %v7103_v48  ;;  %v7130_v26 = vpop.f32.mrf.mxu1 }
  0xbf   :  { %1382 = vmatpush.bf16.msrb.mxu1 %v6607_v29  ;;  %10956 = vst [vmem:[#allocation140_spill] sm:$0xff] %v7130_v26 }
  0xc0   :  { %1395 = vmatpush.bf16.msrb.mxu2 %v6611_v33  ;;  %1408 = vmatpush.bf16.msrb.mxu3 %v6613_v34 }
  0xc1   :  { %v7142_v15 = vpop.f32.mrf.mxu2 }
  0xc2   :  { %1370 = vmatpush.bf16.msrb.mxu0 %v7110_v1  ;;  %10958 = vst [vmem:[#allocation142_spill] sm:$0xff] %v7142_v15  ;;  %v10963_v15 = vld [vmem:[#allocation31_spill] sm:$0xff] }
  0xc3   :  { %1383 = vmatpush.bf16.msrb.mxu1 %v6619_v44 }
  0xc4   :  { %1396 = vmatpush.bf16.msrb.mxu2 %v6623_v45  ;;  %1409 = vmatpush.bf16.msrb.mxu3 %v6625_v46  ;;  %v7138_v46 = vor.u32 %v6245_v49, %v5572_v30  ;;  %v1118_v26 = vpop.f32.mrf.mxu0  ;;  %v7154_v30 = vpop.f32.mrf.mxu3 }
  0xc5   :  { %10959 = vst [vmem:[#allocation143_spill] sm:$0xff] %v7154_v30  ;;  %v10962_v30 = vld [vmem:[#allocation16_spill] sm:$0xff] }
  0xc6   :  { %1371 = vmatpush.bf16.msrb.mxu0 %v7116_v4  ;;  %v1131_v13 = vpop.f32.mrf.mxu1 }
  0xc7   :  { %1384 = vmatpush.bf16.msrb.mxu1 %v6631_v56 }
  0xc8   :  { %1397 = vmatpush.bf16.msrb.mxu2 %v6635_v57  ;;  %1410 = vmatpush.bf16.msrb.mxu3 %v6637_v58  ;;  %v10972_v58 = vld [vmem:[#allocation40_spill] sm:$0xff] }
  0xc9   :  { %v1144_v26 = vpop.f32.mrf.mxu2 }
  0xca   :  { %1372 = vmatpush.bf16.msrb.mxu0 %v7122_v10 }
  0xcb   :  { %1385 = vmatpush.bf16.msrb.mxu1 %v6643_v5 }
  0xcc   :  { %1398 = vmatpush.bf16.msrb.mxu2 %v6647_v6  ;;  %1411 = vmatpush.bf16.msrb.mxu3 %v6649_v9  ;;  %v1157_v26 = vpop.f32.mrf.mxu3  ;;  %v10969_v9 = vld [vmem:[#allocation37_spill] sm:$0xff] }
  0xcd   :  { %v10971_v26 = vld [vmem:[#allocation20_spill] sm:$0xff] }
  0xce   :  { %1373 = vmatpush.bf16.msrb.mxu0 %v7128_v11 }
  0xcf   :  { %1386 = vmatpush.bf16.msrb.mxu1 %v6655_v23 }
  0xd0   :  { %1399 = vmatpush.bf16.msrb.mxu2 %v6659_v27  ;;  %1412 = vmatpush.bf16.msrb.mxu3 %v6661_v28  ;;  %v10968_v28 = vld [vmem:[#allocation36_spill] sm:$0xff] }
  0xd2   :  { %1374 = vmatpush.bf16.msrb.mxu0 %v7138_v46  ;;  %v7166_v13 = vpop.f32.mrf.mxu0 }
  0xd3   :  { %1387 = vmatpush.bf16.msrb.mxu1 %v6667_v43  ;;  %v7164_v49 = vpop.f32.mrf.mxu1  ;;  %10961 = vst [vmem:[#allocation145_spill] sm:$0xff] %v7166_v13 }
  0xd4   :  { %1400 = vmatpush.bf16.msrb.mxu2 %v6671_v51  ;;  %1413 = vmatpush.bf16.msrb.mxu3 %v6673_v52  ;;  %10960 = vst [vmem:[#allocation144_spill] sm:$0xff] %v7164_v49  ;;  %v10967_v49 = vld [vmem:[#allocation18_spill] sm:$0xff] }
  0xd5   :  { %1375 = vmatmul.bf16.vlgmr.msrb.gmra.mxu0 %v6733_v53 }
  0xd6   :  { %1419 = vmatpush.bf16.msra.mxu0 %v6593_v12  ;;  %1388 = vmatmul.bf16.vlgmr.msrb.gmra.mxu1 %v6711_v54 }
  0xd7   :  { %1432 = vmatpush.bf16.msra.mxu1 %v6678_v59  ;;  %1401 = vmatmul.bf16.vlgmr.msrb.gmra.mxu2 %v6711_v54 }
  0xd8   :  { %1445 = vmatpush.bf16.msra.mxu2 %v6680_v60  ;;  %1458 = vmatpush.bf16.msra.mxu3 %v6682_v61  ;;  %v10966_v61 = vld [vmem:[#allocation33_spill] sm:$0xff] }
  0xd9   :  { %1414 = vmatmul.bf16.vlgmr.msrb.gmra.mxu3 %v6711_v54 }
  0xda   :  { %1420 = vmatpush.bf16.msra.mxu0 %v6604_v25  ;;  %v1170_v52 = vpop.f32.mrf.mxu0 }
  0xdb   :  { %1433 = vmatpush.bf16.msra.mxu1 %v6691_v18  ;;  %v1183_v13 = vpop.f32.mrf.mxu1  ;;  %v10977_v52 = vld [vmem:[#allocation45_spill] sm:$0xff] }
  0xdc   :  { %1446 = vmatpush.bf16.msra.mxu2 %v6695_v19  ;;  %1459 = vmatpush.bf16.msra.mxu3 %v6697_v20  ;;  %v7174_v20 = vpop.f32.mrf.mxu2  ;;  %v10978_v13 = vld [vmem:[#allocation46_spill] sm:$0xff] }
  0xdd   :  { %10965 = vst [vmem:[#allocation146_spill] sm:$0xff] %v7174_v20  ;;  %v10974_v20 = vld [vmem:[#allocation42_spill] sm:$0xff] }
  0xde   :  { %1421 = vmatpush.bf16.msra.mxu0 %v6616_v38 }
  0xdf   :  { %1434 = vmatpush.bf16.msra.mxu1 %v6703_v40 }
  0xe0   :  { %1447 = vmatpush.bf16.msra.mxu2 %v6707_v42  ;;  %1460 = vmatpush.bf16.msra.mxu3 %v6709_v47  ;;  %v10970_v47 = vld [vmem:[#allocation38_spill] sm:$0xff] }
  0xe2   :  { %1422 = vmatpush.bf16.msra.mxu0 %v10962_v30  ;;  %v11048_v30 = vld [vmem:[#allocation79_spill] sm:$0xff] }
  0xe3   :  { %1435 = vmatpush.bf16.msra.mxu1 %v10963_v15  ;;  %v10973_v15 = vld [vmem:[#allocation41_spill] sm:$0xff] }
  0xe4   :  { %1448 = vmatpush.bf16.msra.mxu2 %v10964_v32  ;;  %1461 = vmatpush.bf16.msra.mxu3 %v10966_v61  ;;  %v1196_v32 = vpop.f32.mrf.mxu2  ;;  %v10975_v61 = vld [vmem:[#allocation22_spill] sm:$0xff] }
  0xe5   :  { %v10984_v32 = vld [vmem:[#allocation52_spill] sm:$0xff] }
  0xe6   :  { %1423 = vmatpush.bf16.msra.mxu0 %v10967_v49  ;;  %v10976_v49 = vld [vmem:[#allocation44_spill] sm:$0xff] }
  0xe7   :  { %1436 = vmatpush.bf16.msra.mxu1 %v10968_v28 }
  0xe8   :  { %1449 = vmatpush.bf16.msra.mxu2 %v10969_v9  ;;  %1462 = vmatpush.bf16.msra.mxu3 %v10970_v47  ;;  %v10979_v9 = vld [vmem:[#allocation24_spill] sm:$0xff] }
  0xe9   :  { %v10980_v47 = vld [vmem:[#allocation48_spill] sm:$0xff] }
  0xea   :  { %1424 = vmatpush.bf16.msra.mxu0 %v10971_v26  ;;  %v10981_v26 = vld [vmem:[#allocation49_spill] sm:$0xff] }
  0xeb   :  { %1437 = vmatpush.bf16.msra.mxu1 %v10972_v58  ;;  %v10982_v58 = vld [vmem:[#allocation50_spill] sm:$0xff] }
  0xec   :  { %1450 = vmatpush.bf16.msra.mxu2 %v10973_v15  ;;  %1463 = vmatpush.bf16.msra.mxu3 %v10974_v20  ;;  %v10983_v15 = vld [vmem:[#allocation26_spill] sm:$0xff]  ;;  %v10985_v20 = vld [vmem:[#allocation53_spill] sm:$0xff] }
  0xee   :  { %1425 = vmatpush.bf16.msra.mxu0 %v10975_v61  ;;  %v10986_v61 = vld [vmem:[#allocation54_spill] sm:$0xff] }
  0xef   :  { %1438 = vmatpush.bf16.msra.mxu1 %v10976_v49 }
  0xf0   :  { %1451 = vmatpush.bf16.msra.mxu2 %v10977_v52  ;;  %1464 = vmatpush.bf16.msra.mxu3 %v10978_v13  ;;  %v7198_v52 = vpop.f32.mrf.mxu3  ;;  %v10988_v13 = vld [vmem:[#allocation28_spill] sm:$0xff] }
  0xf1   :  { %10987 = vst [vmem:[#allocation147_spill] sm:$0xff] %v7198_v52  ;;  %v10995_v52 = vld [vmem:[#allocation60_spill] sm:$0xff] }
  0xf2   :  { %1426 = vmatpush.bf16.msra.mxu0 %v10979_v9  ;;  %v10997_v9 = vld [vmem:[#allocation62_spill] sm:$0xff] }
  0xf3   :  { %1439 = vmatpush.bf16.msra.mxu1 %v10980_v47  ;;  %v10996_v47 = vld [vmem:[#allocation61_spill] sm:$0xff] }
  0xf4   :  { %1452 = vmatpush.bf16.msra.mxu2 %v10981_v26  ;;  %1465 = vmatpush.bf16.msra.mxu3 %v10982_v58  ;;  %v10989_v58 = vld [vmem:[#allocation56_spill] sm:$0xff]  ;;  %v7210_v26 = vpop.f32.mrf.mxu0 }
  0xf5   :  { %1427 = vmatmul.bf16.vlgmr.msra.gmra.mxu0 %v6711_v54  ;;  %10994 = vst [vmem:[#allocation149_spill] sm:$0xff] %v7210_v26 }
  0xf6   :  { %1471 = vmatpush.bf16.msrb.mxu0 %v10983_v15  ;;  %1440 = vmatmul.bf16.vlgmr.msra.gmra.mxu1 %v6711_v54  ;;  %v10990_v15 = vld [vmem:[#allocation57_spill] sm:$0xff] }
  0xf7   :  { %1484 = vmatpush.bf16.msrb.mxu1 %v10984_v32  ;;  %1453 = vmatmul.bf16.vlgmr.msra.gmra.mxu2 %v6711_v54  ;;  %v10991_v32 = vld [vmem:[#allocation58_spill] sm:$0xff] }
  0xf8   :  { %1497 = vmatpush.bf16.msrb.mxu2 %v10985_v20  ;;  %1510 = vmatpush.bf16.msrb.mxu3 %v10986_v61  ;;  %v10992_v20 = vld [vmem:[#allocation30_spill] sm:$0xff]  ;;  %v7208_v61 = vpop.f32.mrf.mxu1  ;;  %v1209_v49 = vpop.f32.mrf.mxu3 }
  0xf9   :  { %1466 = vmatmul.bf16.vlgmr.msra.gmra.mxu3 %v6711_v54  ;;  %10993 = vst [vmem:[#allocation148_spill] sm:$0xff] %v7208_v61  ;;  %v11003_v61 = vld [vmem:[#allocation39_spill] sm:$0xff] }
  0xfa   :  { %1472 = vmatpush.bf16.msrb.mxu0 %v10988_v13  ;;  %v10998_v13 = vld [vmem:[#allocation35_spill] sm:$0xff] }
  0xfb   :  { %1485 = vmatpush.bf16.msrb.mxu1 %v10989_v58  ;;  %v10999_v58 = vld [vmem:[#allocation64_spill] sm:$0xff]  ;;  %v11007_v49 = vld [vmem:[#allocation43_spill] sm:$0xff] }
  0xfc   :  { %1498 = vmatpush.bf16.msrb.mxu2 %v10990_v15  ;;  %1511 = vmatpush.bf16.msrb.mxu3 %v10991_v32  ;;  %v11000_v15 = vld [vmem:[#allocation65_spill] sm:$0xff]  ;;  %v7218_v32 = vpop.f32.mrf.mxu2  ;;  %v1222_v28 = vpop.f32.mrf.mxu0 }
  0xfd   :  { %11001 = vst [vmem:[#allocation150_spill] sm:$0xff] %v7218_v32  ;;  %v11010_v32 = vld [vmem:[#allocation74_spill] sm:$0xff]  ;;  %v11013_v28 = vld [vmem:[#allocation76_spill] sm:$0xff] }
  0xfe   :  { %1473 = vmatpush.bf16.msrb.mxu0 %v10992_v20  ;;  %v11002_v20 = vld [vmem:[#allocation66_spill] sm:$0xff] }
  0xff   :  { %1486 = vmatpush.bf16.msrb.mxu1 %v10995_v52  ;;  %v11004_v52 = vld [vmem:[#allocation68_spill] sm:$0xff] }
 0x100   :  { %1499 = vmatpush.bf16.msrb.mxu2 %v10996_v47  ;;  %1512 = vmatpush.bf16.msrb.mxu3 %v10997_v9  ;;  %v1235_v26 = vpop.f32.mrf.mxu1  ;;  %v11005_v47 = vld [vmem:[#allocation69_spill] sm:$0xff]  ;;  %v11006_v9 = vld [vmem:[#allocation70_spill] sm:$0xff] }
 0x101   :  { %v11014_v26 = vld [vmem:[#allocation77_spill] sm:$0xff] }
 0x102   :  { %1474 = vmatpush.bf16.msrb.mxu0 %v10998_v13  ;;  %v11008_v13 = vld [vmem:[#allocation72_spill] sm:$0xff] }
 0x103   :  { %1487 = vmatpush.bf16.msrb.mxu1 %v10999_v58  ;;  %v11009_v58 = vld [vmem:[#allocation73_spill] sm:$0xff] }
 0x104   :  { %1500 = vmatpush.bf16.msrb.mxu2 %v11000_v15  ;;  %1513 = vmatpush.bf16.msrb.mxu3 %v11002_v20  ;;  %v1248_v15 = vpop.f32.mrf.mxu2  ;;  %v11011_v20 = vld [vmem:[#allocation47_spill] sm:$0xff] }
 0x105   :  { %v11020_v15 = vld [vmem:[#allocation55_spill] sm:$0xff] }
 0x106   :  { %1475 = vmatpush.bf16.msrb.mxu0 %v11003_v61  ;;  %v7230_v61 = vpop.f32.mrf.mxu3 }
 0x107   :  { %1488 = vmatpush.bf16.msrb.mxu1 %v11004_v52  ;;  %11012 = vst [vmem:[#allocation151_spill] sm:$0xff] %v7230_v61  ;;  %v11023_v61 = vld [vmem:[#allocation86_spill] sm:$0xff]  ;;  %v11041_v52 = vld [vmem:[#allocation100_spill] sm:$0xff] }
 0x108   :  { %1501 = vmatpush.bf16.msrb.mxu2 %v11005_v47  ;;  %1514 = vmatpush.bf16.msrb.mxu3 %v11006_v9  ;;  %v11015_v47 = vld [vmem:[#allocation78_spill] sm:$0xff]  ;;  %v11016_v9 = vld [vmem:[#allocation51_spill] sm:$0xff] }
 0x10a   :  { %1476 = vmatpush.bf16.msrb.mxu0 %v11007_v49  ;;  %v11017_v49 = vld [vmem:[#allocation80_spill] sm:$0xff] }
 0x10b   :  { %1489 = vmatpush.bf16.msrb.mxu1 %v11008_v13  ;;  %v11018_v13 = vld [vmem:[#allocation81_spill] sm:$0xff] }
 0x10c   :  { %1502 = vmatpush.bf16.msrb.mxu2 %v11009_v58  ;;  %1515 = vmatpush.bf16.msrb.mxu3 %v11010_v32  ;;  %v11019_v58 = vld [vmem:[#allocation82_spill] sm:$0xff]  ;;  %v11021_v32 = vld [vmem:[#allocation84_spill] sm:$0xff] }
 0x10e   :  { %1477 = vmatpush.bf16.msrb.mxu0 %v11011_v20  ;;  %v11022_v20 = vld [vmem:[#allocation85_spill] sm:$0xff] }
 0x10f   :  { %1490 = vmatpush.bf16.msrb.mxu1 %v11013_v28  ;;  %v11034_v28 = vld [vmem:[#allocation67_spill] sm:$0xff] }
 0x110   :  { %1503 = vmatpush.bf16.msrb.mxu2 %v11014_v26  ;;  %1516 = vmatpush.bf16.msrb.mxu3 %v11015_v47  ;;  %v1261_v26 = vpop.f32.mrf.mxu3  ;;  %v11024_v47 = vld [vmem:[#allocation59_spill] sm:$0xff] }
 0x111   :  { %v11031_v26 = vld [vmem:[#allocation92_spill] sm:$0xff] }
 0x112   :  { %1478 = vmatpush.bf16.msrb.mxu0 %v11016_v9  ;;  %v11033_v9 = vld [vmem:[#allocation94_spill] sm:$0xff] }
 0x113   :  { %1491 = vmatpush.bf16.msrb.mxu1 %v11017_v49  ;;  %v11032_v49 = vld [vmem:[#allocation93_spill] sm:$0xff] }
 0x114   :  { %1504 = vmatpush.bf16.msrb.mxu2 %v11018_v13  ;;  %1517 = vmatpush.bf16.msrb.mxu3 %v11019_v58  ;;  %v11025_v58 = vld [vmem:[#allocation88_spill] sm:$0xff]  ;;  %v7254_v13 = vpop.f32.mrf.mxu0 }
 0x115   :  { %1479 = vmatmul.bf16.vlgmr.msrb.gmra.mxu0 %v6711_v54  ;;  %11030 = vst [vmem:[#allocation153_spill] sm:$0xff] %v7254_v13 }
 0x116   :  { %1523 = vmatpush.bf16.msra.mxu0 %v11020_v15  ;;  %1492 = vmatmul.bf16.vlgmr.msrb.gmra.mxu1 %v6711_v54  ;;  %v11026_v15 = vld [vmem:[#allocation89_spill] sm:$0xff] }
 0x117   :  { %1536 = vmatpush.bf16.msra.mxu1 %v11021_v32  ;;  %1505 = vmatmul.bf16.vlgmr.msrb.gmra.mxu2 %v6711_v54  ;;  %v11027_v32 = vld [vmem:[#allocation90_spill] sm:$0xff] }
 0x118   :  { %1549 = vmatpush.bf16.msra.mxu2 %v11022_v20  ;;  %1562 = vmatpush.bf16.msra.mxu3 %v11023_v61  ;;  %v11028_v20 = vld [vmem:[#allocation63_spill] sm:$0xff]  ;;  %v7252_v61 = vpop.f32.mrf.mxu1 }
 0x119   :  { %1518 = vmatmul.bf16.vlgmr.msrb.gmra.mxu3 %v6711_v54  ;;  %11029 = vst [vmem:[#allocation152_spill] sm:$0xff] %v7252_v61  ;;  %v11040_v61 = vld [vmem:[#allocation71_spill] sm:$0xff] }
 0x11a   :  { %1524 = vmatpush.bf16.msra.mxu0 %v11024_v47  ;;  %v11035_v47 = vld [vmem:[#allocation96_spill] sm:$0xff] }
 0x11b   :  { %1537 = vmatpush.bf16.msra.mxu1 %v11025_v58  ;;  %v11036_v58 = vld [vmem:[#allocation97_spill] sm:$0xff] }
 0x11c   :  { %1550 = vmatpush.bf16.msra.mxu2 %v11026_v15  ;;  %1563 = vmatpush.bf16.msra.mxu3 %v11027_v32  ;;  %v7262_v15 = vpop.f32.mrf.mxu2  ;;  %v11038_v32 = vld [vmem:[#allocation98_spill] sm:$0xff] }
 0x11d   :  { %11037 = vst [vmem:[#allocation154_spill] sm:$0xff] %v7262_v15 }
 0x11e   :  { %1525 = vmatpush.bf16.msra.mxu0 %v11028_v20  ;;  %v7265_v20 = vpop.f32.mrf.mxu3 }
 0x11f   :  { %1538 = vmatpush.bf16.msra.mxu1 %v11031_v26  ;;  %11039 = vst [vmem:[#allocation155_spill] sm:$0xff] %v7265_v20  ;;  %v1274_v26 = vpop.f32.mrf.mxu0 }
 0x120   :  { %1551 = vmatpush.bf16.msra.mxu2 %v11032_v49  ;;  %1564 = vmatpush.bf16.msra.mxu3 %v11033_v9  ;;  %v1287_v13 = vpop.f32.mrf.mxu1  ;;  %v11042_v49 = vld [vmem:[#allocation101_spill] sm:$0xff]  ;;  %v11043_v9 = vld [vmem:[#allocation102_spill] sm:$0xff] }
 0x121   :  { %v11049_v13 = vld [vmem:[#allocation108_spill] sm:$0xff]  ;;  %v11050_v26 = vld [vmem:[#allocation109_spill] sm:$0xff] }
 0x122   :  { %1526 = vmatpush.bf16.msra.mxu0 %v11034_v28  ;;  %v11044_v28 = vld [vmem:[#allocation75_spill] sm:$0xff] }
 0x123   :  { %1539 = vmatpush.bf16.msra.mxu1 %v11035_v47  ;;  %v11045_v47 = vld [vmem:[#allocation104_spill] sm:$0xff] }
 0x124   :  { %1552 = vmatpush.bf16.msra.mxu2 %v11036_v58  ;;  %1565 = vmatpush.bf16.msra.mxu3 %v11038_v32  ;;  %v11046_v58 = vld [vmem:[#allocation105_spill] sm:$0xff]  ;;  %v1300_v15 = vpop.f32.mrf.mxu2  ;;  %v11047_v32 = vld [vmem:[#allocation106_spill] sm:$0xff] }
 0x125   :  { %v11053_v15 = vld [vmem:[#allocation87_spill] sm:$0xff] }
 0x126   :  { %1527 = vmatpush.bf16.msra.mxu0 %v11040_v61  ;;  %v1313_v20 = vpop.f32.mrf.mxu3 }
 0x127   :  { %1540 = vmatpush.bf16.msra.mxu1 %v11041_v52  ;;  %v11055_v20 = vld [vmem:[#allocation117_spill] sm:$0xff] }
 0x128   :  { %1553 = vmatpush.bf16.msra.mxu2 %v11042_v49  ;;  %1566 = vmatpush.bf16.msra.mxu3 %v11043_v9  ;;  %v11051_v49 = vld [vmem:[#allocation83_spill] sm:$0xff]  ;;  %v11052_v9 = vld [vmem:[#allocation114_spill] sm:$0xff] }
 0x12a   :  { %1528 = vmatpush.bf16.msra.mxu0 %v11044_v28 }
 0x12b   :  { %1541 = vmatpush.bf16.msra.mxu1 %v11045_v47 }
 0x12c   :  { %1554 = vmatpush.bf16.msra.mxu2 %v11046_v58  ;;  %1567 = vmatpush.bf16.msra.mxu3 %v11047_v32  ;;  %v11054_v32 = vld [vmem:[#allocation116_spill] sm:$0xff]  ;;  %v11077_v58 = vld [vmem:[#allocation107_spill] sm:$0xff] }
 0x12e   :  { %1529 = vmatpush.bf16.msra.mxu0 %v11048_v30  ;;  %v11056_v30 = vld [vmem:[#allocation118_spill] sm:$0xff] }
 0x12f   :  { %1542 = vmatpush.bf16.msra.mxu1 %v11049_v13  ;;  %v11067_v13 = vld [vmem:[#allocation99_spill] sm:$0xff] }
 0x130   :  { %1555 = vmatpush.bf16.msra.mxu2 %v11050_v26  ;;  %1568 = vmatpush.bf16.msra.mxu3 %v6970_v35  ;;  %v11057_v35 = vld [vmem:[#allocation91_spill] sm:$0xff] }
 0x132   :  { %1530 = vmatpush.bf16.msra.mxu0 %v11051_v49  ;;  %v11065_v49 = vld [vmem:[#allocation126_spill] sm:$0xff]  ;;  %v7301_v26 = vpop.f32.mrf.mxu0 }
 0x133   :  { %1543 = vmatpush.bf16.msra.mxu1 %v6976_v2  ;;  %v11064_v2 = vld [vmem:[#allocation125_spill] sm:$0xff]  ;;  %11066 = vst [vmem:[#allocation100_spill] sm:$0xff] %v7301_v26  ;;  %v11076_v26 = vld [vmem:[#allocation134_spill] sm:$0xff] }
 0x134   :  { %1556 = vmatpush.bf16.msra.mxu2 %v6980_v0  ;;  %1569 = vmatpush.bf16.msra.mxu3 %v11052_v9  ;;  %v11058_v0 = vld [vmem:[#allocation120_spill] sm:$0xff]  ;;  %v11059_v9 = vld [vmem:[#allocation121_spill] sm:$0xff] }
 0x135   :  { %1531 = vmatmul.bf16.vlgmr.msra.gmra.mxu0 %v6711_v54 }
 0x136   :  { %1575 = vmatpush.bf16.msrb.mxu0 %v11053_v15  ;;  %1544 = vmatmul.bf16.vlgmr.msra.gmra.mxu1 %v6711_v54  ;;  %v11060_v15 = vld [vmem:[#allocation122_spill] sm:$0xff] }
 0x137   :  { %1588 = vmatpush.bf16.msrb.mxu1 %v11054_v32  ;;  %1557 = vmatmul.bf16.vlgmr.msra.gmra.mxu2 %v6711_v54  ;;  %v7295_v32 = vpop.f32.mrf.mxu1 }
 0x138   :  { %1601 = vmatpush.bf16.msrb.mxu2 %v11055_v20  ;;  %1614 = vmatpush.bf16.msrb.mxu3 %v11056_v30  ;;  %11061 = vst [vmem:[#allocation71_spill] sm:$0xff] %v7295_v32  ;;  %v11062_v20 = vld [vmem:[#allocation95_spill] sm:$0xff]  ;;  %v11063_v30 = vld [vmem:[#allocation124_spill] sm:$0xff] }
 0x139   :  { %1570 = vmatmul.bf16.vlgmr.msra.gmra.mxu3 %v6711_v54 }
 0x13a   :  { %1576 = vmatpush.bf16.msrb.mxu0 %v11057_v35  ;;  %v11068_v35 = vld [vmem:[#allocation128_spill] sm:$0xff] }
 0x13b   :  { %1589 = vmatpush.bf16.msrb.mxu1 %v11058_v0  ;;  %v11069_v0 = vld [vmem:[#allocation129_spill] sm:$0xff] }
 0x13c   :  { %1602 = vmatpush.bf16.msrb.mxu2 %v11059_v9  ;;  %1615 = vmatpush.bf16.msrb.mxu3 %v11060_v15  ;;  %v11070_v9 = vld [vmem:[#allocation130_spill] sm:$0xff]  ;;  %v7307_v15 = vpop.f32.mrf.mxu2  ;;  %v7309_v32 = vpop.f32.mrf.mxu3 }
 0x13d   :  { %11071 = vst [vmem:[#allocation75_spill] sm:$0xff] %v7307_v15 }
 0x13e   :  { %1577 = vmatpush.bf16.msrb.mxu0 %v11062_v20  ;;  %11072 = vst [vmem:[#allocation104_spill] sm:$0xff] %v7309_v32 }
 0x13f   :  { %1590 = vmatpush.bf16.msrb.mxu1 %v11063_v30  ;;  %v1339_v20 = vpop.f32.mrf.mxu1  ;;  %v11073_v30 = vld [vmem:[#allocation103_spill] sm:$0xff] }
 0x140   :  { %1603 = vmatpush.bf16.msrb.mxu2 %v11064_v2  ;;  %1616 = vmatpush.bf16.msrb.mxu3 %v11065_v49  ;;  %v11074_v2 = vld [vmem:[#allocation132_spill] sm:$0xff]  ;;  %v11075_v49 = vld [vmem:[#allocation133_spill] sm:$0xff]  ;;  %v11080_v20 = vld [vmem:[#allocation111_spill] sm:$0xff] }
 0x142   :  { %1578 = vmatpush.bf16.msrb.mxu0 %v11067_v13  ;;  %v1326_v13 = vpop.f32.mrf.mxu0 }
 0x143   :  { %1591 = vmatpush.bf16.msrb.mxu1 %v11068_v35  ;;  %v11078_v35 = vld [vmem:[#allocation136_spill] sm:$0xff]  ;;  %v11082_v13 = vld [vmem:[#allocation119_spill] sm:$0xff] }
 0x144   :  { %1604 = vmatpush.bf16.msrb.mxu2 %v11069_v0  ;;  %1617 = vmatpush.bf16.msrb.mxu3 %v11070_v9  ;;  %v11079_v9 = vld [vmem:[#allocation137_spill] sm:$0xff]  ;;  %v1352_v15 = vpop.f32.mrf.mxu2  ;;  %v1365_v32 = vpop.f32.mrf.mxu3 }
 0x145   :  { %v11083_v32 = vld [vmem:[#allocation123_spill] sm:$0xff] }
 0x146   :  { %1579 = vmatpush.bf16.msrb.mxu0 %v11073_v30 }
 0x147   :  { %1592 = vmatpush.bf16.msrb.mxu1 %v11074_v2 }
 0x148   :  { %1605 = vmatpush.bf16.msrb.mxu2 %v11075_v49  ;;  %1618 = vmatpush.bf16.msrb.mxu3 %v11076_v26  ;;  %v11081_v26 = vld [vmem:[#allocation115_spill] sm:$0xff] }
 0x14a   :  { %1580 = vmatpush.bf16.msrb.mxu0 %v11077_v58 }
 0x14b   :  { %1593 = vmatpush.bf16.msrb.mxu1 %v11078_v35 }
 0x14c   :  { %1606 = vmatpush.bf16.msrb.mxu2 %v7056_v63  ;;  %1619 = vmatpush.bf16.msrb.mxu3 %v11079_v9  ;;  %v11087_v9 = vld [vmem:[#allocation135_spill] sm:$0xff] }
 0x14e   :  { %1581 = vmatpush.bf16.msrb.mxu0 %v11080_v20 }
 0x14f   :  { %1594 = vmatpush.bf16.msrb.mxu1 %v7064_v31 }
 0x150   :  { %1607 = vmatpush.bf16.msrb.mxu2 %v7068_v41  ;;  %1620 = vmatpush.bf16.msrb.mxu3 %v7070_v55 }
 0x152   :  { %1582 = vmatpush.bf16.msrb.mxu0 %v11081_v26 }
 0x153   :  { %1595 = vmatpush.bf16.msrb.mxu1 %v7076_v39  ;;  %v7339_v15 = vpop.f32.mrf.mxu1 }
 0x154   :  { %1608 = vmatpush.bf16.msrb.mxu2 %v7080_v24  ;;  %1621 = vmatpush.bf16.msrb.mxu3 %v7082_v50  ;;  %v11086_v50 = vld [vmem:[#allocation131_spill] sm:$0xff] }
 0x155   :  { %1583 = vmatmul.bf16.vlgmr.msrb.gmra.mxu0 %v6711_v54 }
 0x156   :  { %1627 = vmatpush.bf16.msra.mxu0 %v11082_v13  ;;  %1596 = vmatmul.bf16.vlgmr.msrb.gmra.mxu1 %v6711_v54 }
 0x157   :  { %1640 = vmatpush.bf16.msra.mxu1 %v7087_v36  ;;  %1609 = vmatmul.bf16.vlgmr.msrb.gmra.mxu2 %v6711_v54 }
 0x158   :  { %1653 = vmatpush.bf16.msra.mxu2 %v6586_v3  ;;  %1666 = vmatpush.bf16.msra.mxu3 %v6588_v7  ;;  %v11084_v3 = vld [vmem:[#allocation127_spill] sm:$0xff]  ;;  %v7345_v7 = vpop.f32.mrf.mxu0 }
 0x159   :  { %1622 = vmatmul.bf16.vlgmr.msrb.gmra.mxu3 %v6711_v54  ;;  %11085 = vst [vmem:[#allocation129_spill] sm:$0xff] %v7345_v7 }
 0x15a   :  { %1628 = vmatpush.bf16.msra.mxu0 %v11083_v32 }
 0x15b   :  { %1641 = vmatpush.bf16.msra.mxu1 %v7094_v14  ;;  %v1391_v55 = vpop.f32.mrf.mxu1 }
 0x15c   :  { %1654 = vmatpush.bf16.msra.mxu2 %v6597_v16  ;;  %1667 = vmatpush.bf16.msra.mxu3 %v6599_v17  ;;  %v7351_v16 = vpop.f32.mrf.mxu2  ;;  %v7353_v17 = vpop.f32.mrf.mxu3 }
 0x15e   :  { %1629 = vmatpush.bf16.msra.mxu0 %v11084_v3 }
 0x15f   :  { %1642 = vmatpush.bf16.msra.mxu1 %v7103_v48 }
 0x160   :  { %1655 = vmatpush.bf16.msra.mxu2 %v6607_v29  ;;  %1668 = vmatpush.bf16.msra.mxu3 %v6611_v33  ;;  %v1378_v29 = vpop.f32.mrf.mxu0  ;;  %v80_v33 = vunpack.c.l.bf16 %v6733_v53 }
 0x161   :  { %v11101_v29 = vld [vmem:[#allocation21_spill] sm:$0xff] }
 0x162   :  { %1630 = vmatpush.bf16.msra.mxu0 %v11086_v50 }
 0x163   :  { %1643 = vmatpush.bf16.msra.mxu1 %v7110_v1 }
 0x164   :  { %1656 = vmatpush.bf16.msra.mxu2 %v6619_v44  ;;  %1669 = vmatpush.bf16.msra.mxu3 %v6623_v45  ;;  %v1404_v44 = vpop.f32.mrf.mxu2  ;;  %v1417_v45 = vpop.f32.mrf.mxu3 }
 0x165   :  { %v11103_v44 = vld [vmem:[#allocation44_spill] sm:$0xff]  ;;  %v11104_v45 = vld [vmem:[#allocation45_spill] sm:$0xff] }
 0x166   :  { %1631 = vmatpush.bf16.msra.mxu0 %v11087_v9 }
 0x167   :  { %1644 = vmatpush.bf16.msra.mxu1 %v7116_v4 }
 0x168   :  { %1657 = vmatpush.bf16.msra.mxu2 %v6631_v56  ;;  %1670 = vmatpush.bf16.msra.mxu3 %v6635_v57  ;;  %v11088_v56 = vld [vmem:[#allocation34_spill] sm:$0xff] }
 0x169   :  { %v81_v57 = vsub.f32 %v11088_v56, %v80_v33  ;;  %v11102_v33 = vld [vmem:[#allocation22_spill] sm:$0xff]  ;;  %v11105_v56 = vld [vmem:[#allocation23_spill] sm:$0xff] }
 0x16a   :  { %1632 = vmatpush.bf16.msra.mxu0 %v7061_v22 }
 0x16b   :  { %1645 = vmatpush.bf16.msra.mxu1 %v7122_v10 }
 0x16c   :  { %1658 = vmatpush.bf16.msra.mxu2 %v6643_v5  ;;  %1671 = vmatpush.bf16.msra.mxu3 %v6647_v6  ;;  %v7372_v5 = vpack.c.bf16 %v81_v57, %v81_v57  ;;  %v11089_v6 = vld [vmem:[#allocation15_spill] sm:$0xff]  ;;  %v11106_v57 = vld [vmem:[#allocation24_spill] sm:$0xff] }
 0x16e   :  { %1633 = vmatpush.bf16.msra.mxu0 %v7073_v37 }
 0x16f   :  { %1646 = vmatpush.bf16.msra.mxu1 %v7128_v11 }
 0x170   :  { %1659 = vmatpush.bf16.msra.mxu2 %v6655_v23  ;;  %1672 = vmatpush.bf16.msra.mxu3 %v6659_v27  ;;  %v11092_v23 = vld [vmem:[#allocation32_spill] sm:$0xff] }
 0x172   :  { %1634 = vmatpush.bf16.msra.mxu0 %v7085_v62 }
 0x173   :  { %1647 = vmatpush.bf16.msra.mxu1 %v7138_v46 }
 0x174   :  { %1660 = vmatpush.bf16.msra.mxu2 %v6667_v43  ;;  %1673 = vmatpush.bf16.msra.mxu3 %v6671_v51  ;;  %v11093_v51 = vld [vmem:[#allocation17_spill] sm:$0xff] }
 0x175   :  { %1635 = vmatmul.bf16.vlgmr.msra.gmra.mxu0 %v6711_v54 }
 0x176   :  { %1679 = vmatpush.bf16.msrb.mxu0 %v6590_v8  ;;  %1648 = vmatmul.bf16.vlgmr.msra.gmra.mxu1 %v6711_v54  ;;  %v7387_v8 = vpop.f32.mrf.mxu0  ;;  %v11100_v54 = vld [vmem:[#allocation41_spill] sm:$0xff] }
 0x177   :  { %1692 = vmatpush.bf16.msrb.mxu1 %v6593_v12  ;;  %1661 = vmatmul.bf16.vlgmr.msra.gmra.mxu2 %v7372_v5  ;;  %v7390_v12 = vpop.f32.mrf.mxu1 }
 0x178   :  { %1705 = vmatpush.bf16.msrb.mxu2 %v6678_v59  ;;  %1718 = vmatpush.bf16.msrb.mxu3 %v6680_v60  ;;  %v11094_v59 = vld [vmem:[#allocation18_spill] sm:$0xff]  ;;  %v11095_v60 = vld [vmem:[#allocation36_spill] sm:$0xff] }
 0x179   :  { %1674 = vmatmul.bf16.vlgmr.msra.gmra.mxu3 %v7372_v5 }
 0x17a   :  { %1680 = vmatpush.bf16.msrb.mxu0 %v6602_v21  ;;  %v11090_v21 = vld [vmem:[#allocation16_spill] sm:$0xff]  ;;  %v7399_v27 = vpop.f32.mrf.mxu2 }
 0x17b   :  { %1693 = vmatpush.bf16.msrb.mxu1 %v6604_v25  ;;  %v11091_v25 = vld [vmem:[#allocation31_spill] sm:$0xff] }
 0x17c   :  { %1706 = vmatpush.bf16.msrb.mxu2 %v6691_v18  ;;  %1719 = vmatpush.bf16.msrb.mxu3 %v6695_v19  ;;  %v7401_v43 = vpop.f32.mrf.mxu3  ;;  %v11096_v18 = vld [vmem:[#allocation37_spill] sm:$0xff]  ;;  %v11097_v19 = vld [vmem:[#allocation19_spill] sm:$0xff] }
 0x17e   :  { %1681 = vmatpush.bf16.msrb.mxu0 %v6613_v34  ;;  %v1430_v34 = vpop.f32.mrf.mxu0 }
 0x17f   :  { %1694 = vmatpush.bf16.msrb.mxu1 %v6616_v38  ;;  %v1443_v38 = vpop.f32.mrf.mxu1  ;;  %v11111_v34 = vld [vmem:[#allocation52_spill] sm:$0xff] }
 0x180   :  { %1707 = vmatpush.bf16.msrb.mxu2 %v6703_v40  ;;  %1720 = vmatpush.bf16.msrb.mxu3 %v6707_v42  ;;  %v11098_v40 = vld [vmem:[#allocation20_spill] sm:$0xff]  ;;  %v11113_v38 = vld [vmem:[#allocation27_spill] sm:$0xff] }
 0x181   :  { %v11099_v42 = vld [vmem:[#allocation40_spill] sm:$0xff] }
 0x182   :  { %1682 = vmatpush.bf16.msrb.mxu0 %v11089_v6  ;;  %v1456_v53 = vpop.f32.mrf.mxu2  ;;  %v11107_v6 = vld [vmem:[#allocation48_spill] sm:$0xff] }
 0x183   :  { %1695 = vmatpush.bf16.msrb.mxu1 %v11090_v21  ;;  %v11108_v21 = vld [vmem:[#allocation49_spill] sm:$0xff]  ;;  %v11119_v53 = vld [vmem:[#allocation60_spill] sm:$0xff] }
 0x184   :  { %1708 = vmatpush.bf16.msrb.mxu2 %v11091_v25  ;;  %1721 = vmatpush.bf16.msrb.mxu3 %v11092_v23  ;;  %v1469_v55 = vpop.f32.mrf.mxu3  ;;  %v11109_v25 = vld [vmem:[#allocation25_spill] sm:$0xff]  ;;  %v11110_v23 = vld [vmem:[#allocation26_spill] sm:$0xff] }
 0x185   :  { %v11120_v55 = vld [vmem:[#allocation61_spill] sm:$0xff] }
 0x186   :  { %1683 = vmatpush.bf16.msrb.mxu0 %v11093_v51  ;;  %v11112_v51 = vld [vmem:[#allocation53_spill] sm:$0xff] }
 0x187   :  { %1696 = vmatpush.bf16.msrb.mxu1 %v11094_v59  ;;  %v11114_v59 = vld [vmem:[#allocation28_spill] sm:$0xff] }
 0x188   :  { %1709 = vmatpush.bf16.msrb.mxu2 %v11095_v60  ;;  %1722 = vmatpush.bf16.msrb.mxu3 %v11096_v18  ;;  %v11115_v60 = vld [vmem:[#allocation56_spill] sm:$0xff]  ;;  %v11116_v18 = vld [vmem:[#allocation57_spill] sm:$0xff] }
 0x18a   :  { %1684 = vmatpush.bf16.msrb.mxu0 %v11097_v19 }
 0x18b   :  { %1697 = vmatpush.bf16.msrb.mxu1 %v11098_v40  ;;  %v11117_v40 = vld [vmem:[#allocation29_spill] sm:$0xff] }
 0x18c   :  { %1710 = vmatpush.bf16.msrb.mxu2 %v11099_v42  ;;  %1723 = vmatpush.bf16.msrb.mxu3 %v11100_v54  ;;  %v11118_v54 = vld [vmem:[#allocation30_spill] sm:$0xff] }
 0x18e   :  { %1685 = vmatpush.bf16.msrb.mxu0 %v11101_v29  ;;  %v11121_v29 = vld [vmem:[#allocation33_spill] sm:$0xff] }
 0x18f   :  { %1698 = vmatpush.bf16.msrb.mxu1 %v11102_v33  ;;  %v11122_v33 = vld [vmem:[#allocation35_spill] sm:$0xff] }
 0x190   :  { %1711 = vmatpush.bf16.msrb.mxu2 %v11103_v44  ;;  %1724 = vmatpush.bf16.msrb.mxu3 %v11104_v45  ;;  %v11123_v44 = vld [vmem:[#allocation64_spill] sm:$0xff]  ;;  %v11124_v45 = vld [vmem:[#allocation65_spill] sm:$0xff] }
 0x192   :  { %1686 = vmatpush.bf16.msrb.mxu0 %v11105_v56  ;;  %v7431_v19 = vpop.f32.mrf.mxu0 }
 0x193   :  { %1699 = vmatpush.bf16.msrb.mxu1 %v11106_v57  ;;  %v7434_v42 = vpop.f32.mrf.mxu1 }
 0x194   :  { %1712 = vmatpush.bf16.msrb.mxu2 %v11107_v6  ;;  %1725 = vmatpush.bf16.msrb.mxu3 %v11108_v21  ;;  %v11125_v21 = vld [vmem:[#allocation38_spill] sm:$0xff] }
 0x195   :  { %1687 = vmatmul.bf16.vlgmr.msrb.gmra.mxu0 %v7372_v5 }
 0x196   :  { %1731 = vmatpush.bf16.msra.mxu0 %v11109_v25  ;;  %1700 = vmatmul.bf16.vlgmr.msrb.gmra.mxu1 %v7372_v5 }
 0x197   :  { %1744 = vmatpush.bf16.msra.mxu1 %v11110_v23  ;;  %1713 = vmatmul.bf16.vlgmr.msrb.gmra.mxu2 %v7372_v5  ;;  %v11126_v23 = vld [vmem:[#allocation39_spill] sm:$0xff] }
 0x198   :  { %1757 = vmatpush.bf16.msra.mxu2 %v11111_v34  ;;  %1770 = vmatpush.bf16.msra.mxu3 %v11112_v51  ;;  %v11127_v34 = vld [vmem:[#allocation68_spill] sm:$0xff]  ;;  %v11128_v51 = vld [vmem:[#allocation69_spill] sm:$0xff] }
 0x199   :  { %1726 = vmatmul.bf16.vlgmr.msrb.gmra.mxu3 %v7372_v5 }
 0x19a   :  { %1732 = vmatpush.bf16.msra.mxu0 %v11113_v38  ;;  %v7443_v56 = vpop.f32.mrf.mxu2  ;;  %v1482_v6 = vpop.f32.mrf.mxu0  ;;  %v11129_v38 = vld [vmem:[#allocation42_spill] sm:$0xff] }
 0x19b   :  { %1745 = vmatpush.bf16.msra.mxu1 %v11114_v59  ;;  %v1495_v25 = vpop.f32.mrf.mxu1  ;;  %v11130_v59 = vld [vmem:[#allocation43_spill] sm:$0xff]  ;;  %v11139_v6 = vld [vmem:[#allocation80_spill] sm:$0xff] }
 0x19c   :  { %1758 = vmatpush.bf16.msra.mxu2 %v11115_v60  ;;  %1771 = vmatpush.bf16.msra.mxu3 %v11116_v18  ;;  %v7445_v57 = vpop.f32.mrf.mxu3  ;;  %v11131_v60 = vld [vmem:[#allocation72_spill] sm:$0xff]  ;;  %v11132_v18 = vld [vmem:[#allocation73_spill] sm:$0xff]  ;;  %v11141_v25 = vld [vmem:[#allocation54_spill] sm:$0xff] }
 0x19e   :  { %1733 = vmatpush.bf16.msra.mxu0 %v11117_v40 }
 0x19f   :  { %1746 = vmatpush.bf16.msra.mxu1 %v11118_v54 }
 0x1a0   :  { %1759 = vmatpush.bf16.msra.mxu2 %v11119_v53  ;;  %1772 = vmatpush.bf16.msra.mxu3 %v11120_v55  ;;  %v11133_v53 = vld [vmem:[#allocation46_spill] sm:$0xff]  ;;  %v11134_v55 = vld [vmem:[#allocation47_spill] sm:$0xff] }
 0x1a2   :  { %1734 = vmatpush.bf16.msra.mxu0 %v11121_v29  ;;  %v1508_v40 = vpop.f32.mrf.mxu2  ;;  %v11135_v29 = vld [vmem:[#allocation76_spill] sm:$0xff] }
 0x1a3   :  { %1747 = vmatpush.bf16.msra.mxu1 %v11122_v33  ;;  %v11136_v33 = vld [vmem:[#allocation77_spill] sm:$0xff] }
 0x1a4   :  { %1760 = vmatpush.bf16.msra.mxu2 %v11123_v44  ;;  %1773 = vmatpush.bf16.msra.mxu3 %v11124_v45  ;;  %v1521_v54 = vpop.f32.mrf.mxu3  ;;  %v11137_v44 = vld [vmem:[#allocation50_spill] sm:$0xff]  ;;  %v11138_v45 = vld [vmem:[#allocation51_spill] sm:$0xff] }
 0x1a5   :  { %v11149_v54 = vld [vmem:[#allocation62_spill] sm:$0xff] }
 0x1a6   :  { %1735 = vmatpush.bf16.msra.mxu0 %v11125_v21  ;;  %v11140_v21 = vld [vmem:[#allocation81_spill] sm:$0xff] }
 0x1a7   :  { %1748 = vmatpush.bf16.msra.mxu1 %v11126_v23  ;;  %v11142_v23 = vld [vmem:[#allocation55_spill] sm:$0xff] }
 0x1a8   :  { %1761 = vmatpush.bf16.msra.mxu2 %v11127_v34  ;;  %1774 = vmatpush.bf16.msra.mxu3 %v11128_v51  ;;  %v11143_v34 = vld [vmem:[#allocation84_spill] sm:$0xff]  ;;  %v11144_v51 = vld [vmem:[#allocation85_spill] sm:$0xff] }
 0x1aa   :  { %1736 = vmatpush.bf16.msra.mxu0 %v11129_v38  ;;  %v11145_v38 = vld [vmem:[#allocation58_spill] sm:$0xff] }
 0x1ab   :  { %1749 = vmatpush.bf16.msra.mxu1 %v11130_v59  ;;  %v11146_v59 = vld [vmem:[#allocation59_spill] sm:$0xff] }
 0x1ac   :  { %1762 = vmatpush.bf16.msra.mxu2 %v11131_v60  ;;  %1775 = vmatpush.bf16.msra.mxu3 %v11132_v18  ;;  %v11147_v60 = vld [vmem:[#allocation88_spill] sm:$0xff]  ;;  %v11148_v18 = vld [vmem:[#allocation89_spill] sm:$0xff] }
 0x1ae   :  { %1737 = vmatpush.bf16.msra.mxu0 %v11133_v53 }
 0x1af   :  { %1750 = vmatpush.bf16.msra.mxu1 %v11134_v55  ;;  %v11150_v55 = vld [vmem:[#allocation63_spill] sm:$0xff] }
 0x1b0   :  { %1763 = vmatpush.bf16.msra.mxu2 %v11135_v29  ;;  %1776 = vmatpush.bf16.msra.mxu3 %v11136_v33  ;;  %v11151_v29 = vld [vmem:[#allocation92_spill] sm:$0xff]  ;;  %v11152_v33 = vld [vmem:[#allocation93_spill] sm:$0xff] }
 0x1b2   :  { %1738 = vmatpush.bf16.msra.mxu0 %v11137_v44  ;;  %v7475_v40 = vpop.f32.mrf.mxu0  ;;  %v11153_v44 = vld [vmem:[#allocation66_spill] sm:$0xff] }
 0x1b3   :  { %1751 = vmatpush.bf16.msra.mxu1 %v11138_v45  ;;  %v7478_v53 = vpop.f32.mrf.mxu1  ;;  %v11154_v45 = vld [vmem:[#allocation67_spill] sm:$0xff] }
 0x1b4   :  { %1764 = vmatpush.bf16.msra.mxu2 %v11139_v6  ;;  %1777 = vmatpush.bf16.msra.mxu3 %v11140_v21  ;;  %v11155_v6 = vld [vmem:[#allocation96_spill] sm:$0xff]  ;;  %v11156_v21 = vld [vmem:[#allocation97_spill] sm:$0xff] }
 0x1b5   :  { %1739 = vmatmul.bf16.vlgmr.msra.gmra.mxu0 %v7372_v5 }
 0x1b6   :  { %1783 = vmatpush.bf16.msrb.mxu0 %v11141_v25  ;;  %1752 = vmatmul.bf16.vlgmr.msra.gmra.mxu1 %v7372_v5 }
 0x1b7   :  { %1796 = vmatpush.bf16.msrb.mxu1 %v11142_v23  ;;  %1765 = vmatmul.bf16.vlgmr.msra.gmra.mxu2 %v7372_v5 }
 0x1b8   :  { %1809 = vmatpush.bf16.msrb.mxu2 %v11143_v34  ;;  %1822 = vmatpush.bf16.msrb.mxu3 %v11144_v51  ;;  %v11157_v51 = vld [vmem:[#allocation70_spill] sm:$0xff] }
 0x1b9   :  { %1778 = vmatmul.bf16.vlgmr.msra.gmra.mxu3 %v7372_v5 }
 0x1ba   :  { %1784 = vmatpush.bf16.msrb.mxu0 %v11145_v38  ;;  %v7487_v25 = vpop.f32.mrf.mxu2  ;;  %v1534_v34 = vpop.f32.mrf.mxu0 }
 0x1bb   :  { %1797 = vmatpush.bf16.msrb.mxu1 %v11146_v59  ;;  %v1547_v38 = vpop.f32.mrf.mxu1  ;;  %v11158_v59 = vld [vmem:[#allocation101_spill] sm:$0xff]  ;;  %v11171_v34 = vld [vmem:[#allocation116_spill] sm:$0xff] }
 0x1bc   :  { %1810 = vmatpush.bf16.msrb.mxu2 %v11147_v60  ;;  %1823 = vmatpush.bf16.msrb.mxu3 %v11148_v18  ;;  %v7489_v23 = vpop.f32.mrf.mxu3  ;;  %v11159_v60 = vld [vmem:[#allocation74_spill] sm:$0xff]  ;;  %v11160_v18 = vld [vmem:[#allocation105_spill] sm:$0xff] }
 0x1bd   :  { %v11173_v38 = vld [vmem:[#allocation90_spill] sm:$0xff] }
 0x1be   :  { %1785 = vmatpush.bf16.msrb.mxu0 %v11149_v54 }
 0x1bf   :  { %1798 = vmatpush.bf16.msrb.mxu1 %v11150_v55 }
 0x1c0   :  { %1811 = vmatpush.bf16.msrb.mxu2 %v11151_v29  ;;  %1824 = vmatpush.bf16.msrb.mxu3 %v11152_v33  ;;  %v11161_v29 = vld [vmem:[#allocation78_spill] sm:$0xff]  ;;  %v11162_v33 = vld [vmem:[#allocation79_spill] sm:$0xff] }
 0x1c2   :  { %1786 = vmatpush.bf16.msrb.mxu0 %v11153_v44  ;;  %v1560_v54 = vpop.f32.mrf.mxu2  ;;  %v11163_v44 = vld [vmem:[#allocation108_spill] sm:$0xff] }
 0x1c3   :  { %1799 = vmatpush.bf16.msrb.mxu1 %v11154_v45  ;;  %v11166_v45 = vld [vmem:[#allocation83_spill] sm:$0xff] }
 0x1c4   :  { %1812 = vmatpush.bf16.msrb.mxu2 %v11155_v6  ;;  %1825 = vmatpush.bf16.msrb.mxu3 %v11156_v21  ;;  %v1573_v55 = vpop.f32.mrf.mxu3  ;;  %v11167_v6 = vld [vmem:[#allocation112_spill] sm:$0xff]  ;;  %v11170_v21 = vld [vmem:[#allocation87_spill] sm:$0xff] }
 0x1c5   :  { %v11177_v55 = vld [vmem:[#allocation94_spill] sm:$0xff] }
 0x1c6   :  { %1787 = vmatpush.bf16.msrb.mxu0 %v11157_v51  ;;  %v11172_v51 = vld [vmem:[#allocation117_spill] sm:$0xff] }
 0x1c7   :  { %1800 = vmatpush.bf16.msrb.mxu1 %v11040_v61  ;;  %v11164_v61 = vld [vmem:[#allocation109_spill] sm:$0xff] }
 0x1c8   :  { %1813 = vmatpush.bf16.msrb.mxu2 %v11041_v52  ;;  %1826 = vmatpush.bf16.msrb.mxu3 %v11158_v59  ;;  %v11165_v52 = vld [vmem:[#allocation82_spill] sm:$0xff]  ;;  %v11174_v59 = vld [vmem:[#allocation91_spill] sm:$0xff] }
 0x1ca   :  { %1788 = vmatpush.bf16.msrb.mxu0 %v11159_v60  ;;  %v11175_v60 = vld [vmem:[#allocation120_spill] sm:$0xff] }
 0x1cb   :  { %1801 = vmatpush.bf16.msrb.mxu1 %v11044_v28  ;;  %v11168_v28 = vld [vmem:[#allocation113_spill] sm:$0xff] }
 0x1cc   :  { %1814 = vmatpush.bf16.msrb.mxu2 %v11045_v47  ;;  %1827 = vmatpush.bf16.msrb.mxu3 %v11160_v18  ;;  %v11169_v47 = vld [vmem:[#allocation86_spill] sm:$0xff]  ;;  %v11176_v18 = vld [vmem:[#allocation121_spill] sm:$0xff] }
 0x1ce   :  { %1789 = vmatpush.bf16.msrb.mxu0 %v11161_v29 }
 0x1cf   :  { %1802 = vmatpush.bf16.msrb.mxu1 %v11162_v33  ;;  %v11178_v33 = vld [vmem:[#allocation95_spill] sm:$0xff] }
 0x1d0   :  { %1815 = vmatpush.bf16.msrb.mxu2 %v11163_v44  ;;  %1828 = vmatpush.bf16.msrb.mxu3 %v11164_v61  ;;  %v11179_v44 = vld [vmem:[#allocation124_spill] sm:$0xff]  ;;  %v11180_v61 = vld [vmem:[#allocation125_spill] sm:$0xff] }
 0x1d2   :  { %1790 = vmatpush.bf16.msrb.mxu0 %v11165_v52  ;;  %v7519_v54 = vpop.f32.mrf.mxu0  ;;  %v11181_v52 = vld [vmem:[#allocation98_spill] sm:$0xff] }
 0x1d3   :  { %1803 = vmatpush.bf16.msrb.mxu1 %v11166_v45  ;;  %v7522_v29 = vpop.f32.mrf.mxu1  ;;  %v11182_v45 = vld [vmem:[#allocation99_spill] sm:$0xff] }
 0x1d4   :  { %1816 = vmatpush.bf16.msrb.mxu2 %v11167_v6  ;;  %1829 = vmatpush.bf16.msrb.mxu3 %v11168_v28  ;;  %v11183_v6 = vld [vmem:[#allocation128_spill] sm:$0xff] }
 0x1d5   :  { %1791 = vmatmul.bf16.vlgmr.msrb.gmra.mxu0 %v7372_v5 }
 0x1d6   :  { %1835 = vmatpush.bf16.msra.mxu0 %v11169_v47  ;;  %1804 = vmatmul.bf16.vlgmr.msrb.gmra.mxu1 %v7372_v5 }
 0x1d7   :  { %1848 = vmatpush.bf16.msra.mxu1 %v11170_v21  ;;  %1817 = vmatmul.bf16.vlgmr.msrb.gmra.mxu2 %v7372_v5 }
 0x1d8   :  { %1861 = vmatpush.bf16.msra.mxu2 %v11171_v34  ;;  %1874 = vmatpush.bf16.msra.mxu3 %v11172_v51  ;;  %v11186_v34 = vld [vmem:[#allocation102_spill] sm:$0xff] }
 0x1d9   :  { %1830 = vmatmul.bf16.vlgmr.msrb.gmra.mxu3 %v7372_v5 }
 0x1da   :  { %1836 = vmatpush.bf16.msra.mxu0 %v11173_v38  ;;  %v7531_v28 = vpop.f32.mrf.mxu2  ;;  %v1586_v21 = vpop.f32.mrf.mxu0  ;;  %v11187_v38 = vld [vmem:[#allocation106_spill] sm:$0xff] }
 0x1db   :  { %1849 = vmatpush.bf16.msra.mxu1 %v11174_v59  ;;  %11184 = vst [vmem:[#allocation103_spill] sm:$0xff] %v7531_v28  ;;  %v1599_v51 = vpop.f32.mrf.mxu1 }
 0x1dc   :  { %1862 = vmatpush.bf16.msra.mxu2 %v11175_v60  ;;  %1875 = vmatpush.bf16.msra.mxu3 %v11176_v18  ;;  %v7533_v47 = vpop.f32.mrf.mxu3  ;;  %v11188_v60 = vld [vmem:[#allocation110_spill] sm:$0xff] }
 0x1dd   :  { %11185 = vst [vmem:[#allocation132_spill] sm:$0xff] %v7533_v47  ;;  %v11200_v51 = vld [vmem:[#allocation138_spill] sm:$0xff] }
 0x1de   :  { %1837 = vmatpush.bf16.msra.mxu0 %v11177_v55 }
 0x1df   :  { %1850 = vmatpush.bf16.msra.mxu1 %v11178_v33 }
 0x1e0   :  { %1863 = vmatpush.bf16.msra.mxu2 %v11179_v44  ;;  %1876 = vmatpush.bf16.msra.mxu3 %v11180_v61  ;;  %v11199_v44 = vld [vmem:[#allocation137_spill] sm:$0xff] }
 0x1e2   :  { %1838 = vmatpush.bf16.msra.mxu0 %v11181_v52 }
 0x1e3   :  { %1851 = vmatpush.bf16.msra.mxu1 %v11182_v45 }
 0x1e4   :  { %1864 = vmatpush.bf16.msra.mxu2 %v11183_v6  ;;  %1877 = vmatpush.bf16.msra.mxu3 %v11069_v0  ;;  %v1612_v0 = vpop.f32.mrf.mxu2  ;;  %v1625_v59 = vpop.f32.mrf.mxu3 }
 0x1e6   :  { %1839 = vmatpush.bf16.msra.mxu0 %v11186_v34 }
 0x1e7   :  { %1852 = vmatpush.bf16.msra.mxu1 %v11073_v30 }
 0x1e8   :  { %1865 = vmatpush.bf16.msra.mxu2 %v11074_v2  ;;  %1878 = vmatpush.bf16.msra.mxu3 %v11075_v49  ;;  %v11189_v2 = vld [vmem:[#allocation114_spill] sm:$0xff] }
 0x1ea   :  { %1840 = vmatpush.bf16.msra.mxu0 %v11187_v38 }
 0x1eb   :  { %1853 = vmatpush.bf16.msra.mxu1 %v11077_v58  ;;  %v11190_v58 = vld [vmem:[#allocation118_spill] sm:$0xff] }
 0x1ec   :  { %1866 = vmatpush.bf16.msra.mxu2 %v11078_v35  ;;  %1879 = vmatpush.bf16.msra.mxu3 %v7056_v63  ;;  %v11191_v35 = vld [vmem:[#allocation122_spill] sm:$0xff] }
 0x1ed   :  { %v11193_v63 = vld [vmem:[#allocation126_spill] sm:$0xff] }
 0x1ee   :  { %1841 = vmatpush.bf16.msra.mxu0 %v11188_v60 }
 0x1ef   :  { %1854 = vmatpush.bf16.msra.mxu1 %v11080_v20 }
 0x1f0   :  { %1867 = vmatpush.bf16.msra.mxu2 %v7064_v31  ;;  %1880 = vmatpush.bf16.msra.mxu3 %v7068_v41  ;;  %v11195_v41 = vld [vmem:[#allocation130_spill] sm:$0xff] }
 0x1f2   :  { %1842 = vmatpush.bf16.msra.mxu0 %v11189_v2  ;;  %v7561_v31 = vpop.f32.mrf.mxu0 }
 0x1f3   :  { %1855 = vmatpush.bf16.msra.mxu1 %v11081_v26  ;;  %11192 = vst [vmem:[#allocation133_spill] sm:$0xff] %v7561_v31 }
 0x1f4   :  { %1868 = vmatpush.bf16.msra.mxu2 %v7076_v39  ;;  %1881 = vmatpush.bf16.msra.mxu3 %v7080_v24  ;;  %v7564_v39 = vpop.f32.mrf.mxu1  ;;  %v11196_v24 = vld [vmem:[#allocation141_spill] sm:$0xff] }
 0x1f5   :  { %1843 = vmatmul.bf16.vlgmr.msra.gmra.mxu0 %v7372_v5  ;;  %11194 = vst [vmem:[#allocation107_spill] sm:$0xff] %v7564_v39 }
 0x1f6   :  { %1887 = vmatpush.bf16.msrb.mxu0 %v11190_v58  ;;  %1856 = vmatmul.bf16.vlgmr.msra.gmra.mxu1 %v7372_v5  ;;  %v11202_v58 = vld [vmem:[#allocation139_spill] sm:$0xff] }
 0x1f7   :  { %1900 = vmatpush.bf16.msrb.mxu1 %v11082_v13  ;;  %1869 = vmatmul.bf16.vlgmr.msra.gmra.mxu2 %v7372_v5 }
 0x1f8   :  { %1913 = vmatpush.bf16.msrb.mxu2 %v7087_v36  ;;  %1882 = vmatmul.bf16.vlgmr.msra.gmra.mxu3 %v7372_v5  ;;  %v1390_v36 = vadd.f32 %v7339_v15, %v11196_v24 }
 0x1fa   :  { %1888 = vmatpush.bf16.msrb.mxu0 %v11191_v35  ;;  %v1662_v49 = vpop.f32.mrf.mxu2  ;;  %v1638_v13 = vpop.f32.mrf.mxu0 }
 0x1fb   :  { %1901 = vmatpush.bf16.msrb.mxu1 %v11083_v32  ;;  %v7575_v26 = vadd.f32 %v1662_v49, %v1390_v36  ;;  %v11198_v32 = vld [vmem:[#allocation134_spill] sm:$0xff]  ;;  %v10812_v36 = vmov 2475754826  }
 0x1fc   :  { %1914 = vmatpush.bf16.msrb.mxu2 %v7094_v14  ;;  %v11197_v14 = vld [vmem:[#allocation140_spill] sm:$0xff]  ;;  %v1675_v20 = vpop.f32.mrf.mxu3 }
 0x1fd   :  { %v1403_v30 = vadd.f32 %v7351_v16, %v11197_v14 }
 0x1fe   :  { %1889 = vmatpush.bf16.msrb.mxu0 %v11193_v63 }
 0x1ff   :  { %1902 = vmatpush.bf16.msrb.mxu1 %v11084_v3  ;;  %v1651_v3 = vpop.f32.mrf.mxu1 }
 0x200   :  { %1915 = vmatpush.bf16.msrb.mxu2 %v7103_v48  ;;  %v7578_v48 = vadd.f32 %v1675_v20, %v1403_v30  ;;  %v10815_v30 = vmov 2131351028   ;;  %v10820_v3 = vmov 920167782  }
 0x202   :  { %1890 = vmatpush.bf16.msrb.mxu0 %v11195_v41  ;;  %v10811_v15 = vand.u32 2147483647, %v7578_v48  ;;  %v2105_v16 = vand.u32 2139095040, %v7578_v48  ;;  %v1664_v45 = vpop.f32.mrf.mxu2 }
 0x203   :  { %1903 = vmatpush.bf16.msrb.mxu1 %v11086_v50  ;;  %v10814_v50 = vand.u32 2147483647, %v7575_v26 }
 0x204   :  { %1916 = vmatpush.bf16.msrb.mxu2 %v7110_v1  ;;  %v1950_v1 = vand.u32 2139095040, %v7575_v26  ;;  %v2106_v33 = vshrl.u32 %v2105_v16, 23  ;;  %v1677_v21 = vpop.f32.mrf.mxu3 }
 0x205   :  { %v1954_v55 = vand.u32 8388607, %v10814_v50 }
 0x206   :  { %1891 = vmatpush.bf16.msrb.mxu0 %v11198_v32  ;;  %v1951_v18 = vshrl.u32 %v1950_v1, 23  ;;  %v10822_v32 = vmov 2102212464  }
 0x207   :  { %1904 = vmatpush.bf16.msrb.mxu1 %v11087_v9  ;;  %v1955_v52 = vor.u32 8388608, %v1954_v55  ;;  %v2109_v9 = vand.u32 8388607, %v10811_v15 }
 0x208   :  { %1917 = vmatpush.bf16.msrb.mxu2 %v7116_v4  ;;  %v6162_v61 = vadd.s32 4294967169, %v1951_v18  ;;  %v6165_v4 = vadd.s32 4294967169, %v2106_v33  ;;  %v10818_v18 = vmov 1326507024  }
 0x209   :  { %v7594_v38 = vshll.u32 %v1955_v52, 8  ;;  %v2110_v0 = vor.u32 8388608, %v2109_v9 }
 0x20a   :  { %1892 = vmatpush.bf16.msrb.mxu0 %v11199_v44  ;;  %v1957_v6 = vadd.s32 1, %v6162_v61  ;;  %v2112_v34 = vadd.s32 1, %v6165_v4 }
 0x20b   :  { %1905 = vmatpush.bf16.msrb.mxu1 %v7061_v22  ;;  %v7604_v63 = vand.u32 65535, %v7594_v38  ;;  %v7608_v24 = vshll.u32 %v2110_v0, 8  ;;  %v1997_v33 = vshrl.u32 %v7594_v38, 16 }
 0x20c   :  { %1918 = vmatpush.bf16.msrb.mxu2 %v7122_v10  ;;  %vm1958_vm0 = vcmp.gt.s32.totalorder %v1957_v6, 0  ;;  %vm2113_vm1 = vcmp.gt.s32.totalorder %v2112_v34, 0  ;;  %v11201_v10 = vld [vmem:[#allocation142_spill] sm:$0xff] }
 0x20d   :  { %v1959_v59 = vsel %vm1958_vm0, %v1957_v6, 0  ;;  %v2114_v60 = vsel %vm2113_vm1, %v2112_v34, 0  ;;  %v7600_v2 = vadd.f32 %v7353_v17, %v11201_v10 }
 0x20e   :  { %1893 = vmatpush.bf16.msrb.mxu0 %v11200_v51  ;;  %v1961_v22 = vand.u32 31, %v1959_v59  ;;  %v7606_v41 = vand.u32 31, %v2114_v60 }
 0x20f   :  { %1906 = vmatpush.bf16.msrb.mxu1 %v7073_v37  ;;  %v7612_v37 = vshrl.u32 %v1959_v59, 5 }
 0x210   :  { %1919 = vmatpush.bf16.msrb.mxu2 %v7128_v11  ;;  %v1962_v35 = vsub.s32 32, %v1961_v22  ;;  %v10824_v11 = vmov 683565275   ;;  %v1967_v14 = vshll.u32 %v10812_v36, %v1961_v22  ;;  %v1970_v49 = vshll.u32 %v10815_v30, %v1961_v22 }
 0x211   :  { %v1964_v17 = vshll.u32 %v10824_v11, %v1961_v22  ;;  %v1976_v16 = vshll.u32 %v10820_v3, %v1961_v22  ;;  %v7629_v9 = vsub.s32 32, %v7606_v41  ;;  %vm1979_vm2 = vcmp.lt.s32.totalorder %v7612_v37, 1 }
 0x212   :  { %1894 = vmatpush.bf16.msrb.mxu0 %v11202_v58  ;;  %v1965_v20 = vshrl.u32 %v10812_v36, %v1962_v35  ;;  %v1968_v13 = vshrl.u32 %v10815_v30, %v1962_v35  ;;  %v1974_v1 = vshrl.u32 %v10820_v3, %v1962_v35  ;;  %v1977_v55 = vshrl.u32 %v10818_v18, %v1962_v35 }
 0x213   :  { %1907 = vmatpush.bf16.msrb.mxu1 %v7085_v62  ;;  %v1971_v62 = vshrl.u32 %v10822_v32, %v1962_v35  ;;  %vm1980_vm3 = vcmp.lt.s32.totalorder %v7612_v37, 2  ;;  %v1963_v6 = vshrl.u32 %v10824_v11, %v1962_v35  ;;  %vm1982_vm4 = vcmp.lt.s32.totalorder %v7612_v37, 4  ;;  %v7648_v35 = vpop.f32.mrf.mxu0 }
 0x214   :  { %1920 = vmatpush.bf16.msrb.mxu2 %v7138_v46  ;;  %v1973_v46 = vshll.u32 %v10822_v32, %v1961_v22  ;;  %v1966_v44 = vor.u32 %v1965_v20, %v1964_v17  ;;  %v1969_v61 = vor.u32 %v1968_v13, %v1967_v14  ;;  %v1978_v45 = vor.u32 %v1977_v55, %v1976_v16 }
 0x215   :  { %1895 = vmatmul.bf16.vlgmr.msrb.gmra.mxu0 %v7372_v5  ;;  %v1972_v52 = vor.u32 %v1971_v62, %v1970_v49  ;;  %vm1981_vm5 = vcmp.lt.s32.totalorder %v7612_v37, 3  ;;  %v2119_v0 = vshll.u32 %v10824_v11, %v7606_v41  ;;  %v2120_v58 = vshrl.u32 %v10812_v36, %v7629_v9 }
 0x216   :  { %1908 = vmatmul.bf16.vlgmr.msrb.gmra.mxu1 %v7372_v5  ;;  %v1975_v4 = vor.u32 %v1974_v1, %v1973_v46  ;;  %v1987_v21 = vsel %vm1979_vm2, %v1966_v44, %v1969_v61  ;;  %v1992_v51 = vsel %vm1982_vm4, %v1978_v45, 1326507024  ;;  %v2122_v49 = vshll.u32 %v10812_v36, %v7606_v41 }
 0x217   :  { %1921 = vmatmul.bf16.vlgmr.msrb.gmra.mxu2 %v7372_v5  ;;  %v1991_v5 = vsel %vm1979_vm2, %v1969_v61, %v1972_v52  ;;  %v1984_v59 = vsel %vm1982_vm4, %v1972_v52, 2102212464  ;;  %v2123_v20 = vshrl.u32 %v10815_v30, %v7629_v9  ;;  %v1983_v16 = vsel %vm1979_vm2, %v1963_v6, %v1966_v44 }
 0x218   :  { %v1988_v34 = vsel %vm1982_vm4, %v1975_v4, 920167782  ;;  %v1993_v10 = vsel %vm1981_vm5, %v1975_v4, %v1992_v51  ;;  %v1985_v55 = vsel %vm1981_vm5, %v1969_v61, %v1984_v59  ;;  %v7664_v4 = vor.u32 %v2120_v58, %v2119_v0 }
 0x219   :  { %v1989_v22 = vsel %vm1981_vm5, %v1972_v52, %v1988_v34  ;;  %v1994_v14 = vsel %vm1980_vm3, %v1991_v5, %v1993_v10  ;;  %v7662_v52 = vshrl.u32 %v2114_v60, 5  ;;  %v7667_v5 = vor.u32 %v2123_v20, %v2122_v49 }
 0x21a   :  { %v1990_v17 = vsel %vm1980_vm3, %v1987_v21, %v1989_v22  ;;  %v1998_v13 = vand.u32 65535, %v1994_v14  ;;  %v1999_v62 = vshrl.u32 %v1994_v14, 16  ;;  %v2126_v34 = vshrl.u32 %v10822_v32, %v7629_v9 }
 0x21b   :  { %v2020_v46 = vand.u32 65535, %v1990_v17  ;;  %v2021_v1 = vshrl.u32 %v1990_v17, 16  ;;  %v2125_v61 = vshll.u32 %v10815_v30, %v7606_v41  ;;  %v10826_v36 = vmov 0  }
 0x21c   :  { %v2001_v45 = vmul.u32 %v1999_v62, %v7604_v63  ;;  %v2002_v21 = vmul.u32 %v1998_v13, %v1997_v33  ;;  %v2000_v51 = vmul.u32 %v1998_v13, %v7604_v63  ;;  %v2003_v60 = vmul.u32 %v1999_v62, %v1997_v33  ;;  %v1690_v13 = vpop.f32.mrf.mxu0 }
 0x21d   :  { %v2023_v22 = vmul.u32 %v2021_v1, %v7604_v63  ;;  %v2024_v44 = vmul.u32 %v2020_v46, %v1997_v33  ;;  %v2022_v0 = vmul.u32 %v2020_v46, %v7604_v63  ;;  %v2025_v59 = vmul.u32 %v2021_v1, %v1997_v33 }
 0x21e   :  { %v2004_v6 = vshll.u32 %v2001_v45, 16  ;;  %v2005_v10 = vshrl.u32 %v2001_v45, 16  ;;  %v2006_v58 = vshll.u32 %v2002_v21, 16  ;;  %v2007_v17 = vshrl.u32 %v2002_v21, 16 }
 0x21f   :  { %v2026_v14 = vshll.u32 %v2023_v22, 16  ;;  %v2028_v20 = vshll.u32 %v2024_v44, 16  ;;  %v7676_v15 = vor.u32 %v2126_v34, %v2125_v61  ;;  %v2129_v62 = vshrl.u32 %v10820_v3, %v7629_v9 }
 0x220   :  { %vm2008_vm6 = vc.u32 %v2000_v51, %v2004_v6  ;;  %v2010_v49 = vadd.s32 %v2004_v6, %v2000_v51  ;;  %v2128_v46 = vshll.u32 %v10822_v32, %v7606_v41  ;;  %v2131_v21 = vshll.u32 %v10820_v3, %v7606_v41 }
 0x221   :  { %v2009_v50 = vsel %vm2008_vm6, 1, %v10826_v36  ;;  %vm2030_vm7 = vc.u32 %v2022_v0, %v2026_v14  ;;  %v2032_v30 = vadd.s32 %v2026_v14, %v2022_v0  ;;  %v2029_v6 = vshrl.u32 %v2024_v44, 16 }
 0x222   :  { %v2011_v63 = vadd.s32 %v2009_v50, %v2003_v60  ;;  %vm2012_vm8 = vc.u32 %v2010_v49, %v2006_v58  ;;  %v2031_v33 = vsel %vm2030_vm7, 1, %v10826_v36  ;;  %v2130_v61 = vor.u32 %v2129_v62, %v2128_v46 }
 0x223   :  { %v2013_v1 = vsel %vm2012_vm8, 1, %v10826_v36  ;;  %v2033_v45 = vadd.s32 %v2031_v33, %v2025_v59  ;;  %vm2034_vm9 = vc.u32 %v2032_v30, %v2028_v20  ;;  %v2132_v50 = vshrl.u32 %v10818_v18, %v7629_v9 }
 0x224   :  { %v2015_v34 = vadd.s32 %v2013_v1, %v2011_v63  ;;  %v2035_v51 = vsel %vm2034_vm9, 1, %v10826_v36  ;;  %v2027_v60 = vshrl.u32 %v2023_v22, 16  ;;  %v7690_v0 = vadd.s32 %v2032_v30, %v2028_v20 }
 0x225   :  { %v2037_v58 = vadd.s32 %v2035_v51, %v2033_v45  ;;  %v2133_v49 = vor.u32 %v2132_v50, %v2131_v21  ;;  %vm2134_vm10 = vcmp.lt.s32.totalorder %v7662_v52, 1  ;;  %vm2137_vm11 = vcmp.lt.s32.totalorder %v7662_v52, 4 }
 0x226   :  { %v2016_v14 = vadd.s32 %v2015_v34, %v2005_v10  ;;  %vm2136_vm12 = vcmp.lt.s32.totalorder %v7662_v52, 3  ;;  %v2142_v41 = vsel %vm2134_vm10, %v7664_v4, %v7667_v5  ;;  %v2143_v22 = vsel %vm2137_vm11, %v2130_v61, 920167782 }
 0x227   :  { %v2038_v59 = vadd.s32 %v2037_v58, %v2027_v60  ;;  %vm2135_vm13 = vcmp.lt.s32.totalorder %v7662_v52, 2  ;;  %v2144_v44 = vsel %vm2136_vm12, %v7676_v15, %v2143_v22  ;;  %v2146_v10 = vsel %vm2134_vm10, %v7667_v5, %v7676_v15 }
 0x228   :  { %v7701_v30 = vadd.s32 %v2016_v14, %v2007_v17  ;;  %v1986_v20 = vsel %vm1980_vm3, %v1983_v16, %v1985_v55  ;;  %v2145_v62 = vsel %vm2135_vm13, %v2142_v41, %v2144_v44  ;;  %v2147_v17 = vsel %vm2137_vm11, %v2133_v49, 1326507024 }
 0x229   :  { %v2039_v13 = vadd.s32 %v2038_v59, %v2029_v6  ;;  %v2148_v63 = vsel %vm2136_vm12, %v2130_v61, %v2147_v17  ;;  %v2151_v33 = vand.u32 65535, %v7608_v24  ;;  %v2175_v46 = vand.u32 65535, %v2145_v62  ;;  %v7730_v6 = vpop.f32.mrf.mxu1 }
 0x22a   :  { %vm2042_vm14 = vc.u32 %v7701_v30, %v7690_v0  ;;  %v2149_v37 = vsel %vm2135_vm13, %v2146_v10, %v2148_v63  ;;  %v2152_v16 = vshrl.u32 %v7608_v24, 16  ;;  %v2176_v55 = vshrl.u32 %v2145_v62, 16 }
 0x22b   :  { %v2043_v1 = vadd.s32 1, %v2039_v13  ;;  %v2040_v45 = vmul.u32 %v7594_v38, %v1986_v20  ;;  %v2153_v21 = vand.u32 65535, %v2149_v37  ;;  %v2154_v34 = vshrl.u32 %v2149_v37, 16 }
 0x22c   :  { %v2178_v50 = vmul.u32 %v2176_v55, %v2151_v33  ;;  %v2179_v60 = vmul.u32 %v2175_v46, %v2152_v16  ;;  %v7728_v61 = vadd.f32 %v7648_v35, %v7600_v2  ;;  %v2177_v59 = vmul.u32 %v2175_v46, %v2151_v33 }
 0x22d   :  { %v2044_v51 = vsel %vm2042_vm14, %v2043_v1, %v2039_v13  ;;  %v2156_v14 = vmul.u32 %v2154_v34, %v2151_v33  ;;  %v2157_v49 = vmul.u32 %v2153_v21, %v2152_v16  ;;  %v2180_v41 = vmul.u32 %v2176_v55, %v2152_v16 }
 0x22e   :  { %v2045_v58 = vadd.s32 %v2044_v51, %v2040_v45  ;;  %v2181_v22 = vshll.u32 %v2178_v50, 16  ;;  %v2155_v10 = vmul.u32 %v2153_v21, %v2151_v33  ;;  %v2158_v38 = vmul.u32 %v2154_v34, %v2152_v16 }
 0x22f   :  { %v2159_v20 = vshll.u32 %v2156_v14, 16  ;;  %v2161_v62 = vshll.u32 %v2157_v49, 16  ;;  %v2183_v13 = vshll.u32 %v2179_v60, 16  ;;  %v2118_v1 = vshrl.u32 %v10824_v11, %v7629_v9 }
 0x230   :  { %v2046_v44 = vadd.s32 536870912, %v2045_v58  ;;  %vm2185_vm15 = vc.u32 %v2177_v59, %v2181_v22  ;;  %v2187_v17 = vadd.s32 %v2181_v22, %v2177_v59  ;;  %v2139_v33 = vsel %vm2137_vm11, %v7676_v15, 2102212464 }
 0x231   :  { %vm2163_vm0 = vc.u32 %v2155_v10, %v2159_v20  ;;  %v2165_v2 = vadd.s32 %v2159_v20, %v2155_v10  ;;  %v2186_v35 = vsel %vm2185_vm15, 1, %v10826_v36  ;;  %v2138_v45 = vsel %vm2134_vm10, %v2118_v1, %v7664_v4  ;;  %v1703_v9 = vpop.f32.mrf.mxu1 }
 0x232   :  { %v2047_v63 = vshrl.u32 %v2046_v44, 30  ;;  %v2164_v46 = vsel %vm2163_vm0, 1, %v10826_v36  ;;  %v2188_v37 = vadd.s32 %v2186_v35, %v2180_v41  ;;  %vm2189_vm1 = vc.u32 %v2187_v17, %v2183_v13 }
 0x233   :  { %v2166_v16 = vadd.s32 %v2164_v46, %v2158_v38  ;;  %vm2167_vm2 = vc.u32 %v2165_v2, %v2161_v62  ;;  %v2190_v34 = vsel %vm2189_vm1, 1, %v10826_v36  ;;  %v2160_v59 = vshrl.u32 %v2156_v14, 16 }
 0x234   :  { %v2048_v55 = vshll.u32 %v2047_v63, 30  ;;  %v2168_v21 = vsel %vm2167_vm2, 1, %v10826_v36  ;;  %v2192_v22 = vadd.s32 %v2190_v34, %v2188_v37  ;;  %v2140_v44 = vsel %vm2136_vm12, %v7667_v5, %v2139_v33 }
 0x235   :  { %v2170_v41 = vadd.s32 %v2168_v21, %v2166_v16  ;;  %v2162_v15 = vshrl.u32 %v2157_v49, 16  ;;  %v2182_v10 = vshrl.u32 %v2178_v50, 16  ;;  %v2260_v38 = vand.u32 2139095040, %v7728_v61 }
 0x236   :  { %v2049_v51 = vsub.s32 %v2045_v58, %v2048_v55  ;;  %v10817_v62 = vand.u32 2147483647, %v7728_v61  ;;  %v2184_v2 = vshrl.u32 %v2179_v60, 16  ;;  %v2071_v14 = vsub.s32 4, %v2047_v63 }
 0x237   :  { %v2171_v4 = vadd.s32 %v2170_v41, %v2160_v59  ;;  %v2193_v35 = vadd.s32 %v2192_v22, %v2182_v10  ;;  %v2261_v1 = vshrl.u32 %v2260_v38, 23  ;;  %v2141_v46 = vsel %vm2135_vm13, %v2138_v45, %v2140_v44  ;;  %v11206_v10 = vld [vmem:[#allocation143_spill] sm:$0xff] }
 0x238   :  { %vm2050_vm3 = vcmp.lt.s32.totalorder %v2049_v51, 0  ;;  %v2051_v20 = vsub.s32 0, %v2049_v51  ;;  %v2191_v5 = vadd.s32 %v2187_v17, %v2183_v13  ;;  %vm1949_vm4 = vcmp.lt.s32.totalorder %v7575_v26, 0 }
 0x239   :  { %v2172_v37 = vadd.s32 %v2171_v4, %v2162_v15  ;;  %v2194_v49 = vadd.s32 %v2193_v35, %v2184_v2  ;;  %v6168_v50 = vadd.s32 4294967169, %v2261_v1  ;;  %v2264_v33 = vand.u32 8388607, %v10817_v62 }
 0x23a   :  { %v2052_v58 = vsel %vm2050_vm3, %v2051_v20, %v2049_v51  ;;  %v2072_v34 = vsel %vm1949_vm4, %v2071_v14, %v2047_v63  ;;  %v2195_v52 = vmul.u32 %v7608_v24, %v2141_v46  ;;  %v11203_v45 = vand.u32 2147483647, %v7575_v26 }
 0x23b   :  { %v2053_v55 = vclz %v2052_v58  ;;  %vm2197_vm5 = vc.u32 %v2172_v37, %v2191_v5  ;;  %v2198_v60 = vadd.s32 1, %v2194_v49  ;;  %v2267_v21 = vadd.s32 1, %v6168_v50 }
 0x23c   :  { %vm7759_vm6 = vcmp.le.f32.partialorder %v11203_v45, 0.7853982  ;;  %v2041_v9 = vadd.s32 %v7690_v0, %v7701_v30  ;;  %v2265_v63 = vor.u32 8388608, %v2264_v33  ;;  %v1429_v38 = vadd.f32 %v7387_v8, %v11206_v10  ;;  %v11207_v8 = vld [vmem:[#allocation145_spill] sm:$0xff] }
 0x23d   :  { %v6163_v16 = vadd.s32 4294967294, %v2053_v55  ;;  %v2199_v17 = vsel %vm2197_vm5, %v2198_v60, %v2194_v49  ;;  %vm2268_vm8 = vcmp.gt.s32.totalorder %v2267_v21, 0  ;;  %v2074_v24 = vsel %vm7759_vm6, 0, %v2072_v34 }
 0x23e   :  { %v2200_v41 = vadd.s32 %v2199_v17, %v2195_v52  ;;  %v2269_v22 = vsel %vm2268_vm8, %v2267_v21, 0  ;;  %v2091_v58 = vadd.s32 3, %v2074_v24  ;;  %v7772_v0 = vadd.f32 %v7730_v6, %v1429_v38 }
 0x23f   :  { %vm6164_vm7 = vcmp.lt.s32.totalorder %v6163_v16, 0  ;;  %v2271_v4 = vand.u32 31, %v2269_v22  ;;  %v7774_v55 = vshll.u32 %v2265_v63, 8  ;;  %v7781_v33 = vadd.f32 %v7390_v12, %v11207_v8 }
 0x240   :  { %v2056_v59 = vsel %vm6164_vm7, 0, %v6163_v16  ;;  %v2201_v20 = vadd.s32 536870912, %v2200_v41  ;;  %v7783_v16 = vand.u32 3, %v2091_v58  ;;  %v2196_v60 = vadd.s32 %v2191_v5, %v2172_v37 }
 0x241   :  { %v2057_v44 = vsub.s32 32, %v2056_v59  ;;  %v2061_v15 = vsub.s32 4294967266, %v2056_v59  ;;  %v2058_v2 = vshll.u32 %v2049_v51, %v2056_v59  ;;  %v7777_v50 = vsub.s32 32, %v2271_v4 }
 0x242   :  { %v7769_v14 = vshrl.u32 %v2201_v20, 30  ;;  %v2415_v6 = vand.u32 2139095040, %v7772_v0  ;;  %v7789_v45 = vand.u32 65535, %v7774_v55  ;;  %v7792_v17 = vshrl.u32 %v7774_v55, 16 }
 0x243   :  { %v2059_v35 = vshrl.u32 %v2041_v9, %v2057_v44  ;;  %v2062_v1 = vadd.s32 127, %v2061_v15  ;;  %v7796_v9 = vshrl.u32 %v2269_v22, 5  ;;  %v2284_v37 = vshrl.u32 %v10820_v3, %v7777_v50 }
 0x244   :  { %v2203_v49 = vshll.u32 %v7769_v14, 30  ;;  %vm2104_vm10 = vcmp.lt.s32.totalorder %v7578_v48, 0  ;;  %v11208_v59 = vmov 2475754826   ;;  %v11209_v44 = vmov 2131351028  }
 0x245   :  { %v2060_v30 = vor.u32 %v2059_v35, %v2058_v2  ;;  %v2063_v46 = vshll.u32 %v2062_v1, 23  ;;  %v2278_v15 = vshrl.u32 %v11209_v44, %v7777_v50  ;;  %v2281_v22 = vshrl.u32 %v10822_v32, %v7777_v50 }
 0x246   :  { %v7785_v21 = vsub.s32 %v2200_v41, %v2203_v49  ;;  %v2275_v41 = vshrl.u32 %v11208_v59, %v7777_v50  ;;  %v2283_v10 = vshll.u32 %v10822_v32, %v2271_v4  ;;  %v7810_v38 = vshrl.u32 %v2415_v6, 23 }
 0x247   :  { %v2064_v51 = vor.u32 4788187, %v2063_v46  ;;  %v2067_v52 = vcvt.s32.f32 %v2060_v30  ;;  %v2274_v35 = vshll.u32 %v10824_v11, %v2271_v4  ;;  %v2277_v1 = vshll.u32 %v11208_v59, %v2271_v4 }
 0x248   :  { %vm2205_vm9 = vcmp.lt.s32.totalorder %v7785_v21, 0  ;;  %v2206_v12 = vsub.s32 0, %v7785_v21  ;;  %v2280_v58 = vshll.u32 %v11209_v44, %v2271_v4  ;;  %v2285_v30 = vor.u32 %v2284_v37, %v2283_v10 }
 0x249   :  { %v2065_v34 = vand.u32 2147483647, %v2064_v51  ;;  %v2287_v46 = vshrl.u32 %v10818_v18, %v7777_v50  ;;  %vm2289_vm11 = vcmp.lt.s32.totalorder %v7796_v9, 1  ;;  %v7820_v51 = vor.u32 %v2275_v41, %v2274_v35 }
 0x24a   :  { %v2207_v63 = vsel %vm2205_vm9, %v2206_v12, %v7785_v21  ;;  %v7822_v6 = vor.u32 %v2278_v15, %v2277_v1  ;;  %v7830_v12 = vor.u32 %v2281_v22, %v2280_v58  ;;  %v2286_v37 = vshll.u32 %v10820_v3, %v2271_v4 }
 0x24b   :  { %v2068_v5 = vmul.f32 %v2067_v52, %v2065_v34  ;;  %v2208_v2 = vclz %v2207_v63  ;;  %v2226_v52 = vsub.s32 4, %v7769_v14  ;;  %v11210_v41 = vand.u32 2147483647, %v7578_v48 }
 0x24c   :  { %vm2290_vm14 = vcmp.lt.s32.totalorder %v7796_v9, 2  ;;  %vm2292_vm15 = vcmp.lt.s32.totalorder %v7796_v9, 4  ;;  %v2288_v22 = vor.u32 %v2287_v46, %v2286_v37  ;;  %vm2291_vm0 = vcmp.lt.s32.totalorder %v7796_v9, 3  ;;  %v5337_v37 = vld [vmem:[#allocation8] sm:$0xff] }
 0x24d   :  { %v2069_v20 = vxor.u32 2147483648, %v2068_v5  ;;  %v6166_v8 = vadd.s32 4294967294, %v2208_v2  ;;  %vm7837_vm12 = vcmp.le.f32.partialorder %v11210_v41, 0.7853982  ;;  %v2298_v4 = vsel %vm2292_vm15, %v2285_v30, 920167782 }
 0x24e   :  { %v2297_v35 = vsel %vm2289_vm11, %v7820_v51, %v7822_v6  ;;  %v2227_v58 = vsel %vm2104_vm10, %v2226_v52, %v7769_v14  ;;  %v2299_v46 = vsel %vm2291_vm0, %v7830_v12, %v2298_v4  ;;  %v2301_v62 = vsel %vm2289_vm11, %v7822_v6, %v7830_v12 }
 0x24f   :  { %v2070_v49 = vsel %vm1949_vm4, %v2069_v20, %v2068_v5  ;;  %v5265_v5 = vld [vmem:[#allocation7] sm:$0xff]  ;;  %vm6167_vm13 = vcmp.lt.s32.totalorder %v6166_v8, 0  ;;  %v7863_v3 = vsel %vm2290_vm14, %v2297_v35, %v2299_v46  ;;  %v2302_v14 = vsel %vm2292_vm15, %v2288_v22, 1326507024 }
 0x250   :  { %v7827_v34 = vsel %vm7759_vm6, %v7575_v26, %v2070_v49  ;;  %v2211_v13 = vsel %vm6167_vm13, 0, %v6166_v8  ;;  %vm5268_vm1 = vcmp.gt.f32.partialorder %v5265_v5, 0.5  ;;  %vm5340_vm2 = vcmp.gt.f32.partialorder %v5337_v37, 0.5 }
 0x251   :  { %v2075_v63 = vmul.f32 %v7827_v34, %v7827_v34  ;;  %v2212_v2 = vsub.s32 32, %v2211_v13  ;;  %v2216_v1 = vsub.s32 4294967266, %v2211_v13  ;;  %v2213_v5 = vshll.u32 %v7785_v21, %v2211_v13 }
 0x252   :  { %v2331_v22 = vshrl.u32 %v7863_v3, 16  ;;  %vm2094_vm3 = vcmp.eq.s32.totalorder %v7783_v16, 0  ;;  %vm2097_vm4 = vcmp.eq.s32.totalorder %v7783_v16, 2  ;;  %vm2093_vm5 = vcmp.lt.s32.totalorder %v7783_v16, 2 }
 0x253   :  { %v2076_v10 = vmul.f32 -0.001358992, %v2075_v63  ;;  %v2083_v20 = vmul.f32 -0.00019511016, %v2075_v63  ;;  %v2214_v41 = vshrl.u32 %v2196_v60, %v2212_v2  ;;  %v2217_v18 = vadd.s32 127, %v2216_v1 }
 0x254   :  { %v2303_v60 = vsel %vm2291_vm0, %v2285_v30, %v2302_v14  ;;  %v2273_v30 = vshrl.u32 %v10824_v11, %v7777_v50  ;;  %v2330_v50 = vand.u32 65535, %v7863_v3  ;;  %v2294_v3 = vsel %vm2292_vm15, %v7830_v12, 2102212464 }
 0x255   :  { %v2077_v49 = vadd.f32 0.041655596, %v2076_v10  ;;  %v2084_v8 = vadd.f32 0.008332121, %v2083_v20  ;;  %v7868_v10 = vsel %vm5268_vm1, 1, %v10826_v36  ;;  %v7872_v20 = vpop.f32.mrf.mxu2  ;;  %v2215_v21 = vor.u32 %v2214_v41, %v2213_v5 }
 0x256   :  { %v2218_v13 = vshll.u32 %v2217_v18, 23  ;;  %v2304_v2 = vsel %vm2290_vm14, %v2301_v62, %v2303_v60  ;;  %v7883_v41 = vsel %vm5340_vm2, 1, %v10826_v36  ;;  %vm2090_vm7 = vweird.f32 %v7575_v26 }
 0x257   :  { %v2078_v52 = vmul.f32 %v2077_v49, %v2075_v63  ;;  %v2085_v4 = vmul.f32 %v2084_v8, %v2075_v63  ;;  %v2308_v46 = vand.u32 65535, %v2304_v2  ;;  %v2229_v8 = vsel %vm7837_vm12, 0, %v2227_v58 }
 0x258   :  { %v2219_v49 = vor.u32 4788187, %v2218_v13  ;;  %v2309_v14 = vshrl.u32 %v2304_v2, 16  ;;  %v2222_v5 = vcvt.s32.f32 %v2215_v21  ;;  %v2246_v60 = vadd.s32 3, %v2229_v8 }
 0x259   :  { %v2079_v35 = vadd.f32 -0.4999988, %v2078_v52  ;;  %v2086_v1 = vadd.f32 -0.16666654, %v2085_v4  ;;  %v7888_v4 = vmul.u32 %v2308_v46, %v7792_v17  ;;  %v2332_v13 = vmul.u32 %v2330_v50, %v7789_v45 }
 0x25a   :  { %v2220_v62 = vand.u32 2147483647, %v2219_v49  ;;  %v2311_v52 = vmul.u32 %v2309_v14, %v7789_v45  ;;  %v2313_v8 = vmul.u32 %v2309_v14, %v7792_v17  ;;  %vm2245_vm15 = vweird.f32 %v7578_v48 }
 0x25b   :  { %v2080_v32 = vmul.f32 %v2079_v35, %v2075_v63  ;;  %v2087_v37 = vmul.f32 %v2086_v1, %v2075_v63  ;;  %v7892_v63 = vmul.u32 %v2331_v22, %v7789_v45  ;;  %v2310_v35 = vmul.u32 %v2308_v46, %v7789_v45 }
 0x25c   :  { %v2223_v2 = vmul.f32 %v2222_v5, %v2220_v62  ;;  %v2314_v21 = vshll.u32 %v2311_v52, 16  ;;  %v2316_v18 = vshll.u32 %v7888_v4, 16 }
 0x25d   :  { %v2088_v58 = vadd.f32 1.0, %v2087_v37  ;;  %v2081_v1 = vadd.f32 1.0, %v2080_v32  ;;  %v1716_v37 = vpop.f32.mrf.mxu2  ;;  %v2334_v32 = vmul.u32 %v2330_v50, %v7792_v17  ;;  %v2315_v50 = vshrl.u32 %v2311_v52, 16 }
 0x25e   :  { %v2224_v11 = vxor.u32 2147483648, %v2223_v2  ;;  %vm2318_vm6 = vc.u32 %v2310_v35, %v2314_v21  ;;  %v2320_v62 = vadd.s32 %v2314_v21, %v2310_v35 }
 0x25f   :  { %v2089_v49 = vmul.f32 %v2088_v58, %v7827_v34  ;;  %v2319_v46 = vsel %vm2318_vm6, 1, %v10826_v36  ;;  %v2336_v34 = vshll.u32 %v7892_v63, 16  ;;  %v7910_v58 = vand.u32 3, %v2246_v60 }
 0x260   :  { %v2225_v12 = vsel %vm2104_vm10, %v2224_v11, %v2223_v2  ;;  %v2321_v14 = vadd.s32 %v2319_v46, %v2313_v8  ;;  %vm2322_vm8 = vc.u32 %v2320_v62, %v2316_v18  ;;  %v2098_v37 = vxor.u32 2147483648, %v2081_v1 }
 0x261   :  { %v2095_v5 = vxor.u32 2147483648, %v2089_v49  ;;  %v7915_v35 = vsel %vm7837_vm12, %v7578_v48, %v2225_v12  ;;  %v2323_v21 = vsel %vm2322_vm8, 1, %v10826_v36  ;;  %v2293_v11 = vsel %vm2289_vm11, %v2273_v30, %v7820_v51 }
 0x262   :  { %v2230_v24 = vmul.f32 %v7915_v35, %v7915_v35  ;;  %v2295_v18 = vsel %vm2291_vm0, %v7822_v6, %v2294_v3  ;;  %v2325_v60 = vadd.s32 %v2323_v21, %v2321_v14  ;;  %v2338_v2 = vshll.u32 %v2334_v32, 16 }
 0x263   :  { %v2096_v15 = vsel %vm2094_vm3, %v2081_v1, %v2095_v5  ;;  %vm2340_vm9 = vc.u32 %v2332_v13, %v2336_v34  ;;  %v2342_v8 = vadd.s32 %v2336_v34, %v2332_v13  ;;  %v2335_v46 = vmul.u32 %v2331_v22, %v7792_v17 }
 0x264   :  { %v2231_v62 = vmul.f32 -0.001358992, %v2230_v24  ;;  %v2238_v45 = vmul.f32 -0.00019511016, %v2230_v24  ;;  %v2099_v12 = vsel %vm2097_vm4, %v2098_v37, %v2089_v49  ;;  %v2341_v51 = vsel %vm2340_vm9, 1, %v10826_v36 }
 0x265   :  { %vm2344_vm10 = vc.u32 %v2342_v8, %v2338_v2  ;;  %v6171_v6 = vadd.s32 4294967169, %v7810_v38  ;;  %v2100_v30 = vsel %vm2093_vm5, %v2096_v15, %v2099_v12  ;;  %v2326_v5 = vadd.s32 %v2325_v60, %v2315_v50 }
 0x266   :  { %v2232_v1 = vadd.f32 0.041655596, %v2231_v62  ;;  %v2239_v3 = vadd.f32 0.008332121, %v2238_v45  ;;  %v2296_v13 = vsel %vm2290_vm14, %v2293_v11, %v2295_v18  ;;  %v2343_v52 = vadd.s32 %v2341_v51, %v2335_v46 }
 0x267   :  { %v2345_v17 = vsel %vm2344_vm10, 1, %v10826_v36  ;;  %v2422_v22 = vadd.s32 1, %v6171_v6  ;;  %v2317_v14 = vshrl.u32 %v7888_v4, 16  ;;  %v2337_v37 = vshrl.u32 %v7892_v63, 16 }
 0x268   :  { %v2233_v34 = vmul.f32 %v2232_v1, %v2230_v24  ;;  %v2240_v49 = vmul.f32 %v2239_v3, %v2230_v24  ;;  %v7943_v16 = vsel %vm2090_vm7, nan, %v2100_v30  ;;  %v2347_v38 = vadd.s32 %v2345_v17, %v2343_v52 }
 0x269   :  { %v11213_v21 = vand.u32 2147483647, %v7772_v0  ;;  %vm2423_vm11 = vcmp.gt.s32.totalorder %v2422_v22, 0  ;;  %v7949_v18 = vadd.s32 %v2326_v5, %v2317_v14  ;;  %vm2249_vm12 = vcmp.eq.s32.totalorder %v7910_v58, 0 }
 0x26a   :  { %v2234_v9 = vadd.f32 -0.4999988, %v2233_v34  ;;  %v2241_v11 = vadd.f32 -0.16666654, %v2240_v49  ;;  %v2424_v15 = vsel %vm2423_vm11, %v2422_v22, 0  ;;  %vm2252_vm13 = vcmp.eq.s32.totalorder %v7910_v58, 2 }
 0x26b   :  { %v7947_v60 = vand.u32 8388607, %v11213_v21  ;;  %v5275_v4 = vperm.slane %v7868_v10, 1  ;;  %v2339_v63 = vshrl.u32 %v2334_v32, 16  ;;  %v2348_v62 = vadd.s32 %v2347_v38, %v2337_v37 }
 0x26c   :  { %v2426_v45 = vand.u32 31, %v2424_v15  ;;  %v2235_v50 = vmul.f32 %v2234_v9, %v2230_v24  ;;  %v2242_v46 = vmul.f32 %v2241_v11, %v2230_v24  ;;  %vm2248_vm14 = vcmp.lt.s32.totalorder %v7910_v58, 2 }
 0x26d   :  { %v5347_v12 = vperm.slane %v7883_v41, 1  ;;  %v7956_v51 = vadd.s32 %v2342_v8, %v2338_v2  ;;  %v5202_v6 = vmul.f32 2.0, %v7943_v16  ;;  %v2349_v30 = vadd.s32 %v2348_v62, %v2339_v63 }
 0x26e   :  { %v2350_v1 = vmul.u32 %v7774_v55, %v2296_v13  ;;  %v7961_v3 = vsub.s32 32, %v2426_v45  ;;  %v2236_v32 = vadd.f32 1.0, %v2235_v50  ;;  %v2243_v5 = vadd.f32 1.0, %v2242_v46 }
 0x26f   :  { %vm2352_vm0 = vc.u32 %v7949_v18, %v7956_v51  ;;  %v2420_v24 = vor.u32 8388608, %v7947_v60  ;;  %v2353_v52 = vadd.s32 1, %v2349_v30  ;;  %v7966_v17 = vshrl.u32 %v2424_v15, 5 }
 0x270   :  { %v2432_v2 = vshll.u32 %v11208_v59, %v2426_v45  ;;  %v2433_v8 = vshrl.u32 %v11209_v44, %v7961_v3  ;;  %v2244_v22 = vmul.f32 %v2243_v5, %v7915_v35  ;;  %v2253_v55 = vxor.u32 2147483648, %v2236_v32 }
 0x271   :  { %v11214_v13 = vmov 2102212464   ;;  %v11215_v49 = vmov 920167782   ;;  %v2354_v37 = vsel %vm2352_vm0, %v2353_v52, %v2349_v30  ;;  %v2430_v38 = vshrl.u32 %v11208_v59, %v7961_v3 }
 0x272   :  { %v2436_v34 = vshrl.u32 %v11214_v13, %v7961_v3  ;;  %v2439_v14 = vshrl.u32 %v11215_v49, %v7961_v3  ;;  %v2435_v21 = vshll.u32 %v11209_v44, %v2426_v45  ;;  %v2438_v60 = vshll.u32 %v11214_v13, %v2426_v45 }
 0x273   :  { %v11216_v9 = vperm.slane %v7868_v10, 0  ;;  %v2250_v35 = vxor.u32 2147483648, %v2244_v22  ;;  %v2355_v15 = vadd.s32 %v2354_v37, %v2350_v1  ;;  %v11219_v63 = vmov 683565275  }
 0x274   :  { %v2429_v62 = vshll.u32 %v11219_v63, %v2426_v45  ;;  %v7987_v50 = vor.u32 %v2433_v8, %v2432_v2  ;;  %v7989_v46 = vor.u32 %v2436_v34, %v2435_v21  ;;  %v2440_v30 = vor.u32 %v2439_v14, %v2438_v60 }
 0x275   :  { %vm7982_vm1 = vcmp.eq.s32.totalorder %v11216_v9, 1  ;;  %v2441_v5 = vshll.u32 %v11215_v49, %v2426_v45  ;;  %v11220_v52 = vmov 1326507024   ;;  %v2251_v9 = vsel %vm2249_vm12, %v2236_v32, %v2250_v35 }
 0x276   :  { %v2442_v36 = vshrl.u32 %v11220_v52, %v7961_v3  ;;  %v2254_v39 = vsel %vm2252_vm13, %v2253_v55, %v2244_v22  ;;  %vm7998_vm2 = vcmp.eq.s32.totalorder %v5275_v4, 1  ;;  %v2356_v2 = vadd.s32 536870912, %v2355_v15 }
 0x277   :  { %v5223_v8 = vmul.f32 %v5202_v6, %v7943_v16  ;;  %v2255_v34 = vsel %vm2248_vm14, %v2251_v9, %v2254_v39  ;;  %v8005_v45 = vor.u32 %v2430_v38, %v2429_v62  ;;  %vm2444_vm3 = vcmp.lt.s32.totalorder %v7966_v17, 1  ;;  %v8029_v38 = vpop.f32.mrf.mxu3 }
 0x278   :  { %v2443_v14 = vor.u32 %v2442_v36, %v2441_v5  ;;  %v2256_v37 = vsel %vm2245_vm15, nan, %v2255_v34  ;;  %v8009_v32 = vshrl.u32 %v2356_v2, 30  ;;  %vm2447_vm4 = vcmp.lt.s32.totalorder %v7966_v17, 4 }
 0x279   :  { %v5203_v4 = vmul.f32 2.0, %v2256_v37  ;;  %v2453_v22 = vsel %vm2447_vm4, %v2440_v30, 920167782  ;;  %v2456_v39 = vsel %vm2444_vm3, %v7987_v50, %v7989_v46  ;;  %v8019_v58 = vshll.u32 %v2420_v24, 8 }
 0x27a   :  { %vm8021_vm5 = vcmp.eq.s32.totalorder %v5347_v12, 1  ;;  %v2358_v6 = vshll.u32 %v8009_v32, 30  ;;  %vm2446_vm6 = vcmp.lt.s32.totalorder %v7966_v17, 3  ;;  %v2457_v55 = vsel %vm2447_vm4, %v2443_v14, 1326507024 }
 0x27b   :  { %v5244_v21 = vsub.f32 1.0, %v5223_v8  ;;  %v5224_v60 = vmul.f32 %v5203_v4, %v2256_v37  ;;  %vm2445_vm7 = vcmp.lt.s32.totalorder %v7966_v17, 2  ;;  %v2458_v24 = vsel %vm2446_vm6, %v2440_v30, %v2457_v55 }
 0x27c   :  { %v8034_v12 = vsub.s32 %v2355_v15, %v2358_v6  ;;  %v2452_v35 = vsel %vm2444_vm3, %v8005_v45, %v7987_v50  ;;  %v2454_v62 = vsel %vm2446_vm6, %v7989_v46, %v2453_v22  ;;  %v2459_v5 = vsel %vm2445_vm7, %v2456_v39, %v2458_v24 }
 0x27d   :  { %v5245_v9 = vsub.f32 1.0, %v5224_v60  ;;  %v2461_v2 = vand.u32 65535, %v8019_v58  ;;  %v2463_v8 = vand.u32 65535, %v2459_v5  ;;  %v2464_v34 = vshrl.u32 %v2459_v5, 16 }
 0x27e   :  { %v11225_v15 = vperm.slane %v7883_v41, 0  ;;  %vm2360_vm9 = vcmp.lt.s32.totalorder %v8034_v12, 0  ;;  %v2361_v14 = vsub.s32 0, %v8034_v12  ;;  %v2462_v4 = vshrl.u32 %v8019_v58, 16 }
 0x27f   :  { %v5316_v22 = vsel %vm7982_vm1, %v5244_v21, %v7943_v16  ;;  %v5317_v39 = vsel %vm7998_vm2, %v5245_v9, %v2256_v37  ;;  %v2455_v6 = vsel %vm2445_vm7, %v2452_v35, %v2454_v62  ;;  %v2466_v55 = vmul.u32 %v2464_v34, %v2461_v2  ;;  %v11228_v16 = vld [vmem:[#allocation144_spill] sm:$0xff] }
 0x280   :  { %vm8048_vm8 = vcmp.eq.s32.totalorder %v11225_v15, 1  ;;  %v5389_v60 = vsel %vm8021_vm5, %v7578_v48, %v5317_v39  ;;  %vm5439_vm10 = vcmask 1043456   ;;  %v2362_v24 = vsel %vm2360_vm9, %v2361_v14, %v8034_v12  ;;  %v1729_v48 = vpop.f32.mrf.mxu3 }
 0x281   :  { %v2467_v5 = vmul.u32 %v2463_v8, %v2462_v4  ;;  %v5429_v15 = vrot.slane %v5389_v60, 4  ;;  %v2363_v7 = vclz %v2362_v24  ;;  %v2465_v31 = vmul.u32 %v2463_v8, %v2461_v2 }
 0x282   :  { %v2469_v11 = vshll.u32 %v2466_v55, 16  ;;  %v1455_v1 = vadd.f32 %v7399_v27, %v11228_v16  ;;  %v5388_v37 = vsel %vm8048_vm8, %v7575_v26, %v5316_v22  ;;  %v2351_v21 = vadd.s32 %v7956_v51, %v7949_v18 }
 0x283   :  { %v2485_v36 = vand.u32 65535, %v2455_v6  ;;  %v5440_v35 = vsel %vm5439_vm10, %v5388_v37, %v5429_v15  ;;  %v6169_v62 = vadd.s32 4294967294, %v2363_v7  ;;  %v2468_v9 = vmul.u32 %v2464_v34, %v2462_v4 }
 0x284   :  { %vm2473_vm11 = vc.u32 %v2465_v31, %v2469_v11  ;;  %5460 = vst [vmem:[#allocation10] sm:$0xff] %v5440_v35  ;;  %v2471_v8 = vshll.u32 %v2467_v5, 16  ;;  %v11229_v14 = vmov 0   ;;  %v2475_v60 = vadd.s32 %v2469_v11, %v2465_v31 }
 0x285   :  { %v2474_v39 = vsel %vm2473_vm11, 1, %v11229_v14  ;;  %v2486_v27 = vshrl.u32 %v2455_v6, 16  ;;  %vm6170_vm12 = vcmp.lt.s32.totalorder %v6169_v62, 0  ;;  %v2428_v26 = vshrl.u32 %v11219_v63, %v7961_v3 }
 0x286   :  { %v2449_v18 = vsel %vm2447_vm4, %v7989_v46, 2102212464  ;;  %v2476_v51 = vadd.s32 %v2474_v39, %v2468_v9  ;;  %v2366_v30 = vsel %vm6170_vm12, 0, %v6169_v62  ;;  %vm2477_vm13 = vc.u32 %v2475_v60, %v2471_v8 }
 0x287   :  { %v2488_v7 = vmul.u32 %v2486_v27, %v2461_v2  ;;  %v2489_v34 = vmul.u32 %v2485_v36, %v2462_v4  ;;  %v2367_v22 = vsub.s32 32, %v2366_v30  ;;  %v2371_v24 = vsub.s32 4294967266, %v2366_v30 }
 0x288   :  { %v2470_v15 = vshrl.u32 %v2466_v55, 16  ;;  %v2478_v16 = vsel %vm2477_vm13, 1, %v11229_v14  ;;  %v2487_v6 = vmul.u32 %v2485_v36, %v2461_v2  ;;  %v2490_v11 = vmul.u32 %v2486_v27, %v2462_v4 }
 0x289   :  { %v2480_v31 = vadd.s32 %v2478_v16, %v2476_v51  ;;  %v2491_v37 = vshll.u32 %v2488_v7, 16  ;;  %v2368_v3 = vshll.u32 %v8034_v12, %v2366_v30  ;;  %v2369_v48 = vshrl.u32 %v2351_v21, %v2367_v22 }
 0x28a   :  { %v2372_v35 = vadd.s32 127, %v2371_v24  ;;  %v8084_v46 = vadd.f32 %v7872_v20, %v7781_v33  ;;  %v2493_v62 = vshll.u32 %v2489_v34, 16  ;;  %v8087_v8 = vadd.f32 %v8029_v38, %v1455_v1 }
 0x28b   :  { %vm2495_vm14 = vc.u32 %v2487_v6, %v2491_v37  ;;  %v2497_v9 = vadd.s32 %v2491_v37, %v2487_v6  ;;  %v2370_v55 = vor.u32 %v2369_v48, %v2368_v3  ;;  %v2481_v60 = vadd.s32 %v2480_v31, %v2470_v15 }
 0x28c   :  { %v2373_v39 = vshll.u32 %v2372_v35, 23  ;;  %v2496_v2 = vsel %vm2495_vm14, 1, %v11229_v14  ;;  %v2448_v21 = vsel %vm2444_vm3, %v2428_v26, %v8005_v45  ;;  %v2472_v33 = vshrl.u32 %v2467_v5, 16 }
 0x28d   :  { %v2498_v4 = vadd.s32 %v2496_v2, %v2490_v11  ;;  %vm2499_vm15 = vc.u32 %v2497_v9, %v2493_v62  ;;  %v2381_v36 = vsub.s32 4, %v8009_v32  ;;  %v2450_v38 = vsel %vm2446_vm6, %v7987_v50, %v2449_v18 }
 0x28e   :  { %v2374_v12 = vor.u32 4788187, %v2373_v39  ;;  %v2500_v20 = vsel %vm2499_vm15, 1, %v11229_v14  ;;  %v2492_v1 = vshrl.u32 %v2488_v7, 16  ;;  %v2377_v30 = vcvt.s32.f32 %v2370_v55 }
 0x28f   :  { %v2502_v27 = vadd.s32 %v2500_v20, %v2498_v4  ;;  %v2482_v22 = vadd.s32 %v2481_v60, %v2472_v33  ;;  %v2570_v24 = vand.u32 2139095040, %v8084_v46  ;;  %v2494_v15 = vshrl.u32 %v2489_v34, 16 }
 0x290   :  { %v2375_v51 = vand.u32 2147483647, %v2374_v12  ;;  %vm2259_vm0 = vcmp.lt.s32.totalorder %v7728_v61, 0  ;;  %v2501_v5 = vadd.s32 %v2497_v9, %v2493_v62  ;;  %v2451_v6 = vsel %vm2445_vm7, %v2448_v21, %v2450_v38 }
 0x291   :  { %v2503_v16 = vadd.s32 %v2502_v27, %v2492_v1  ;;  %v2571_v26 = vshrl.u32 %v2570_v24, 23  ;;  %v2382_v31 = vsel %vm2259_vm0, %v2381_v36, %v8009_v32  ;;  %v10829_v18 = vand.u32 2147483647, %v8084_v46 }
 0x292   :  { %v2378_v45 = vmul.f32 %v2377_v30, %v2375_v51  ;;  %vm2507_vm1 = vc.u32 %v2482_v22, %v2501_v5  ;;  %v11230_v37 = vand.u32 2147483647, %v7728_v61  ;;  %v2505_v35 = vmul.u32 %v8019_v58, %v2451_v6 }
 0x293   :  { %v2504_v50 = vadd.s32 %v2503_v16, %v2494_v15  ;;  %v6174_v11 = vadd.s32 4294967169, %v2571_v26  ;;  %v2574_v17 = vand.u32 8388607, %v10829_v18  ;;  %v2725_v1 = vand.u32 2139095040, %v8087_v8 }
 0x294   :  { %v2379_v7 = vxor.u32 2147483648, %v2378_v45  ;;  %vm2258_vm2 = vcmp.le.f32.partialorder %v11230_v37, 0.7853982  ;;  %v8115_v15 = vadd.s32 %v2501_v5, %v2482_v22  ;;  %v10828_v6 = vand.u32 2147483647, %v8087_v8 }
 0x295   :  { %v2508_v34 = vadd.s32 1, %v2504_v50  ;;  %v2384_v48 = vsel %vm2258_vm2, 0, %v2382_v31  ;;  %v2577_v62 = vadd.s32 1, %v6174_v11  ;;  %v2575_v33 = vor.u32 8388608, %v2574_v17 }
 0x296   :  { %v2380_v3 = vsel %vm2259_vm0, %v2379_v7, %v2378_v45  ;;  %v2401_v60 = vadd.s32 3, %v2384_v48  ;;  %v5276_v45 = vperm.slane %v7868_v10, 2  ;;  %v2726_v37 = vshrl.u32 %v2725_v1, 23 }
 0x297   :  { %v2383_v32 = vsel %vm2258_vm2, %v7728_v61, %v2380_v3  ;;  %v2509_v9 = vsel %vm2507_vm1, %v2508_v34, %v2504_v50  ;;  %vm2578_vm3 = vcmp.gt.s32.totalorder %v2577_v62, 0  ;;  %v8119_v31 = vshll.u32 %v2575_v33, 8 }
 0x298   :  { %v2385_v55 = vmul.f32 %v2383_v32, %v2383_v32  ;;  %v2510_v39 = vadd.s32 %v2509_v9, %v2505_v35  ;;  %v2579_v2 = vsel %vm2578_vm3, %v2577_v62, 0  ;;  %v8111_v27 = vand.u32 3, %v2401_v60 }
 0x299   :  { %v2581_v20 = vand.u32 31, %v2579_v2  ;;  %vm2414_vm4 = vcmp.lt.s32.totalorder %v7772_v0, 0  ;;  %v8125_v34 = vshrl.u32 %v2579_v2, 5  ;;  %v11231_v33 = vand.u32 2147483647, %v7772_v0 }
 0x29a   :  { %v2386_v4 = vmul.f32 -0.001358992, %v2385_v55  ;;  %v2393_v12 = vmul.f32 -0.00019511016, %v2385_v55  ;;  %v2511_v21 = vadd.s32 536870912, %v2510_v39  ;;  %vm2404_vm7 = vcmp.eq.s32.totalorder %v8111_v27, 0 }
 0x29b   :  { %v8113_v51 = vsub.s32 32, %v2581_v20  ;;  %v2584_v22 = vshll.u32 %v11219_v63, %v2581_v20  ;;  %v2587_v9 = vshll.u32 %v11208_v59, %v2581_v20  ;;  %v2590_v17 = vshll.u32 %v11209_v44, %v2581_v20 }
 0x29c   :  { %v2387_v36 = vadd.f32 0.041655596, %v2386_v4  ;;  %v2394_v38 = vadd.f32 0.008332121, %v2393_v12  ;;  %v2512_v58 = vshrl.u32 %v2511_v21, 30  ;;  %vm2407_vm8 = vcmp.eq.s32.totalorder %v8111_v27, 2 }
 0x29d   :  { %v2585_v5 = vshrl.u32 %v11208_v59, %v8113_v51  ;;  %v2588_v3 = vshrl.u32 %v11209_v44, %v8113_v51  ;;  %v2591_v62 = vshrl.u32 %v11214_v13, %v8113_v51  ;;  %v2594_v60 = vshrl.u32 %v11215_v49, %v8113_v51 }
 0x29e   :  { %v2388_v30 = vmul.f32 %v2387_v36, %v2385_v55  ;;  %v2395_v24 = vmul.f32 %v2394_v38, %v2385_v55  ;;  %v2513_v16 = vshll.u32 %v2512_v58, 30  ;;  %v2597_v21 = vshrl.u32 %v11220_v52, %v8113_v51 }
 0x29f   :  { %vm8146_vm6 = vcmp.le.f32.partialorder %v11231_v33, 0.7853982  ;;  %v8150_v1 = vor.u32 %v2585_v5, %v2584_v22  ;;  %v2616_v33 = vand.u32 65535, %v8119_v31  ;;  %vm2599_vm9 = vcmp.lt.s32.totalorder %v8125_v34, 1 }
 0x2a0   :  { %v2389_v50 = vadd.f32 -0.4999988, %v2388_v30  ;;  %v2396_v7 = vadd.f32 -0.16666654, %v2395_v24  ;;  %v8122_v11 = vsub.s32 %v2510_v39, %v2513_v16  ;;  %v2593_v39 = vshll.u32 %v11214_v13, %v2581_v20 }
 0x2a1   :  { %v8152_v30 = vor.u32 %v2588_v3, %v2587_v9  ;;  %v2592_v16 = vor.u32 %v2591_v62, %v2590_v17  ;;  %vm2602_vm11 = vcmp.lt.s32.totalorder %v8125_v34, 4  ;;  %vm2403_vm12 = vcmp.lt.s32.totalorder %v8111_v27, 2 }
 0x2a2   :  { %v2397_v48 = vmul.f32 %v2396_v7, %v2385_v55  ;;  %vm2515_vm5 = vcmp.lt.s32.totalorder %v8122_v11, 0  ;;  %v2516_v35 = vsub.s32 0, %v8122_v11  ;;  %v2390_v2 = vmul.f32 %v2389_v50, %v2385_v55 }
 0x2a3   :  { %v2595_v24 = vor.u32 %v2594_v60, %v2593_v39  ;;  %v2536_v55 = vsub.s32 4, %v2512_v58  ;;  %v2596_v50 = vshll.u32 %v11215_v49, %v2581_v20  ;;  %v8158_v7 = vand.u32 8388607, %v10828_v6 }
 0x2a4   :  { %v2398_v4 = vadd.f32 1.0, %v2397_v48  ;;  %v2517_v12 = vsel %vm2515_vm5, %v2516_v35, %v8122_v11  ;;  %v2391_v22 = vadd.f32 1.0, %v2390_v2  ;;  %vm2601_vm14 = vcmp.lt.s32.totalorder %v8125_v34, 3 }
 0x2a5   :  { %v2518_v38 = vclz %v2517_v12  ;;  %v6177_v12 = vadd.s32 4294967169, %v2726_v37  ;;  %v2598_v5 = vor.u32 %v2597_v21, %v2596_v50  ;;  %v2608_v20 = vsel %vm2602_vm11, %v2595_v24, 920167782 }
 0x2a6   :  { %v2399_v48 = vmul.f32 %v2398_v4, %v2383_v32  ;;  %v2607_v32 = vsel %vm2599_vm9, %v8150_v1, %v8152_v30  ;;  %v2537_v3 = vsel %vm2414_vm4, %v2536_v55, %v2512_v58  ;;  %v2609_v62 = vsel %vm2601_vm14, %v2592_v16, %v2608_v20 }
 0x2a7   :  { %v6172_v35 = vadd.s32 4294967294, %v2518_v38  ;;  %v2617_v9 = vshrl.u32 %v8119_v31, 16  ;;  %vm2600_vm15 = vcmp.lt.s32.totalorder %v8125_v34, 2  ;;  %vm2400_vm0 = vweird.f32 %v7728_v61 }
 0x2a8   :  { %v2405_v17 = vxor.u32 2147483648, %v2399_v48  ;;  %v2408_v2 = vxor.u32 2147483648, %v2391_v22  ;;  %v2610_v4 = vsel %vm2600_vm15, %v2607_v32, %v2609_v62  ;;  %v2611_v58 = vsel %vm2599_vm9, %v8152_v30, %v2592_v16 }
 0x2a9   :  { %vm6173_vm13 = vcmp.lt.s32.totalorder %v6172_v35, 0  ;;  %v2732_v21 = vadd.s32 1, %v6177_v12  ;;  %v2539_v20 = vsel %vm8146_vm6, 0, %v2537_v3  ;;  %v2641_v32 = vshrl.u32 %v2610_v4, 16 }
 0x2aa   :  { %v2521_v37 = vsel %vm6173_vm13, 0, %v6172_v35  ;;  %v2612_v35 = vsel %vm2602_vm11, %v2598_v5, 1326507024  ;;  %v2406_v12 = vsel %vm2404_vm7, %v2391_v22, %v2405_v17  ;;  %v2640_v5 = vand.u32 65535, %v2610_v4 }
 0x2ab   :  { %v2522_v39 = vsub.s32 32, %v2521_v37  ;;  %v2526_v60 = vsub.s32 4294967266, %v2521_v37  ;;  %v2523_v38 = vshll.u32 %v8122_v11, %v2521_v37  ;;  %v2613_v6 = vsel %vm2601_vm14, %v2595_v24, %v2612_v35 }
 0x2ac   :  { %v2409_v3 = vsel %vm2407_vm8, %v2408_v2, %v2399_v48  ;;  %v2583_v24 = vshrl.u32 %v11219_v63, %v8113_v51  ;;  %vm2733_vm1 = vcmp.gt.s32.totalorder %v2732_v21, 0  ;;  %v2604_v17 = vsel %vm2602_vm11, %v2592_v16, 2102212464 }
 0x2ad   :  { %v2524_v55 = vshrl.u32 %v8115_v15, %v2522_v39  ;;  %v2527_v50 = vadd.s32 127, %v2526_v60  ;;  %v2614_v15 = vsel %vm2600_vm15, %v2611_v58, %v2613_v6  ;;  %v2643_v60 = vmul.u32 %v2641_v32, %v2616_v33 }
 0x2ae   :  { %v2618_v37 = vand.u32 65535, %v2614_v15  ;;  %v2619_v39 = vshrl.u32 %v2614_v15, 16  ;;  %v2410_v22 = vsel %vm2403_vm12, %v2406_v12, %v2409_v3  ;;  %v2556_v4 = vadd.s32 3, %v2539_v20 }
 0x2af   :  { %v2525_v18 = vor.u32 %v2524_v55, %v2523_v38  ;;  %v2528_v11 = vshll.u32 %v2527_v50, 23  ;;  %v2603_v48 = vsel %vm2599_vm9, %v2583_v24, %v8150_v1  ;;  %v2644_v35 = vmul.u32 %v2640_v5, %v2617_v9 }
 0x2b0   :  { %v2621_v38 = vmul.u32 %v2619_v39, %v2616_v33  ;;  %v2622_v6 = vmul.u32 %v2618_v37, %v2617_v9  ;;  %v2620_v2 = vmul.u32 %v2618_v37, %v2616_v33  ;;  %v2646_v51 = vshll.u32 %v2643_v60, 16 }
 0x2b1   :  { %v2529_v26 = vor.u32 4788187, %v2528_v11  ;;  %v2532_v55 = vcvt.s32.f32 %v2525_v18  ;;  %v8210_v27 = vsel %vm2400_vm0, nan, %v2410_v22  ;;  %v2605_v16 = vsel %vm2601_vm14, %v8152_v30, %v2604_v17 }
 0x2b2   :  { %v2624_v50 = vshll.u32 %v2621_v38, 16  ;;  %v2623_v18 = vmul.u32 %v2619_v39, %v2617_v9  ;;  %v2626_v20 = vshll.u32 %v2622_v6, 16  ;;  %v2625_v1 = vshrl.u32 %v2621_v38, 16 }
 0x2b3   :  { %v2530_v58 = vand.u32 2147483647, %v2529_v26  ;;  %v2642_v26 = vmul.u32 %v2640_v5, %v2616_v33  ;;  %v2645_v3 = vmul.u32 %v2641_v32, %v2617_v9  ;;  %v2648_v62 = vshll.u32 %v2644_v35, 16 }
 0x2b4   :  { %vm2628_vm2 = vc.u32 %v2620_v2, %v2624_v50  ;;  %v2630_v11 = vadd.s32 %v2624_v50, %v2620_v2  ;;  %v2734_v9 = vsel %vm2733_vm1, %v2732_v21, 0  ;;  %v5204_v32 = vmul.f32 2.0, %v8210_v27 }
 0x2b5   :  { %v2533_v12 = vmul.f32 %v2532_v55, %v2530_v58  ;;  %v2629_v37 = vsel %vm2628_vm2, 1, %v11229_v14  ;;  %vm2650_vm5 = vc.u32 %v2642_v26, %v2646_v51  ;;  %v2652_v33 = vadd.s32 %v2646_v51, %v2642_v26 }
 0x2b6   :  { %v2631_v24 = vadd.s32 %v2629_v37, %v2623_v18  ;;  %vm2632_vm3 = vc.u32 %v2630_v11, %v2626_v20  ;;  %v2651_v30 = vsel %vm2650_vm5, 1, %v11229_v14  ;;  %v2606_v55 = vsel %vm2600_vm15, %v2603_v48, %v2605_v16 }
 0x2b7   :  { %v2534_v15 = vxor.u32 2147483648, %v2533_v12  ;;  %v2633_v58 = vsel %vm2632_vm3, 1, %v11229_v14  ;;  %v2653_v17 = vadd.s32 %v2651_v30, %v2645_v3  ;;  %v2627_v2 = vshrl.u32 %v2622_v6, 16 }
 0x2b8   :  { %v2635_v5 = vadd.s32 %v2633_v58, %v2631_v24  ;;  %v2736_v36 = vand.u32 31, %v2734_v9  ;;  %v2647_v18 = vshrl.u32 %v2643_v60, 16  ;;  %v8232_v11 = vand.u32 3, %v2556_v4 }
 0x2b9   :  { %v2535_v22 = vsel %vm2414_vm4, %v2534_v15, %v2533_v12  ;;  %vm2654_vm4 = vc.u32 %v2652_v33, %v2648_v62  ;;  %v2649_v15 = vshrl.u32 %v2644_v35, 16  ;;  %v8238_v48 = vadd.s32 %v2652_v33, %v2648_v62 }
 0x2ba   :  { %v8223_v39 = vsel %vm8146_vm6, %v7772_v0, %v2535_v22  ;;  %v2636_v50 = vadd.s32 %v2635_v5, %v2625_v1  ;;  %v2655_v51 = vsel %vm2654_vm4, 1, %v11229_v14  ;;  %v8236_v37 = vsub.s32 32, %v2736_v36 }
 0x2bb   :  { %v2540_v38 = vmul.f32 %v8223_v39, %v8223_v39  ;;  %v2657_v20 = vadd.s32 %v2655_v51, %v2653_v17  ;;  %v8241_v16 = vmul.f32 %v5204_v32, %v8210_v27  ;;  %v2660_v1 = vmul.u32 %v8119_v31, %v2606_v55 }
 0x2bc   :  { %v8234_v21 = vadd.s32 %v2636_v50, %v2627_v2  ;;  %v8244_v24 = vshrl.u32 %v2734_v9, 5  ;;  %v2742_v60 = vshll.u32 %v11208_v59, %v2736_v36  ;;  %v2743_v62 = vshrl.u32 %v11209_v44, %v8236_v37 }
 0x2bd   :  { %v2541_v12 = vmul.f32 -0.001358992, %v2540_v38  ;;  %v2548_v26 = vmul.f32 -0.00019511016, %v2540_v38  ;;  %v2658_v6 = vadd.s32 %v2657_v20, %v2647_v18  ;;  %v2746_v35 = vshrl.u32 %v11214_v13, %v8236_v37 }
 0x2be   :  { %vm2662_vm6 = vc.u32 %v8234_v21, %v8238_v48  ;;  %v2748_v30 = vshll.u32 %v11214_v13, %v2736_v36  ;;  %v2749_v31 = vshrl.u32 %v11215_v49, %v8236_v37  ;;  %vm8258_vm7 = vcmp.eq.s32.totalorder %v5276_v45, 1 }
 0x2bf   :  { %v2542_v3 = vadd.f32 0.041655596, %v2541_v12  ;;  %v2549_v34 = vadd.f32 0.008332121, %v2548_v26  ;;  %v2659_v58 = vadd.s32 %v2658_v6, %v2649_v15  ;;  %vm2562_vm8 = vcmp.eq.s32.totalorder %v8232_v11, 2 }
 0x2c0   :  { %v2740_v32 = vshrl.u32 %v11208_v59, %v8236_v37  ;;  %v2745_v55 = vshll.u32 %v11209_v44, %v2736_v36  ;;  %v2750_v2 = vor.u32 %v2749_v31, %v2748_v30  ;;  %v2751_v50 = vshll.u32 %v11215_v49, %v2736_v36 }
 0x2c1   :  { %v2543_v4 = vmul.f32 %v2542_v3, %v2540_v38  ;;  %v2550_v22 = vmul.f32 %v2549_v34, %v2540_v38  ;;  %v2663_v9 = vadd.s32 1, %v2659_v58  ;;  %v2752_v51 = vshrl.u32 %v11220_v52, %v8236_v37 }
 0x2c2   :  { %vm2558_vm9 = vcmp.lt.s32.totalorder %v8232_v11, 2  ;;  %v2739_v18 = vshll.u32 %v11219_v63, %v2736_v36  ;;  %vm2555_vm11 = vweird.f32 %v7772_v0  ;;  %v8275_v15 = vor.u32 %v2743_v62, %v2742_v60 }
 0x2c3   :  { %v2544_v5 = vadd.f32 -0.4999988, %v2543_v4  ;;  %v2551_v17 = vadd.f32 -0.16666654, %v2550_v22  ;;  %v2664_v26 = vsel %vm2662_vm6, %v2663_v9, %v2659_v58  ;;  %v8277_v3 = vor.u32 %v2746_v35, %v2745_v55 }
 0x2c4   :  { %v2665_v20 = vadd.s32 %v2664_v26, %v2660_v1  ;;  %v2753_v34 = vor.u32 %v2752_v51, %v2751_v50  ;;  %v8279_v22 = vor.u32 %v2740_v32, %v2739_v18  ;;  %vm2757_vm12 = vcmp.lt.s32.totalorder %v8244_v24, 4 }
 0x2c5   :  { %v2545_v45 = vmul.f32 %v2544_v5, %v2540_v38  ;;  %v2552_v12 = vmul.f32 %v2551_v17, %v2540_v38  ;;  %v5246_v38 = vsub.f32 1.0, %v8241_v16  ;;  %v11236_v58 = vperm.slane %v7883_v41, 2 }
 0x2c6   :  { %v2666_v1 = vadd.s32 536870912, %v2665_v20  ;;  %v2763_v60 = vsel %vm2757_vm12, %v2750_v2, 920167782  ;;  %v11239_v62 = vor.u32 8388608, %v8158_v7  ;;  %vm2754_vm14 = vcmp.lt.s32.totalorder %v8244_v24, 1 }
 0x2c7   :  { %v2546_v6 = vadd.f32 1.0, %v2545_v45  ;;  %v2553_v4 = vadd.f32 1.0, %v2552_v12  ;;  %vm8285_vm13 = vcmp.eq.s32.totalorder %v11236_v58, 1  ;;  %vm2755_vm15 = vcmp.lt.s32.totalorder %v8244_v24, 2 }
 0x2c8   :  { %v8293_v35 = vshll.u32 %v11239_v62, 8  ;;  %v8298_v16 = vshrl.u32 %v2666_v1, 30  ;;  %vm2756_vm0 = vcmp.lt.s32.totalorder %v8244_v24, 3  ;;  %v2766_v5 = vsel %vm2754_vm14, %v8275_v15, %v8277_v3 }
 0x2c9   :  { %v2554_v30 = vmul.f32 %v2553_v4, %v8223_v39  ;;  %v2563_v31 = vxor.u32 2147483648, %v2546_v6  ;;  %v2767_v7 = vsel %vm2757_vm12, %v2753_v34, 1326507024  ;;  %v2762_v39 = vsel %vm2754_vm14, %v8279_v22, %v8275_v15 }
 0x2ca   :  { %v2764_v9 = vsel %vm2756_vm0, %v8277_v3, %v2763_v60  ;;  %v2768_v32 = vsel %vm2756_vm0, %v2750_v2, %v2767_v7  ;;  %vm2559_vm1 = vcmp.eq.s32.totalorder %v8232_v11, 0  ;;  %v2668_v50 = vshll.u32 %v8298_v16, 30  ;;  %v1740_v11 = vpop.f32.mrf.mxu0 }
 0x2cb   :  { %v2560_v17 = vxor.u32 2147483648, %v2554_v30  ;;  %v2564_v55 = vsel %vm2562_vm8, %v2563_v31, %v2554_v30  ;;  %v2769_v51 = vsel %vm2755_vm15, %v2766_v5, %v2768_v32  ;;  %v2771_v12 = vand.u32 65535, %v8293_v35 }
 0x2cc   :  { %v2773_v26 = vand.u32 65535, %v2769_v51  ;;  %v2774_v18 = vshrl.u32 %v2769_v51, 16  ;;  %v5318_v34 = vsel %vm8258_vm7, %v5246_v38, %v8210_v27  ;;  %v8328_v4 = vsub.s32 %v2665_v20, %v2668_v50  ;;  %v8339_v20 = vpop.f32.mrf.mxu1 }
 0x2cd   :  { %v2561_v45 = vsel %vm2559_vm1, %v2546_v6, %v2560_v17  ;;  %v2765_v58 = vsel %vm2755_vm15, %v2762_v39, %v2764_v9  ;;  %v5277_v6 = vperm.slane %v7868_v10, 3  ;;  %v2772_v60 = vshrl.u32 %v8293_v35, 16  ;;  %v11240_v17 = vld [vmem:[#allocation146_spill] sm:$0xff] }
 0x2ce   :  { %v2565_v2 = vsel %vm2558_vm9, %v2561_v45, %v2564_v55  ;;  %v2776_v62 = vmul.u32 %v2774_v18, %v2771_v12  ;;  %v5349_v33 = vperm.slane %v7883_v41, 3  ;;  %vm2670_vm2 = vcmp.lt.s32.totalorder %v8328_v4, 0 }
 0x2cf   :  { %v2566_v1 = vsel %vm2555_vm11, nan, %v2565_v2  ;;  %v2671_v27 = vsub.s32 0, %v8328_v4  ;;  %v2775_v38 = vmul.u32 %v2773_v26, %v2771_v12  ;;  %v8341_v31 = vmul.u32 %v2773_v26, %v2772_v60 }
 0x2d0   :  { %v5205_v30 = vmul.f32 2.0, %v2566_v1  ;;  %v2779_v5 = vshll.u32 %v2776_v62, 16  ;;  %v2796_v7 = vshrl.u32 %v2765_v58, 16  ;;  %v1468_v39 = vadd.f32 %v7401_v43, %v11240_v17 }
 0x2d1   :  { %v2672_v32 = vsel %vm2670_vm2, %v2671_v27, %v8328_v4  ;;  %v2795_v55 = vand.u32 65535, %v2765_v58  ;;  %v5390_v50 = vsel %vm8285_vm13, %v7728_v61, %v5318_v34  ;;  %vm5298_vm3 = vcmp.eq.s32.totalorder %v5277_v6, 1 }
 0x2d2   :  { %v5226_v9 = vmul.f32 %v5205_v30, %v2566_v1  ;;  %v2673_v51 = vclz %v2672_v32  ;;  %vm2783_vm5 = vc.u32 %v2775_v38, %v2779_v5  ;;  %vm5370_vm4 = vcmp.eq.s32.totalorder %v5349_v33, 1  ;;  %v1742_v32 = vpop.f32.mrf.mxu0 }
 0x2d3   :  { %v2778_v26 = vmul.u32 %v2774_v18, %v2772_v60  ;;  %v2781_v2 = vshll.u32 %v8341_v31, 16  ;;  %v2784_v28 = vsel %vm2783_vm5, 1, %v11229_v14  ;;  %v2785_v43 = vadd.s32 %v2779_v5, %v2775_v38 }
 0x2d4   :  { %v5247_v45 = vsub.f32 1.0, %v5226_v9  ;;  %v6175_v47 = vadd.s32 4294967294, %v2673_v51  ;;  %v2798_v30 = vmul.u32 %v2796_v7, %v2771_v12  ;;  %v2661_v58 = vadd.s32 %v8238_v48, %v8234_v21  ;;  %v1755_v51 = vpop.f32.mrf.mxu1 }
 0x2d5   :  { %v2786_v27 = vadd.s32 %v2784_v28, %v2778_v26  ;;  %v2797_v36 = vmul.u32 %v2795_v55, %v2771_v12  ;;  %vm2787_vm7 = vc.u32 %v2785_v43, %v2781_v2  ;;  %v2799_v9 = vmul.u32 %v2795_v55, %v2772_v60 }
 0x2d6   :  { %v5319_v17 = vsel %vm5298_vm3, %v5247_v45, %v2566_v1  ;;  %vm6176_vm6 = vcmp.lt.s32.totalorder %v6175_v47, 0  ;;  %v2801_v34 = vshll.u32 %v2798_v30, 16  ;;  %v2788_v33 = vsel %vm2787_vm7, 1, %v11229_v14 }
 0x2d7   :  { %v5391_v61 = vsel %vm5370_vm4, %v7772_v0, %v5319_v17  ;;  %v2676_v18 = vsel %vm6176_vm6, 0, %v6175_v47  ;;  %v2738_v1 = vshrl.u32 %v11219_v63, %v8236_v37  ;;  %v2790_v21 = vadd.s32 %v2788_v33, %v2786_v27 }
 0x2d8   :  { %v5430_v6 = vrot.slane %v5391_v61, 4  ;;  %v2677_v38 = vsub.s32 32, %v2676_v18  ;;  %v2681_v5 = vsub.s32 4294967266, %v2676_v18  ;;  %v2780_v48 = vshrl.u32 %v2776_v62, 16 }
 0x2d9   :  { %v2800_v0 = vmul.u32 %v2796_v7, %v2772_v60  ;;  %vm2805_vm8 = vc.u32 %v2797_v36, %v2801_v34  ;;  %v2678_v12 = vshll.u32 %v8328_v4, %v2676_v18  ;;  %v2759_v26 = vsel %vm2757_vm12, %v8277_v3, 2102212464 }
 0x2da   :  { %v5441_v28 = vsel %vm5439_vm10, %v5390_v50, %v5430_v6  ;;  %v2679_v47 = vshrl.u32 %v2661_v58, %v2677_v38  ;;  %v2682_v45 = vadd.s32 127, %v2681_v5  ;;  %v2806_v55 = vsel %vm2805_vm8, 1, %v11229_v14 }
 0x2db   :  { %5461 = vst [vmem:[#allocation10 + $0x8] sm:$0xff] %v5441_v28  ;;  %v2803_v2 = vshll.u32 %v2799_v9, 16  ;;  %v2807_v43 = vadd.s32 %v2801_v34, %v2797_v36  ;;  %v2808_v37 = vadd.s32 %v2806_v55, %v2800_v0  ;;  %v2791_v50 = vadd.s32 %v2790_v21, %v2780_v48  ;;  %v11241_v28 = vld [vmem:[#allocation147_spill] sm:$0xff] }
 0x2dc   :  { %v2680_v17 = vor.u32 %v2679_v47, %v2678_v12  ;;  %v2683_v27 = vshll.u32 %v2682_v45, 23  ;;  %v8363_v62 = vadd.f32 %v1740_v11, %v1468_v39  ;;  %v2758_v4 = vsel %vm2754_vm14, %v2738_v1, %v8279_v22 }
 0x2dd   :  { %vm2809_vm9 = vc.u32 %v2807_v43, %v2803_v2  ;;  %v2782_v7 = vshrl.u32 %v8341_v31, 16  ;;  %v2691_v3 = vsub.s32 4, %v8298_v16  ;;  %v2760_v36 = vsel %vm2756_vm0, %v8275_v15, %v2759_v26 }
 0x2de   :  { %v2684_v60 = vor.u32 4788187, %v2683_v27  ;;  %v2810_v58 = vsel %vm2809_vm9, 1, %v11229_v14  ;;  %v2802_v61 = vshrl.u32 %v2798_v30, 16  ;;  %v2687_v39 = vcvt.s32.f32 %v2680_v17 }
 0x2df   :  { %v2812_v34 = vadd.s32 %v2810_v58, %v2808_v37  ;;  %v2792_v6 = vadd.s32 %v2791_v50, %v2782_v7  ;;  %v2880_v18 = vand.u32 2139095040, %v8363_v62  ;;  %v2804_v33 = vshrl.u32 %v2799_v9, 16 }
 0x2e0   :  { %v2685_v11 = vand.u32 2147483647, %v2684_v60  ;;  %vm2569_vm11 = vcmp.lt.s32.totalorder %v8084_v46, 0  ;;  %v2811_v31 = vadd.s32 %v2807_v43, %v2803_v2  ;;  %v2761_v5 = vsel %vm2755_vm15, %v2758_v4, %v2760_v36 }
 0x2e1   :  { %v2813_v32 = vadd.s32 %v2812_v34, %v2802_v61  ;;  %v2881_v51 = vshrl.u32 %v2880_v18, 23  ;;  %v2692_v38 = vsel %vm2569_vm11, %v2691_v3, %v8298_v16  ;;  %v2877_v30 = vand.u32 2147483647, %v8363_v62 }
 0x2e2   :  { %v2688_v22 = vmul.f32 %v2687_v39, %v2685_v11  ;;  %vm2817_vm12 = vc.u32 %v2792_v6, %v2811_v31  ;;  %v1481_v9 = vadd.f32 %v7431_v19, %v11241_v28  ;;  %v11242_v48 = vand.u32 2147483647, %v8084_v46 }
 0x2e3   :  { %v2814_v15 = vadd.s32 %v2813_v32, %v2804_v33  ;;  %v6180_v21 = vadd.s32 4294967169, %v2881_v51  ;;  %v2815_v16 = vmul.u32 %v8293_v35, %v2761_v5  ;;  %v2884_v26 = vand.u32 8388607, %v2877_v30 }
 0x2e4   :  { %v2689_v1 = vxor.u32 2147483648, %v2688_v22  ;;  %vm2568_vm13 = vcmp.le.f32.partialorder %v11242_v48, 0.7853982  ;;  %v8389_v2 = vadd.f32 %v8339_v20, %v1481_v9  ;;  %v8395_v18 = vadd.s32 %v2811_v31, %v2792_v6 }
 0x2e5   :  { %v2818_v0 = vadd.s32 1, %v2814_v15  ;;  %v2694_v47 = vsel %vm2568_vm13, 0, %v2692_v38  ;;  %v2887_v45 = vadd.s32 1, %v6180_v21  ;;  %v2885_v4 = vor.u32 8388608, %v2884_v26 }
 0x2e6   :  { %v2690_v12 = vsel %vm2569_vm11, %v2689_v1, %v2688_v22  ;;  %v2711_v37 = vadd.s32 3, %v2694_v47  ;;  %v10830_v7 = vand.u32 2147483647, %v8389_v2  ;;  %v3035_v58 = vand.u32 2139095040, %v8389_v2 }
 0x2e7   :  { %v2693_v24 = vsel %vm2568_vm13, %v8084_v46, %v2690_v12  ;;  %v2819_v55 = vsel %vm2817_vm12, %v2818_v0, %v2814_v15  ;;  %vm2888_vm14 = vcmp.gt.s32.totalorder %v2887_v45, 0  ;;  %v5278_v32 = vperm.slane %v7868_v10, 4 }
 0x2e8   :  { %v2695_v43 = vmul.f32 %v2693_v24, %v2693_v24  ;;  %v2820_v19 = vadd.s32 %v2819_v55, %v2815_v16  ;;  %v2889_v17 = vsel %vm2888_vm14, %v2887_v45, 0  ;;  %v8393_v34 = vand.u32 3, %v2711_v37 }
 0x2e9   :  { %v2891_v35 = vand.u32 31, %v2889_v17  ;;  %vm2724_vm15 = vcmp.lt.s32.totalorder %v8087_v8, 0  ;;  %v8399_v22 = vshll.u32 %v2885_v4, 8  ;;  %v3036_v51 = vshrl.u32 %v3035_v58, 23 }
 0x2ea   :  { %v2696_v27 = vmul.f32 -0.001358992, %v2695_v43  ;;  %v2703_v50 = vmul.f32 -0.00019511016, %v2695_v43  ;;  %v2821_v60 = vadd.s32 536870912, %v2820_v19  ;;  %v8407_v21 = vshrl.u32 %v2889_v17, 5 }
 0x2eb   :  { %v2892_v20 = vsub.s32 32, %v2891_v35  ;;  %v8403_v38 = vand.u32 8388607, %v10830_v7  ;;  %v2894_v6 = vshll.u32 %v11219_v63, %v2891_v35  ;;  %vm2714_vm1 = vcmp.eq.s32.totalorder %v8393_v34, 0 }
 0x2ec   :  { %v2697_v3 = vadd.f32 0.041655596, %v2696_v27  ;;  %v2704_v36 = vadd.f32 0.008332121, %v2703_v50  ;;  %v2822_v61 = vshrl.u32 %v2821_v60, 30  ;;  %v2897_v45 = vshll.u32 %v11208_v59, %v2891_v35 }
 0x2ed   :  { %v2895_v31 = vshrl.u32 %v11208_v59, %v2892_v20  ;;  %v2898_v28 = vshrl.u32 %v11209_v44, %v2892_v20  ;;  %v2901_v9 = vshrl.u32 %v11214_v13, %v2892_v20  ;;  %v11243_v47 = vand.u32 2147483647, %v8087_v8 }
 0x2ee   :  { %v2698_v11 = vmul.f32 %v2697_v3, %v2695_v43  ;;  %v2705_v39 = vmul.f32 %v2704_v36, %v2695_v43  ;;  %v2823_v33 = vshll.u32 %v2822_v61, 30  ;;  %v2900_v55 = vshll.u32 %v11209_v44, %v2891_v35 }
 0x2ef   :  { %vm8418_vm2 = vcmp.le.f32.partialorder %v11243_v47, 0.7853982  ;;  %v2903_v26 = vshll.u32 %v11214_v13, %v2891_v35  ;;  %v2846_v17 = vsub.s32 4, %v2822_v61  ;;  %v2907_v27 = vshrl.u32 %v11220_v52, %v2892_v20 }
 0x2f0   :  { %v2699_v5 = vadd.f32 -0.4999988, %v2698_v11  ;;  %v2706_v15 = vadd.f32 -0.16666654, %v2705_v39  ;;  %v8405_v1 = vsub.s32 %v2820_v19, %v2823_v33  ;;  %vm2717_vm3 = vcmp.eq.s32.totalorder %v8393_v34, 2 }
 0x2f1   :  { %v2896_v60 = vor.u32 %v2895_v31, %v2894_v6  ;;  %v2899_v4 = vor.u32 %v2898_v28, %v2897_v45  ;;  %vm2713_vm5 = vcmp.lt.s32.totalorder %v8393_v34, 2  ;;  %v2902_v11 = vor.u32 %v2901_v9, %v2900_v55 }
 0x2f2   :  { %v2700_v48 = vmul.f32 %v2699_v5, %v2695_v43  ;;  %v2707_v0 = vmul.f32 %v2706_v15, %v2695_v43  ;;  %vm2825_vm0 = vcmp.lt.s32.totalorder %v8405_v1, 0  ;;  %v2826_v12 = vsub.s32 0, %v8405_v1 }
 0x2f3   :  { %v2904_v43 = vshrl.u32 %v11215_v49, %v2892_v20  ;;  %v2906_v39 = vshll.u32 %v11215_v49, %v2891_v35  ;;  %vm2909_vm4 = vcmp.lt.s32.totalorder %v8407_v21, 1  ;;  %v2926_v5 = vand.u32 65535, %v8399_v22 }
 0x2f4   :  { %v2708_v19 = vadd.f32 1.0, %v2707_v0  ;;  %v2827_v37 = vsel %vm2825_vm0, %v2826_v12, %v8405_v1  ;;  %v2701_v3 = vadd.f32 1.0, %v2700_v48  ;;  %v8434_v15 = vshrl.u32 %v8399_v22, 16 }
 0x2f5   :  { %v2828_v50 = vclz %v2827_v37  ;;  %v2905_v58 = vor.u32 %v2904_v43, %v2903_v26  ;;  %v2847_v6 = vsel %vm2724_vm15, %v2846_v17, %v2822_v61  ;;  %v2908_v31 = vor.u32 %v2907_v27, %v2906_v39 }
 0x2f6   :  { %v2709_v36 = vmul.f32 %v2708_v19, %v2693_v24  ;;  %vm2912_vm6 = vcmp.lt.s32.totalorder %v8407_v21, 4  ;;  %vm2710_vm7 = vweird.f32 %v8084_v46  ;;  %vm2911_vm9 = vcmp.lt.s32.totalorder %v8407_v21, 3 }
 0x2f7   :  { %v6178_v33 = vadd.s32 4294967294, %v2828_v50  ;;  %v2917_v24 = vsel %vm2909_vm4, %v2896_v60, %v2899_v4  ;;  %v2918_v35 = vsel %vm2912_vm6, %v2905_v58, 920167782  ;;  %v2718_v28 = vxor.u32 2147483648, %v2701_v3 }
 0x2f8   :  { %v2715_v0 = vxor.u32 2147483648, %v2709_v36  ;;  %v2919_v48 = vsel %vm2911_vm9, %v2902_v11, %v2918_v35  ;;  %v6183_v61 = vadd.s32 4294967169, %v3036_v51  ;;  %v2893_v45 = vshrl.u32 %v11219_v63, %v2892_v20 }
 0x2f9   :  { %vm6179_vm8 = vcmp.lt.s32.totalorder %v6178_v33, 0  ;;  %vm2910_vm11 = vcmp.lt.s32.totalorder %v8407_v21, 2  ;;  %v2849_v26 = vsel %vm8418_vm2, 0, %v2847_v6  ;;  %v2921_v19 = vsel %vm2909_vm4, %v2899_v4, %v2902_v11 }
 0x2fa   :  { %v2831_v9 = vsel %vm6179_vm8, 0, %v6178_v33  ;;  %v2716_v55 = vsel %vm2714_vm1, %v2701_v3, %v2715_v0  ;;  %v2920_v43 = vsel %vm2910_vm11, %v2917_v24, %v2919_v48  ;;  %v2922_v20 = vsel %vm2912_vm6, %v2908_v31, 1326507024 }
 0x2fb   :  { %v2832_v12 = vsub.s32 32, %v2831_v9  ;;  %v2836_v47 = vsub.s32 4294967266, %v2831_v9  ;;  %v2833_v51 = vshll.u32 %v8405_v1, %v2831_v9  ;;  %v2719_v27 = vsel %vm2717_vm3, %v2718_v28, %v2709_v36 }
 0x2fc   :  { %v2914_v50 = vsel %vm2912_vm6, %v2902_v11, 2102212464  ;;  %v2923_v3 = vsel %vm2911_vm9, %v2905_v58, %v2922_v20  ;;  %v2951_v39 = vshrl.u32 %v2920_v43, 16  ;;  %v2720_v33 = vsel %vm2713_vm5, %v2716_v55, %v2719_v27 }
 0x2fd   :  { %v2834_v37 = vshrl.u32 %v8395_v18, %v2832_v12  ;;  %v2837_v17 = vadd.s32 127, %v2836_v47  ;;  %v2924_v18 = vsel %vm2910_vm11, %v2921_v19, %v2923_v3  ;;  %v2950_v24 = vand.u32 65535, %v2920_v43 }
 0x2fe   :  { %v2928_v6 = vand.u32 65535, %v2924_v18  ;;  %v2929_v31 = vshrl.u32 %v2924_v18, 16  ;;  %v2953_v35 = vmul.u32 %v2951_v39, %v2926_v5  ;;  %v5350_v36 = vperm.slane %v7883_v41, 4 }
 0x2ff   :  { %v2835_v1 = vor.u32 %v2834_v37, %v2833_v51  ;;  %v2838_v0 = vshll.u32 %v2837_v17, 23  ;;  %v2913_v11 = vsel %vm2909_vm4, %v2893_v45, %v2896_v60  ;;  %v3040_v58 = vor.u32 8388608, %v8403_v38 }
 0x300   :  { %v8477_v34 = vsel %vm2710_vm7, nan, %v2720_v33  ;;  %v2915_v9 = vsel %vm2911_vm9, %v2899_v4, %v2914_v50  ;;  %v2931_v48 = vmul.u32 %v2929_v31, %v2926_v5  ;;  %v2932_v12 = vmul.u32 %v2928_v6, %v8434_v15 }
 0x301   :  { %v2839_v28 = vor.u32 4788187, %v2838_v0  ;;  %v2842_v55 = vcvt.s32.f32 %v2835_v1  ;;  %v2866_v43 = vadd.s32 3, %v2849_v26  ;;  %v3042_v19 = vadd.s32 1, %v6183_v61 }
 0x302   :  { %v2930_v51 = vmul.u32 %v2928_v6, %v2926_v5  ;;  %v2934_v37 = vshll.u32 %v2931_v48, 16  ;;  %v2954_v60 = vmul.u32 %v2950_v24, %v8434_v15  ;;  %v2956_v45 = vshll.u32 %v2953_v35, 16 }
 0x303   :  { %v2840_v47 = vand.u32 2147483647, %v2839_v28  ;;  %v5206_v17 = vmul.f32 2.0, %v8477_v34  ;;  %v8486_v27 = vsel %vm2910_vm11, %v2913_v11, %v2915_v9  ;;  %v2952_v4 = vmul.u32 %v2950_v24, %v2926_v5 }
 0x304   :  { %v2933_v50 = vmul.u32 %v2929_v31, %v8434_v15  ;;  %v2936_v3 = vshll.u32 %v2932_v12, 16  ;;  %vm2938_vm12 = vc.u32 %v2930_v51, %v2934_v37  ;;  %v2940_v33 = vadd.s32 %v2934_v37, %v2930_v51 }
 0x305   :  { %v2843_v20 = vmul.f32 %v2842_v55, %v2840_v47  ;;  %v2935_v61 = vshrl.u32 %v2931_v48, 16  ;;  %v2939_v1 = vsel %vm2938_vm12, 1, %v11229_v14  ;;  %v2955_v0 = vmul.u32 %v2951_v39, %v8434_v15 }
 0x306   :  { %v2941_v18 = vadd.s32 %v2939_v1, %v2933_v50  ;;  %vm2942_vm13 = vc.u32 %v2940_v33, %v2936_v3  ;;  %v2958_v6 = vshll.u32 %v2954_v60, 16  ;;  %vm2960_vm14 = vc.u32 %v2952_v4, %v2956_v45 }
 0x307   :  { %v2844_v26 = vxor.u32 2147483648, %v2843_v20  ;;  %v2943_v5 = vsel %vm2942_vm13, 1, %v11229_v14  ;;  %v2961_v31 = vsel %vm2960_vm14, 1, %v11229_v14  ;;  %v2962_v24 = vadd.s32 %v2956_v45, %v2952_v4 }
 0x308   :  { %v2945_v11 = vadd.s32 %v2943_v5, %v2941_v18  ;;  %v2963_v9 = vadd.s32 %v2961_v31, %v2955_v0  ;;  %vm3043_vm0 = vcmp.gt.s32.totalorder %v3042_v19, 0  ;;  %v8501_v15 = vmul.f32 %v5206_v17, %v8477_v34 }
 0x309   :  { %v2845_v21 = vsel %vm2724_vm15, %v2844_v26, %v2843_v20  ;;  %vm2964_vm15 = vc.u32 %v2962_v24, %v2958_v6  ;;  %v3044_v48 = vsel %vm3043_vm0, %v3042_v19, 0  ;;  %v2937_v47 = vshrl.u32 %v2932_v12, 16 }
 0x30a   :  { %v8498_v28 = vsel %vm8418_vm2, %v8087_v8, %v2845_v21  ;;  %v2946_v55 = vadd.s32 %v2945_v11, %v2935_v61  ;;  %v2965_v51 = vsel %vm2964_vm15, 1, %v11229_v14  ;;  %v3046_v37 = vand.u32 31, %v3044_v48  ;;  %v8514_v61 = vpop.f32.mrf.mxu2 }
 0x30b   :  { %v2850_v39 = vmul.f32 %v8498_v28, %v8498_v28  ;;  %v2957_v20 = vshrl.u32 %v2953_v35, 16  ;;  %v2967_v4 = vadd.s32 %v2965_v51, %v2963_v9  ;;  %v8506_v50 = vand.u32 3, %v2866_v43  ;;  %v8598_v35 = vpop.f32.mrf.mxu3 }
 0x30c   :  { %v8508_v3 = vadd.s32 %v2946_v55, %v2937_v47  ;;  %v8510_v17 = vadd.s32 %v2962_v24, %v2958_v6  ;;  %v8512_v33 = vsub.s32 32, %v3046_v37  ;;  %v2959_v19 = vshrl.u32 %v2954_v60, 16 }
 0x30d   :  { %v2851_v45 = vmul.f32 -0.001358992, %v2850_v39  ;;  %v2858_v16 = vmul.f32 -0.00019511016, %v2850_v39  ;;  %v2968_v12 = vadd.s32 %v2967_v4, %v2957_v20  ;;  %v5248_v0 = vsub.f32 1.0, %v8501_v15 }
 0x30e   :  { %vm8519_vm1 = vcmp.eq.s32.totalorder %v5278_v32, 1  ;;  %v2970_v43 = vmul.u32 %v8399_v22, %v8486_v27  ;;  %vm2972_vm2 = vc.u32 %v8508_v3, %v8510_v17  ;;  %v8527_v18 = vshrl.u32 %v3044_v48, 5 }
 0x30f   :  { %v2852_v26 = vadd.f32 0.041655596, %v2851_v45  ;;  %v2859_v1 = vadd.f32 0.008332121, %v2858_v16  ;;  %v2969_v21 = vadd.s32 %v2968_v12, %v2959_v19  ;;  %v3050_v5 = vshrl.u32 %v11208_v59, %v8512_v33 }
 0x310   :  { %v3053_v32 = vshrl.u32 %v11209_v44, %v8512_v33  ;;  %v3056_v31 = vshrl.u32 %v11214_v13, %v8512_v33  ;;  %v3058_v24 = vshll.u32 %v11214_v13, %v3046_v37  ;;  %v3059_v22 = vshrl.u32 %v11215_v49, %v8512_v33 }
 0x311   :  { %v2853_v60 = vmul.f32 %v2852_v26, %v2850_v39  ;;  %v2860_v6 = vmul.f32 %v2859_v1, %v2850_v39  ;;  %v2973_v9 = vadd.s32 1, %v2969_v21  ;;  %v3049_v15 = vshll.u32 %v11219_v63, %v3046_v37 }
 0x312   :  { %v3052_v48 = vshll.u32 %v11208_v59, %v3046_v37  ;;  %v3055_v47 = vshll.u32 %v11209_v44, %v3046_v37  ;;  %v3060_v55 = vor.u32 %v3059_v22, %v3058_v24  ;;  %v3062_v51 = vshrl.u32 %v11220_v52, %v8512_v33 }
 0x313   :  { %v2854_v27 = vadd.f32 -0.4999988, %v2853_v60  ;;  %v2861_v11 = vadd.f32 -0.16666654, %v2860_v6  ;;  %vm2868_vm3 = vcmp.lt.s32.totalorder %v8506_v50, 2  ;;  %v2974_v20 = vsel %vm2972_vm2, %v2973_v9, %v2969_v21 }
 0x314   :  { %v3061_v4 = vshll.u32 %v11215_v49, %v3046_v37  ;;  %vm2865_vm5 = vweird.f32 %v8087_v8  ;;  %v2975_v26 = vadd.s32 %v2974_v20, %v2970_v43  ;;  %v8549_v1 = vor.u32 %v3050_v5, %v3049_v15  ;;  %v1768_v37 = vpop.f32.mrf.mxu2 }
 0x315   :  { %v2855_v45 = vmul.f32 %v2854_v27, %v2850_v39  ;;  %v2862_v16 = vmul.f32 %v2861_v11, %v2850_v39  ;;  %v8551_v19 = vor.u32 %v3053_v32, %v3052_v48  ;;  %v8553_v12 = vor.u32 %v3056_v31, %v3055_v47 }
 0x316   :  { %vm8557_vm4 = vcmp.eq.s32.totalorder %v5350_v36, 1  ;;  %v3063_v21 = vor.u32 %v3062_v51, %v3061_v4  ;;  %vm3067_vm6 = vcmp.lt.s32.totalorder %v8527_v18, 4  ;;  %vm2869_vm7 = vcmp.eq.s32.totalorder %v8506_v50, 0 }
 0x317   :  { %v2856_v60 = vadd.f32 1.0, %v2855_v45  ;;  %v2863_v6 = vadd.f32 1.0, %v2862_v16  ;;  %vm2872_vm8 = vcmp.eq.s32.totalorder %v8506_v50, 2  ;;  %v2976_v43 = vadd.s32 536870912, %v2975_v26 }
 0x318   :  { %v3073_v5 = vsel %vm3067_vm6, %v3060_v55, 920167782  ;;  %vm3064_vm9 = vcmp.lt.s32.totalorder %v8527_v18, 1  ;;  %vm3066_vm11 = vcmp.lt.s32.totalorder %v8527_v18, 3  ;;  %v8585_v27 = vsel %vm8519_vm1, %v5248_v0, %v8477_v34 }
 0x319   :  { %v2864_v32 = vmul.f32 %v2863_v6, %v8498_v28  ;;  %v2873_v36 = vxor.u32 2147483648, %v2856_v60  ;;  %v8569_v31 = vshrl.u32 %v2976_v43, 30  ;;  %v3072_v24 = vsel %vm3064_vm9, %v8549_v1, %v8551_v19 }
 0x31a   :  { %v3074_v22 = vsel %vm3066_vm11, %v8553_v12, %v3073_v5  ;;  %v3076_v28 = vsel %vm3064_vm9, %v8551_v19, %v8553_v12  ;;  %v3077_v9 = vsel %vm3067_vm6, %v3063_v21, 1326507024  ;;  %v8591_v15 = vshll.u32 %v3040_v58, 8 }
 0x31b   :  { %v2870_v11 = vxor.u32 2147483648, %v2864_v32  ;;  %v5279_v48 = vperm.slane %v7868_v10, 5  ;;  %v2978_v47 = vshll.u32 %v8569_v31, 30  ;;  %vm3065_vm12 = vcmp.lt.s32.totalorder %v8527_v18, 2 }
 0x31c   :  { %v3078_v51 = vsel %vm3066_vm11, %v3060_v55, %v3077_v9  ;;  %v2874_v0 = vsel %vm2872_vm8, %v2873_v36, %v2864_v32  ;;  %v3075_v38 = vsel %vm3065_vm12, %v3072_v24, %v3074_v22  ;;  %v5351_v16 = vperm.slane %v7883_v41, 5  ;;  %v11250_v32 = vld [vmem:[#allocation149_spill] sm:$0xff]  ;;  %v11251_v36 = vld [vmem:[#allocation148_spill] sm:$0xff] }
 0x31d   :  { %v2871_v34 = vsel %vm2869_vm7, %v2856_v60, %v2870_v11  ;;  %v3079_v58 = vsel %vm3065_vm12, %v3076_v28, %v3078_v51  ;;  %v2979_v55 = vsub.s32 %v2975_v26, %v2978_v47  ;;  %v3081_v60 = vand.u32 65535, %v8591_v15 }
 0x31e   :  { %v2875_v45 = vsel %vm2868_vm3, %v2871_v34, %v2874_v0  ;;  %v3083_v20 = vand.u32 65535, %v3079_v58  ;;  %v3082_v6 = vshrl.u32 %v8591_v15, 16  ;;  %v3084_v21 = vshrl.u32 %v3079_v58, 16 }
 0x31f   :  { %v2876_v4 = vsel %vm2865_vm5, nan, %v2875_v45  ;;  %vm2980_vm13 = vcmp.lt.s32.totalorder %v2979_v55, 0  ;;  %v2981_v43 = vsub.s32 0, %v2979_v55  ;;  %v3106_v5 = vshrl.u32 %v3075_v38, 16 }
 0x320   :  { %v5207_v37 = vmul.f32 2.0, %v2876_v4  ;;  %v1494_v50 = vadd.f32 %v7434_v42, %v11250_v32  ;;  %v1507_v24 = vadd.f32 %v7443_v56, %v11251_v36  ;;  %v3086_v26 = vmul.u32 %v3084_v21, %v3081_v60  ;;  %v1781_v32 = vpop.f32.mrf.mxu3 }
 0x321   :  { %v8619_v22 = vmul.u32 %v3083_v20, %v3082_v6  ;;  %v5392_v28 = vsel %vm8557_vm4, %v8084_v46, %v8585_v27  ;;  %v2982_v9 = vsel %vm2980_vm13, %v2981_v43, %v2979_v55  ;;  %v3105_v47 = vand.u32 65535, %v3075_v38 }
 0x322   :  { %v5228_v11 = vmul.f32 %v5207_v37, %v2876_v4  ;;  %vm5300_vm14 = vcmp.eq.s32.totalorder %v5279_v48, 1  ;;  %v2983_v51 = vclz %v2982_v9  ;;  %v3085_v34 = vmul.u32 %v3083_v20, %v3081_v60 }
 0x323   :  { %v3089_v0 = vshll.u32 %v3086_v26, 16  ;;  %vm8625_vm0 = vcmp.eq.s32.totalorder %v5351_v16, 1  ;;  %v3088_v56 = vmul.u32 %v3084_v21, %v3082_v6  ;;  %v3108_v45 = vmul.u32 %v3106_v5, %v3081_v60 }
 0x324   :  { %v5249_v58 = vsub.f32 1.0, %v5228_v11  ;;  %v6181_v36 = vadd.s32 4294967294, %v2983_v51  ;;  %v3091_v7 = vshll.u32 %v8619_v22, 16  ;;  %v2971_v27 = vadd.s32 %v8510_v17, %v8508_v3 }
 0x325   :  { %vm3093_vm15 = vc.u32 %v3085_v34, %v3089_v0  ;;  %v3095_v46 = vadd.s32 %v3089_v0, %v3085_v34  ;;  %v3109_v38 = vmul.u32 %v3105_v47, %v3082_v6  ;;  %v3111_v11 = vshll.u32 %v3108_v45, 16 }
 0x326   :  { %v5321_v39 = vsel %vm5300_vm14, %v5249_v58, %v2876_v4  ;;  %v3094_v48 = vsel %vm3093_vm15, 1, %v11229_v14  ;;  %vm6182_vm1 = vcmp.lt.s32.totalorder %v6181_v36, 0  ;;  %v3107_v34 = vmul.u32 %v3105_v47, %v3081_v60 }
 0x327   :  { %v5393_v16 = vsel %vm8625_vm0, %v8087_v8, %v5321_v39  ;;  %v3096_v20 = vadd.s32 %v3094_v48, %v3088_v56  ;;  %vm3097_vm2 = vc.u32 %v3095_v46, %v3091_v7  ;;  %v2986_v37 = vsel %vm6182_vm1, 0, %v6181_v36 }
 0x328   :  { %v5431_v21 = vrot.slane %v5393_v16, 4  ;;  %v3098_v43 = vsel %vm3097_vm2, 1, %v11229_v14  ;;  %v2987_v9 = vsub.s32 32, %v2986_v37  ;;  %v2991_v4 = vsub.s32 4294967266, %v2986_v37 }
 0x329   :  { %v3100_v51 = vadd.s32 %v3098_v43, %v3096_v20  ;;  %v3048_v17 = vshrl.u32 %v11219_v63, %v8512_v33  ;;  %v3090_v0 = vshrl.u32 %v3086_v26, 16  ;;  %v3110_v58 = vmul.u32 %v3106_v5, %v3082_v6 }
 0x32a   :  { %v5442_v3 = vsel %vm5439_vm10, %v5392_v28, %v5431_v21  ;;  %v2988_v8 = vshll.u32 %v2979_v55, %v2986_v37  ;;  %v2989_v42 = vshrl.u32 %v2971_v27, %v2987_v9  ;;  %v2992_v7 = vadd.s32 127, %v2991_v4 }
 0x32b   :  { %5462 = vst [vmem:[#allocation10 + $0x10] sm:$0xff] %v5442_v3  ;;  %vm3115_vm3 = vc.u32 %v3107_v34, %v3111_v11  ;;  %v3069_v56 = vsel %vm3067_vm6, %v8553_v12, 2102212464  ;;  %v3113_v32 = vshll.u32 %v3109_v38, 16  ;;  %v3117_v60 = vadd.s32 %v3111_v11, %v3107_v34 }
 0x32c   :  { %v3116_v36 = vsel %vm3115_vm3, 1, %v11229_v14  ;;  %v2990_v47 = vor.u32 %v2989_v42, %v2988_v8  ;;  %v2993_v28 = vshll.u32 %v2992_v7, 23  ;;  %v3101_v46 = vadd.s32 %v3100_v51, %v3090_v0 }
 0x32d   :  { %v3118_v39 = vadd.s32 %v3116_v36, %v3110_v58  ;;  %vm3119_vm5 = vc.u32 %v3117_v60, %v3113_v32  ;;  %v8645_v33 = vadd.f32 %v8514_v61, %v1494_v50  ;;  %v8648_v55 = vadd.f32 %v8598_v35, %v1507_v24 }
 0x32e   :  { %v2994_v6 = vor.u32 4788187, %v2993_v28  ;;  %v3068_v12 = vsel %vm3064_vm9, %v3048_v17, %v8549_v1  ;;  %v3092_v5 = vshrl.u32 %v8619_v22, 16  ;;  %v3120_v26 = vsel %vm3119_vm5, 1, %v11229_v14 }
 0x32f   :  { %v3001_v27 = vsub.s32 4, %v8569_v31  ;;  %v3070_v48 = vsel %vm3066_vm11, %v8551_v19, %v3069_v56  ;;  %v3112_v61 = vshrl.u32 %v3108_v45, 16  ;;  %v3122_v50 = vadd.s32 %v3120_v26, %v3118_v39 }
 0x330   :  { %v2995_v16 = vand.u32 2147483647, %v2994_v6  ;;  %v2997_v35 = vcvt.s32.f32 %v2990_v47  ;;  %v3102_v24 = vadd.s32 %v3101_v46, %v3092_v5  ;;  %v3190_v20 = vand.u32 2139095040, %v8645_v33 }
 0x331   :  { %v3114_v21 = vshrl.u32 %v3109_v38, 16  ;;  %v3123_v37 = vadd.s32 %v3122_v50, %v3112_v61  ;;  %vm2879_vm4 = vcmp.lt.s32.totalorder %v8363_v62, 0  ;;  %v3121_v22 = vadd.s32 %v3117_v60, %v3113_v32 }
 0x332   :  { %v2998_v1 = vmul.f32 %v2997_v35, %v2995_v16  ;;  %v3191_v43 = vshrl.u32 %v3190_v20, 23  ;;  %v3002_v11 = vsel %vm2879_vm4, %v3001_v27, %v8569_v31  ;;  %v3071_v9 = vsel %vm3065_vm12, %v3068_v12, %v3070_v48 }
 0x333   :  { %v3124_v19 = vadd.s32 %v3123_v37, %v3114_v21  ;;  %v3187_v45 = vand.u32 2147483647, %v8645_v33  ;;  %vm3127_vm6 = vc.u32 %v3102_v24, %v3121_v22  ;;  %vm2878_vm7 = vcmp.le.f32.partialorder %v2877_v30, 0.7853982 }
 0x334   :  { %v2999_v4 = vxor.u32 2147483648, %v2998_v1  ;;  %v6186_v51 = vadd.s32 4294967169, %v3191_v43  ;;  %v3004_v3 = vsel %vm2878_vm7, 0, %v3002_v11  ;;  %v3125_v17 = vmul.u32 %v8591_v15, %v3071_v9 }
 0x335   :  { %v3128_v38 = vadd.s32 1, %v3124_v19  ;;  %v3194_v18 = vand.u32 8388607, %v3187_v45  ;;  %v3021_v7 = vadd.s32 3, %v3004_v3  ;;  %v3342_v28 = vand.u32 2147483647, %v8648_v55 }
 0x336   :  { %v3000_v34 = vsel %vm2879_vm4, %v2999_v4, %v2998_v1  ;;  %v3197_v0 = vadd.s32 1, %v6186_v51  ;;  %v3345_v15 = vand.u32 2139095040, %v8648_v55  ;;  %v8675_v48 = vadd.s32 %v3121_v22, %v3102_v24 }
 0x337   :  { %v3003_v31 = vsel %vm2878_vm7, %v8363_v62, %v3000_v34  ;;  %v3129_v58 = vsel %vm3127_vm6, %v3128_v38, %v3124_v19  ;;  %v3195_v60 = vor.u32 8388608, %v3194_v18  ;;  %v8673_v12 = vand.u32 3, %v3021_v7 }
 0x338   :  { %v3005_v8 = vmul.f32 %v3003_v31, %v3003_v31  ;;  %v3130_v42 = vadd.s32 %v3129_v58, %v3125_v17  ;;  %vm3198_vm8 = vcmp.gt.s32.totalorder %v3197_v0, 0  ;;  %v5280_v50 = vperm.slane %v7868_v10, 6 }
 0x339   :  { %v3199_v56 = vsel %vm3198_vm8, %v3197_v0, 0  ;;  %vm3034_vm9 = vcmp.lt.s32.totalorder %v8389_v2, 0  ;;  %v8679_v16 = vshll.u32 %v3195_v60, 8  ;;  %v3346_v35 = vshrl.u32 %v3345_v15, 23 }
 0x33a   :  { %v3006_v32 = vmul.f32 -0.001358992, %v3005_v8  ;;  %v3013_v36 = vmul.f32 -0.00019511016, %v3005_v8  ;;  %v3131_v30 = vadd.s32 536870912, %v3130_v42  ;;  %v3201_v47 = vand.u32 31, %v3199_v56 }
 0x33b   :  { %v8683_v20 = vand.u32 8388607, %v3342_v28  ;;  %v8687_v43 = vshrl.u32 %v3199_v56, 5  ;;  %vm3024_vm12 = vcmp.eq.s32.totalorder %v8673_v12, 0  ;;  %v11254_v38 = vand.u32 2147483647, %v8389_v2 }
 0x33c   :  { %v3007_v46 = vadd.f32 0.041655596, %v3006_v32  ;;  %v3014_v39 = vadd.f32 0.008332121, %v3013_v36  ;;  %v3132_v6 = vshrl.u32 %v3131_v30, 30  ;;  %v3202_v5 = vsub.s32 32, %v3201_v47 }
 0x33d   :  { %v3204_v24 = vshll.u32 %v11219_v63, %v3201_v47  ;;  %vm8698_vm13 = vcmp.le.f32.partialorder %v11254_v38, 0.7853982  ;;  %v3207_v3 = vshll.u32 %v11208_v59, %v3201_v47  ;;  %v3210_v17 = vshll.u32 %v11209_v44, %v3201_v47 }
 0x33e   :  { %v3008_v26 = vmul.f32 %v3007_v46, %v3005_v8  ;;  %v3015_v27 = vmul.f32 %v3014_v39, %v3005_v8  ;;  %v3133_v61 = vshll.u32 %v3132_v6, 30  ;;  %v3205_v22 = vshrl.u32 %v11208_v59, %v3202_v5 }
 0x33f   :  { %v3208_v11 = vshrl.u32 %v11209_v44, %v3202_v5  ;;  %v3211_v9 = vshrl.u32 %v11214_v13, %v3202_v5  ;;  %v3213_v0 = vshll.u32 %v11214_v13, %v3201_v47  ;;  %v3214_v58 = vshrl.u32 %v11215_v49, %v3202_v5 }
 0x340   :  { %v3009_v21 = vadd.f32 -0.4999988, %v3008_v26  ;;  %v3016_v37 = vadd.f32 -0.16666654, %v3015_v27  ;;  %v8685_v1 = vsub.s32 %v3130_v42, %v3133_v61  ;;  %v3156_v42 = vsub.s32 4, %v3132_v6 }
 0x341   :  { %v3217_v7 = vshrl.u32 %v11220_v52, %v3202_v5  ;;  %vm3027_vm14 = vcmp.eq.s32.totalorder %v8673_v12, 2  ;;  %v3206_v32 = vor.u32 %v3205_v22, %v3204_v24  ;;  %v3209_v36 = vor.u32 %v3208_v11, %v3207_v3 }
 0x342   :  { %v3010_v19 = vmul.f32 %v3009_v21, %v3005_v8  ;;  %v3017_v4 = vmul.f32 %v3016_v37, %v3005_v8  ;;  %vm3135_vm11 = vcmp.lt.s32.totalorder %v8685_v1, 0  ;;  %v3136_v51 = vsub.s32 0, %v8685_v1 }
 0x343   :  { %v3215_v30 = vor.u32 %v3214_v58, %v3213_v0  ;;  %vm3023_vm0 = vcmp.lt.s32.totalorder %v8673_v12, 2  ;;  %v3212_v46 = vor.u32 %v3211_v9, %v3210_v17  ;;  %v3216_v39 = vshll.u32 %v11215_v49, %v3201_v47 }
 0x344   :  { %v3018_v18 = vadd.f32 1.0, %v3017_v4  ;;  %v3137_v8 = vsel %vm3135_vm11, %v3136_v51, %v8685_v1  ;;  %v3011_v60 = vadd.f32 1.0, %v3010_v19  ;;  %vm3219_vm15 = vcmp.lt.s32.totalorder %v8687_v43, 1 }
 0x345   :  { %v3138_v56 = vclz %v3137_v8  ;;  %v3236_v27 = vand.u32 65535, %v8679_v16  ;;  %v8714_v61 = vshrl.u32 %v8679_v16, 16  ;;  %v3157_v37 = vsel %vm3034_vm9, %v3156_v42, %v3132_v6 }
 0x346   :  { %v3019_v15 = vmul.f32 %v3018_v18, %v3003_v31  ;;  %v3218_v24 = vor.u32 %v3217_v7, %v3216_v39  ;;  %vm3222_vm1 = vcmp.lt.s32.totalorder %v8687_v43, 4  ;;  %vm3020_vm2 = vweird.f32 %v8363_v62 }
 0x347   :  { %v6184_v26 = vadd.s32 4294967294, %v3138_v56  ;;  %vm3221_vm5 = vcmp.lt.s32.totalorder %v8687_v43, 3  ;;  %v3227_v31 = vsel %vm3219_vm15, %v3206_v32, %v3209_v36  ;;  %v3228_v47 = vsel %vm3222_vm1, %v3215_v30, 920167782 }
 0x348   :  { %v3025_v21 = vxor.u32 2147483648, %v3019_v15  ;;  %v3028_v22 = vxor.u32 2147483648, %v3011_v60  ;;  %v3229_v9 = vsel %vm3221_vm5, %v3212_v46, %v3228_v47  ;;  %v6189_v6 = vadd.s32 4294967169, %v3346_v35 }
 0x349   :  { %vm6185_vm3 = vcmp.lt.s32.totalorder %v6184_v26, 0  ;;  %v3203_v51 = vshrl.u32 %v11219_v63, %v3202_v5  ;;  %vm3220_vm4 = vcmp.lt.s32.totalorder %v8687_v43, 2  ;;  %v3159_v3 = vsel %vm8698_vm13, 0, %v3157_v37 }
 0x34a   :  { %v3141_v11 = vsel %vm6185_vm3, 0, %v6184_v26  ;;  %v3026_v38 = vsel %vm3024_vm12, %v3011_v60, %v3025_v21  ;;  %v3230_v17 = vsel %vm3220_vm4, %v3227_v31, %v3229_v9  ;;  %v3231_v0 = vsel %vm3219_vm15, %v3209_v36, %v3212_v46 }
 0x34b   :  { %v3142_v19 = vsub.s32 32, %v3141_v11  ;;  %v3146_v4 = vsub.s32 4294967266, %v3141_v11  ;;  %v3143_v35 = vshll.u32 %v8685_v1, %v3141_v11  ;;  %v3232_v5 = vsel %vm3222_vm1, %v3218_v24, 1326507024 }
 0x34c   :  { %v3029_v8 = vsel %vm3027_vm14, %v3028_v22, %v3019_v15  ;;  %v3224_v42 = vsel %vm3222_vm1, %v3212_v46, 2102212464  ;;  %v3233_v7 = vsel %vm3221_vm5, %v3215_v30, %v3232_v5  ;;  %v3261_v56 = vshrl.u32 %v3230_v17, 16 }
 0x34d   :  { %v3144_v58 = vshrl.u32 %v8675_v48, %v3142_v19  ;;  %v3147_v18 = vadd.s32 127, %v3146_v4  ;;  %v3030_v60 = vsel %vm3023_vm0, %v3026_v38, %v3029_v8  ;;  %v3234_v48 = vsel %vm3220_vm4, %v3231_v0, %v3233_v7 }
 0x34e   :  { %v3238_v26 = vand.u32 65535, %v3234_v48  ;;  %v3239_v21 = vshrl.u32 %v3234_v48, 16  ;;  %v3260_v37 = vand.u32 65535, %v3230_v17  ;;  %v3263_v24 = vmul.u32 %v3261_v56, %v3236_v27 }
 0x34f   :  { %v3145_v1 = vor.u32 %v3144_v58, %v3143_v35  ;;  %v3148_v39 = vshll.u32 %v3147_v18, 23  ;;  %v5352_v15 = vperm.slane %v7883_v41, 6  ;;  %v3223_v46 = vsel %vm3219_vm15, %v3203_v51, %v3206_v32 }
 0x350   :  { %v3350_v30 = vor.u32 8388608, %v8683_v20  ;;  %v8757_v12 = vsel %vm3020_vm2, nan, %v3030_v60  ;;  %v3225_v47 = vsel %vm3221_vm5, %v3209_v36, %v3224_v42  ;;  %v3241_v22 = vmul.u32 %v3239_v21, %v3236_v27 }
 0x351   :  { %v3149_v31 = vor.u32 4788187, %v3148_v39  ;;  %v3242_v11 = vmul.u32 %v3238_v26, %v8714_v61  ;;  %v3152_v19 = vcvt.s32.f32 %v3145_v1  ;;  %v3176_v4 = vadd.s32 3, %v3159_v3 }
 0x352   :  { %v3352_v38 = vadd.s32 1, %v6189_v6  ;;  %v3240_v17 = vmul.u32 %v3238_v26, %v3236_v27  ;;  %v3244_v0 = vshll.u32 %v3241_v22, 16  ;;  %v3264_v32 = vmul.u32 %v3260_v37, %v8714_v61 }
 0x353   :  { %v3150_v9 = vand.u32 2147483647, %v3149_v31  ;;  %v3266_v51 = vshll.u32 %v3263_v24, 16  ;;  %v5208_v35 = vmul.f32 2.0, %v8757_v12  ;;  %v8766_v18 = vsel %vm3220_vm4, %v3223_v46, %v3225_v47 }
 0x354   :  { %v3262_v36 = vmul.u32 %v3260_v37, %v3236_v27  ;;  %v3243_v5 = vmul.u32 %v3239_v21, %v8714_v61  ;;  %v3246_v8 = vshll.u32 %v3242_v11, 16  ;;  %vm3248_vm6 = vc.u32 %v3240_v17, %v3244_v0 }
 0x355   :  { %v3153_v58 = vmul.f32 %v3152_v19, %v3150_v9  ;;  %v3250_v42 = vadd.s32 %v3244_v0, %v3240_v17  ;;  %v3245_v6 = vshrl.u32 %v3241_v22, 16  ;;  %v3249_v7 = vsel %vm3248_vm6, 1, %v11229_v14 }
 0x356   :  { %v3265_v60 = vmul.u32 %v3261_v56, %v8714_v61  ;;  %v3251_v1 = vadd.s32 %v3249_v7, %v3243_v5  ;;  %v3268_v39 = vshll.u32 %v3264_v32, 16  ;;  %vm3270_vm8 = vc.u32 %v3262_v36, %v3266_v51 }
 0x357   :  { %v3154_v3 = vxor.u32 2147483648, %v3153_v58  ;;  %vm3252_vm7 = vc.u32 %v3250_v42, %v3246_v8  ;;  %v3271_v48 = vsel %vm3270_vm8, 1, %v11229_v14  ;;  %v3272_v26 = vadd.s32 %v3266_v51, %v3262_v36 }
 0x358   :  { %v3253_v27 = vsel %vm3252_vm7, 1, %v11229_v14  ;;  %v3273_v31 = vadd.s32 %v3271_v48, %v3265_v60  ;;  %vm3353_vm11 = vcmp.gt.s32.totalorder %v3352_v38, 0  ;;  %v8781_v61 = vmul.f32 %v5208_v35, %v8757_v12 }
 0x359   :  { %v3155_v43 = vsel %vm3034_vm9, %v3154_v3, %v3153_v58  ;;  %v3255_v37 = vadd.s32 %v3253_v27, %v3251_v1  ;;  %vm3274_vm9 = vc.u32 %v3272_v26, %v3268_v39  ;;  %v3354_v46 = vsel %vm3353_vm11, %v3352_v38, 0 }
 0x35a   :  { %v8778_v21 = vsel %vm8698_vm13, %v8389_v2, %v3155_v43  ;;  %v3247_v47 = vshrl.u32 %v3242_v11, 16  ;;  %v3275_v9 = vsel %vm3274_vm9, 1, %v11229_v14  ;;  %v3356_v19 = vand.u32 31, %v3354_v46 }
 0x35b   :  { %v3160_v56 = vmul.f32 %v8778_v21, %v8778_v21  ;;  %v3256_v22 = vadd.s32 %v3255_v37, %v3245_v6  ;;  %v3267_v0 = vshrl.u32 %v3263_v24, 16  ;;  %v3277_v51 = vadd.s32 %v3275_v9, %v3273_v31 }
 0x35c   :  { %v8786_v58 = vand.u32 3, %v3176_v4  ;;  %v8790_v35 = vadd.s32 %v3272_v26, %v3268_v39  ;;  %v8792_v5 = vsub.s32 32, %v3356_v19  ;;  %v3269_v38 = vshrl.u32 %v3264_v32, 16 }
 0x35d   :  { %v3161_v17 = vmul.f32 -0.001358992, %v3160_v56  ;;  %v3168_v34 = vmul.f32 -0.00019511016, %v3160_v56  ;;  %v8788_v36 = vadd.s32 %v3256_v22, %v3247_v47  ;;  %v3278_v11 = vadd.s32 %v3277_v51, %v3267_v0 }
 0x35e   :  { %v5250_v3 = vsub.f32 1.0, %v8781_v61  ;;  %vm8797_vm12 = vcmp.eq.s32.totalorder %v5280_v50, 1  ;;  %v3280_v24 = vmul.u32 %v8679_v16, %v8766_v18  ;;  %v8805_v4 = vshrl.u32 %v3354_v46, 5 }
 0x35f   :  { %v3162_v8 = vadd.f32 0.041655596, %v3161_v17  ;;  %v3169_v42 = vadd.f32 0.008332121, %v3168_v34  ;;  %vm3282_vm13 = vc.u32 %v8788_v36, %v8790_v35  ;;  %v3279_v32 = vadd.s32 %v3278_v11, %v3269_v38 }
 0x360   :  { %v3360_v1 = vshrl.u32 %v11208_v59, %v8792_v5  ;;  %v3363_v50 = vshrl.u32 %v11209_v44, %v8792_v5  ;;  %v3366_v39 = vshrl.u32 %v11214_v13, %v8792_v5  ;;  %v3368_v43 = vshll.u32 %v11214_v13, %v3356_v19 }
 0x361   :  { %v3163_v7 = vmul.f32 %v3162_v8, %v3160_v56  ;;  %v3170_v60 = vmul.f32 %v3169_v42, %v3160_v56  ;;  %v3369_v16 = vshrl.u32 %v11215_v49, %v8792_v5  ;;  %v3283_v48 = vadd.s32 1, %v3279_v32 }
 0x362   :  { %v3359_v26 = vshll.u32 %v11219_v63, %v3356_v19  ;;  %v3362_v37 = vshll.u32 %v11208_v59, %v3356_v19  ;;  %v3365_v31 = vshll.u32 %v11209_v44, %v3356_v19  ;;  %v3372_v46 = vshrl.u32 %v11220_v52, %v8792_v5 }
 0x363   :  { %v3164_v18 = vadd.f32 -0.4999988, %v3163_v7  ;;  %v3171_v27 = vadd.f32 -0.16666654, %v3170_v60  ;;  %v3370_v61 = vor.u32 %v3369_v16, %v3368_v43  ;;  %vm3178_vm14 = vcmp.lt.s32.totalorder %v8786_v58, 2 }
 0x364   :  { %v3284_v9 = vsel %vm3282_vm13, %v3283_v48, %v3279_v32  ;;  %v3371_v17 = vshll.u32 %v11215_v49, %v3356_v19  ;;  %vm3175_vm0 = vweird.f32 %v8389_v2  ;;  %v8827_v0 = vor.u32 %v3360_v1, %v3359_v26 }
 0x365   :  { %v3165_v47 = vmul.f32 %v3164_v18, %v3160_v56  ;;  %v3172_v22 = vmul.f32 %v3171_v27, %v3160_v56  ;;  %v3285_v34 = vadd.s32 %v3284_v9, %v3280_v24  ;;  %v8829_v51 = vor.u32 %v3363_v50, %v3362_v37 }
 0x366   :  { %v8831_v8 = vor.u32 %v3366_v39, %v3365_v31  ;;  %vm8835_vm15 = vcmp.eq.s32.totalorder %v5352_v15, 1  ;;  %v3373_v11 = vor.u32 %v3372_v46, %v3371_v17  ;;  %vm3377_vm1 = vcmp.lt.s32.totalorder %v8805_v4, 4 }
 0x367   :  { %v3166_v42 = vadd.f32 1.0, %v3165_v47  ;;  %v3173_v38 = vadd.f32 1.0, %v3172_v22  ;;  %vm3179_vm2 = vcmp.eq.s32.totalorder %v8786_v58, 0  ;;  %vm3182_vm3 = vcmp.eq.s32.totalorder %v8786_v58, 2 }
 0x368   :  { %v3286_v19 = vadd.s32 536870912, %v3285_v34  ;;  %v3383_v24 = vsel %vm3377_vm1, %v3370_v61, 920167782  ;;  %vm3374_vm5 = vcmp.lt.s32.totalorder %v8805_v4, 1  ;;  %vm3376_vm4 = vcmp.lt.s32.totalorder %v8805_v4, 3 }
 0x369   :  { %v3174_v7 = vmul.f32 %v3173_v38, %v8778_v21  ;;  %v3183_v60 = vxor.u32 2147483648, %v3166_v42  ;;  %v3382_v32 = vsel %vm3374_vm5, %v8827_v0, %v8829_v51  ;;  %v3384_v1 = vsel %vm3376_vm4, %v8831_v8, %v3383_v24  ;;  %v8891_v38 = vpop.f32.mrf.mxu1 }
 0x36a   :  { %v8847_v15 = vshrl.u32 %v3286_v19, 30  ;;  %v3386_v21 = vsel %vm3374_vm5, %v8829_v51, %v8831_v8  ;;  %v8863_v50 = vsel %vm8797_vm12, %v5250_v3, %v8757_v12  ;;  %v3387_v43 = vsel %vm3377_vm1, %v3373_v11, 1326507024 }
 0x36b   :  { %v3180_v39 = vxor.u32 2147483648, %v3174_v7  ;;  %v8869_v16 = vshll.u32 %v3350_v30, 8  ;;  %v5281_v18 = vperm.slane %v7868_v10, 7  ;;  %vm3375_vm6 = vcmp.lt.s32.totalorder %v8805_v4, 2 }
 0x36c   :  { %v3288_v27 = vshll.u32 %v8847_v15, 30  ;;  %v3388_v48 = vsel %vm3376_vm4, %v3370_v61, %v3387_v43  ;;  %v3184_v3 = vsel %vm3182_vm3, %v3183_v60, %v3174_v7  ;;  %v3385_v20 = vsel %vm3375_vm6, %v3382_v32, %v3384_v1 }
 0x36d   :  { %v3181_v12 = vsel %vm3179_vm2, %v3166_v42, %v3180_v39  ;;  %v3389_v30 = vsel %vm3375_vm6, %v3386_v21, %v3388_v48  ;;  %v5353_v6 = vperm.slane %v7883_v41, 7  ;;  %v3391_v61 = vand.u32 65535, %v8869_v16  ;;  %v1792_v42 = vpop.f32.mrf.mxu0 }
 0x36e   :  { %v3185_v10 = vsel %vm3178_vm14, %v3181_v12, %v3184_v3  ;;  %v3289_v26 = vsub.s32 %v3285_v34, %v3288_v27  ;;  %v3393_v37 = vand.u32 65535, %v3389_v30  ;;  %v3392_v46 = vshrl.u32 %v8869_v16, 16 }
 0x36f   :  { %v3186_v31 = vsel %vm3175_vm0, nan, %v3185_v10  ;;  %v3394_v47 = vshrl.u32 %v3389_v30, 16  ;;  %v3416_v17 = vshrl.u32 %v3385_v20, 16  ;;  %v5394_v41 = vsel %vm8835_vm15, %v8363_v62, %v8863_v50 }
 0x370   :  { %v5209_v22 = vmul.f32 2.0, %v3186_v31  ;;  %vm3290_vm7 = vcmp.lt.s32.totalorder %v3289_v26, 0  ;;  %v3291_v9 = vsub.s32 0, %v3289_v26  ;;  %v8893_v11 = vmul.u32 %v3393_v37, %v3392_v46 }
 0x371   :  { %v3396_v58 = vmul.u32 %v3394_v47, %v3391_v61  ;;  %v3415_v24 = vand.u32 65535, %v3385_v20  ;;  %vm5302_vm8 = vcmp.eq.s32.totalorder %v5281_v18, 1  ;;  %v3395_v60 = vmul.u32 %v3393_v37, %v3391_v61 }
 0x372   :  { %v5230_v34 = vmul.f32 %v5209_v22, %v3186_v31  ;;  %v3292_v19 = vsel %vm3290_vm7, %v3291_v9, %v3289_v26  ;;  %vm5374_vm11 = vcmp.eq.s32.totalorder %v5353_v6, 1  ;;  %v3398_v21 = vmul.u32 %v3394_v47, %v3392_v46  ;;  %v1807_v47 = vpop.f32.mrf.mxu1 }
 0x373   :  { %v3293_v7 = vclz %v3292_v19  ;;  %v3399_v32 = vshll.u32 %v3396_v58, 16  ;;  %v3418_v39 = vmul.u32 %v3416_v17, %v3391_v61  ;;  %v3401_v27 = vshll.u32 %v8893_v11, 16 }
 0x374   :  { %v5251_v1 = vsub.f32 1.0, %v5230_v34  ;;  %v3281_v62 = vadd.s32 %v8790_v35, %v8788_v36  ;;  %v3419_v50 = vmul.u32 %v3415_v24, %v3392_v46  ;;  %v3417_v34 = vmul.u32 %v3415_v24, %v3391_v61 }
 0x375   :  { %v6187_v43 = vadd.s32 4294967294, %v3293_v7  ;;  %vm3403_vm9 = vc.u32 %v3395_v60, %v3399_v32  ;;  %v3405_v48 = vadd.s32 %v3399_v32, %v3395_v60  ;;  %v3421_v6 = vshll.u32 %v3418_v39, 16  ;;  %v1794_v37 = vpop.f32.mrf.mxu0  ;;  %v11261_v32 = vld [vmem:[#allocation150_spill] sm:$0xff] }
 0x376   :  { %v5323_v12 = vsel %vm5302_vm8, %v5251_v1, %v3186_v31  ;;  %v3404_v56 = vsel %vm3403_vm9, 1, %v11229_v14  ;;  %v3400_v35 = vshrl.u32 %v3396_v58, 16  ;;  %v3420_v19 = vmul.u32 %v3416_v17, %v3392_v46 }
 0x377   :  { %v5395_v18 = vsel %vm5374_vm11, %v8389_v2, %v5323_v12  ;;  %vm6188_vm12 = vcmp.lt.s32.totalorder %v6187_v43, 0  ;;  %v3406_v3 = vadd.s32 %v3404_v56, %v3398_v21  ;;  %vm3407_vm13 = vc.u32 %v3405_v48, %v3401_v27 }
 0x378   :  { %v5432_v20 = vrot.slane %v5395_v18, 4  ;;  %v3296_v30 = vsel %vm6188_vm12, 0, %v6187_v43  ;;  %v3408_v10 = vsel %vm3407_vm13, 1, %v11229_v14  ;;  %vm3425_vm14 = vc.u32 %v3417_v34, %v3421_v6 }
 0x379   :  { %v3297_v22 = vsub.s32 32, %v3296_v30  ;;  %v3301_v31 = vsub.s32 4294967266, %v3296_v30  ;;  %v3410_v9 = vadd.s32 %v3408_v10, %v3406_v3  ;;  %v3298_v2 = vshll.u32 %v3289_v26, %v3296_v30 }
 0x37a   :  { %v5443_v36 = vsel %vm5439_vm10, %v5394_v41, %v5432_v20  ;;  %v1520_v1 = vadd.f32 %v7445_v57, %v11261_v32  ;;  %v3423_v21 = vshll.u32 %v3419_v50, 16  ;;  %v3426_v43 = vsel %vm3425_vm14, 1, %v11229_v14 }
 0x37b   :  { %5463 = vst [vmem:[#allocation10 + $0x18] sm:$0xff] %v5443_v36  ;;  %v3299_v7 = vshrl.u32 %v3281_v62, %v3297_v22  ;;  %v3302_v60 = vadd.s32 127, %v3301_v31  ;;  %v3427_v27 = vadd.s32 %v3421_v6, %v3417_v34  ;;  %v3411_v56 = vadd.s32 %v3410_v9, %v3400_v35  ;;  %v11262_v9 = vld [vmem:[#allocation151_spill] sm:$0xff] }
 0x37c   :  { %v3428_v61 = vadd.s32 %v3426_v43, %v3420_v19  ;;  %v3358_v58 = vshrl.u32 %v11219_v63, %v8792_v5  ;;  %v3379_v26 = vsel %vm3377_vm1, %v8831_v8, 2102212464  ;;  %v8914_v46 = vadd.f32 %v1792_v42, %v1520_v1  ;;  %v5266_v19 = vld [vmem:[#allocation7 + $0x8] sm:$0xff] }
 0x37d   :  { %v3300_v48 = vor.u32 %v3299_v7, %v3298_v2  ;;  %v3303_v12 = vshll.u32 %v3302_v60, 23  ;;  %vm3429_vm0 = vc.u32 %v3427_v27, %v3423_v21  ;;  %v3402_v57 = vshrl.u32 %v8893_v11, 16 }
 0x37e   :  { %v3430_v41 = vsel %vm3429_vm0, 1, %v11229_v14  ;;  %v3311_v24 = vsub.s32 4, %v8847_v15  ;;  %v3378_v62 = vsel %vm3374_vm5, %v3358_v58, %v8827_v0  ;;  %v3422_v18 = vshrl.u32 %v3418_v39, 16 }
 0x37f   :  { %v3304_v17 = vor.u32 4788187, %v3303_v12  ;;  %v3432_v5 = vadd.s32 %v3430_v41, %v3428_v61  ;;  %v3307_v20 = vcvt.s32.f32 %v3300_v48  ;;  %v3380_v8 = vsel %vm3376_vm4, %v8829_v51, %v3379_v26 }
 0x380   :  { %v3412_v42 = vadd.s32 %v3411_v56, %v3402_v57  ;;  %v3424_v30 = vshrl.u32 %v3419_v50, 16  ;;  %vm3189_vm15 = vcmp.lt.s32.totalorder %v8645_v33, 0  ;;  %v3431_v6 = vadd.s32 %v3427_v27, %v3423_v21 }
 0x381   :  { %v3305_v3 = vand.u32 2147483647, %v3304_v17  ;;  %v3433_v10 = vadd.s32 %v3432_v5, %v3422_v18  ;;  %v3500_v37 = vand.u32 2139095040, %v8914_v46  ;;  %v3312_v47 = vsel %vm3189_vm15, %v3311_v24, %v8847_v15 }
 0x382   :  { %v3381_v0 = vsel %vm3375_vm6, %v3378_v62, %v3380_v8  ;;  %vm3437_vm1 = vc.u32 %v3412_v42, %v3431_v6  ;;  %v1533_v51 = vadd.f32 %v7475_v40, %v11262_v9  ;;  %vm3188_vm2 = vcmp.le.f32.partialorder %v3187_v45, 0.7853982  ;;  %v5338_v40 = vld [vmem:[#allocation8 + $0x8] sm:$0xff] }
 0x383   :  { %v3308_v11 = vmul.f32 %v3307_v20, %v3305_v3  ;;  %v3434_v39 = vadd.s32 %v3433_v10, %v3424_v30  ;;  %v3501_v31 = vshrl.u32 %v3500_v37, 23  ;;  %v3497_v34 = vand.u32 2147483647, %v8914_v46 }
 0x384   :  { %v3314_v35 = vsel %vm3188_vm2, 0, %v3312_v47  ;;  %v3435_v15 = vmul.u32 %v8869_v16, %v3381_v0  ;;  %v8938_v60 = vadd.f32 %v8891_v38, %v1533_v51  ;;  %vm5269_vm3 = vcmp.gt.f32.partialorder %v5266_v19, 0.5 }
 0x385   :  { %v3309_v22 = vxor.u32 2147483648, %v3308_v11  ;;  %v3438_v50 = vadd.s32 1, %v3434_v39  ;;  %v6192_v4 = vadd.s32 4294967169, %v3501_v31  ;;  %v3331_v45 = vadd.s32 3, %v3314_v35 }
 0x386   :  { %v3504_v43 = vand.u32 8388607, %v3497_v34  ;;  %vm5341_vm4 = vcmp.gt.f32.partialorder %v5338_v40, 0.5  ;;  %v3652_v56 = vand.u32 2147483647, %v8938_v60  ;;  %v3655_v38 = vand.u32 2139095040, %v8938_v60 }
 0x387   :  { %v3310_v36 = vsel %vm3189_vm15, %v3309_v22, %v3308_v11  ;;  %v3439_v7 = vsel %vm3437_vm1, %v3438_v50, %v3434_v39  ;;  %v3507_v21 = vadd.s32 1, %v6192_v4  ;;  %v8945_v17 = vsel %vm5269_vm3, 1, %v11229_v14 }
 0x388   :  { %v3313_v2 = vsel %vm3188_vm2, %v8645_v33, %v3310_v36  ;;  %v3440_v1 = vadd.s32 %v3439_v7, %v3435_v15  ;;  %v3505_v57 = vor.u32 8388608, %v3504_v43  ;;  %v8948_v18 = vsel %vm5341_vm4, 1, %v11229_v14 }
 0x389   :  { %v3315_v32 = vmul.f32 %v3313_v2, %v3313_v2  ;;  %vm3508_vm5 = vcmp.gt.s32.totalorder %v3507_v21, 0  ;;  %v8950_v3 = vand.u32 3, %v3331_v45  ;;  %v3656_v20 = vshrl.u32 %v3655_v38, 23 }
 0x38a   :  { %v3441_v12 = vadd.s32 536870912, %v3440_v1  ;;  %v3509_v16 = vsel %vm3508_vm5, %v3507_v21, 0  ;;  %v8954_v8 = vand.u32 8388607, %v3652_v56  ;;  %vm3344_vm6 = vcmp.lt.s32.totalorder %v8648_v55, 0 }
 0x38b   :  { %v3316_v27 = vmul.f32 -0.001358992, %v3315_v32  ;;  %v3323_v48 = vmul.f32 -0.00019511016, %v3315_v32  ;;  %v3511_v41 = vand.u32 31, %v3509_v16  ;;  %v5282_v47 = vperm.slane %v8945_v17, 0 }
 0x38c   :  { %v3442_v26 = vshrl.u32 %v3441_v12, 30  ;;  %v5354_v0 = vperm.slane %v8948_v18, 0  ;;  %v3436_v39 = vadd.s32 %v3431_v6, %v3412_v42  ;;  %v8963_v22 = vshll.u32 %v3505_v57, 8 }
 0x38d   :  { %v3317_v61 = vadd.f32 0.041655596, %v3316_v27  ;;  %v3324_v58 = vadd.f32 0.008332121, %v3323_v48  ;;  %v8959_v37 = vsub.s32 32, %v3511_v41  ;;  %v3514_v35 = vshll.u32 %v11219_v63, %v3511_v41 }
 0x38e   :  { %v3443_v5 = vshll.u32 %v3442_v26, 30  ;;  %vm8969_vm8 = vcmp.le.f32.partialorder %v3342_v28, 0.7853982  ;;  %v3466_v36 = vsub.s32 4, %v3442_v26  ;;  %v6195_v19 = vadd.s32 4294967169, %v3656_v20 }
 0x38f   :  { %v3318_v24 = vmul.f32 %v3317_v61, %v3315_v32  ;;  %v3325_v62 = vmul.f32 %v3324_v58, %v3315_v32  ;;  %v3660_v42 = vor.u32 8388608, %v8954_v8  ;;  %vm3334_vm11 = vcmp.eq.s32.totalorder %v8950_v3, 0 }
 0x390   :  { %v8957_v11 = vsub.s32 %v3440_v1, %v3443_v5  ;;  %v3515_v4 = vshrl.u32 %v11208_v59, %v8959_v37  ;;  %v3518_v28 = vshrl.u32 %v11209_v44, %v8959_v37  ;;  %v3521_v40 = vshrl.u32 %v11214_v13, %v8959_v37 }
 0x391   :  { %v3319_v30 = vadd.f32 -0.4999988, %v3318_v24  ;;  %v3326_v10 = vadd.f32 -0.16666654, %v3325_v62  ;;  %v3524_v1 = vshrl.u32 %v11215_v49, %v8959_v37  ;;  %vm3337_vm9 = vcmp.eq.s32.totalorder %v8950_v3, 2 }
 0x392   :  { %vm3445_vm7 = vcmp.lt.s32.totalorder %v8957_v11, 0  ;;  %v3446_v51 = vsub.s32 0, %v8957_v11  ;;  %v3523_v43 = vshll.u32 %v11214_v13, %v3511_v41  ;;  %v3527_v27 = vshrl.u32 %v11220_v52, %v8959_v37 }
 0x393   :  { %v3320_v31 = vmul.f32 %v3319_v30, %v3315_v32  ;;  %v3327_v9 = vmul.f32 %v3326_v10, %v3315_v32  ;;  %v3517_v32 = vshll.u32 %v11208_v59, %v3511_v41  ;;  %vm3333_vm12 = vcmp.lt.s32.totalorder %v8950_v3, 2 }
 0x394   :  { %v3447_v15 = vsel %vm3445_vm7, %v3446_v51, %v8957_v11  ;;  %v8991_v12 = vshrl.u32 %v3509_v16, 5  ;;  %v3520_v38 = vshll.u32 %v11209_v44, %v3511_v41  ;;  %v8995_v61 = vand.u32 65535, %v8963_v22 }
 0x395   :  { %v3328_v6 = vadd.f32 1.0, %v3327_v9  ;;  %v3448_v7 = vclz %v3447_v15  ;;  %v3321_v21 = vadd.f32 1.0, %v3320_v31  ;;  %v3516_v58 = vor.u32 %v3515_v4, %v3514_v35  ;;  %v9003_v9 = vpop.f32.mrf.mxu2 }
 0x396   :  { %v3519_v57 = vor.u32 %v3518_v28, %v3517_v32  ;;  %v3526_v24 = vshll.u32 %v11215_v49, %v3511_v41  ;;  %v3467_v5 = vsel %vm3344_vm6, %v3466_v36, %v3442_v26  ;;  %v9000_v20 = vadd.s32 1, %v6195_v19 }
 0x397   :  { %v3329_v45 = vmul.f32 %v3328_v6, %v3313_v2  ;;  %v6190_v48 = vadd.s32 4294967294, %v3448_v7  ;;  %v3525_v2 = vor.u32 %v3524_v1, %v3523_v43  ;;  %vm3330_vm14 = vweird.f32 %v8645_v33 }
 0x398   :  { %v3338_v16 = vxor.u32 2147483648, %v3321_v21  ;;  %v3522_v10 = vor.u32 %v3521_v40, %v3520_v38  ;;  %v3528_v31 = vor.u32 %v3527_v27, %v3526_v24  ;;  %vm3529_vm0 = vcmp.lt.s32.totalorder %v8991_v12, 1 }
 0x399   :  { %v3335_v62 = vxor.u32 2147483648, %v3329_v45  ;;  %vm6191_vm13 = vcmp.lt.s32.totalorder %v6190_v48, 0  ;;  %vm3532_vm15 = vcmp.lt.s32.totalorder %v8991_v12, 4  ;;  %v3469_v41 = vsel %vm8969_vm8, 0, %v3467_v5 }
 0x39a   :  { %v3451_v30 = vsel %vm6191_vm13, 0, %v6190_v48  ;;  %vm3531_vm1 = vcmp.lt.s32.totalorder %v8991_v12, 3  ;;  %v3537_v26 = vsel %vm3529_vm0, %v3516_v58, %v3519_v57  ;;  %v3538_v36 = vsel %vm3532_vm15, %v3525_v2, 920167782 }
 0x39b   :  { %v3452_v51 = vsub.s32 32, %v3451_v30  ;;  %v3456_v35 = vsub.s32 4294967266, %v3451_v30  ;;  %v3336_v19 = vsel %vm3334_vm11, %v3321_v21, %v3335_v62  ;;  %v3453_v6 = vshll.u32 %v8957_v11, %v3451_v30 }
 0x39c   :  { %vm3530_vm2 = vcmp.lt.s32.totalorder %v8991_v12, 2  ;;  %v3539_v28 = vsel %vm3531_vm1, %v3522_v10, %v3538_v36  ;;  %v3541_v7 = vsel %vm3529_vm0, %v3519_v57, %v3522_v10  ;;  %v3542_v32 = vsel %vm3532_vm15, %v3528_v31, 1326507024 }
 0x39d   :  { %v3454_v15 = vshrl.u32 %v3436_v39, %v3452_v51  ;;  %v3457_v4 = vadd.s32 127, %v3456_v35  ;;  %v3339_v40 = vsel %vm3337_vm9, %v3338_v16, %v3329_v45  ;;  %v3540_v11 = vsel %vm3530_vm2, %v3537_v26, %v3539_v28  ;;  %v1820_v31 = vpop.f32.mrf.mxu2 }
 0x39e   :  { %v3340_v39 = vsel %vm3333_vm12, %v3336_v19, %v3339_v40  ;;  %v3513_v43 = vshrl.u32 %v11219_v63, %v8959_v37  ;;  %v3543_v27 = vsel %vm3531_vm1, %v3525_v2, %v3542_v32  ;;  %v3571_v48 = vshrl.u32 %v3540_v11, 16 }
 0x39f   :  { %v3455_v1 = vor.u32 %v3454_v15, %v3453_v6  ;;  %v3458_v21 = vshll.u32 %v3457_v4, 23  ;;  %v3534_v24 = vsel %vm3532_vm15, %v3522_v10, 2102212464  ;;  %v3544_v45 = vsel %vm3530_vm2, %v3541_v7, %v3543_v27 }
 0x3a0   :  { %v3570_v62 = vand.u32 65535, %v3540_v11  ;;  %v3486_v5 = vadd.s32 3, %v3469_v41  ;;  %v3548_v16 = vand.u32 65535, %v3544_v45  ;;  %v3549_v30 = vshrl.u32 %v3544_v45, 16 }
 0x3a1   :  { %v3459_v38 = vor.u32 4788187, %v3458_v21  ;;  %v3573_v3 = vmul.u32 %v3571_v48, %v8995_v61  ;;  %v9041_v37 = vsel %vm3330_vm14, nan, %v3340_v39  ;;  %v3462_v51 = vcvt.s32.f32 %v3455_v1 }
 0x3a2   :  { %v3547_v35 = vshrl.u32 %v8963_v22, 16  ;;  %v3533_v10 = vsel %vm3529_vm0, %v3513_v43, %v3516_v58  ;;  %v3535_v26 = vsel %vm3531_vm1, %v3519_v57, %v3534_v24  ;;  %v3551_v41 = vmul.u32 %v3549_v30, %v8995_v61 }
 0x3a3   :  { %v3460_v2 = vand.u32 2147483647, %v3459_v38  ;;  %vm3663_vm3 = vcmp.gt.s32.totalorder %v9000_v20, 0  ;;  %v3576_v15 = vshll.u32 %v3573_v3, 16  ;;  %v5210_v4 = vmul.f32 2.0, %v9041_v37 }
 0x3a4   :  { %v3552_v19 = vmul.u32 %v3548_v16, %v3547_v35  ;;  %v3574_v6 = vmul.u32 %v3570_v62, %v3547_v35  ;;  %v9051_v28 = vand.u32 3, %v3486_v5  ;;  %v3550_v7 = vmul.u32 %v3548_v16, %v8995_v61 }
 0x3a5   :  { %v3463_v36 = vmul.f32 %v3462_v51, %v3460_v2  ;;  %v3554_v32 = vshll.u32 %v3551_v41, 16  ;;  %v9056_v58 = vsel %vm3530_vm2, %v3533_v10, %v3535_v26  ;;  %v3572_v57 = vmul.u32 %v3570_v62, %v8995_v61 }
 0x3a6   :  { %v3575_v1 = vmul.u32 %v3571_v48, %v3547_v35  ;;  %v3553_v21 = vmul.u32 %v3549_v30, %v3547_v35  ;;  %v3556_v11 = vshll.u32 %v3552_v19, 16  ;;  %v3578_v38 = vshll.u32 %v3574_v6, 16 }
 0x3a7   :  { %v3464_v40 = vxor.u32 2147483648, %v3463_v36  ;;  %vm3558_vm5 = vc.u32 %v3550_v7, %v3554_v32  ;;  %v3560_v39 = vadd.s32 %v3554_v32, %v3550_v7  ;;  %vm3580_vm4 = vc.u32 %v3572_v57, %v3576_v15 }
 0x3a8   :  { %v3559_v27 = vsel %vm3558_vm5, 1, %v11229_v14  ;;  %v3581_v61 = vsel %vm3580_vm4, 1, %v11229_v14  ;;  %v3582_v62 = vadd.s32 %v3576_v15, %v3572_v57  ;;  %v9072_v16 = vmul.f32 %v5210_v4, %v9041_v37 }
 0x3a9   :  { %v3465_v43 = vsel %vm3344_vm6, %v3464_v40, %v3463_v36  ;;  %v3561_v24 = vadd.s32 %v3559_v27, %v3553_v21  ;;  %vm3562_vm7 = vc.u32 %v3560_v39, %v3556_v11  ;;  %v3583_v5 = vadd.s32 %v3581_v61, %v3575_v1 }
 0x3aa   :  { %v9065_v12 = vsel %vm8969_vm8, %v8648_v55, %v3465_v43  ;;  %v3563_v45 = vsel %vm3562_vm7, 1, %v11229_v14  ;;  %v3555_v30 = vshrl.u32 %v3551_v41, 16  ;;  %v3664_v50 = vsel %vm3663_vm3, %v9000_v20, 0 }
 0x3ab   :  { %v3470_v48 = vmul.f32 %v9065_v12, %v9065_v12  ;;  %v3565_v31 = vadd.s32 %v3563_v45, %v3561_v24  ;;  %vm3584_vm6 = vc.u32 %v3582_v62, %v3578_v38  ;;  %v3590_v35 = vmul.u32 %v8963_v22, %v9056_v58 }
 0x3ac   :  { %v3557_v10 = vshrl.u32 %v3552_v19, 16  ;;  %v3585_v36 = vsel %vm3584_vm6, 1, %v11229_v14  ;;  %v3666_v15 = vand.u32 31, %v3664_v50  ;;  %v3577_v32 = vshrl.u32 %v3573_v3, 16 }
 0x3ad   :  { %v3471_v2 = vmul.f32 -0.001358992, %v3470_v48  ;;  %v3478_v51 = vmul.f32 -0.00019511016, %v3470_v48  ;;  %v3566_v26 = vadd.s32 %v3565_v31, %v3555_v30  ;;  %v3587_v41 = vadd.s32 %v3585_v36, %v3583_v5 }
 0x3ae   :  { %v3579_v57 = vshrl.u32 %v3574_v6, 16  ;;  %v9082_v1 = vadd.s32 %v3582_v62, %v3578_v38  ;;  %v9084_v20 = vsub.s32 32, %v3666_v15  ;;  %v9086_v22 = vshrl.u32 %v3664_v50, 5 }
 0x3af   :  { %v3472_v7 = vadd.f32 0.041655596, %v3471_v2  ;;  %v3479_v4 = vadd.f32 0.008332121, %v3478_v51  ;;  %v9080_v40 = vadd.s32 %v3566_v26, %v3557_v10  ;;  %v3588_v39 = vadd.s32 %v3587_v41, %v3577_v32 }
 0x3b0   :  { %v3669_v19 = vshll.u32 %v11219_v63, %v3666_v15  ;;  %v3670_v58 = vshrl.u32 %v11208_v59, %v9084_v20  ;;  %v3672_v3 = vshll.u32 %v11208_v59, %v3666_v15  ;;  %v3675_v43 = vshll.u32 %v11209_v44, %v3666_v15 }
 0x3b1   :  { %v3473_v21 = vmul.f32 %v3472_v7, %v3470_v48  ;;  %v3480_v11 = vmul.f32 %v3479_v4, %v3470_v48  ;;  %vm9095_vm8 = vcmp.eq.s32.totalorder %v5282_v47, 1  ;;  %v3589_v24 = vadd.s32 %v3588_v39, %v3579_v57 }
 0x3b2   :  { %v3673_v61 = vshrl.u32 %v11209_v44, %v9084_v20  ;;  %vm3592_vm11 = vc.u32 %v9080_v40, %v9082_v1  ;;  %v3676_v45 = vshrl.u32 %v11214_v13, %v9084_v20  ;;  %v3678_v62 = vshll.u32 %v11214_v13, %v3666_v15 }
 0x3b3   :  { %v3474_v27 = vadd.f32 -0.4999988, %v3473_v21  ;;  %v3481_v38 = vadd.f32 -0.16666654, %v3480_v11  ;;  %v3679_v47 = vshrl.u32 %v11215_v49, %v9084_v20  ;;  %v3593_v31 = vadd.s32 1, %v3589_v24 }
 0x3b4   :  { %v9108_v50 = vor.u32 %v3670_v58, %v3669_v19  ;;  %vm3485_vm9 = vweird.f32 %v8648_v55  ;;  %v9111_v2 = vor.u32 %v3673_v61, %v3672_v3  ;;  %v9113_v51 = vor.u32 %v3676_v45, %v3675_v43 }
 0x3b5   :  { %v3475_v5 = vmul.f32 %v3474_v27, %v3470_v48  ;;  %v3482_v30 = vmul.f32 %v3481_v38, %v3470_v48  ;;  %v3680_v10 = vor.u32 %v3679_v47, %v3678_v62  ;;  %v3682_v26 = vshrl.u32 %v11220_v52, %v9084_v20 }
 0x3b6   :  { %v3594_v4 = vsel %vm3592_vm11, %v3593_v31, %v3589_v24  ;;  %v3681_v32 = vshll.u32 %v11215_v49, %v3666_v15  ;;  %v5252_v48 = vsub.f32 1.0, %v9072_v16  ;;  %vm9121_vm12 = vcmp.eq.s32.totalorder %v5354_v0, 1 }
 0x3b7   :  { %v3476_v36 = vadd.f32 1.0, %v3475_v5  ;;  %v3483_v7 = vadd.f32 1.0, %v3482_v30  ;;  %vm3488_vm13 = vcmp.lt.s32.totalorder %v9051_v28, 2  ;;  %v3595_v57 = vadd.s32 %v3594_v4, %v3590_v35 }
 0x3b8   :  { %vm3684_vm14 = vcmp.lt.s32.totalorder %v9086_v22, 1  ;;  %v3683_v39 = vor.u32 %v3682_v26, %v3681_v32  ;;  %vm3687_vm0 = vcmp.lt.s32.totalorder %v9086_v22, 4  ;;  %vm3686_vm15 = vcmp.lt.s32.totalorder %v9086_v22, 3  ;;  %v11269_v26 = vld [vmem:[#allocation153_spill] sm:$0xff] }
 0x3b9   :  { %v3484_v21 = vmul.f32 %v3483_v7, %v9065_v12  ;;  %v3493_v11 = vxor.u32 2147483648, %v3476_v36  ;;  %v3596_v15 = vadd.s32 536870912, %v3595_v57  ;;  %v3692_v0 = vsel %vm3684_vm14, %v9108_v50, %v9111_v2 }
 0x3ba   :  { %v3693_v16 = vsel %vm3687_vm0, %v3680_v10, 920167782  ;;  %vm3489_vm1 = vcmp.eq.s32.totalorder %v9051_v28, 0  ;;  %vm3492_vm2 = vcmp.eq.s32.totalorder %v9051_v28, 2  ;;  %vm3685_vm3 = vcmp.lt.s32.totalorder %v9086_v22, 2 }
 0x3bb   :  { %v3490_v35 = vxor.u32 2147483648, %v3484_v21  ;;  %v3694_v12 = vsel %vm3686_vm15, %v9113_v51, %v3693_v16  ;;  %v9141_v19 = vshrl.u32 %v3596_v15, 30  ;;  %v3696_v58 = vsel %vm3684_vm14, %v9111_v2, %v9113_v51 }
 0x3bc   :  { %v9150_v3 = vshll.u32 %v3660_v42, 8  ;;  %v3494_v27 = vsel %vm3492_vm2, %v3493_v11, %v3484_v21  ;;  %v3695_v38 = vsel %vm3685_vm3, %v3692_v0, %v3694_v12  ;;  %v3697_v24 = vsel %vm3687_vm0, %v3683_v39, 1326507024  ;;  %v9178_v11 = vpop.f32.mrf.mxu3 }
 0x3bd   :  { %v3491_v43 = vsel %vm3489_vm1, %v3476_v36, %v3490_v35  ;;  %v5324_v61 = vsel %vm9095_vm8, %v5252_v48, %v9041_v37  ;;  %v3598_v62 = vshll.u32 %v9141_v19, 30  ;;  %v3698_v8 = vsel %vm3686_vm15, %v3680_v10, %v3697_v24 }
 0x3be   :  { %v3495_v45 = vsel %vm3488_vm13, %v3491_v43, %v3494_v27  ;;  %v5283_v47 = vperm.slane %v8945_v17, 1  ;;  %v5355_v5 = vperm.slane %v8948_v18, 1  ;;  %v3699_v30 = vsel %vm3685_vm3, %v3696_v58, %v3698_v8 }
 0x3bf   :  { %v3496_v42 = vsel %vm3485_vm9, nan, %v3495_v45  ;;  %v9170_v37 = vsub.s32 %v3595_v57, %v3598_v62  ;;  %v3703_v28 = vand.u32 65535, %v3699_v30  ;;  %v3726_v31 = vshrl.u32 %v3695_v38, 16 }
 0x3c0   :  { %v5211_v6 = vmul.f32 2.0, %v3496_v42  ;;  %v1546_v36 = vadd.f32 %v7478_v53, %v11269_v26  ;;  %v3701_v10 = vand.u32 65535, %v9150_v3  ;;  %v3702_v7 = vshrl.u32 %v9150_v3, 16 }
 0x3c1   :  { %v3704_v4 = vshrl.u32 %v3699_v30, 16  ;;  %vm3600_vm5 = vcmp.lt.s32.totalorder %v9170_v37, 0  ;;  %v3601_v48 = vsub.s32 0, %v9170_v37  ;;  %v3725_v21 = vand.u32 65535, %v3695_v38 }
 0x3c2   :  { %v5232_v32 = vmul.f32 %v5211_v6, %v3496_v42  ;;  %v5396_v57 = vsel %vm9121_vm12, %v8645_v33, %v5324_v61  ;;  %vm5304_vm4 = vcmp.eq.s32.totalorder %v5283_v47, 1  ;;  %v3707_v53 = vmul.u32 %v3703_v28, %v3702_v7 }
 0x3c3   :  { %v3706_v39 = vmul.u32 %v3704_v4, %v3701_v10  ;;  %vm5376_vm7 = vcmp.eq.s32.totalorder %v5355_v5, 1  ;;  %v3602_v0 = vsel %vm3600_vm5, %v3601_v48, %v9170_v37  ;;  %v3728_v16 = vmul.u32 %v3726_v31, %v3701_v10 }
 0x3c4   :  { %v5253_v15 = vsub.f32 1.0, %v5232_v32  ;;  %v3591_v35 = vadd.s32 %v9082_v1, %v9080_v40  ;;  %v3603_v12 = vclz %v3602_v0  ;;  %v3705_v58 = vmul.u32 %v3703_v28, %v3701_v10  ;;  %v1833_v28 = vpop.f32.mrf.mxu3 }
 0x3c5   :  { %v3709_v43 = vshll.u32 %v3706_v39, 16  ;;  %v3668_v38 = vshrl.u32 %v11219_v63, %v9084_v20  ;;  %v3708_v41 = vmul.u32 %v3704_v4, %v3702_v7  ;;  %v3729_v33 = vmul.u32 %v3725_v21, %v3702_v7 }
 0x3c6   :  { %v5325_v27 = vsel %vm5304_vm4, %v5253_v15, %v3496_v42  ;;  %v6193_v61 = vadd.s32 4294967294, %v3603_v12  ;;  %v3711_v45 = vshll.u32 %v3707_v53, 16  ;;  %v3731_v5 = vshll.u32 %v3728_v16, 16 }
 0x3c7   :  { %v5397_v24 = vsel %vm5376_vm7, %v8648_v55, %v5325_v27  ;;  %vm3713_vm6 = vc.u32 %v3705_v58, %v3709_v43  ;;  %v3715_v47 = vadd.s32 %v3709_v43, %v3705_v58  ;;  %v3727_v1 = vmul.u32 %v3725_v21, %v3701_v10 }
 0x3c8   :  { %v5433_v62 = vrot.slane %v5397_v24, 4  ;;  %v3714_v8 = vsel %vm3713_vm6, 1, %v11229_v14  ;;  %vm6194_vm8 = vcmp.lt.s32.totalorder %v6193_v61, 0  ;;  %v3730_v30 = vmul.u32 %v3726_v31, %v3702_v7 }
 0x3c9   :  { %v3716_v40 = vadd.s32 %v3714_v8, %v3708_v41  ;;  %v3606_v6 = vsel %vm6194_vm8, 0, %v6193_v61  ;;  %v3710_v20 = vshrl.u32 %v3706_v39, 16  ;;  %vm3717_vm11 = vc.u32 %v3715_v47, %v3711_v45 }
 0x3ca   :  { %v5444_v42 = vsel %vm5439_vm10, %v5396_v57, %v5433_v62  ;;  %v3607_v55 = vsub.s32 32, %v3606_v6  ;;  %v3611_v26 = vsub.s32 4294967266, %v3606_v6  ;;  %v3718_v4 = vsel %vm3717_vm11, 1, %v11229_v14 }
 0x3cb   :  { %5464 = vst [vmem:[#allocation10 + $0x20] sm:$0xff] %v5444_v42  ;;  %v3733_v32 = vshll.u32 %v3729_v33, 16  ;;  %v3608_v48 = vshll.u32 %v9170_v37, %v3606_v6  ;;  %v3720_v15 = vadd.s32 %v3718_v4, %v3716_v40  ;;  %vm3735_vm9 = vc.u32 %v3727_v1, %v3731_v5 }
 0x3cc   :  { %v3737_v0 = vadd.s32 %v3731_v5, %v3727_v1  ;;  %v3609_v12 = vshrl.u32 %v3591_v35, %v3607_v55  ;;  %v3612_v10 = vadd.s32 127, %v3611_v26  ;;  %v3736_v31 = vsel %vm3735_vm9, 1, %v11229_v14 }
 0x3cd   :  { %v9195_v7 = vadd.f32 %v9003_v9, %v1546_v36  ;;  %v3689_v21 = vsel %vm3687_vm0, %v9113_v51, 2102212464  ;;  %v3721_v57 = vadd.s32 %v3720_v15, %v3710_v20  ;;  %v3738_v39 = vadd.s32 %v3736_v31, %v3730_v30 }
 0x3ce   :  { %vm3739_vm12 = vc.u32 %v3737_v0, %v3733_v32  ;;  %v3610_v58 = vor.u32 %v3609_v12, %v3608_v48  ;;  %v3613_v43 = vshll.u32 %v3612_v10, 23  ;;  %v3712_v37 = vshrl.u32 %v3707_v53, 16 }
 0x3cf   :  { %v3740_v27 = vsel %vm3739_vm12, 1, %v11229_v14  ;;  %v3621_v35 = vsub.s32 4, %v9141_v19  ;;  %v3732_v41 = vshrl.u32 %v3728_v16, 16  ;;  %v3810_v61 = vand.u32 2139095040, %v9195_v7 }
 0x3d0   :  { %v3742_v24 = vadd.s32 %v3740_v27, %v3738_v39  ;;  %v3614_v9 = vor.u32 4788187, %v3613_v43  ;;  %v3688_v36 = vsel %vm3684_vm14, %v3668_v38, %v9108_v50  ;;  %v3690_v51 = vsel %vm3686_vm15, %v9111_v2, %v3689_v21 }
 0x3d1   :  { %v3722_v45 = vadd.s32 %v3721_v57, %v3712_v37  ;;  %vm3499_vm13 = vcmp.lt.s32.totalorder %v8914_v46, 0  ;;  %v3734_v53 = vshrl.u32 %v3729_v33, 16  ;;  %v3811_v8 = vshrl.u32 %v3810_v61, 23  ;;  %v11272_v37 = vld [vmem:[#allocation155_spill] sm:$0xff] }
 0x3d2   :  { %v3743_v62 = vadd.s32 %v3742_v24, %v3732_v41  ;;  %v3615_v47 = vand.u32 2147483647, %v3614_v9  ;;  %v3617_v16 = vcvt.s32.f32 %v3610_v58  ;;  %v3741_v5 = vadd.s32 %v3737_v0, %v3733_v32  ;;  %v11271_v58 = vld [vmem:[#allocation154_spill] sm:$0xff] }
 0x3d3   :  { %v3807_v40 = vand.u32 2147483647, %v9195_v7  ;;  %v3622_v1 = vsel %vm3499_vm13, %v3621_v35, %v9141_v19  ;;  %v3691_v50 = vsel %vm3685_vm3, %v3688_v36, %v3690_v51  ;;  %v6198_v2 = vadd.s32 4294967169, %v3811_v8 }
 0x3d4   :  { %v3744_v38 = vadd.s32 %v3743_v62, %v3734_v53  ;;  %v3618_v30 = vmul.f32 %v3617_v16, %v3615_v47  ;;  %vm3747_vm14 = vc.u32 %v3722_v45, %v3741_v5  ;;  %vm3498_vm0 = vcmp.le.f32.partialorder %v3497_v34, 0.7853982 }
 0x3d5   :  { %v3817_v42 = vadd.s32 1, %v6198_v2  ;;  %v3624_v20 = vsel %vm3498_vm0, 0, %v3622_v1  ;;  %v3745_v28 = vmul.u32 %v9150_v3, %v3691_v50  ;;  %v3814_v55 = vand.u32 8388607, %v3807_v40  ;;  %v11270_v3 = vld [vmem:[#allocation152_spill] sm:$0xff] }
 0x3d6   :  { %v3748_v33 = vadd.s32 1, %v3744_v38  ;;  %v3619_v6 = vxor.u32 2147483648, %v3618_v30  ;;  %v3641_v48 = vadd.s32 3, %v3624_v20  ;;  %v1559_v31 = vadd.f32 %v7487_v25, %v11270_v3 }
 0x3d7   :  { %vm3818_vm15 = vcmp.gt.s32.totalorder %v3817_v42, 0  ;;  %v3815_v12 = vor.u32 8388608, %v3814_v55  ;;  %v9230_v43 = vadd.f32 %v7489_v23, %v11271_v58  ;;  %v9234_v27 = vadd.f32 %v7519_v54, %v11272_v37 }
 0x3d8   :  { %v3749_v19 = vsel %vm3747_vm14, %v3748_v33, %v3744_v38  ;;  %v3620_v22 = vsel %vm3499_vm13, %v3619_v6, %v3618_v30  ;;  %v3819_v4 = vsel %vm3818_vm15, %v3817_v42, 0  ;;  %v9236_v35 = vand.u32 3, %v3641_v48 }
 0x3d9   :  { %v3750_v26 = vadd.s32 %v3749_v19, %v3745_v28  ;;  %v3623_v32 = vsel %vm3498_vm0, %v8914_v46, %v3620_v22  ;;  %v3821_v34 = vand.u32 31, %v3819_v4  ;;  %v9238_v41 = vadd.s32 %v3741_v5, %v3722_v45 }
 0x3da   :  { %v3625_v15 = vmul.f32 %v3623_v32, %v3623_v32  ;;  %v9240_v36 = vshll.u32 %v3815_v12, 8  ;;  %v9242_v25 = vshrl.u32 %v3819_v4, 5  ;;  %vm3654_vm1 = vcmp.lt.s32.totalorder %v8938_v60, 0 }
 0x3db   :  { %v3751_v0 = vadd.s32 536870912, %v3750_v26  ;;  %v9224_v10 = vsub.s32 32, %v3821_v34  ;;  %v3824_v8 = vshll.u32 %v11219_v63, %v3821_v34  ;;  %v3827_v47 = vshll.u32 %v11208_v59, %v3821_v34 }
 0x3dc   :  { %v3626_v21 = vmul.f32 -0.001358992, %v3625_v15  ;;  %v3633_v57 = vmul.f32 -0.00019511016, %v3625_v15  ;;  %v3833_v5 = vshll.u32 %v11214_v13, %v3821_v34  ;;  %v3830_v42 = vshll.u32 %v11209_v44, %v3821_v34 }
 0x3dd   :  { %v3752_v39 = vshrl.u32 %v3751_v0, 30  ;;  %v3825_v51 = vshrl.u32 %v11208_v59, %v9224_v10  ;;  %v3828_v23 = vshrl.u32 %v11209_v44, %v9224_v10  ;;  %v3834_v54 = vshrl.u32 %v11215_v49, %v9224_v10 }
 0x3de   :  { %v3627_v24 = vadd.f32 0.041655596, %v3626_v21  ;;  %v3634_v61 = vadd.f32 0.008332121, %v3633_v57  ;;  %v3831_v16 = vshrl.u32 %v11214_v13, %v9224_v10  ;;  %v3837_v1 = vshrl.u32 %v11220_v52, %v9224_v10 }
 0x3df   :  { %v3753_v9 = vshll.u32 %v3752_v39, 30  ;;  %v9262_v30 = vor.u32 %v3825_v51, %v3824_v8  ;;  %v9264_v33 = vor.u32 %v3828_v23, %v3827_v47  ;;  %v3835_v6 = vor.u32 %v3834_v54, %v3833_v5 }
 0x3e0   :  { %v3628_v53 = vmul.f32 %v3627_v24, %v3625_v15  ;;  %v3635_v62 = vmul.f32 %v3634_v61, %v3625_v15  ;;  %vm3644_vm3 = vcmp.eq.s32.totalorder %v9236_v35, 0  ;;  %v3836_v19 = vshll.u32 %v11215_v49, %v3821_v34 }
 0x3e1   :  { %v9251_v45 = vsub.s32 %v3750_v26, %v3753_v9  ;;  %vm9272_vm5 = vcmp.le.f32.partialorder %v3652_v56, 0.7853982  ;;  %v3776_v4 = vsub.s32 4, %v3752_v39  ;;  %v9276_v48 = vor.u32 %v3831_v16, %v3830_v42 }
 0x3e2   :  { %v3629_v50 = vadd.f32 -0.4999988, %v3628_v53  ;;  %v3636_v38 = vadd.f32 -0.16666654, %v3635_v62  ;;  %v9279_v0 = vadd.f32 %v9178_v11, %v1559_v31  ;;  %vm3647_vm4 = vcmp.eq.s32.totalorder %v9236_v35, 2 }
 0x3e3   :  { %vm3755_vm2 = vcmp.lt.s32.totalorder %v9251_v45, 0  ;;  %v3756_v2 = vsub.s32 0, %v9251_v45  ;;  %v5284_v12 = vperm.slane %v8945_v17, 2  ;;  %v3838_v3 = vor.u32 %v3837_v1, %v3836_v19 }
 0x3e4   :  { %v3630_v20 = vmul.f32 %v3629_v50, %v3625_v15  ;;  %v3637_v28 = vmul.f32 %v3636_v38, %v3625_v15  ;;  %vm3839_vm7 = vcmp.lt.s32.totalorder %v9242_v25, 1  ;;  %vm3643_vm6 = vcmp.lt.s32.totalorder %v9236_v35, 2 }
 0x3e5   :  { %v3757_v55 = vsel %vm3755_vm2, %v3756_v2, %v9251_v45  ;;  %vm3842_vm8 = vcmp.lt.s32.totalorder %v9242_v25, 4  ;;  %v3847_v11 = vsel %vm3839_vm7, %v9262_v30, %v9264_v33  ;;  %vm3841_vm11 = vcmp.lt.s32.totalorder %v9242_v25, 3 }
 0x3e6   :  { %v3758_v26 = vclz %v3757_v55  ;;  %v3638_v15 = vadd.f32 1.0, %v3637_v28  ;;  %v3631_v34 = vadd.f32 1.0, %v3630_v20  ;;  %v3848_v21 = vsel %vm3842_vm8, %v3835_v6, 920167782 }
 0x3e7   :  { %v3856_v57 = vand.u32 65535, %v9240_v36  ;;  %v3777_v58 = vsel %vm3654_vm1, %v3776_v4, %v3752_v39  ;;  %vm3840_vm12 = vcmp.lt.s32.totalorder %v9242_v25, 2  ;;  %v3849_v37 = vsel %vm3841_vm11, %v9276_v48, %v3848_v21 }
 0x3e8   :  { %v6196_v56 = vadd.s32 4294967294, %v3758_v26  ;;  %v3639_v31 = vmul.f32 %v3638_v15, %v3623_v32  ;;  %vm3640_vm13 = vweird.f32 %v8914_v46  ;;  %v3850_v61 = vsel %vm3840_vm12, %v3847_v11, %v3849_v37 }
 0x3e9   :  { %v3851_v9 = vsel %vm3839_vm7, %v9264_v33, %v9276_v48  ;;  %v3648_v51 = vxor.u32 2147483648, %v3631_v34  ;;  %v3852_v54 = vsel %vm3842_vm8, %v3838_v3, 1326507024  ;;  %v3881_v8 = vshrl.u32 %v3850_v61, 16 }
 0x3ea   :  { %vm6197_vm9 = vcmp.lt.s32.totalorder %v6196_v56, 0  ;;  %v3645_v32 = vxor.u32 2147483648, %v3639_v31  ;;  %v3853_v62 = vsel %vm3841_vm11, %v3835_v6, %v3852_v54  ;;  %v3965_v47 = vand.u32 2139095040, %v9279_v0 }
 0x3eb   :  { %v3761_v24 = vsel %vm6197_vm9, 0, %v6196_v56  ;;  %v3854_v50 = vsel %vm3840_vm12, %v3851_v9, %v3853_v62  ;;  %v3779_v38 = vsel %vm9272_vm5, 0, %v3777_v58  ;;  %v3649_v6 = vsel %vm3647_vm4, %v3648_v51, %v3639_v31 }
 0x3ec   :  { %v3762_v39 = vsub.s32 32, %v3761_v24  ;;  %v3766_v23 = vsub.s32 4294967266, %v3761_v24  ;;  %v3763_v53 = vshll.u32 %v9251_v45, %v3761_v24  ;;  %v3646_v16 = vsel %vm3644_vm3, %v3631_v34, %v3645_v32 }
 0x3ed   :  { %v3857_v45 = vshrl.u32 %v9240_v36, 16  ;;  %v3858_v2 = vand.u32 65535, %v3854_v50  ;;  %v3859_v42 = vshrl.u32 %v3854_v50, 16  ;;  %v3883_v55 = vmul.u32 %v3881_v8, %v3856_v57 }
 0x3ee   :  { %v3764_v5 = vshrl.u32 %v9238_v41, %v3762_v39  ;;  %v3767_v1 = vadd.s32 127, %v3766_v23  ;;  %v3650_v41 = vsel %vm3643_vm6, %v3646_v16, %v3649_v6  ;;  %v3880_v26 = vand.u32 65535, %v3850_v61 }
 0x3ef   :  { %v3861_v19 = vmul.u32 %v3859_v42, %v3856_v57  ;;  %v3962_v4 = vand.u32 2147483647, %v9279_v0  ;;  %v5356_v15 = vperm.slane %v8948_v18, 2  ;;  %v3862_v34 = vmul.u32 %v3858_v2, %v3857_v45 }
 0x3f0   :  { %v3765_v20 = vor.u32 %v3764_v5, %v3763_v53  ;;  %v3768_v28 = vshll.u32 %v3767_v1, 23  ;;  %v3966_v56 = vshrl.u32 %v3965_v47, 23  ;;  %v3796_v11 = vadd.s32 3, %v3779_v38 }
 0x3f1   :  { %v3823_v21 = vshrl.u32 %v11219_v63, %v9224_v10  ;;  %v3860_v31 = vmul.u32 %v3858_v2, %v3856_v57  ;;  %v3864_v58 = vshll.u32 %v3861_v19, 16  ;;  %v9331_v37 = vsel %vm3640_vm13, nan, %v3650_v41 }
 0x3f2   :  { %v3769_v3 = vor.u32 4788187, %v3768_v28  ;;  %v3772_v32 = vcvt.s32.f32 %v3765_v20  ;;  %v3886_v24 = vshll.u32 %v3883_v55, 16  ;;  %v3863_v61 = vmul.u32 %v3859_v42, %v3857_v45 }
 0x3f3   :  { %vm3868_vm14 = vc.u32 %v3860_v31, %v3864_v58  ;;  %v3870_v9 = vadd.s32 %v3864_v58, %v3860_v31  ;;  %v3884_v51 = vmul.u32 %v3880_v26, %v3857_v45  ;;  %v3866_v23 = vshll.u32 %v3862_v34, 16 }
 0x3f4   :  { %v3770_v35 = vand.u32 2147483647, %v3769_v3  ;;  %v3869_v54 = vsel %vm3868_vm14, 1, %v11229_v14  ;;  %v3882_v53 = vmul.u32 %v3880_v26, %v3856_v57  ;;  %v5212_v10 = vmul.f32 2.0, %v9331_v37 }
 0x3f5   :  { %v3843_v62 = vsel %vm3839_vm7, %v3823_v21, %v9262_v30  ;;  %v3844_v47 = vsel %vm3842_vm8, %v9276_v48, 2102212464  ;;  %v3871_v16 = vadd.s32 %v3869_v54, %v3863_v61  ;;  %vm3872_vm0 = vc.u32 %v3870_v9, %v3866_v23  ;;  %v1844_v23 = vpop.f32.mrf.mxu0 }
 0x3f6   :  { %v3773_v39 = vmul.f32 %v3772_v32, %v3770_v35  ;;  %v3885_v1 = vmul.u32 %v3881_v8, %v3857_v45  ;;  %vm3890_vm15 = vc.u32 %v3882_v53, %v3886_v24  ;;  %v3873_v50 = vsel %vm3872_vm0, 1, %v11229_v14 }
 0x3f7   :  { %v3888_v38 = vshll.u32 %v3884_v51, 16  ;;  %v3891_v57 = vsel %vm3890_vm15, 1, %v11229_v14  ;;  %v3892_v2 = vadd.s32 %v3886_v24, %v3882_v53  ;;  %v3865_v6 = vshrl.u32 %v3861_v19, 16 }
 0x3f8   :  { %v3774_v5 = vxor.u32 2147483648, %v3773_v39  ;;  %v3875_v30 = vadd.s32 %v3873_v50, %v3871_v16  ;;  %v3893_v20 = vadd.s32 %v3891_v57, %v3885_v1  ;;  %v3845_v8 = vsel %vm3841_vm11, %v9264_v33, %v3844_v47 }
 0x3f9   :  { %vm3894_vm2 = vc.u32 %v3892_v2, %v3888_v38  ;;  %v6201_v45 = vadd.s32 4294967169, %v3966_v56  ;;  %v3867_v41 = vshrl.u32 %v3862_v34, 16  ;;  %v5233_v3 = vmul.f32 %v5212_v10, %v9331_v37 }
 0x3fa   :  { %v3775_v42 = vsel %vm3654_vm1, %v3774_v5, %v3773_v39  ;;  %v3876_v26 = vadd.s32 %v3875_v30, %v3865_v6  ;;  %v3895_v19 = vsel %vm3894_vm2, 1, %v11229_v14  ;;  %v3887_v21 = vshrl.u32 %v3883_v55, 16 }
 0x3fb   :  { %v9348_v48 = vsel %vm9272_vm5, %v8938_v60, %v3775_v42  ;;  %v3897_v31 = vadd.s32 %v3895_v19, %v3893_v20  ;;  %v3972_v22 = vadd.s32 1, %v6201_v45  ;;  %v9361_v33 = vand.u32 8388607, %v3962_v4 }
 0x3fc   :  { %v3780_v28 = vmul.f32 %v9348_v48, %v9348_v48  ;;  %v9357_v32 = vadd.s32 %v3876_v26, %v3867_v41  ;;  %v9363_v56 = vand.u32 3, %v3796_v11  ;;  %v3889_v24 = vshrl.u32 %v3884_v51, 16 }
 0x3fd   :  { %v3898_v34 = vadd.s32 %v3897_v31, %v3887_v21  ;;  %vm3973_vm1 = vcmp.gt.s32.totalorder %v3972_v22, 0  ;;  %v3846_v55 = vsel %vm3840_vm12, %v3843_v62, %v3845_v8  ;;  %v9367_v39 = vadd.s32 %v3892_v2, %v3888_v38  ;;  %v1846_v26 = vpop.f32.mrf.mxu0 }
 0x3fe   :  { %v3781_v58 = vmul.f32 -0.001358992, %v3780_v28  ;;  %v3788_v35 = vmul.f32 -0.00019511016, %v3780_v28  ;;  %v5254_v54 = vsub.f32 1.0, %v5233_v3  ;;  %v3974_v10 = vsel %vm3973_vm1, %v3972_v22, 0 }
 0x3ff   :  { %v3899_v53 = vadd.s32 %v3898_v34, %v3889_v24  ;;  %v9370_v47 = vadd.f32 %v1844_v23, %v9230_v43  ;;  %vm3902_vm3 = vc.u32 %v9357_v32, %v9367_v39  ;;  %v3976_v51 = vand.u32 31, %v3974_v10 }
 0x400   :  { %v3782_v61 = vadd.f32 0.041655596, %v3781_v58  ;;  %v3789_v9 = vadd.f32 0.008332121, %v3788_v35  ;;  %vm5305_vm5 = vcmp.eq.s32.totalorder %v5284_v12, 1  ;;  %vm9378_vm4 = vcmp.eq.s32.totalorder %v5356_v15, 1 }
 0x401   :  { %v3903_v62 = vadd.s32 1, %v3899_v53  ;;  %v3970_v5 = vor.u32 8388608, %v9361_v33  ;;  %v3900_v50 = vmul.u32 %v9240_v36, %v3846_v55  ;;  %v9384_v38 = vsub.s32 32, %v3976_v51 }
 0x402   :  { %v3783_v16 = vmul.f32 %v3782_v61, %v3780_v28  ;;  %v3790_v11 = vmul.f32 %v3789_v9, %v3780_v28  ;;  %vm3799_vm7 = vcmp.eq.s32.totalorder %v9363_v56, 0  ;;  %vm3802_vm6 = vcmp.eq.s32.totalorder %v9363_v56, 2 }
 0x403   :  { %v5285_v12 = vperm.slane %v8945_v17, 3  ;;  %v3904_v57 = vsel %vm3902_vm3, %v3903_v62, %v3899_v53  ;;  %v9390_v15 = vsel %vm5305_vm5, %v5254_v54, %v9331_v37  ;;  %vm3798_vm8 = vcmp.lt.s32.totalorder %v9363_v56, 2  ;;  %v9424_v53 = vpop.f32.mrf.mxu1 }
 0x404   :  { %v3784_v43 = vadd.f32 -0.4999988, %v3783_v16  ;;  %v3791_v1 = vadd.f32 -0.16666654, %v3790_v11  ;;  %v3905_v6 = vadd.s32 %v3904_v57, %v3900_v50  ;;  %vm3795_vm11 = vweird.f32 %v8938_v60 }
 0x405   :  { %v9394_v36 = vshrl.u32 %v3974_v10, 5  ;;  %v3980_v30 = vshrl.u32 %v11208_v59, %v9384_v38  ;;  %v3983_v20 = vshrl.u32 %v11209_v44, %v9384_v38  ;;  %v3989_v8 = vshrl.u32 %v11215_v49, %v9384_v38 }
 0x406   :  { %v3785_v2 = vmul.f32 %v3784_v43, %v3780_v28  ;;  %v3792_v42 = vmul.f32 %v3791_v1, %v3780_v28  ;;  %v3906_v41 = vadd.s32 536870912, %v3905_v6  ;;  %v3979_v28 = vshll.u32 %v11219_v63, %v3976_v51 }
 0x407   :  { %v3982_v19 = vshll.u32 %v11208_v59, %v3976_v51  ;;  %v3985_v3 = vshll.u32 %v11209_v44, %v3976_v51  ;;  %v3986_v21 = vshrl.u32 %v11214_v13, %v9384_v38  ;;  %v3988_v31 = vshll.u32 %v11214_v13, %v3976_v51 }
 0x408   :  { %v3786_v37 = vadd.f32 1.0, %v3785_v2  ;;  %v3793_v45 = vadd.f32 1.0, %v3792_v42  ;;  %v9409_v35 = vshrl.u32 %v3906_v41, 30  ;;  %v3992_v33 = vshrl.u32 %v11220_v52, %v9384_v38 }
 0x409   :  { %v9413_v24 = vor.u32 %v3980_v30, %v3979_v28  ;;  %v9415_v34 = vor.u32 %v3983_v20, %v3982_v19  ;;  %v3990_v61 = vor.u32 %v3989_v8, %v3988_v31  ;;  %v3991_v9 = vshll.u32 %v11215_v49, %v3976_v51 }
 0x40a   :  { %v3794_v22 = vmul.f32 %v3793_v45, %v9348_v48  ;;  %v3803_v58 = vxor.u32 2147483648, %v3786_v37  ;;  %v5398_v55 = vsel %vm9378_vm4, %v8914_v46, %v9390_v15  ;;  %v5357_v48 = vperm.slane %v8948_v18, 3 }
 0x40b   :  { %v3908_v54 = vshll.u32 %v9409_v35, 30  ;;  %v9426_v10 = vor.u32 %v3986_v21, %v3985_v3  ;;  %v3993_v16 = vor.u32 %v3992_v33, %v3991_v9  ;;  %vm3994_vm9 = vcmp.lt.s32.totalorder %v9394_v36, 1 }
 0x40c   :  { %v3800_v23 = vxor.u32 2147483648, %v3794_v22  ;;  %v9429_v11 = vshll.u32 %v3970_v5, 8  ;;  %v3804_v62 = vsel %vm3802_vm6, %v3803_v58, %v3794_v22  ;;  %vm3997_vm12 = vcmp.lt.s32.totalorder %v9394_v36, 4  ;;  %v1859_v22 = vpop.f32.mrf.mxu1 }
 0x40d   :  { %v3909_v43 = vsub.s32 %v3905_v6, %v3908_v54  ;;  %vm3995_vm13 = vcmp.lt.s32.totalorder %v9394_v36, 2  ;;  %v4002_v5 = vsel %vm3994_vm9, %v9413_v24, %v9415_v34  ;;  %v4003_v50 = vsel %vm3997_vm12, %v3990_v61, 920167782 }
 0x40e   :  { %v3801_v51 = vsel %vm3799_vm7, %v3786_v37, %v3800_v23  ;;  %vm3996_vm0 = vcmp.lt.s32.totalorder %v9394_v36, 3  ;;  %v4006_v6 = vsel %vm3994_vm9, %v9415_v34, %v9426_v10  ;;  %v4007_v30 = vsel %vm3997_vm12, %v3993_v16, 1326507024 }
 0x40f   :  { %v3805_v1 = vsel %vm3798_vm8, %v3801_v51, %v3804_v62  ;;  %vm3910_vm14 = vcmp.lt.s32.totalorder %v3909_v43, 0  ;;  %v3911_v2 = vsub.s32 0, %v3909_v43  ;;  %v4004_v56 = vsel %vm3996_vm0, %v9426_v10, %v4003_v50 }
 0x410   :  { %v3806_v57 = vsel %vm3795_vm11, nan, %v3805_v1  ;;  %vm9457_vm15 = vcmp.eq.s32.totalorder %v5285_v12, 1  ;;  %v4005_v37 = vsel %vm3995_vm13, %v4002_v5, %v4004_v56  ;;  %v4008_v45 = vsel %vm3996_vm0, %v3990_v61, %v4007_v30 }
 0x411   :  { %v5213_v42 = vmul.f32 2.0, %v3806_v57  ;;  %v3912_v8 = vsel %vm3910_vm14, %v3911_v2, %v3909_v43  ;;  %vm9465_vm2 = vcmp.eq.s32.totalorder %v5357_v48, 1  ;;  %v4009_v19 = vsel %vm3995_vm13, %v4006_v6, %v4008_v45 }
 0x412   :  { %v3913_v26 = vclz %v3912_v8  ;;  %v4011_v12 = vand.u32 65535, %v9429_v11  ;;  %v4012_v3 = vshrl.u32 %v9429_v11, 16  ;;  %v4013_v21 = vand.u32 65535, %v4009_v19 }
 0x413   :  { %v5234_v41 = vmul.f32 %v5213_v42, %v3806_v57  ;;  %v4035_v31 = vand.u32 65535, %v4005_v37  ;;  %v3901_v33 = vadd.s32 %v9367_v39, %v9357_v32  ;;  %v4014_v9 = vshrl.u32 %v4009_v19, 16 }
 0x414   :  { %v6199_v61 = vadd.s32 4294967294, %v3913_v26  ;;  %v3978_v23 = vshrl.u32 %v11219_v63, %v9384_v38  ;;  %v4017_v48 = vmul.u32 %v4013_v21, %v4012_v3  ;;  %v4036_v54 = vshrl.u32 %v4005_v37, 16 }
 0x415   :  { %v5255_v58 = vsub.f32 1.0, %v5234_v41  ;;  %v4120_v16 = vand.u32 2139095040, %v9370_v47  ;;  %v3931_v62 = vsub.s32 4, %v9409_v35  ;;  %v4016_v1 = vmul.u32 %v4014_v9, %v4011_v12 }
 0x416   :  { %vm6200_vm1 = vcmp.lt.s32.totalorder %v6199_v61, 0  ;;  %v4015_v5 = vmul.u32 %v4013_v21, %v4011_v12  ;;  %v4037_v50 = vmul.u32 %v4035_v31, %v4011_v12  ;;  %v4039_v56 = vmul.u32 %v4035_v31, %v4012_v3 }
 0x417   :  { %v5327_v51 = vsel %vm9457_vm15, %v5255_v58, %v3806_v57  ;;  %v3916_v39 = vsel %vm6200_vm1, 0, %v6199_v61  ;;  %v4018_v6 = vmul.u32 %v4014_v9, %v4012_v3  ;;  %v4019_v30 = vshll.u32 %v4016_v1, 16 }
 0x418   :  { %v5399_v32 = vsel %vm9465_vm2, %v8938_v60, %v5327_v51  ;;  %v3917_v38 = vsub.s32 32, %v3916_v39  ;;  %v3921_v42 = vsub.s32 4294967266, %v3916_v39  ;;  %v4021_v8 = vshll.u32 %v4017_v48, 16 }
 0x419   :  { %v5434_v2 = vrot.slane %v5399_v32, 4  ;;  %v4038_v20 = vmul.u32 %v4036_v54, %v4011_v12  ;;  %v3918_v37 = vshll.u32 %v3909_v43, %v3916_v39  ;;  %vm3809_vm3 = vcmp.lt.s32.totalorder %v9195_v7, 0 }
 0x41a   :  { %v3919_v60 = vshrl.u32 %v3901_v33, %v3917_v38  ;;  %v3922_v45 = vadd.s32 127, %v3921_v42  ;;  %vm4023_vm5 = vc.u32 %v4015_v5, %v4019_v30  ;;  %v4025_v41 = vadd.s32 %v4019_v30, %v4015_v5 }
 0x41b   :  { %v5445_v57 = vsel %vm5439_vm10, %v5398_v55, %v5434_v2  ;;  %v4040_v28 = vmul.u32 %v4036_v54, %v4012_v3  ;;  %v4041_v26 = vshll.u32 %v4038_v20, 16  ;;  %v4024_v12 = vsel %vm4023_vm5, 1, %v11229_v14 }
 0x41c   :  { %5465 = vst [vmem:[#allocation10 + $0x28] sm:$0xff] %v5445_v57  ;;  %v3920_v19 = vor.u32 %v3919_v60, %v3918_v37  ;;  %v3923_v21 = vshll.u32 %v3922_v45, 23  ;;  %v4043_v25 = vshll.u32 %v4039_v56, 16  ;;  %v4026_v31 = vadd.s32 %v4024_v12, %v4018_v6 }
 0x41d   :  { %vm4027_vm7 = vc.u32 %v4025_v41, %v4021_v8  ;;  %vm4045_vm4 = vc.u32 %v4037_v50, %v4041_v26  ;;  %v4047_v46 = vadd.s32 %v4041_v26, %v4037_v50  ;;  %v3999_v55 = vsel %vm3997_vm12, %v9426_v10, 2102212464 }
 0x41e   :  { %v3924_v15 = vor.u32 4788187, %v3923_v21  ;;  %v4028_v43 = vsel %vm4027_vm7, 1, %v11229_v14  ;;  %v4046_v22 = vsel %vm4045_vm4, 1, %v11229_v14  ;;  %v4020_v3 = vshrl.u32 %v4016_v1, 16 }
 0x41f   :  { %v4030_v58 = vadd.s32 %v4028_v43, %v4026_v31  ;;  %v4048_v33 = vadd.s32 %v4046_v22, %v4040_v28  ;;  %vm4049_vm6 = vc.u32 %v4047_v46, %v4043_v25  ;;  %v3927_v9 = vcvt.s32.f32 %v3920_v19 }
 0x420   :  { %v3925_v61 = vand.u32 2147483647, %v3924_v15  ;;  %v4022_v54 = vshrl.u32 %v4017_v48, 16  ;;  %v4050_v51 = vsel %vm4049_vm6, 1, %v11229_v14  ;;  %v4042_v39 = vshrl.u32 %v4038_v20, 16 }
 0x421   :  { %v4031_v32 = vadd.s32 %v4030_v58, %v4020_v3  ;;  %v4052_v5 = vadd.s32 %v4050_v51, %v4048_v33  ;;  %v4121_v50 = vshrl.u32 %v4120_v16, 23  ;;  %v3998_v10 = vsel %vm3994_vm9, %v3978_v23, %v9413_v24 }
 0x422   :  { %v3928_v2 = vmul.f32 %v3927_v9, %v3925_v61  ;;  %v4000_v1 = vsel %vm3996_vm0, %v9415_v34, %v3999_v55  ;;  %v9506_v38 = vadd.f32 %v9424_v53, %v9234_v27  ;;  %v4044_v42 = vshrl.u32 %v4039_v56, 16 }
 0x423   :  { %v4032_v48 = vadd.s32 %v4031_v32, %v4022_v54  ;;  %v4053_v6 = vadd.s32 %v4052_v5, %v4042_v39  ;;  %v4117_v30 = vand.u32 2147483647, %v9370_v47  ;;  %v3932_v16 = vsel %vm3809_vm3, %v3931_v62, %v9409_v35 }
 0x424   :  { %v3929_v8 = vxor.u32 2147483648, %v3928_v2  ;;  %v4051_v20 = vadd.s32 %v4047_v46, %v4043_v25  ;;  %v6204_v24 = vadd.s32 4294967169, %v4121_v50  ;;  %v4001_v23 = vsel %vm3995_vm13, %v3998_v10, %v4000_v1  ;;  %v11281_v46 = vld [vmem:[#allocation100_spill] sm:$0xff] }
 0x425   :  { %v4054_v34 = vadd.s32 %v4053_v6, %v4044_v42  ;;  %vm3808_vm8 = vcmp.le.f32.partialorder %v3807_v40, 0.7853982  ;;  %v4055_v36 = vmul.u32 %v9429_v11, %v4001_v23  ;;  %v4124_v62 = vand.u32 8388607, %v4117_v30 }
 0x426   :  { %v3930_v27 = vsel %vm3809_vm3, %v3929_v8, %v3928_v2  ;;  %vm4057_vm11 = vc.u32 %v4032_v48, %v4051_v20  ;;  %v4127_v53 = vadd.s32 1, %v6204_v24  ;;  %v3934_v57 = vsel %vm3808_vm8, 0, %v3932_v16 }
 0x427   :  { %v9519_v56 = vsel %vm3808_vm8, %v9195_v7, %v3930_v27  ;;  %v4058_v37 = vadd.s32 1, %v4054_v34  ;;  %v3951_v28 = vadd.s32 3, %v3934_v57  ;;  %v4125_v31 = vor.u32 8388608, %v4124_v62 }
 0x428   :  { %v3935_v35 = vmul.f32 %v9519_v56, %v9519_v56  ;;  %vm4128_vm9 = vcmp.gt.s32.totalorder %v4127_v53, 0  ;;  %v9528_v15 = vadd.f32 %v7522_v29, %v11281_v46  ;;  %v5286_v58 = vperm.slane %v8945_v17, 4 }
 0x429   :  { %v4059_v40 = vsel %vm4057_vm11, %v4058_v37, %v4054_v34  ;;  %v4129_v60 = vsel %vm4128_vm9, %v4127_v53, 0  ;;  %v9532_v22 = vand.u32 3, %v3951_v28  ;;  %v5358_v33 = vperm.slane %v8948_v18, 4 }
 0x42a   :  { %v3936_v45 = vmul.f32 -0.001358992, %v3935_v35  ;;  %v3943_v41 = vmul.f32 -0.00019511016, %v3935_v35  ;;  %v4060_v26 = vadd.s32 %v4059_v40, %v4055_v36  ;;  %v4131_v19 = vand.u32 31, %v4129_v60 }
 0x42b   :  { %vm3964_vm12 = vcmp.lt.s32.totalorder %v9279_v0, 0  ;;  %v9537_v61 = vadd.s32 %v4051_v20, %v4032_v48  ;;  %v4272_v9 = vand.u32 2147483647, %v9506_v38  ;;  %v9540_v51 = vshll.u32 %v4125_v31, 8 }
 0x42c   :  { %v3937_v21 = vadd.f32 0.041655596, %v3936_v45  ;;  %v3944_v12 = vadd.f32 0.008332121, %v3943_v41  ;;  %v4061_v25 = vadd.s32 536870912, %v4060_v26  ;;  %v9530_v11 = vsub.s32 32, %v4131_v19 }
 0x42d   :  { %v4275_v32 = vand.u32 2139095040, %v9506_v38  ;;  %v9543_v39 = vshrl.u32 %v4129_v60, 5  ;;  %v4134_v5 = vshll.u32 %v11219_v63, %v4131_v19  ;;  %v4137_v6 = vshll.u32 %v11208_v59, %v4131_v19 }
 0x42e   :  { %v3938_v55 = vmul.f32 %v3937_v21, %v3935_v35  ;;  %v3945_v43 = vmul.f32 %v3944_v12, %v3935_v35  ;;  %v4062_v3 = vshrl.u32 %v4061_v25, 30  ;;  %v4135_v50 = vshrl.u32 %v11208_v59, %v9530_v11 }
 0x42f   :  { %v4138_v2 = vshrl.u32 %v11209_v44, %v9530_v11  ;;  %v4144_v42 = vshrl.u32 %v11215_v49, %v9530_v11  ;;  %v4140_v8 = vshll.u32 %v11209_v44, %v4131_v19  ;;  %v4141_v16 = vshrl.u32 %v11214_v13, %v9530_v11 }
 0x430   :  { %v3946_v54 = vadd.f32 -0.16666654, %v3945_v43  ;;  %v4063_v29 = vshll.u32 %v4062_v3, 30  ;;  %v3939_v10 = vadd.f32 -0.4999988, %v3938_v55  ;;  %v4147_v20 = vshrl.u32 %v11220_v52, %v9530_v11 }
 0x431   :  { %vm9562_vm13 = vcmp.le.f32.partialorder %v3962_v4, 0.7853982  ;;  %v4086_v34 = vsub.s32 4, %v4062_v3  ;;  %v4143_v27 = vshll.u32 %v11214_v13, %v4131_v19  ;;  %v9569_v57 = vor.u32 %v4135_v50, %v4134_v5 }
 0x432   :  { %v3947_v1 = vmul.f32 %v3946_v54, %v3935_v35  ;;  %v9550_v48 = vsub.s32 %v4060_v26, %v4063_v29  ;;  %v9571_v37 = vor.u32 %v4138_v2, %v4137_v6  ;;  %v4146_v36 = vshll.u32 %v11215_v49, %v4131_v19  ;;  %v9608_v54 = vpop.f32.mrf.mxu2 }
 0x433   :  { %v3940_v62 = vmul.f32 %v3939_v10, %v3935_v35  ;;  %v4145_v40 = vor.u32 %v4144_v42, %v4143_v27  ;;  %v9576_v60 = vand.u32 65535, %v9540_v51  ;;  %v4142_v41 = vor.u32 %v4141_v16, %v4140_v8 }
 0x434   :  { %vm4065_vm14 = vcmp.lt.s32.totalorder %v9550_v48, 0  ;;  %v4066_v23 = vsub.s32 0, %v9550_v48  ;;  %v3948_v53 = vadd.f32 1.0, %v3947_v1  ;;  %v4148_v28 = vor.u32 %v4147_v20, %v4146_v36 }
 0x435   :  { %v9579_v26 = vshrl.u32 %v9540_v51, 16  ;;  %vm3954_vm0 = vcmp.eq.s32.totalorder %v9532_v22, 0  ;;  %v4087_v21 = vsel %vm3964_vm12, %v4086_v34, %v4062_v3  ;;  %vm4149_vm15 = vcmp.lt.s32.totalorder %v9543_v39, 1 }
 0x436   :  { %v4067_v4 = vsel %vm4065_vm14, %v4066_v23, %v9550_v48  ;;  %v4276_v35 = vshrl.u32 %v4275_v32, 23  ;;  %v9587_v19 = vand.u32 8388607, %v4272_v9  ;;  %v3949_v12 = vmul.f32 %v3948_v53, %v9519_v56 }
 0x437   :  { %v4068_v45 = vclz %v4067_v4  ;;  %vm4152_vm2 = vcmp.lt.s32.totalorder %v9543_v39, 4  ;;  %v4157_v31 = vsel %vm4149_vm15, %v9569_v57, %v9571_v37  ;;  %v3941_v46 = vadd.f32 1.0, %v3940_v62 }
 0x438   :  { %vm3957_vm1 = vcmp.eq.s32.totalorder %v9532_v22, 2  ;;  %vm4150_vm3 = vcmp.lt.s32.totalorder %v9543_v39, 2  ;;  %vm4151_vm5 = vcmp.lt.s32.totalorder %v9543_v39, 3  ;;  %v4158_v55 = vsel %vm4152_vm2, %v4145_v40, 920167782 }
 0x439   :  { %v6202_v25 = vadd.s32 4294967294, %v4068_v45  ;;  %vm3953_vm7 = vcmp.lt.s32.totalorder %v9532_v22, 2  ;;  %v4159_v56 = vsel %vm4151_vm5, %v4142_v41, %v4158_v55  ;;  %v4161_v43 = vsel %vm4149_vm15, %v9571_v37, %v4142_v41 }
 0x43a   :  { %v4162_v3 = vsel %vm4152_vm2, %v4148_v28, 1326507024  ;;  %v4160_v32 = vsel %vm4150_vm3, %v4157_v31, %v4159_v56  ;;  %v6207_v50 = vadd.s32 4294967169, %v4276_v35  ;;  %v3955_v2 = vxor.u32 2147483648, %v3949_v12 }
 0x43b   :  { %vm6203_vm4 = vcmp.lt.s32.totalorder %v6202_v25, 0  ;;  %v4163_v5 = vsel %vm4151_vm5, %v4145_v40, %v4162_v3  ;;  %v4089_v42 = vsel %vm9562_vm13, 0, %v4087_v21  ;;  %v3958_v6 = vxor.u32 2147483648, %v3941_v46 }
 0x43c   :  { %v4071_v29 = vsel %vm6203_vm4, 0, %v6202_v25  ;;  %v4164_v8 = vsel %vm4150_vm3, %v4161_v43, %v4163_v5  ;;  %v4190_v16 = vand.u32 65535, %v4160_v32  ;;  %v4191_v20 = vshrl.u32 %v4160_v32, 16  ;;  %v1872_v43 = vpop.f32.mrf.mxu2 }
 0x43d   :  { %v4072_v10 = vsub.s32 32, %v4071_v29  ;;  %v4076_v1 = vsub.s32 4294967266, %v4071_v29  ;;  %vm3950_vm6 = vweird.f32 %v9195_v7  ;;  %v4073_v23 = vshll.u32 %v9550_v48, %v4071_v29 }
 0x43e   :  { %v4168_v53 = vand.u32 65535, %v4164_v8  ;;  %v4133_v36 = vshrl.u32 %v11219_v63, %v9530_v11  ;;  %v4169_v62 = vshrl.u32 %v4164_v8, 16  ;;  %v4193_v4 = vmul.u32 %v4191_v20, %v9576_v60 }
 0x43f   :  { %v4074_v34 = vshrl.u32 %v9537_v61, %v4072_v10  ;;  %v4077_v27 = vadd.s32 127, %v4076_v1  ;;  %v4280_v40 = vor.u32 8388608, %v9587_v19  ;;  %v3956_v45 = vsel %vm3954_vm0, %v3941_v46, %v3955_v2 }
 0x440   :  { %v4154_v48 = vsel %vm4152_vm2, %v4142_v41, 2102212464  ;;  %v4106_v35 = vadd.s32 3, %v4089_v42  ;;  %v4171_v61 = vmul.u32 %v4169_v62, %v9576_v60  ;;  %v4172_v25 = vmul.u32 %v4168_v53, %v9579_v26 }
 0x441   :  { %v4075_v28 = vor.u32 %v4074_v34, %v4073_v23  ;;  %v4078_v21 = vshll.u32 %v4077_v27, 23  ;;  %v4194_v11 = vmul.u32 %v4190_v16, %v9579_v26  ;;  %v3959_v31 = vsel %vm3957_vm1, %v3958_v6, %v3949_v12 }
 0x442   :  { %v4153_v46 = vsel %vm4149_vm15, %v4133_v36, %v9569_v57  ;;  %v4196_v56 = vshll.u32 %v4193_v4, 16  ;;  %v3960_v41 = vsel %vm3953_vm7, %v3956_v45, %v3959_v31  ;;  %v4155_v3 = vsel %vm4151_vm5, %v9571_v37, %v4154_v48 }
 0x443   :  { %v4079_v55 = vor.u32 4788187, %v4078_v21  ;;  %v4170_v29 = vmul.u32 %v4168_v53, %v9576_v60  ;;  %v4174_v32 = vshll.u32 %v4171_v61, 16  ;;  %v4082_v2 = vcvt.s32.f32 %v4075_v28 }
 0x444   :  { %v4173_v12 = vmul.u32 %v4169_v62, %v9579_v26  ;;  %v4192_v10 = vmul.u32 %v4190_v16, %v9576_v60  ;;  %v4176_v1 = vshll.u32 %v4172_v25, 16  ;;  %v4198_v42 = vshll.u32 %v4194_v11, 16 }
 0x445   :  { %v4080_v5 = vand.u32 2147483647, %v4079_v55  ;;  %vm4178_vm8 = vc.u32 %v4170_v29, %v4174_v32  ;;  %v4180_v57 = vadd.s32 %v4174_v32, %v4170_v29  ;;  %v9648_v37 = vsel %vm3950_vm6, nan, %v3960_v41 }
 0x446   :  { %v4179_v22 = vsel %vm4178_vm8, 1, %v11229_v14  ;;  %vm4200_vm11 = vc.u32 %v4192_v10, %v4196_v56  ;;  %v4202_v8 = vadd.s32 %v4196_v56, %v4192_v10  ;;  %v4195_v34 = vmul.u32 %v4191_v20, %v9579_v26 }
 0x447   :  { %v4083_v6 = vmul.f32 %v4082_v2, %v4080_v5  ;;  %v4181_v23 = vadd.s32 %v4179_v22, %v4173_v12  ;;  %vm4182_vm9 = vc.u32 %v4180_v57, %v4176_v1  ;;  %v4201_v16 = vsel %vm4200_vm11, 1, %v11229_v14 }
 0x448   :  { %v4183_v60 = vsel %vm4182_vm9, 1, %v11229_v14  ;;  %vm4204_vm14 = vc.u32 %v4202_v8, %v4198_v42  ;;  %v4175_v53 = vshrl.u32 %v4171_v61, 16  ;;  %v4203_v62 = vadd.s32 %v4201_v16, %v4195_v34 }
 0x449   :  { %v4084_v27 = vxor.u32 2147483648, %v4083_v6  ;;  %v4185_v36 = vadd.s32 %v4183_v60, %v4181_v23  ;;  %v4205_v45 = vsel %vm4204_vm14, 1, %v11229_v14  ;;  %v5214_v28 = vmul.f32 2.0, %v9648_v37 }
 0x44a   :  { %v4177_v48 = vshrl.u32 %v4172_v25, 16  ;;  %v4282_v31 = vadd.s32 1, %v6207_v50  ;;  %v4197_v55 = vshrl.u32 %v4193_v4, 16  ;;  %v4207_v56 = vadd.s32 %v4205_v45, %v4203_v62 }
 0x44b   :  { %v4085_v21 = vsel %vm3964_vm12, %v4084_v27, %v4083_v6  ;;  %v4186_v20 = vadd.s32 %v4185_v36, %v4175_v53  ;;  %v4156_v43 = vsel %vm4150_vm3, %v4153_v46, %v4155_v3  ;;  %v4199_v41 = vshrl.u32 %v4194_v11, 16 }
 0x44c   :  { %v9660_v26 = vsel %vm9562_vm13, %v9279_v0, %v4085_v21  ;;  %vm4283_vm0 = vcmp.gt.s32.totalorder %v4282_v31, 0  ;;  %v4208_v25 = vadd.s32 %v4207_v56, %v4197_v55  ;;  %v9670_v24 = vadd.f32 %v9608_v54, %v9528_v15 }
 0x44d   :  { %v4090_v61 = vmul.f32 %v9660_v26, %v9660_v26  ;;  %v9666_v29 = vadd.s32 %v4186_v20, %v4177_v48  ;;  %v4284_v50 = vsel %vm4283_vm0, %v4282_v31, 0  ;;  %v9672_v4 = vadd.s32 %v4202_v8, %v4198_v42 }
 0x44e   :  { %v4286_v2 = vand.u32 31, %v4284_v50  ;;  %v5235_v12 = vmul.f32 %v5214_v28, %v9648_v37  ;;  %v9675_v10 = vand.u32 3, %v4106_v35  ;;  %v4209_v39 = vadd.s32 %v4208_v25, %v4199_v41 }
 0x44f   :  { %v4091_v32 = vmul.f32 -0.001358992, %v4090_v61  ;;  %v4098_v5 = vmul.f32 -0.00019511016, %v4090_v61  ;;  %v4210_v11 = vmul.u32 %v9540_v51, %v4156_v43  ;;  %vm9680_vm12 = vcmp.eq.s32.totalorder %v5286_v58, 1 }
 0x450   :  { %vm4212_vm13 = vc.u32 %v9666_v29, %v9672_v4  ;;  %v9686_v3 = vsub.s32 32, %v4286_v2  ;;  %v4213_v1 = vadd.s32 1, %v4209_v39  ;;  %v9688_v57 = vshrl.u32 %v4284_v50, 5 }
 0x451   :  { %v4092_v15 = vadd.f32 0.041655596, %v4091_v32  ;;  %v4099_v54 = vadd.f32 0.008332121, %v4098_v5  ;;  %v4289_v35 = vshll.u32 %v11219_v63, %v4286_v2  ;;  %v4292_v51 = vshll.u32 %v11208_v59, %v4286_v2 }
 0x452   :  { %v4290_v58 = vshrl.u32 %v11208_v59, %v9686_v3  ;;  %v4298_v22 = vshll.u32 %v11214_v13, %v4286_v2  ;;  %v4214_v8 = vsel %vm4212_vm13, %v4213_v1, %v4209_v39  ;;  %v4293_v23 = vshrl.u32 %v11209_v44, %v9686_v3 }
 0x453   :  { %v4093_v42 = vmul.f32 %v4092_v15, %v4090_v61  ;;  %v4100_v6 = vmul.f32 %v4099_v54, %v4090_v61  ;;  %v4296_v34 = vshrl.u32 %v11214_v13, %v9686_v3  ;;  %v4299_v27 = vshrl.u32 %v11215_v49, %v9686_v3 }
 0x454   :  { %v4215_v53 = vadd.s32 %v4214_v8, %v4210_v11  ;;  %v4295_v36 = vshll.u32 %v11209_v44, %v4286_v2  ;;  %v9702_v62 = vor.u32 %v4290_v58, %v4289_v35  ;;  %v9704_v45 = vor.u32 %v4293_v23, %v4292_v51  ;;  %v9734_v11 = vpop.f32.mrf.mxu3 }
 0x455   :  { %v4094_v60 = vadd.f32 -0.4999988, %v4093_v42  ;;  %v4101_v16 = vadd.f32 -0.16666654, %v4100_v6  ;;  %v4300_v28 = vor.u32 %v4299_v27, %v4298_v22  ;;  %v4301_v21 = vshll.u32 %v11215_v49, %v4286_v2 }
 0x456   :  { %vm4108_vm15 = vcmp.lt.s32.totalorder %v9675_v10, 2  ;;  %v4216_v20 = vadd.s32 536870912, %v4215_v53  ;;  %v4302_v55 = vshrl.u32 %v11220_v52, %v9686_v3  ;;  %v5256_v56 = vsub.f32 1.0, %v5235_v12 }
 0x457   :  { %v4095_v48 = vmul.f32 %v4094_v60, %v4090_v61  ;;  %v4102_v31 = vmul.f32 %v4101_v16, %v4090_v61  ;;  %vm9712_vm2 = vcmp.eq.s32.totalorder %v5358_v33, 1  ;;  %vm4105_vm1 = vweird.f32 %v9279_v0 }
 0x458   :  { %vm4109_vm3 = vcmp.eq.s32.totalorder %v9675_v10, 0  ;;  %v9718_v41 = vor.u32 %v4296_v34, %v4295_v36  ;;  %vm4307_vm5 = vcmp.lt.s32.totalorder %v9688_v57, 4  ;;  %v9721_v50 = vshrl.u32 %v4216_v20, 30 }
 0x459   :  { %v4096_v61 = vadd.f32 1.0, %v4095_v48  ;;  %v4103_v25 = vadd.f32 1.0, %v4102_v31  ;;  %v4303_v32 = vor.u32 %v4302_v55, %v4301_v21  ;;  %vm4112_vm7 = vcmp.eq.s32.totalorder %v9675_v10, 2 }
 0x45a   :  { %vm4304_vm4 = vcmp.lt.s32.totalorder %v9688_v57, 1  ;;  %vm4306_vm6 = vcmp.lt.s32.totalorder %v9688_v57, 3  ;;  %v4313_v33 = vsel %vm4307_vm5, %v4300_v28, 920167782  ;;  %v4218_v12 = vshll.u32 %v9721_v50, 30 }
 0x45b   :  { %v4104_v5 = vmul.f32 %v4103_v25, %v9660_v26  ;;  %v4113_v2 = vxor.u32 2147483648, %v4096_v61  ;;  %v4312_v39 = vsel %vm4304_vm4, %v9702_v62, %v9704_v45  ;;  %v9739_v15 = vsel %vm9680_vm12, %v5256_v56, %v9648_v37 }
 0x45c   :  { %v4314_v54 = vsel %vm4306_vm6, %v9718_v41, %v4313_v33  ;;  %v4317_v26 = vsel %vm4307_vm5, %v4303_v32, 1326507024  ;;  %v9748_v1 = vshll.u32 %v4280_v40, 8  ;;  %v4219_v51 = vsub.s32 %v4215_v53, %v4218_v12  ;;  %v1885_v55 = vpop.f32.mrf.mxu3 }
 0x45d   :  { %v4110_v35 = vxor.u32 2147483648, %v4104_v5  ;;  %vm4305_vm8 = vcmp.lt.s32.totalorder %v9688_v57, 2  ;;  %v4316_v37 = vsel %vm4304_vm4, %v9704_v45, %v9718_v41  ;;  %v5287_v46 = vperm.slane %v8945_v17, 5 }
 0x45e   :  { %v5359_v42 = vperm.slane %v8948_v18, 5  ;;  %v4315_v6 = vsel %vm4305_vm8, %v4312_v39, %v4314_v54  ;;  %v4318_v19 = vsel %vm4306_vm6, %v4300_v28, %v4317_v26  ;;  %v4114_v58 = vsel %vm4112_vm7, %v4113_v2, %v4104_v5 }
 0x45f   :  { %v4111_v40 = vsel %vm4109_vm3, %v4096_v61, %v4110_v35  ;;  %vm4220_vm11 = vcmp.lt.s32.totalorder %v4219_v51, 0  ;;  %v4221_v22 = vsub.s32 0, %v4219_v51  ;;  %v4319_v23 = vsel %vm4305_vm8, %v4316_v37, %v4318_v19 }
 0x460   :  { %v4115_v8 = vsel %vm4108_vm15, %v4111_v40, %v4114_v58  ;;  %v4321_v34 = vand.u32 65535, %v9748_v1  ;;  %v4345_v27 = vand.u32 65535, %v4315_v6  ;;  %v4323_v53 = vand.u32 65535, %v4319_v23 }
 0x461   :  { %v4116_v60 = vsel %vm4105_vm1, nan, %v4115_v8  ;;  %v4222_v16 = vsel %vm4220_vm11, %v4221_v22, %v4219_v51  ;;  %v4346_v36 = vshrl.u32 %v4315_v6, 16  ;;  %v4322_v48 = vshrl.u32 %v9748_v1, 16 }
 0x462   :  { %v5215_v28 = vmul.f32 2.0, %v4116_v60  ;;  %v4223_v21 = vclz %v4222_v16  ;;  %v4324_v31 = vshrl.u32 %v4319_v23, 16  ;;  %v5400_v10 = vsel %vm9712_vm2, %v9195_v7, %v9739_v15 }
 0x463   :  { %vm9777_vm9 = vcmp.eq.s32.totalorder %v5287_v46, 1  ;;  %v4327_v32 = vmul.u32 %v4323_v53, %v4322_v48  ;;  %vm9781_vm14 = vcmp.eq.s32.totalorder %v5359_v42, 1  ;;  %v4211_v5 = vadd.s32 %v9672_v4, %v9666_v29 }
 0x464   :  { %v5236_v56 = vmul.f32 %v5215_v28, %v4116_v60  ;;  %v6205_v61 = vadd.s32 4294967294, %v4223_v21  ;;  %v4326_v25 = vmul.u32 %v4324_v31, %v4321_v34  ;;  %v4347_v2 = vmul.u32 %v4345_v27, %v4321_v34 }
 0x465   :  { %v4348_v12 = vmul.u32 %v4346_v36, %v4321_v34  ;;  %v4325_v7 = vmul.u32 %v4323_v53, %v4321_v34  ;;  %v4328_v54 = vmul.u32 %v4324_v31, %v4322_v48  ;;  %v4331_v26 = vshll.u32 %v4327_v32, 16 }
 0x466   :  { %v5257_v43 = vsub.f32 1.0, %v5236_v56  ;;  %vm6206_vm0 = vcmp.lt.s32.totalorder %v6205_v61, 0  ;;  %v4329_v39 = vshll.u32 %v4326_v25, 16  ;;  %v4349_v35 = vmul.u32 %v4345_v27, %v4322_v48 }
 0x467   :  { %v4226_v15 = vsel %vm6206_vm0, 0, %v6205_v61  ;;  %v4351_v6 = vshll.u32 %v4348_v12, 16  ;;  %v4330_v23 = vshrl.u32 %v4326_v25, 16  ;;  %v4350_v27 = vmul.u32 %v4346_v36, %v4322_v48 }
 0x468   :  { %v5329_v37 = vsel %vm9777_vm9, %v5257_v43, %v4116_v60  ;;  %v4227_v46 = vsub.s32 32, %v4226_v15  ;;  %v4231_v42 = vsub.s32 4294967266, %v4226_v15  ;;  %v4228_v4 = vshll.u32 %v4219_v51, %v4226_v15 }
 0x469   :  { %v5401_v29 = vsel %vm9781_vm14, %v9279_v0, %v5329_v37  ;;  %vm4333_vm12 = vc.u32 %v4325_v7, %v4329_v39  ;;  %v4335_v19 = vadd.s32 %v4329_v39, %v4325_v7  ;;  %v4353_v51 = vshll.u32 %v4349_v35, 16 }
 0x46a   :  { %v5435_v40 = vrot.slane %v5401_v29, 4  ;;  %v4229_v58 = vshrl.u32 %v4211_v5, %v4227_v46  ;;  %v4232_v22 = vadd.s32 127, %v4231_v42  ;;  %v4334_v8 = vsel %vm4333_vm12, 1, %v11229_v14 }
 0x46b   :  { %v4336_v34 = vadd.s32 %v4334_v8, %v4328_v54  ;;  %vm4337_vm13 = vc.u32 %v4335_v19, %v4331_v26  ;;  %vm4355_vm15 = vc.u32 %v4347_v2, %v4351_v6  ;;  %v4357_v21 = vadd.s32 %v4351_v6, %v4347_v2  ;;  %v11292_v54 = vld [vmem:[#allocation71_spill] sm:$0xff] }
 0x46c   :  { %v5446_v60 = vsel %vm5439_vm10, %v5400_v10, %v5435_v40  ;;  %v4230_v16 = vor.u32 %v4229_v58, %v4228_v4  ;;  %v4233_v53 = vshll.u32 %v4232_v22, 23  ;;  %v4338_v28 = vsel %vm4337_vm13, 1, %v11229_v14  ;;  %v11293_v26 = vld [vmem:[#allocation103_spill] sm:$0xff] }
 0x46d   :  { %5466 = vst [vmem:[#allocation10 + $0x30] sm:$0xff] %v5446_v60  ;;  %v4340_v0 = vadd.s32 %v4338_v28, %v4336_v34  ;;  %v4288_v20 = vshrl.u32 %v11219_v63, %v9686_v3  ;;  %v4309_v55 = vsel %vm4307_vm5, %v9718_v41, 2102212464  ;;  %v4356_v36 = vsel %vm4355_vm15, 1, %v11229_v14 }
 0x46e   :  { %v4234_v31 = vor.u32 4788187, %v4233_v53  ;;  %v4332_v48 = vshrl.u32 %v4327_v32, 16  ;;  %v4358_v56 = vadd.s32 %v4356_v36, %v4350_v27  ;;  %vm4359_vm2 = vc.u32 %v4357_v21, %v4353_v51 }
 0x46f   :  { %v4341_v10 = vadd.s32 %v4340_v0, %v4330_v23  ;;  %v4237_v25 = vcvt.s32.f32 %v4230_v16  ;;  %v4360_v33 = vsel %vm4359_vm2, 1, %v11229_v14  ;;  %v4430_v5 = vand.u32 2139095040, %v9670_v24 }
 0x470   :  { %v4235_v61 = vand.u32 2147483647, %v4234_v31  ;;  %v4241_v2 = vsub.s32 4, %v9721_v50  ;;  %v4308_v3 = vsel %vm4304_vm4, %v4288_v20, %v9702_v62  ;;  %v4352_v43 = vshrl.u32 %v4348_v12, 16 }
 0x471   :  { %v4362_v41 = vadd.s32 %v4360_v33, %v4358_v56  ;;  %v4310_v32 = vsel %vm4306_vm6, %v9704_v45, %v4309_v55  ;;  %v9810_v39 = vadd.s32 %v4341_v10, %v4332_v48  ;;  %v4431_v15 = vshrl.u32 %v4430_v5, 23  ;;  %v11296_v10 = vld [vmem:[#allocation75_spill] sm:$0xff]  ;;  %v11297_v56 = vld [vmem:[#allocation132_spill] sm:$0xff] }
 0x472   :  { %v4238_v7 = vmul.f32 %v4237_v25, %v4235_v61  ;;  %v1611_v37 = vadd.f32 %v11293_v26, %v11292_v54  ;;  %vm4119_vm1 = vcmp.lt.s32.totalorder %v9370_v47, 0  ;;  %v4354_v46 = vshrl.u32 %v4349_v35, 16 }
 0x473   :  { %v4363_v42 = vadd.s32 %v4362_v41, %v4352_v43  ;;  %vm9817_vm3 = vcmp.le.f32.partialorder %v4117_v30, 0.7853982  ;;  %v4361_v6 = vadd.s32 %v4357_v21, %v4353_v51  ;;  %v6210_v29 = vadd.s32 4294967169, %v4431_v15 }
 0x474   :  { %v4239_v12 = vxor.u32 2147483648, %v4238_v7  ;;  %v4311_v45 = vsel %vm4305_vm8, %v4308_v3, %v4310_v32  ;;  %v4427_v19 = vand.u32 2147483647, %v9670_v24  ;;  %v9825_v40 = vadd.f32 %v9734_v11, %v1611_v37 }
 0x475   :  { %v4364_v4 = vadd.s32 %v4363_v42, %v4354_v46  ;;  %v4242_v58 = vsel %vm4119_vm1, %v4241_v2, %v9721_v50  ;;  %vm4367_vm5 = vc.u32 %v9810_v39, %v4361_v6  ;;  %v4437_v30 = vadd.s32 1, %v6210_v29 }
 0x476   :  { %v4240_v35 = vsel %vm4119_vm1, %v4239_v12, %v4238_v7  ;;  %v4365_v57 = vmul.u32 %v9748_v1, %v4311_v45  ;;  %v4244_v34 = vsel %vm9817_vm3, 0, %v4242_v58  ;;  %v4434_v27 = vand.u32 8388607, %v4427_v19 }
 0x477   :  { %v4243_v22 = vsel %vm9817_vm3, %v9370_v47, %v4240_v35  ;;  %v4368_v8 = vadd.s32 1, %v4364_v4  ;;  %vm4438_vm7 = vcmp.gt.s32.totalorder %v4437_v30, 0  ;;  %v4261_v21 = vadd.s32 3, %v4244_v34 }
 0x478   :  { %v4245_v23 = vmul.f32 %v4243_v22, %v4243_v22  ;;  %v4439_v50 = vsel %vm4438_vm7, %v4437_v30, 0  ;;  %v4435_v20 = vor.u32 8388608, %v4434_v27  ;;  %v9843_v61 = vadd.f32 %v11297_v56, %v11296_v10 }
 0x479   :  { %v4369_v11 = vsel %vm4367_vm5, %v4368_v8, %v4364_v4  ;;  %v4441_v28 = vand.u32 31, %v4439_v50  ;;  %v9845_v33 = vand.u32 3, %v4261_v21  ;;  %v5288_v5 = vperm.slane %v8945_v17, 6 }
 0x47a   :  { %v4246_v60 = vmul.f32 -0.001358992, %v4245_v23  ;;  %v4253_v16 = vmul.f32 -0.00019511016, %v4245_v23  ;;  %v4370_v53 = vadd.s32 %v4369_v11, %v4365_v57  ;;  %v9849_v3 = vshrl.u32 %v4439_v50, 5 }
 0x47b   :  { %v9837_v55 = vsub.s32 32, %v4441_v28  ;;  %v9855_v7 = vshll.u32 %v4435_v20, 8  ;;  %v4444_v37 = vshll.u32 %v11219_v63, %v4441_v28  ;;  %v4447_v46 = vshll.u32 %v11208_v59, %v4441_v28 }
 0x47c   :  { %v4247_v0 = vadd.f32 0.041655596, %v4246_v60  ;;  %v4254_v51 = vadd.f32 0.008332121, %v4253_v16  ;;  %v4371_v31 = vadd.s32 536870912, %v4370_v53  ;;  %vm4274_vm4 = vcmp.lt.s32.totalorder %v9506_v38, 0 }
 0x47d   :  { %v4445_v43 = vshrl.u32 %v11208_v59, %v9837_v55  ;;  %v4448_v41 = vshrl.u32 %v11209_v44, %v9837_v55  ;;  %v4454_v26 = vshrl.u32 %v11215_v49, %v9837_v55  ;;  %v4451_v42 = vshrl.u32 %v11214_v13, %v9837_v55 }
 0x47e   :  { %v4248_v1 = vmul.f32 %v4247_v0, %v4245_v23  ;;  %v4255_v36 = vmul.f32 %v4254_v51, %v4245_v23  ;;  %v9839_v48 = vshrl.u32 %v4371_v31, 30  ;;  %v4457_v62 = vshrl.u32 %v11220_v52, %v9837_v55 }
 0x47f   :  { %v4450_v29 = vshll.u32 %v11209_v44, %v4441_v28  ;;  %v4453_v45 = vshll.u32 %v11214_v13, %v4441_v28  ;;  %v9872_v35 = vor.u32 %v4445_v43, %v4444_v37  ;;  %v9874_v58 = vor.u32 %v4448_v41, %v4447_v46 }
 0x480   :  { %v4256_v25 = vadd.f32 -0.16666654, %v4255_v36  ;;  %v4373_v2 = vshll.u32 %v9839_v48, 30  ;;  %v4249_v32 = vadd.f32 -0.4999988, %v4248_v1  ;;  %v4456_v30 = vshll.u32 %v11215_v49, %v4441_v28 }
 0x481   :  { %v4366_v57 = vadd.s32 %v4361_v6, %v9810_v39  ;;  %v4455_v11 = vor.u32 %v4454_v26, %v4453_v45  ;;  %v4452_v50 = vor.u32 %v4451_v42, %v4450_v29  ;;  %v4582_v16 = vand.u32 2147483647, %v9825_v40 }
 0x482   :  { %v4257_v15 = vmul.f32 %v4256_v25, %v4245_v23  ;;  %v9857_v54 = vsub.s32 %v4370_v53, %v4373_v2  ;;  %v4250_v8 = vmul.f32 %v4249_v32, %v4245_v23  ;;  %v4458_v60 = vor.u32 %v4457_v62, %v4456_v30 }
 0x483   :  { %vm4264_vm8 = vcmp.eq.s32.totalorder %v9845_v33, 0  ;;  %v4396_v53 = vsub.s32 4, %v9839_v48  ;;  %vm4459_vm11 = vcmp.lt.s32.totalorder %v9849_v3, 1  ;;  %v4476_v0 = vand.u32 65535, %v9855_v7 }
 0x484   :  { %vm4375_vm6 = vcmp.lt.s32.totalorder %v9857_v54, 0  ;;  %v4376_v12 = vsub.s32 0, %v9857_v54  ;;  %v4258_v4 = vadd.f32 1.0, %v4257_v15  ;;  %v9885_v23 = vshrl.u32 %v9855_v7, 16 }
 0x485   :  { %vm9889_vm9 = vcmp.le.f32.partialorder %v4272_v9, 0.7853982  ;;  %vm4462_vm14 = vcmp.lt.s32.totalorder %v9849_v3, 4  ;;  %v4467_v51 = vsel %vm4459_vm11, %v9872_v35, %v9874_v58  ;;  %v4251_v21 = vadd.f32 1.0, %v4250_v8 }
 0x486   :  { %v4377_v34 = vsel %vm4375_vm6, %v4376_v12, %v9857_v54  ;;  %v4259_v39 = vmul.f32 %v4258_v4, %v4243_v22  ;;  %vm4267_vm0 = vcmp.eq.s32.totalorder %v9845_v33, 2  ;;  %vm4460_vm12 = vcmp.lt.s32.totalorder %v9849_v3, 2 }
 0x487   :  { %v4378_v27 = vclz %v4377_v34  ;;  %vm4461_vm13 = vcmp.lt.s32.totalorder %v9849_v3, 3  ;;  %v4468_v9 = vsel %vm4462_vm14, %v4455_v11, 920167782  ;;  %vm4263_vm15 = vcmp.lt.s32.totalorder %v9845_v33, 2 }
 0x488   :  { %v4469_v22 = vsel %vm4461_vm13, %v4452_v50, %v4468_v9  ;;  %v4471_v31 = vsel %vm4459_vm11, %v9874_v58, %v4452_v50  ;;  %v4472_v20 = vsel %vm4462_vm14, %v4458_v60, 1326507024  ;;  %v4585_v56 = vand.u32 2139095040, %v9825_v40 }
 0x489   :  { %v6208_v28 = vadd.s32 4294967294, %v4378_v27  ;;  %v4470_v36 = vsel %vm4460_vm12, %v4467_v51, %v4469_v22  ;;  %v4473_v10 = vsel %vm4461_vm13, %v4455_v11, %v4472_v20  ;;  %v4265_v25 = vxor.u32 2147483648, %v4259_v39 }
 0x48a   :  { %v9919_v41 = vsel %vm4274_vm4, %v4396_v53, %v9839_v48  ;;  %v4268_v32 = vxor.u32 2147483648, %v4251_v21  ;;  %v4474_v15 = vsel %vm4460_vm12, %v4471_v31, %v4473_v10  ;;  %v4500_v26 = vand.u32 65535, %v4470_v36 }
 0x48b   :  { %vm6209_vm2 = vcmp.lt.s32.totalorder %v6208_v28, 0  ;;  %v4501_v37 = vshrl.u32 %v4470_v36, 16  ;;  %vm4260_vm1 = vweird.f32 %v9370_v47  ;;  %v4478_v12 = vand.u32 65535, %v4474_v15 }
 0x48c   :  { %v4381_v1 = vsel %vm6209_vm2, 0, %v6208_v28  ;;  %v4479_v29 = vshrl.u32 %v4474_v15, 16  ;;  %v4586_v4 = vshrl.u32 %v4585_v56, 23  ;;  %v9927_v48 = vand.u32 8388607, %v4582_v16 }
 0x48d   :  { %v4382_v2 = vsub.s32 32, %v4381_v1  ;;  %v4386_v43 = vsub.s32 4294967266, %v4381_v1  ;;  %v4383_v46 = vshll.u32 %v9857_v54, %v4381_v1  ;;  %v4503_v45 = vmul.u32 %v4501_v37, %v4476_v0 }
 0x48e   :  { %v4266_v30 = vsel %vm4264_vm8, %v4251_v21, %v4265_v25  ;;  %v4443_v11 = vshrl.u32 %v11219_v63, %v9837_v55  ;;  %v4399_v54 = vsel %vm9889_vm9, 0, %v9919_v41  ;;  %v4482_v27 = vmul.u32 %v4478_v12, %v9885_v23 }
 0x48f   :  { %v4384_v42 = vshrl.u32 %v4366_v57, %v4382_v2  ;;  %v4387_v62 = vadd.s32 127, %v4386_v43  ;;  %v4481_v57 = vmul.u32 %v4479_v29, %v4476_v0  ;;  %v4504_v60 = vmul.u32 %v4500_v26, %v9885_v23 }
 0x490   :  { %v4269_v53 = vsel %vm4267_vm0, %v4268_v32, %v4259_v39  ;;  %v4463_v51 = vsel %vm4459_vm11, %v4443_v11, %v9872_v35  ;;  %v4506_v21 = vshll.u32 %v4503_v45, 16  ;;  %v4464_v9 = vsel %vm4462_vm14, %v4452_v50, 2102212464 }
 0x491   :  { %v4385_v8 = vor.u32 %v4384_v42, %v4383_v46  ;;  %v4388_v34 = vshll.u32 %v4387_v62, 23  ;;  %v4270_v55 = vsel %vm4263_vm15, %v4266_v30, %v4269_v53  ;;  %v4480_v22 = vmul.u32 %v4478_v12, %v4476_v0 }
 0x492   :  { %v4484_v31 = vshll.u32 %v4481_v57, 16  ;;  %v4483_v36 = vmul.u32 %v4479_v29, %v9885_v23  ;;  %v4502_v10 = vmul.u32 %v4500_v26, %v4476_v0  ;;  %v4486_v39 = vshll.u32 %v4482_v27, 16  ;;  %v1896_v26 = vpop.f32.mrf.mxu0 }
 0x493   :  { %v4389_v28 = vor.u32 4788187, %v4388_v34  ;;  %v4392_v1 = vcvt.s32.f32 %v4385_v8  ;;  %v4508_v25 = vshll.u32 %v4504_v60, 16  ;;  %v9951_v43 = vsel %vm4260_vm1, nan, %v4270_v55 }
 0x494   :  { %vm4488_vm3 = vc.u32 %v4480_v22, %v4484_v31  ;;  %v4490_v56 = vadd.s32 %v4484_v31, %v4480_v22  ;;  %vm4510_vm5 = vc.u32 %v4502_v10, %v4506_v21  ;;  %v4512_v33 = vadd.s32 %v4506_v21, %v4502_v10 }
 0x495   :  { %v4390_v20 = vand.u32 2147483647, %v4389_v28  ;;  %v4489_v35 = vsel %vm4488_vm3, 1, %v11229_v14  ;;  %v4505_v41 = vmul.u32 %v4501_v37, %v9885_v23  ;;  %v4511_v15 = vsel %vm4510_vm5, 1, %v11229_v14 }
 0x496   :  { %v4491_v50 = vadd.s32 %v4489_v35, %v4483_v36  ;;  %vm4492_vm7 = vc.u32 %v4490_v56, %v4486_v39  ;;  %vm4514_vm6 = vc.u32 %v4512_v33, %v4508_v25  ;;  %v4485_v46 = vshrl.u32 %v4481_v57, 16 }
 0x497   :  { %v4393_v2 = vmul.f32 %v4392_v1, %v4390_v20  ;;  %v4493_v0 = vsel %vm4492_vm7, 1, %v11229_v14  ;;  %v4513_v62 = vadd.s32 %v4511_v15, %v4505_v41  ;;  %v4515_v12 = vsel %vm4514_vm6, 1, %v11229_v14 }
 0x498   :  { %v4495_v42 = vadd.s32 %v4493_v0, %v4491_v50  ;;  %v5216_v29 = vmul.f32 2.0, %v9951_v43  ;;  %v4487_v8 = vshrl.u32 %v4482_v27, 16  ;;  %v6213_v34 = vadd.s32 4294967169, %v4586_v4 }
 0x499   :  { %v4394_v32 = vxor.u32 2147483648, %v4393_v2  ;;  %v4507_v11 = vshrl.u32 %v4503_v45, 16  ;;  %v4517_v53 = vadd.s32 %v4515_v12, %v4513_v62  ;;  %v4465_v28 = vsel %vm4461_vm13, %v9874_v58, %v4464_v9 }
 0x49a   :  { %v4496_v37 = vadd.s32 %v4495_v42, %v4485_v46  ;;  %v4592_v21 = vadd.s32 1, %v6213_v34  ;;  %v9971_v55 = vadd.f32 %v1896_v26, %v9843_v61  ;;  %v4416_v4 = vadd.s32 3, %v4399_v54 }
 0x49b   :  { %v4395_v30 = vsel %vm4274_vm4, %v4394_v32, %v4393_v2  ;;  %v4509_v6 = vshrl.u32 %v4504_v60, 16  ;;  %v4518_v22 = vadd.s32 %v4517_v53, %v4507_v11  ;;  %v9975_v45 = vadd.s32 %v4512_v33, %v4508_v25  ;;  %v1898_v60 = vpop.f32.mrf.mxu0 }
 0x49c   :  { %v9963_v23 = vsel %vm9889_vm9, %v9506_v38, %v4395_v30  ;;  %v9973_v27 = vadd.s32 %v4496_v37, %v4487_v8  ;;  %vm4593_vm4 = vcmp.gt.s32.totalorder %v4592_v21, 0  ;;  %v5237_v1 = vmul.f32 %v5216_v29, %v9951_v43 }
 0x49d   :  { %v4400_v57 = vmul.f32 %v9963_v23, %v9963_v23  ;;  %v4466_v36 = vsel %vm4460_vm12, %v4463_v51, %v4465_v28  ;;  %v4519_v58 = vadd.s32 %v4518_v22, %v4509_v6  ;;  %v4594_v9 = vsel %vm4593_vm4, %v4592_v21, 0 }
 0x49e   :  { %vm4522_vm8 = vc.u32 %v9973_v27, %v9975_v45  ;;  %v4596_v54 = vand.u32 31, %v4594_v9  ;;  %v4417_v39 = vand.u32 3, %v4416_v4  ;;  %v4520_v35 = vmul.u32 %v9855_v7, %v4466_v36 }
 0x49f   :  { %v4401_v31 = vmul.f32 -0.001358992, %v4400_v57  ;;  %v4408_v20 = vmul.f32 -0.00019511016, %v4400_v57  ;;  %v4523_v56 = vadd.s32 1, %v4519_v58  ;;  %v5258_v50 = vsub.f32 1.0, %v5237_v1 }
 0x4a0   :  { %v9983_v33 = vsub.s32 32, %v4596_v54  ;;  %vm9987_vm11 = vcmp.eq.s32.totalorder %v5288_v5, 1  ;;  %v5360_v51 = vperm.slane %v8948_v18, 6  ;;  %v4590_v26 = vor.u32 8388608, %v9927_v48 }
 0x4a1   :  { %v4402_v10 = vadd.f32 0.041655596, %v4401_v31  ;;  %v4409_v61 = vadd.f32 0.008332121, %v4408_v20  ;;  %v4524_v41 = vsel %vm4522_vm8, %v4523_v56, %v4519_v58  ;;  %vm4419_vm9 = vcmp.eq.s32.totalorder %v4417_v39, 0 }
 0x4a2   :  { %v4525_v15 = vadd.s32 %v4524_v41, %v4520_v35  ;;  %vm4422_vm14 = vcmp.eq.s32.totalorder %v4417_v39, 2  ;;  %v9993_v7 = vshrl.u32 %v4594_v9, 5  ;;  %v4600_v46 = vshrl.u32 %v11208_v59, %v9983_v33 }
 0x4a3   :  { %v4403_v2 = vmul.f32 %v4402_v10, %v4400_v57  ;;  %v4410_v25 = vmul.f32 %v4409_v61, %v4400_v57  ;;  %v4603_v5 = vshrl.u32 %v11209_v44, %v9983_v33  ;;  %v4609_v42 = vshrl.u32 %v11215_v49, %v9983_v33 }
 0x4a4   :  { %vm4418_vm0 = vcmp.lt.s32.totalorder %v4417_v39, 2  ;;  %v4526_v29 = vadd.s32 536870912, %v4525_v15  ;;  %v4599_v30 = vshll.u32 %v11219_v63, %v4596_v54  ;;  %vm10002_vm12 = vcmp.eq.s32.totalorder %v5360_v51, 1 }
 0x4a5   :  { %v4404_v32 = vadd.f32 -0.4999988, %v4403_v2  ;;  %v4411_v0 = vadd.f32 -0.16666654, %v4410_v25  ;;  %vm4415_vm13 = vweird.f32 %v9506_v38  ;;  %v4602_v8 = vshll.u32 %v11208_v59, %v4596_v54 }
 0x4a6   :  { %v4605_v34 = vshll.u32 %v11209_v44, %v4596_v54  ;;  %v4606_v37 = vshrl.u32 %v11214_v13, %v9983_v33  ;;  %v4608_v11 = vshll.u32 %v11214_v13, %v4596_v54  ;;  %v10012_v28 = vshrl.u32 %v4526_v29, 30 }
 0x4a7   :  { %v4405_v62 = vmul.f32 %v4404_v32, %v4400_v57  ;;  %v4412_v12 = vmul.f32 %v4411_v0, %v4400_v57  ;;  %v4612_v21 = vshrl.u32 %v11220_v52, %v9983_v33  ;;  %v10016_v4 = vor.u32 %v4600_v46, %v4599_v30 }
 0x4a8   :  { %v10018_v6 = vor.u32 %v4603_v5, %v4602_v8  ;;  %v4610_v22 = vor.u32 %v4609_v42, %v4608_v11  ;;  %v4611_v31 = vshll.u32 %v11215_v49, %v4596_v54  ;;  %v10024_v20 = vsel %vm9987_vm11, %v5258_v50, %v9951_v43 }
 0x4a9   :  { %v4406_v53 = vadd.f32 1.0, %v4405_v62  ;;  %v4413_v57 = vadd.f32 1.0, %v4412_v12  ;;  %v4528_v58 = vshll.u32 %v10012_v28, 30  ;;  %v5289_v9 = vperm.slane %v8945_v17, 7 }
 0x4aa   :  { %v10029_v10 = vor.u32 %v4606_v37, %v4605_v34  ;;  %v4613_v61 = vor.u32 %v4612_v21, %v4611_v31  ;;  %v10031_v60 = vshll.u32 %v4590_v26, 8  ;;  %vm4614_vm15 = vcmp.lt.s32.totalorder %v9993_v7, 1  ;;  %v10069_v34 = vpop.f32.mrf.mxu1 }
 0x4ab   :  { %v4414_v1 = vmul.f32 %v4413_v57, %v9963_v23  ;;  %v4423_v36 = vxor.u32 2147483648, %v4406_v53  ;;  %v4529_v2 = vsub.s32 %v4525_v15, %v4528_v58  ;;  %vm4617_vm2 = vcmp.lt.s32.totalorder %v9993_v7, 4 }
 0x4ac   :  { %vm4615_vm1 = vcmp.lt.s32.totalorder %v9993_v7, 2  ;;  %vm4616_vm3 = vcmp.lt.s32.totalorder %v9993_v7, 3  ;;  %v4622_v17 = vsel %vm4614_vm15, %v10016_v4, %v10018_v6  ;;  %v4623_v43 = vsel %vm4617_vm2, %v4610_v22, 920167782 }
 0x4ad   :  { %v4420_v56 = vxor.u32 2147483648, %v4414_v1  ;;  %v4424_v54 = vsel %vm4422_vm14, %v4423_v36, %v4414_v1  ;;  %vm4530_vm5 = vcmp.lt.s32.totalorder %v4529_v2, 0  ;;  %v4531_v25 = vsub.s32 0, %v4529_v2 }
 0x4ae   :  { %v4624_v50 = vsel %vm4616_vm3, %v10029_v10, %v4623_v43  ;;  %v4626_v3 = vsel %vm4614_vm15, %v10018_v6, %v10029_v10  ;;  %v4627_v51 = vsel %vm4617_vm2, %v4613_v61, 1326507024  ;;  %v5361_v32 = vperm.slane %v8948_v18, 7 }
 0x4af   :  { %v4421_v23 = vsel %vm4419_vm9, %v4406_v53, %v4420_v56  ;;  %v4532_v0 = vsel %vm4530_vm5, %v4531_v25, %v4529_v2  ;;  %v4625_v39 = vsel %vm4615_vm1, %v4622_v17, %v4624_v50  ;;  %v4628_v46 = vsel %vm4616_vm3, %v4610_v22, %v4627_v51 }
 0x4b0   :  { %v4425_v35 = vsel %vm4418_vm0, %v4421_v23, %v4424_v54  ;;  %v4533_v26 = vclz %v4532_v0  ;;  %v5402_v5 = vsel %vm10002_vm12, %v9370_v47, %v10024_v20  ;;  %v4629_v42 = vsel %vm4615_vm1, %v4626_v3, %v4628_v46 }
 0x4b1   :  { %v4426_v41 = vsel %vm4415_vm13, nan, %v4425_v35  ;;  %v4631_v62 = vand.u32 65535, %v10031_v60  ;;  %v4655_v18 = vand.u32 65535, %v4625_v39  ;;  %v4633_v30 = vand.u32 65535, %v4629_v42 }
 0x4b2   :  { %v5217_v15 = vmul.f32 2.0, %v4426_v41  ;;  %v6211_v29 = vadd.s32 4294967294, %v4533_v26  ;;  %v4634_v8 = vshrl.u32 %v4629_v42, 16  ;;  %vm5310_vm7 = vcmp.eq.s32.totalorder %v5289_v9, 1 }
 0x4b3   :  { %vm10071_vm6 = vcmp.eq.s32.totalorder %v5361_v32, 1  ;;  %v4632_v48 = vshrl.u32 %v10031_v60, 16  ;;  %v4656_v47 = vshrl.u32 %v4625_v39, 16  ;;  %v4521_v53 = vadd.s32 %v9975_v45, %v9973_v27  ;;  %v1911_v32 = vpop.f32.mrf.mxu1 }
 0x4b4   :  { %v5238_v12 = vmul.f32 %v5217_v15, %v4426_v41  ;;  %vm6212_vm4 = vcmp.lt.s32.totalorder %v6211_v29, 0  ;;  %v4636_v57 = vmul.u32 %v4634_v8, %v4631_v62  ;;  %v4598_v22 = vshrl.u32 %v11219_v63, %v9983_v33 }
 0x4b5   :  { %v4536_v21 = vsel %vm6212_vm4, 0, %v6211_v29  ;;  %v4637_v31 = vmul.u32 %v4633_v30, %v4632_v48  ;;  %v4658_v20 = vmul.u32 %v4656_v47, %v4631_v62  ;;  %v10080_v9 = vmul.u32 %v4655_v18, %v4632_v48 }
 0x4b6   :  { %v5259_v11 = vsub.f32 1.0, %v5238_v12  ;;  %v4537_v36 = vsub.s32 32, %v4536_v21  ;;  %v4541_v58 = vsub.s32 4294967266, %v4536_v21  ;;  %v4635_v56 = vmul.u32 %v4633_v30, %v4631_v62 }
 0x4b7   :  { %v4638_v17 = vmul.u32 %v4634_v8, %v4632_v48  ;;  %v4639_v27 = vshll.u32 %v4636_v57, 16  ;;  %v4538_v43 = vshll.u32 %v4529_v2, %v4536_v21  ;;  %v4641_v25 = vshll.u32 %v4637_v31, 16 }
 0x4b8   :  { %v5331_v1 = vsel %vm5310_vm7, %v5259_v11, %v4426_v41  ;;  %v4539_v23 = vshrl.u32 %v4521_v53, %v4537_v36  ;;  %v4542_v54 = vadd.s32 127, %v4541_v58  ;;  %v4661_v35 = vshll.u32 %v4658_v20, 16 }
 0x4b9   :  { %v5403_v61 = vsel %vm10071_vm6, %v9506_v38, %v5331_v1  ;;  %vm4643_vm8 = vc.u32 %v4635_v56, %v4639_v27  ;;  %v4645_v33 = vadd.s32 %v4639_v27, %v4635_v56  ;;  %v4551_v38 = vsub.s32 4, %v10012_v28 }
 0x4ba   :  { %v5436_v45 = vrot.slane %v5403_v61, 4  ;;  %v4540_v3 = vor.u32 %v4539_v23, %v4538_v43  ;;  %v4543_v51 = vshll.u32 %v4542_v54, 23  ;;  %v4644_v41 = vsel %vm4643_vm8, 1, %v11229_v14  ;;  %v5267_v43 = vld [vmem:[#allocation7 + $0x10] sm:$0x1f] }
 0x4bb   :  { %v4646_v0 = vadd.s32 %v4644_v41, %v4638_v17  ;;  %vm4647_vm11 = vc.u32 %v4645_v33, %v4641_v25  ;;  %v4657_v39 = vmul.u32 %v4655_v18, %v4631_v62  ;;  %v4619_v15 = vsel %vm4617_vm2, %v10029_v10, 2102212464  ;;  %v5339_v23 = vld [vmem:[#allocation8 + $0x10] sm:$0x1f]  ;;  %v11309_v33 = vld [vmem:[#allocation133_spill] sm:$0xff] }
 0x4bc   :  { %v5447_v50 = vsel %vm5439_vm10, %v5402_v5, %v5436_v45  ;;  %v4544_v2 = vor.u32 4788187, %v4543_v51  ;;  %v4640_v26 = vshrl.u32 %v4636_v57, 16  ;;  %v4648_v46 = vsel %vm4647_vm11, 1, %v11229_v14  ;;  %v11308_v25 = vld [vmem:[#allocation104_spill] sm:$0xff] }
 0x4bd   :  { %5467 = vst [vmem:[#allocation10 + $0x38] sm:$0xff] %v5447_v50  ;;  %v4650_v5 = vadd.s32 %v4648_v46, %v4646_v0  ;;  %v4660_v42 = vmul.u32 %v4656_v47, %v4632_v48  ;;  %vm4665_vm9 = vc.u32 %v4657_v39, %v4661_v35  ;;  %v4667_v12 = vadd.s32 %v4661_v35, %v4657_v39 }
 0x4be   :  { %v4545_v29 = vand.u32 2147483647, %v4544_v2  ;;  %v4547_v30 = vcvt.s32.f32 %v4540_v3  ;;  %v4663_v8 = vshll.u32 %v10080_v9, 16  ;;  %v4666_v37 = vsel %vm4665_vm9, 1, %v11229_v14 }
 0x4bf   :  { %vm4429_vm14 = vcmp.lt.s32.totalorder %v9670_v24, 0  ;;  %v4618_v62 = vsel %vm4614_vm15, %v4598_v22, %v10016_v4  ;;  %v4651_v10 = vadd.s32 %v4650_v5, %v4640_v26  ;;  %v4668_v18 = vadd.s32 %v4666_v37, %v4660_v42 }
 0x4c0   :  { %v4548_v11 = vmul.f32 %v4547_v30, %v4545_v29  ;;  %v4552_v48 = vsel %vm4429_vm14, %v4551_v38, %v10012_v28  ;;  %v4620_v47 = vsel %vm4616_vm3, %v10018_v6, %v4619_v15  ;;  %vm4669_vm0 = vc.u32 %v4667_v12, %v4663_v8 }
 0x4c1   :  { %vm10106_vm12 = vcmp.le.f32.partialorder %v4427_v19, 0.7853982  ;;  %v4642_v57 = vshrl.u32 %v4637_v31, 16  ;;  %v4670_v4 = vsel %vm4669_vm0, 1, %v11229_v14  ;;  %v4662_v22 = vshrl.u32 %v4658_v20, 16 }
 0x4c2   :  { %v4549_v21 = vxor.u32 2147483648, %v4548_v11  ;;  %v4672_v1 = vadd.s32 %v4670_v4, %v4668_v18  ;;  %v4740_v36 = vand.u32 2139095040, %v9971_v55  ;;  %v4554_v28 = vsel %vm10106_vm12, 0, %v4552_v48 }
 0x4c3   :  { %v4621_v6 = vsel %vm4615_vm1, %v4618_v62, %v4620_v47  ;;  %v4652_v58 = vadd.s32 %v4651_v10, %v4642_v57  ;;  %v4664_v61 = vshrl.u32 %v10080_v9, 16  ;;  %v4671_v17 = vadd.s32 %v4667_v12, %v4663_v8 }
 0x4c4   :  { %v4550_v19 = vsel %vm4429_vm14, %v4549_v21, %v4548_v11  ;;  %v4673_v31 = vadd.s32 %v4672_v1, %v4662_v22  ;;  %v4741_v56 = vshrl.u32 %v4740_v36, 23  ;;  %v4737_v27 = vand.u32 2147483647, %v9971_v55 }
 0x4c5   :  { %v4553_v20 = vsel %vm10106_vm12, %v9670_v24, %v4550_v19  ;;  %v1637_v35 = vadd.f32 %v11309_v33, %v11308_v25  ;;  %v4571_v50 = vadd.s32 3, %v4554_v28  ;;  %v4675_v9 = vmul.u32 %v10031_v60, %v4621_v6 }
 0x4c6   :  { %v4555_v45 = vmul.f32 %v4553_v20, %v4553_v20  ;;  %v4674_v7 = vadd.s32 %v4673_v31, %v4664_v61  ;;  %v6216_v54 = vadd.s32 4294967169, %v4741_v56  ;;  %vm4677_vm13 = vc.u32 %v4652_v58, %v4671_v17 }
 0x4c7   :  { %vm5270_vm15 = vcmp.gt.f32.partialorder %v5267_v43, 0.5  ;;  %vm5342_vm2 = vcmp.gt.f32.partialorder %v5339_v23, 0.5  ;;  %v4744_v38 = vand.u32 8388607, %v4737_v27  ;;  %v10129_v0 = vadd.f32 %v10069_v34, %v1637_v35 }
 0x4c8   :  { %v4556_v3 = vmul.f32 -0.001358992, %v4555_v45  ;;  %v4563_v51 = vmul.f32 -0.00019511016, %v4555_v45  ;;  %v4678_v41 = vadd.s32 1, %v4674_v7  ;;  %v4747_v32 = vadd.s32 1, %v6216_v54 }
 0x4c9   :  { %v10131_v42 = vand.u32 3, %v4571_v50  ;;  %v10134_v29 = vsel %vm5270_vm15, 1, %v11229_v14  ;;  %v10137_v30 = vsel %vm5342_vm2, 1, %v11229_v14  ;;  %v4745_v34 = vor.u32 8388608, %v4744_v38 }
 0x4ca   :  { %v4557_v39 = vadd.f32 0.041655596, %v4556_v3  ;;  %v4564_v2 = vadd.f32 0.008332121, %v4563_v51  ;;  %v4679_v15 = vsel %vm4677_vm13, %v4678_v41, %v4674_v7  ;;  %vm4748_vm1 = vcmp.gt.s32.totalorder %v4747_v32, 0 }
 0x4cb   :  { %v4680_v26 = vadd.s32 %v4679_v15, %v4675_v9  ;;  %v4749_v46 = vsel %vm4748_vm1, %v4747_v32, 0  ;;  %v4895_v18 = vand.u32 2139095040, %v10129_v0  ;;  %v5290_v47 = vperm.slane %v10134_v29, 0 }
 0x4cc   :  { %v4558_v60 = vmul.f32 %v4557_v39, %v4555_v45  ;;  %v4565_v5 = vmul.f32 %v4564_v2, %v4555_v45  ;;  %v4751_v12 = vand.u32 31, %v4749_v46  ;;  %v5362_v53 = vperm.slane %v10137_v30, 0 }
 0x4cd   :  { %v4681_v8 = vadd.s32 536870912, %v4680_v26  ;;  %vm4584_vm3 = vcmp.lt.s32.totalorder %v9825_v40, 0  ;;  %v10145_v4 = vadd.s32 %v4671_v17, %v4652_v58  ;;  %v10147_v22 = vshll.u32 %v4745_v34, 8 }
 0x4ce   :  { %v4559_v37 = vadd.f32 -0.4999988, %v4558_v60  ;;  %v4566_v62 = vadd.f32 -0.16666654, %v4565_v5  ;;  %v10139_v10 = vsub.s32 32, %v4751_v12  ;;  %vm4574_vm5 = vcmp.eq.s32.totalorder %v10131_v42, 0 }
 0x4cf   :  { %v4682_v11 = vshrl.u32 %v4681_v8, 30  ;;  %v4896_v6 = vshrl.u32 %v4895_v18, 23  ;;  %v10156_v61 = vshrl.u32 %v4749_v46, 5  ;;  %v4754_v58 = vshll.u32 %v11219_v63, %v4751_v12 }
 0x4d0   :  { %v4567_v48 = vmul.f32 %v4566_v62, %v4555_v45  ;;  %v4560_v57 = vmul.f32 %v4559_v37, %v4555_v45  ;;  %v4755_v36 = vshrl.u32 %v11208_v59, %v10139_v10  ;;  %v4758_v28 = vshrl.u32 %v11209_v44, %v10139_v10 }
 0x4d1   :  { %v4683_v21 = vshll.u32 %v4682_v11, 30  ;;  %v4764_v31 = vshrl.u32 %v11215_v49, %v10139_v10  ;;  %vm4577_vm7 = vcmp.eq.s32.totalorder %v10131_v42, 2  ;;  %v4757_v17 = vshll.u32 %v11208_v59, %v4751_v12 }
 0x4d2   :  { %v4568_v1 = vadd.f32 1.0, %v4567_v48  ;;  %v4760_v45 = vshll.u32 %v11209_v44, %v4751_v12  ;;  %v4761_v43 = vshrl.u32 %v11214_v13, %v10139_v10  ;;  %v4561_v23 = vadd.f32 1.0, %v4560_v57 }
 0x4d3   :  { %v10154_v19 = vsub.s32 %v4680_v26, %v4683_v21  ;;  %vm4573_vm6 = vcmp.lt.s32.totalorder %v10131_v42, 2  ;;  %v4763_v54 = vshll.u32 %v11214_v13, %v4751_v12  ;;  %vm10172_vm8 = vcmp.le.f32.partialorder %v4582_v16, 0.7853982 }
 0x4d4   :  { %v4569_v56 = vmul.f32 %v4568_v1, %v4553_v20  ;;  %v4706_v25 = vsub.s32 4, %v4682_v11  ;;  %v4756_v33 = vor.u32 %v4755_v36, %v4754_v58  ;;  %v10176_v35 = vor.u32 %v4758_v28, %v4757_v17 }
 0x4d5   :  { %vm4685_vm4 = vcmp.lt.s32.totalorder %v10154_v19, 0  ;;  %v4686_v7 = vsub.s32 0, %v10154_v19  ;;  %v4767_v50 = vshrl.u32 %v11220_v52, %v10139_v10  ;;  %v4765_v51 = vor.u32 %v4764_v31, %v4763_v54 }
 0x4d6   :  { %v4575_v9 = vxor.u32 2147483648, %v4569_v56  ;;  %v4766_v41 = vshll.u32 %v11215_v49, %v4751_v12  ;;  %vm4570_vm11 = vweird.f32 %v9670_v24  ;;  %v4762_v16 = vor.u32 %v4761_v43, %v4760_v45 }
 0x4d7   :  { %v4687_v3 = vsel %vm4685_vm4, %v4686_v7, %v10154_v19  ;;  %v4786_v38 = vand.u32 65535, %v10147_v22  ;;  %v4892_v39 = vand.u32 2147483647, %v10129_v0  ;;  %v4578_v2 = vxor.u32 2147483648, %v4561_v23 }
 0x4d8   :  { %v4688_v32 = vclz %v4687_v3  ;;  %v4768_v15 = vor.u32 %v4767_v50, %v4766_v41  ;;  %v4787_v26 = vshrl.u32 %v10147_v22, 16  ;;  %v6219_v46 = vadd.s32 4294967169, %v4896_v6 }
 0x4d9   :  { %v4707_v5 = vsel %vm4584_vm3, %v4706_v25, %v4682_v11  ;;  %vm4769_vm9 = vcmp.lt.s32.totalorder %v10156_v61, 1  ;;  %vm4772_vm14 = vcmp.lt.s32.totalorder %v10156_v61, 4  ;;  %v4576_v12 = vsel %vm4574_vm5, %v4561_v23, %v4575_v9  ;;  %v10220_v23 = vpop.f32.mrf.mxu2 }
 0x4da   :  { %v6214_v60 = vadd.s32 4294967294, %v4688_v32  ;;  %vm4771_vm0 = vcmp.lt.s32.totalorder %v10156_v61, 3  ;;  %v4777_v8 = vsel %vm4769_vm9, %v4756_v33, %v10176_v35  ;;  %v4778_v34 = vsel %vm4772_vm14, %v4765_v51, 920167782 }
 0x4db   :  { %vm4770_vm13 = vcmp.lt.s32.totalorder %v10156_v61, 2  ;;  %v4779_v37 = vsel %vm4771_vm0, %v4762_v16, %v4778_v34  ;;  %v4781_v62 = vsel %vm4769_vm9, %v10176_v35, %v4762_v16  ;;  %v4579_v18 = vsel %vm4577_vm7, %v4578_v2, %v4569_v56 }
 0x4dc   :  { %vm6215_vm12 = vcmp.lt.s32.totalorder %v6214_v60, 0  ;;  %v4780_v48 = vsel %vm4770_vm13, %v4777_v8, %v4779_v37  ;;  %v4782_v57 = vsel %vm4772_vm14, %v4768_v15, 1326507024  ;;  %v4580_v21 = vsel %vm4573_vm6, %v4576_v12, %v4579_v18 }
 0x4dd   :  { %v4691_v11 = vsel %vm6215_vm12, 0, %v6214_v60  ;;  %v4783_v28 = vsel %vm4771_vm0, %v4765_v51, %v4782_v57  ;;  %v4709_v58 = vsel %vm10172_vm8, 0, %v4707_v5  ;;  %v4811_v56 = vshrl.u32 %v4780_v48, 16 }
 0x4de   :  { %v4692_v1 = vsub.s32 32, %v4691_v11  ;;  %v4696_v36 = vsub.s32 4294967266, %v4691_v11  ;;  %v4693_v6 = vshll.u32 %v10154_v19, %v4691_v11  ;;  %v4784_v31 = vsel %vm4770_vm13, %v4781_v62, %v4783_v28 }
 0x4df   :  { %v4788_v43 = vand.u32 65535, %v4784_v31  ;;  %v4789_v42 = vshrl.u32 %v4784_v31, 16  ;;  %v10224_v7 = vsel %vm4570_vm11, nan, %v4580_v21  ;;  %v4810_v54 = vand.u32 65535, %v4780_v48 }
 0x4e0   :  { %v4694_v17 = vshrl.u32 %v10145_v4, %v4692_v1  ;;  %v4697_v45 = vadd.s32 127, %v4696_v36  ;;  %v4813_v19 = vmul.u32 %v4811_v56, %v4786_v38  ;;  %v10228_v25 = vand.u32 8388607, %v4892_v39 }
 0x4e1   :  { %v4753_v4 = vshrl.u32 %v11219_v63, %v10139_v10  ;;  %v4902_v3 = vadd.s32 1, %v6219_v46  ;;  %v4726_v51 = vadd.s32 3, %v4709_v58  ;;  %v4774_v41 = vsel %vm4772_vm14, %v4762_v16, 2102212464  ;;  %v1924_v36 = vpop.f32.mrf.mxu2 }
 0x4e2   :  { %v4695_v50 = vor.u32 %v4694_v17, %v4693_v6  ;;  %v4698_v9 = vshll.u32 %v4697_v45, 23  ;;  %v4791_v32 = vmul.u32 %v4789_v42, %v4786_v38  ;;  %v4792_v2 = vmul.u32 %v4788_v43, %v4787_v26 }
 0x4e3   :  { %v5218_v15 = vmul.f32 2.0, %v10224_v7  ;;  %v4773_v5 = vsel %vm4769_vm9, %v4753_v4, %v4756_v33  ;;  %v4816_v12 = vshll.u32 %v4813_v19, 16  ;;  %v4790_v8 = vmul.u32 %v4788_v43, %v4786_v38 }
 0x4e4   :  { %v4699_v60 = vor.u32 4788187, %v4698_v9  ;;  %v4794_v34 = vshll.u32 %v4791_v32, 16  ;;  %v4812_v37 = vmul.u32 %v4810_v54, %v4786_v38  ;;  %v4814_v62 = vmul.u32 %v4810_v54, %v4787_v26 }
 0x4e5   :  { %v4702_v10 = vcvt.s32.f32 %v4695_v50  ;;  %v4775_v46 = vsel %vm4771_vm0, %v10176_v35, %v4774_v41  ;;  %v4793_v16 = vmul.u32 %v4789_v42, %v4787_v26  ;;  %v4796_v11 = vshll.u32 %v4792_v2, 16 }
 0x4e6   :  { %v4700_v18 = vand.u32 2147483647, %v4699_v60  ;;  %vm4798_vm15 = vc.u32 %v4790_v8, %v4794_v34  ;;  %v4800_v48 = vadd.s32 %v4794_v34, %v4790_v8  ;;  %vm4820_vm2 = vc.u32 %v4812_v37, %v4816_v12 }
 0x4e7   :  { %v4799_v21 = vsel %vm4798_vm15, 1, %v11229_v14  ;;  %v4815_v33 = vmul.u32 %v4811_v56, %v4787_v26  ;;  %v4821_v1 = vsel %vm4820_vm2, 1, %v11229_v14  ;;  %v4818_v28 = vshll.u32 %v4814_v62, 16 }
 0x4e8   :  { %v4703_v57 = vmul.f32 %v4702_v10, %v4700_v18  ;;  %v4801_v38 = vadd.s32 %v4799_v21, %v4793_v16  ;;  %vm4802_vm1 = vc.u32 %v4800_v48, %v4796_v11  ;;  %v4822_v6 = vadd.s32 %v4816_v12, %v4812_v37 }
 0x4e9   :  { %v10243_v58 = vmul.f32 %v5218_v15, %v10224_v7  ;;  %v4803_v31 = vsel %vm4802_vm1, 1, %v11229_v14  ;;  %v4823_v17 = vadd.s32 %v4821_v1, %v4815_v33  ;;  %v4795_v45 = vshrl.u32 %v4791_v32, 16 }
 0x4ea   :  { %v4704_v35 = vxor.u32 2147483648, %v4703_v57  ;;  %v4805_v43 = vadd.s32 %v4803_v31, %v4801_v38  ;;  %vm4824_vm5 = vc.u32 %v4822_v6, %v4818_v28  ;;  %vm4903_vm7 = vcmp.gt.s32.totalorder %v4902_v3, 0 }
 0x4eb   :  { %v4817_v56 = vshrl.u32 %v4813_v19, 16  ;;  %v4825_v42 = vsel %vm4824_vm5, 1, %v11229_v14  ;;  %v4904_v54 = vsel %vm4903_vm7, %v4902_v3, 0  ;;  %v4797_v9 = vshrl.u32 %v4792_v2, 16 }
 0x4ec   :  { %v4705_v26 = vsel %vm4584_vm3, %v4704_v35, %v4703_v57  ;;  %v4806_v4 = vadd.s32 %v4805_v43, %v4795_v45  ;;  %v4827_v41 = vadd.s32 %v4825_v42, %v4823_v17  ;;  %v4776_v15 = vsel %vm4770_vm13, %v4773_v5, %v4775_v46 }
 0x4ed   :  { %v10252_v50 = vsel %vm10172_vm8, %v9825_v40, %v4705_v26  ;;  %v4900_v60 = vor.u32 8388608, %v10228_v25  ;;  %v4906_v19 = vand.u32 31, %v4904_v54  ;;  %v10259_v12 = vand.u32 3, %v4726_v51 }
 0x4ee   :  { %v4710_v32 = vmul.f32 %v10252_v50, %v10252_v50  ;;  %v10261_v3 = vadd.s32 %v4806_v4, %v4797_v9  ;;  %v4819_v8 = vshrl.u32 %v4814_v62, 16  ;;  %v4828_v20 = vadd.s32 %v4827_v41, %v4817_v56 }
 0x4ef   :  { %v10263_v2 = vadd.s32 %v4822_v6, %v4818_v28  ;;  %v10265_v18 = vsub.s32 32, %v4906_v19  ;;  %v5260_v10 = vsub.f32 1.0, %v10243_v58  ;;  %v4830_v61 = vmul.u32 %v10147_v22, %v4776_v15 }
 0x4f0   :  { %v4711_v34 = vmul.f32 -0.001358992, %v4710_v32  ;;  %v4718_v37 = vmul.f32 -0.00019511016, %v4710_v32  ;;  %v4829_v16 = vadd.s32 %v4828_v20, %v4819_v8  ;;  %v10269_v5 = vshrl.u32 %v4904_v54, 5 }
 0x4f1   :  { %vm4832_vm3 = vc.u32 %v10261_v3, %v10263_v2  ;;  %v4910_v62 = vshrl.u32 %v11208_v59, %v10265_v18  ;;  %vm10277_vm6 = vcmp.eq.s32.totalorder %v5290_v47, 1  ;;  %v4909_v57 = vshll.u32 %v11219_v63, %v4906_v19 }
 0x4f2   :  { %v4712_v46 = vadd.f32 0.041655596, %v4711_v34  ;;  %v4719_v51 = vadd.f32 0.008332121, %v4718_v37  ;;  %v4833_v48 = vadd.s32 1, %v4829_v16  ;;  %v4913_v22 = vshrl.u32 %v11209_v44, %v10265_v18 }
 0x4f3   :  { %v4916_v21 = vshrl.u32 %v11214_v13, %v10265_v18  ;;  %v4912_v36 = vshll.u32 %v11208_v59, %v4906_v19  ;;  %v4915_v38 = vshll.u32 %v11209_v44, %v4906_v19  ;;  %v10288_v47 = vor.u32 %v4910_v62, %v4909_v57 }
 0x4f4   :  { %v4713_v33 = vmul.f32 %v4712_v46, %v4710_v32  ;;  %v4720_v1 = vmul.f32 %v4719_v51, %v4710_v32  ;;  %v4834_v28 = vsel %vm4832_vm3, %v4833_v48, %v4829_v16  ;;  %v4918_v6 = vshll.u32 %v11214_v13, %v4906_v19 }
 0x4f5   :  { %v4919_v58 = vshrl.u32 %v11215_v49, %v10265_v18  ;;  %v4835_v17 = vadd.s32 %v4834_v28, %v4830_v61  ;;  %v10293_v45 = vor.u32 %v4913_v22, %v4912_v36  ;;  %v10295_v43 = vor.u32 %v4916_v21, %v4915_v38 }
 0x4f6   :  { %v4714_v35 = vadd.f32 -0.4999988, %v4713_v33  ;;  %v4721_v31 = vadd.f32 -0.16666654, %v4720_v1  ;;  %v4921_v56 = vshll.u32 %v11215_v49, %v4906_v19  ;;  %v4922_v42 = vshrl.u32 %v11220_v52, %v10265_v18 }
 0x4f7   :  { %v4920_v26 = vor.u32 %v4919_v58, %v4918_v6  ;;  %v4836_v4 = vadd.s32 536870912, %v4835_v17  ;;  %vm4927_vm4 = vcmp.lt.s32.totalorder %v10269_v5, 4  ;;  %vm10303_vm8 = vcmp.eq.s32.totalorder %v5362_v53, 1 }
 0x4f8   :  { %v4715_v54 = vmul.f32 %v4714_v35, %v4710_v32  ;;  %v4722_v9 = vmul.f32 %v4721_v31, %v4710_v32  ;;  %vm4725_vm11 = vweird.f32 %v9825_v40  ;;  %v4923_v15 = vor.u32 %v4922_v42, %v4921_v56  ;;  %v11317_v56 = vld [vmem:[#allocation107_spill] sm:$0xff] }
 0x4f9   :  { %vm4924_vm9 = vcmp.lt.s32.totalorder %v10269_v5, 1  ;;  %vm4926_vm14 = vcmp.lt.s32.totalorder %v10269_v5, 3  ;;  %v4933_v19 = vsel %vm4927_vm4, %v4920_v26, 920167782  ;;  %v10312_v20 = vshrl.u32 %v4836_v4, 30 }
 0x4fa   :  { %v4716_v32 = vadd.f32 1.0, %v4715_v54  ;;  %v4723_v8 = vadd.f32 1.0, %v4722_v9  ;;  %v4932_v53 = vsel %vm4924_vm9, %v10288_v47, %v10293_v45  ;;  %vm4728_vm0 = vcmp.lt.s32.totalorder %v10259_v12, 2 }
 0x4fb   :  { %vm4925_vm12 = vcmp.lt.s32.totalorder %v10269_v5, 2  ;;  %v4934_v34 = vsel %vm4926_vm14, %v10295_v43, %v4933_v19  ;;  %v4937_v37 = vsel %vm4927_vm4, %v4923_v15, 1326507024  ;;  %v4838_v46 = vshll.u32 %v10312_v20, 30 }
 0x4fc   :  { %v4724_v16 = vmul.f32 %v4723_v8, %v10252_v50  ;;  %v4733_v61 = vxor.u32 2147483648, %v4716_v32  ;;  %v4936_v51 = vsel %vm4924_vm9, %v10293_v45, %v10295_v43  ;;  %vm4729_vm13 = vcmp.eq.s32.totalorder %v10259_v12, 0 }
 0x4fd   :  { %v4935_v62 = vsel %vm4925_vm12, %v4932_v53, %v4934_v34  ;;  %v4938_v48 = vsel %vm4926_vm14, %v4920_v26, %v4937_v37  ;;  %v10338_v57 = vshll.u32 %v4900_v60, 8  ;;  %v5332_v50 = vsel %vm10277_vm6, %v5260_v10, %v10224_v7  ;;  %v11316_v26 = vld [vmem:[#allocation129_spill] sm:$0xff] }
 0x4fe   :  { %v4730_v22 = vxor.u32 2147483648, %v4724_v16  ;;  %vm4732_vm15 = vcmp.eq.s32.totalorder %v10259_v12, 2  ;;  %v4839_v21 = vsub.s32 %v4835_v17, %v4838_v46  ;;  %v5291_v1 = vperm.slane %v10134_v29, 1 }
 0x4ff   :  { %v4734_v33 = vsel %vm4732_vm15, %v4733_v61, %v4724_v16  ;;  %v5363_v36 = vperm.slane %v10137_v30, 1  ;;  %v4939_v38 = vsel %vm4925_vm12, %v4936_v51, %v4938_v48  ;;  %v4966_v60 = vshrl.u32 %v4935_v62, 16 }
 0x500   :  { %v4731_v28 = vsel %vm4729_vm13, %v4716_v32, %v4730_v22  ;;  %vm4840_vm2 = vcmp.lt.s32.totalorder %v4839_v21, 0  ;;  %v4841_v25 = vsub.s32 0, %v4839_v21  ;;  %v4941_v7 = vand.u32 65535, %v10338_v57 }
 0x501   :  { %v4735_v11 = vsel %vm4728_vm0, %v4731_v28, %v4734_v33  ;;  %v4943_v10 = vand.u32 65535, %v4939_v38  ;;  %v4944_v6 = vshrl.u32 %v4939_v38, 16  ;;  %v4942_v31 = vshrl.u32 %v10338_v57, 16 }
 0x502   :  { %v4736_v58 = vsel %vm4725_vm11, nan, %v4735_v11  ;;  %v4842_v35 = vsel %vm4840_vm2, %v4841_v25, %v4839_v21  ;;  %v4965_v17 = vand.u32 65535, %v4935_v62  ;;  %v1650_v42 = vadd.f32 %v11317_v56, %v11316_v26 }
 0x503   :  { %v5219_v54 = vmul.f32 2.0, %v4736_v58  ;;  %v4843_v9 = vclz %v4842_v35  ;;  %v4946_v4 = vmul.u32 %v4944_v6, %v4941_v7  ;;  %v5404_v12 = vsel %vm10303_vm8, %v9670_v24, %v5332_v50 }
 0x504   :  { %vm10359_vm1 = vcmp.eq.s32.totalorder %v5291_v1, 1  ;;  %v4947_v19 = vmul.u32 %v4943_v10, %v4942_v31  ;;  %v4968_v32 = vmul.u32 %v4966_v60, %v4941_v7  ;;  %v4945_v34 = vmul.u32 %v4943_v10, %v4941_v7 }
 0x505   :  { %v5240_v8 = vmul.f32 %v5219_v54, %v4736_v58  ;;  %v6217_v53 = vadd.s32 4294967294, %v4843_v9  ;;  %v4949_v37 = vshll.u32 %v4946_v4, 16  ;;  %vm10363_vm5 = vcmp.eq.s32.totalorder %v5363_v36, 1 }
 0x506   :  { %v4831_v61 = vadd.s32 %v10263_v2, %v10261_v3  ;;  %v4948_v46 = vmul.u32 %v4944_v6, %v4942_v31  ;;  %v4967_v41 = vmul.u32 %v4965_v17, %v4941_v7  ;;  %v4951_v48 = vshll.u32 %v4947_v19, 16 }
 0x507   :  { %v5261_v24 = vsub.f32 1.0, %v5240_v8  ;;  %vm6218_vm7 = vcmp.lt.s32.totalorder %v6217_v53, 0  ;;  %vm4953_vm3 = vc.u32 %v4945_v34, %v4949_v37  ;;  %v4955_v51 = vadd.s32 %v4949_v37, %v4945_v34 }
 0x508   :  { %v4846_v62 = vsel %vm6218_vm7, 0, %v6217_v53  ;;  %v4954_v50 = vsel %vm4953_vm3, 1, %v11229_v14  ;;  %v4971_v22 = vshll.u32 %v4968_v32, 16  ;;  %v4969_v38 = vmul.u32 %v4965_v17, %v4942_v31 }
 0x509   :  { %v5333_v33 = vsel %vm10359_vm1, %v5261_v24, %v4736_v58  ;;  %v4847_v1 = vsub.s32 32, %v4846_v62  ;;  %v4851_v36 = vsub.s32 4294967266, %v4846_v62  ;;  %v4848_v2 = vshll.u32 %v4839_v21, %v4846_v62 }
 0x50a   :  { %v5405_v3 = vsel %vm10363_vm5, %v9825_v40, %v5333_v33  ;;  %v4956_v28 = vadd.s32 %v4954_v50, %v4948_v46  ;;  %vm4957_vm6 = vc.u32 %v4955_v51, %v4951_v48  ;;  %v4950_v6 = vshrl.u32 %v4946_v4, 16 }
 0x50b   :  { %v5437_v25 = vrot.slane %v5405_v3, 4  ;;  %v4849_v11 = vshrl.u32 %v4831_v61, %v4847_v1  ;;  %v4852_v7 = vadd.s32 127, %v4851_v36  ;;  %v4958_v10 = vsel %vm4957_vm6, 1, %v11229_v14 }
 0x50c   :  { %v4960_v35 = vadd.s32 %v4958_v10, %v4956_v28  ;;  %v4970_v26 = vmul.u32 %v4966_v60, %v4942_v31  ;;  %vm4975_vm8 = vc.u32 %v4967_v41, %v4971_v22  ;;  %v4973_v40 = vshll.u32 %v4969_v38, 16 }
 0x50d   :  { %v5448_v58 = vsel %vm5439_vm10, %v5404_v12, %v5437_v25  ;;  %v4850_v56 = vor.u32 %v4849_v11, %v4848_v2  ;;  %v4853_v17 = vshll.u32 %v4852_v7, 23  ;;  %v4976_v54 = vsel %vm4975_vm8, 1, %v11229_v14 }
 0x50e   :  { %5468 = vst [vmem:[#allocation10 + $0x40] sm:$0xff] %v5448_v58  ;;  %v4977_v21 = vadd.s32 %v4971_v22, %v4967_v41  ;;  %v4978_v9 = vadd.s32 %v4976_v54, %v4970_v26  ;;  %v10379_v15 = vadd.f32 %v10220_v23, %v1650_v42  ;;  %v4961_v53 = vadd.s32 %v4960_v35, %v4950_v6 }
 0x50f   :  { %v4854_v8 = vor.u32 4788187, %v4853_v17  ;;  %v4908_v4 = vshrl.u32 %v11219_v63, %v10265_v18  ;;  %v4929_v60 = vsel %vm4927_vm4, %v10295_v43, 2102212464  ;;  %v4952_v31 = vshrl.u32 %v4947_v19, 16 }
 0x510   :  { %vm4979_vm11 = vc.u32 %v4977_v21, %v4973_v40  ;;  %v4857_v34 = vcvt.s32.f32 %v4850_v56  ;;  %v5050_v16 = vand.u32 2139095040, %v10379_v15  ;;  %v4972_v42 = vshrl.u32 %v4968_v32, 16 }
 0x511   :  { %v4855_v12 = vand.u32 2147483647, %v4854_v8  ;;  %v4980_v37 = vsel %vm4979_vm11, 1, %v11229_v14  ;;  %v4928_v23 = vsel %vm4924_vm9, %v4908_v4, %v10288_v47  ;;  %v4930_v18 = vsel %vm4926_vm14, %v10293_v45, %v4929_v60 }
 0x512   :  { %v4982_v61 = vadd.s32 %v4980_v37, %v4978_v9  ;;  %v10394_v43 = vadd.s32 %v4961_v53, %v4952_v31  ;;  %v5051_v19 = vshrl.u32 %v5050_v16, 23  ;;  %v4974_v41 = vshrl.u32 %v4969_v38, 16 }
 0x513   :  { %v4858_v46 = vmul.f32 %v4857_v34, %v4855_v12  ;;  %v10396_v62 = vadd.s32 %v4977_v21, %v4973_v40  ;;  %vm4739_vm4 = vcmp.lt.s32.totalorder %v9971_v55, 0  ;;  %v4931_v47 = vsel %vm4925_vm12, %v4928_v23, %v4930_v18 }
 0x514   :  { %v4983_v24 = vadd.s32 %v4982_v61, %v4972_v42  ;;  %v6222_v48 = vadd.s32 4294967169, %v5051_v19  ;;  %vm10403_vm9 = vcmp.le.f32.partialorder %v4737_v27, 0.7853982  ;;  %v4985_v27 = vmul.u32 %v10338_v57, %v4931_v47 }
 0x515   :  { %v4859_v51 = vxor.u32 2147483648, %v4858_v46  ;;  %vm4987_vm14 = vc.u32 %v10394_v43, %v10396_v62  ;;  %v5047_v38 = vand.u32 2147483647, %v10379_v15  ;;  %v4861_v2 = vsub.s32 4, %v10312_v20 }
 0x516   :  { %v4984_v32 = vadd.s32 %v4983_v24, %v4974_v41  ;;  %v5057_v22 = vadd.s32 1, %v6222_v48  ;;  %vm4894_vm7 = vcmp.lt.s32.totalorder %v10129_v0, 0  ;;  %vm10499_vm3 = vcmp.le.f32.partialorder %v4892_v39, 0.7853982 }
 0x517   :  { %v4860_v45 = vsel %vm4739_vm4, %v4859_v51, %v4858_v46  ;;  %v5054_v10 = vand.u32 8388607, %v5047_v38  ;;  %v4862_v57 = vsel %vm4739_vm4, %v4861_v2, %v10312_v20 }
 0x518   :  { %v10414_v33 = vsel %vm10403_vm9, %v9971_v55, %v4860_v45  ;;  %v4988_v5 = vadd.s32 1, %v4984_v32  ;;  %vm5058_vm0 = vcmp.gt.s32.totalorder %v5057_v22, 0  ;;  %v4864_v56 = vsel %vm10403_vm9, 0, %v4862_v57 }
 0x519   :  { %v10418_v1 = vmul.f32 %v10414_v33, %v10414_v33  ;;  %v5059_v3 = vsel %vm5058_vm0, %v5057_v22, 0  ;;  %v5055_v17 = vor.u32 8388608, %v5054_v10  ;;  %v4881_v51 = vadd.s32 3, %v4864_v56 }
 0x51a   :  { %v4989_v36 = vsel %vm4987_vm14, %v4988_v5, %v4984_v32  ;;  %v5061_v25 = vand.u32 31, %v5059_v3  ;;  %v10441_v8 = vshrl.u32 %v5059_v3, 5  ;;  %v4986_v3 = vadd.s32 %v10396_v62, %v10394_v43 }
 0x51b   :  { %v4990_v28 = vadd.s32 %v4989_v36, %v4985_v27  ;;  %v4873_v11 = vmul.f32 -0.00019511016, %v10418_v1  ;;  %v4866_v21 = vmul.f32 -0.001358992, %v10418_v1 }
 0x51c   :  { %v10426_v6 = vsub.s32 32, %v5061_v25  ;;  %v5064_v53 = vshll.u32 %v11219_v63, %v5061_v25  ;;  %v5067_v4 = vshll.u32 %v11208_v59, %v5061_v25  ;;  %v5073_v37 = vshll.u32 %v11214_v13, %v5061_v25 }
 0x51d   :  { %v4991_v7 = vadd.s32 536870912, %v4990_v28  ;;  %v4874_v26 = vadd.f32 0.008332121, %v4873_v11  ;;  %v5070_v42 = vshll.u32 %v11209_v44, %v5061_v25  ;;  %v4867_v61 = vadd.f32 0.041655596, %v4866_v21 }
 0x51e   :  { %v5065_v54 = vshrl.u32 %v11208_v59, %v10426_v6  ;;  %v5068_v40 = vshrl.u32 %v11209_v44, %v10426_v6  ;;  %v5074_v20 = vshrl.u32 %v11215_v49, %v10426_v6  ;;  %v5071_v60 = vshrl.u32 %v11214_v13, %v10426_v6 }
 0x51f   :  { %v10431_v35 = vshrl.u32 %v4991_v7, 30  ;;  %v5077_v31 = vshrl.u32 %v11220_v52, %v10426_v6  ;;  %v4875_v12 = vmul.f32 %v4874_v26, %v10418_v1  ;;  %v5076_v59 = vshll.u32 %v11215_v49, %v5061_v25 }
 0x520   :  { %v10453_v16 = vor.u32 %v5065_v54, %v5064_v53  ;;  %v10455_v23 = vor.u32 %v5068_v40, %v5067_v4  ;;  %v5075_v18 = vor.u32 %v5074_v20, %v5073_v37  ;;  %v10459_v41 = vor.u32 %v5071_v60, %v5070_v42 }
 0x521   :  { %v4993_v58 = vshll.u32 %v10431_v35, 30  ;;  %v5078_v52 = vor.u32 %v5077_v31, %v5076_v59  ;;  %v4876_v24 = vadd.f32 -0.16666654, %v4875_v12  ;;  %vm5079_vm13 = vcmp.lt.s32.totalorder %v10441_v8, 1 }
 0x522   :  { %vm5082_vm15 = vcmp.lt.s32.totalorder %v10441_v8, 4  ;;  %v5087_v44 = vsel %vm5079_vm13, %v10453_v16, %v10455_v23  ;;  %v10467_v49 = vshll.u32 %v5055_v17, 8  ;;  %v4868_v48 = vmul.f32 %v4867_v61, %v10418_v1 }
 0x523   :  { %v4994_v9 = vsub.s32 %v4990_v28, %v4993_v58  ;;  %vm5080_vm2 = vcmp.lt.s32.totalorder %v10441_v8, 2  ;;  %vm5081_vm1 = vcmp.lt.s32.totalorder %v10441_v8, 3  ;;  %v5088_v47 = vsel %vm5082_vm15, %v5075_v18, 920167782 }
 0x524   :  { %v5089_v32 = vsel %vm5081_vm1, %v10459_v41, %v5088_v47  ;;  %v5091_v50 = vsel %vm5079_vm13, %v10455_v23, %v10459_v41  ;;  %v5092_v45 = vsel %vm5082_vm15, %v5078_v52, 1326507024  ;;  %v4877_v22 = vmul.f32 %v4876_v24, %v10418_v1 }
 0x525   :  { %vm4995_vm12 = vcmp.lt.s32.totalorder %v4994_v9, 0  ;;  %v4996_v34 = vsub.s32 0, %v4994_v9  ;;  %v5090_v27 = vsel %vm5080_vm2, %v5087_v44, %v5089_v32  ;;  %v5093_v36 = vsel %vm5081_vm1, %v5075_v18, %v5092_v45 }
 0x526   :  { %v5096_v25 = vand.u32 65535, %v10467_v49  ;;  %v5094_v11 = vsel %vm5080_vm2, %v5091_v50, %v5093_v36  ;;  %v5097_v7 = vshrl.u32 %v10467_v49, 16  ;;  %v5120_v10 = vand.u32 65535, %v5090_v27 }
 0x527   :  { %v4997_v46 = vsel %vm4995_vm12, %v4996_v34, %v4994_v9  ;;  %v5121_v57 = vshrl.u32 %v5090_v27, 16  ;;  %v5098_v17 = vand.u32 65535, %v5094_v11  ;;  %v4869_v54 = vadd.f32 -0.4999988, %v4868_v48 }
 0x528   :  { %v4998_v19 = vclz %v4997_v46  ;;  %v4878_v40 = vadd.f32 1.0, %v4877_v22  ;;  %v5099_v21 = vshrl.u32 %v5094_v11, 16  ;;  %v5124_v60 = vmul.u32 %v5120_v10, %v5097_v7 }
 0x529   :  { %v5123_v20 = vmul.u32 %v5121_v57, %v5096_v25  ;;  %v5102_v4 = vmul.u32 %v5098_v17, %v5097_v7  ;;  %v10495_v31 = vand.u32 3, %v4881_v51  ;;  %v5016_v34 = vsub.s32 4, %v10431_v35 }
 0x52a   :  { %v6220_v13 = vadd.s32 4294967294, %v4998_v19  ;;  %v5101_v53 = vmul.u32 %v5099_v21, %v5096_v25  ;;  %v4870_v42 = vmul.f32 %v4869_v54, %v10418_v1  ;;  %v4879_v59 = vmul.f32 %v4878_v40, %v10414_v33 }
 0x52b   :  { %v5126_v37 = vshll.u32 %v5123_v20, 16  ;;  %v5100_v61 = vmul.u32 %v5098_v17, %v5096_v25  ;;  %v5103_v52 = vmul.u32 %v5099_v21, %v5097_v7  ;;  %v5122_v24 = vmul.u32 %v5120_v10, %v5096_v25 }
 0x52c   :  { %vm6221_vm5 = vcmp.lt.s32.totalorder %v6220_v13, 0  ;;  %v5104_v46 = vshll.u32 %v5101_v53, 16  ;;  %v5106_v51 = vshll.u32 %v5102_v4, 16  ;;  %v5084_v1 = vsel %vm5082_vm15, %v10459_v41, 2102212464 }
 0x52d   :  { %v5001_v5 = vsel %vm6221_vm5, 0, %v6220_v13  ;;  %v5128_v13 = vshll.u32 %v5124_v60, 16  ;;  %vm5130_vm8 = vc.u32 %v5122_v24, %v5126_v37  ;;  %v5132_v47 = vadd.s32 %v5126_v37, %v5122_v24 }
 0x52e   :  { %v5002_v2 = vsub.s32 32, %v5001_v5  ;;  %v5006_v28 = vsub.s32 4294967266, %v5001_v5  ;;  %v5003_v26 = vshll.u32 %v4994_v9, %v5001_v5  ;;  %vm5108_vm6 = vc.u32 %v5100_v61, %v5104_v46 }
 0x52f   :  { %v5110_v39 = vadd.s32 %v5104_v46, %v5100_v61  ;;  %v5109_v48 = vsel %vm5108_vm6, 1, %v11229_v14  ;;  %v5125_v32 = vmul.u32 %v5121_v57, %v5097_v7  ;;  %v5131_v22 = vsel %vm5130_vm8, 1, %v11229_v14 }
 0x530   :  { %v5004_v58 = vshrl.u32 %v4986_v3, %v5002_v2  ;;  %v5007_v56 = vadd.s32 127, %v5006_v28  ;;  %v5111_v33 = vadd.s32 %v5109_v48, %v5103_v52  ;;  %vm5134_vm4 = vc.u32 %v5132_v47, %v5128_v13 }
 0x531   :  { %vm5112_vm11 = vc.u32 %v5110_v39, %v5106_v51  ;;  %v5105_v5 = vshrl.u32 %v5101_v53, 16  ;;  %v5133_v36 = vadd.s32 %v5131_v22, %v5125_v32  ;;  %v5135_v3 = vsel %vm5134_vm4, 1, %v11229_v14 }
 0x532   :  { %v5005_v43 = vor.u32 %v5004_v58, %v5003_v26  ;;  %v5008_v62 = vshll.u32 %v5007_v56, 23  ;;  %v5113_v45 = vsel %vm5112_vm11, 1, %v11229_v14  ;;  %v4871_v2 = vadd.f32 1.0, %v4870_v42 }
 0x533   :  { %v5115_v27 = vadd.s32 %v5113_v45, %v5111_v33  ;;  %v5063_v41 = vshrl.u32 %v11219_v63, %v10426_v6  ;;  %v5107_v25 = vshrl.u32 %v5102_v4, 16  ;;  %v5127_v10 = vshrl.u32 %v5123_v20, 16 }
 0x534   :  { %v5009_v12 = vor.u32 4788187, %v5008_v62  ;;  %v5012_v19 = vcvt.s32.f32 %v5005_v43  ;;  %v5137_v57 = vadd.s32 %v5135_v3, %v5133_v36  ;;  %v4885_v26 = vxor.u32 2147483648, %v4879_v59 }
 0x535   :  { %v5116_v7 = vadd.s32 %v5115_v27, %v5105_v5  ;;  %v5083_v14 = vsel %vm5079_vm13, %v5063_v41, %v10453_v16  ;;  %v5085_v56 = vsel %vm5081_vm1, %v10455_v23, %v5084_v1  ;;  %v5017_v63 = vsel %vm4894_vm7, %v5016_v34, %v10431_v35 }
 0x536   :  { %v5010_v18 = vand.u32 2147483647, %v5009_v12  ;;  %v5129_v17 = vshrl.u32 %v5124_v60, 16  ;;  %v5138_v54 = vadd.s32 %v5137_v57, %v5127_v10  ;;  %v4888_v40 = vxor.u32 2147483648, %v4871_v2 }
 0x537   :  { %v10529_v6 = vadd.s32 %v5116_v7, %v5107_v25  ;;  %v10531_v43 = vadd.s32 %v5132_v47, %v5128_v13  ;;  %vm4884_vm9 = vcmp.eq.s32.totalorder %v10495_v31, 0  ;;  %v5086_v16 = vsel %vm5080_vm2, %v5083_v14, %v5085_v56 }
 0x538   :  { %v5013_v44 = vmul.f32 %v5012_v19, %v5010_v18  ;;  %v5139_v62 = vadd.s32 %v5138_v54, %v5129_v17  ;;  %v4886_v23 = vsel %vm4884_vm9, %v4871_v2, %v4885_v26  ;;  %vm4883_vm0 = vcmp.lt.s32.totalorder %v10495_v31, 2 }
 0x539   :  { %vm5142_vm14 = vc.u32 %v10529_v6, %v10531_v43  ;;  %vm4887_vm12 = vcmp.eq.s32.totalorder %v10495_v31, 2  ;;  %v5019_v35 = vsel %vm10499_vm3, 0, %v5017_v63  ;;  %v5140_v8 = vmul.u32 %v10467_v49, %v5086_v16 }
 0x53a   :  { %v5014_v50 = vxor.u32 2147483648, %v5013_v44  ;;  %v5143_v60 = vadd.s32 1, %v5139_v62  ;;  %v4889_v12 = vsel %vm4887_vm12, %v4888_v40, %v4879_v59  ;;  %vm4880_vm13 = vweird.f32 %v9971_v55 }
 0x53b   :  { %v4890_v42 = vsel %vm4883_vm0, %v4886_v23, %v4889_v12  ;;  %v5036_v52 = vadd.s32 3, %v5019_v35  ;;  %v5292_v27 = vperm.slane %v10134_v29, 2  ;;  %v5293_v2 = vperm.slane %v10134_v29, 3 }
 0x53c   :  { %v5015_v28 = vsel %vm4894_vm7, %v5014_v50, %v5013_v44  ;;  %v5144_v61 = vsel %vm5142_vm14, %v5143_v60, %v5139_v62  ;;  %v4891_v24 = vsel %vm4880_vm13, nan, %v4890_v42  ;;  %vm5035_vm7 = vweird.f32 %v10129_v0 }
 0x53d   :  { %v5018_v11 = vsel %vm10499_vm3, %v10129_v0, %v5015_v28  ;;  %v5145_v19 = vadd.s32 %v5144_v61, %v5140_v8  ;;  %v5220_v59 = vmul.f32 2.0, %v4891_v24  ;;  %v5037_v48 = vand.u32 3, %v5036_v52 }
 0x53e   :  { %v5020_v58 = vmul.f32 %v5018_v11, %v5018_v11  ;;  %v5365_v25 = vperm.slane %v10137_v30, 3  ;;  %v5364_v10 = vperm.slane %v10137_v30, 2  ;;  %vm5313_vm3 = vcmp.eq.s32.totalorder %v5292_v27, 1 }
 0x53f   :  { %v5146_v39 = vadd.s32 536870912, %v5145_v19  ;;  %v5241_v50 = vmul.f32 %v5220_v59, %v4891_v24  ;;  %vm5038_vm15 = vcmp.lt.s32.totalorder %v5037_v48, 2  ;;  %vm5039_vm2 = vcmp.eq.s32.totalorder %v5037_v48, 0 }
 0x540   :  { %v5021_v21 = vmul.f32 -0.001358992, %v5020_v58  ;;  %v5028_v20 = vmul.f32 -0.00019511016, %v5020_v58  ;;  %vm5042_vm1 = vcmp.eq.s32.totalorder %v5037_v48, 2  ;;  %vm5314_vm6 = vcmp.eq.s32.totalorder %v5293_v2, 1 }
 0x541   :  { %v10544_v44 = vshrl.u32 %v5146_v39, 30  ;;  %v5262_v7 = vsub.f32 1.0, %v5241_v50  ;;  %vm5386_vm8 = vcmp.eq.s32.totalorder %v5365_v25, 1  ;;  %vm5385_vm4 = vcmp.eq.s32.totalorder %v5364_v10, 1 }
 0x542   :  { %v5022_v53 = vadd.f32 0.041655596, %v5021_v21  ;;  %v5029_v4 = vadd.f32 0.008332121, %v5028_v20  ;;  %v5141_v17 = vadd.s32 %v10531_v43, %v10529_v6  ;;  %vm5049_vm9 = vcmp.lt.s32.totalorder %v10379_v15, 0 }
 0x543   :  { %v5148_v1 = vshll.u32 %v10544_v44, 30  ;;  %v5334_v14 = vsel %vm5313_vm3, %v5262_v7, %v4891_v24  ;;  %vm5048_vm14 = vcmp.le.f32.partialorder %v5047_v38, 0.7853982  ;;  %v5171_v43 = vsub.s32 4, %v10544_v44 }
 0x544   :  { %v5023_v34 = vmul.f32 %v5022_v53, %v5020_v58  ;;  %v5030_v37 = vmul.f32 %v5029_v4, %v5020_v58  ;;  %v5406_v53 = vsel %vm5385_vm4, %v9971_v55, %v5334_v14  ;;  %vm5190_vm13 = vweird.f32 %v10379_v15 }
 0x545   :  { %v5149_v32 = vsub.s32 %v5145_v19, %v5148_v1 }
 0x546   :  { %v5024_v46 = vadd.f32 -0.4999988, %v5023_v34  ;;  %v5031_v18 = vadd.f32 -0.16666654, %v5030_v37 }
 0x547   :  { %vm5150_vm5 = vcmp.lt.s32.totalorder %v5149_v32, 0  ;;  %v5151_v5 = vsub.s32 0, %v5149_v32 }
 0x548   :  { %v5025_v51 = vmul.f32 %v5024_v46, %v5020_v58  ;;  %v5032_v31 = vmul.f32 %v5031_v18, %v5020_v58  ;;  %v5172_v18 = vsel %vm5049_vm9, %v5171_v43, %v10544_v44 }
 0x549   :  { %v5152_v28 = vsel %vm5150_vm5, %v5151_v5, %v5149_v32  ;;  %v5174_v24 = vsel %vm5048_vm14, 0, %v5172_v18  ;;  %v5294_v5 = vperm.slane %v10134_v29, 4 }
 0x54a   :  { %v5026_v9 = vadd.f32 1.0, %v5025_v51  ;;  %v5033_v13 = vadd.f32 1.0, %v5032_v31 }
 0x54c   :  { %v5034_v47 = vmul.f32 %v5033_v13, %v5018_v11  ;;  %v5043_v49 = vxor.u32 2147483648, %v5026_v9  ;;  %v5153_v11 = vclz %v5152_v28  ;;  %v5191_v13 = vadd.s32 3, %v5174_v24 }
 0x54e   :  { %v5040_v33 = vxor.u32 2147483648, %v5034_v47  ;;  %v5044_v22 = vsel %vm5042_vm1, %v5043_v49, %v5034_v47  ;;  %v6223_v26 = vadd.s32 4294967294, %v5153_v11  ;;  %v5192_v49 = vand.u32 3, %v5191_v13 }
 0x550   :  { %v5041_v45 = vsel %vm5039_vm2, %v5026_v9, %v5040_v33  ;;  %vm6224_vm11 = vcmp.lt.s32.totalorder %v6223_v26, 0  ;;  %vm5197_vm0 = vcmp.eq.s32.totalorder %v5192_v49, 2  ;;  %vm5193_vm12 = vcmp.lt.s32.totalorder %v5192_v49, 2 }
 0x551   :  { %v5045_v36 = vsel %vm5038_vm15, %v5041_v45, %v5044_v22  ;;  %v5156_v56 = vsel %vm6224_vm11, 0, %v6223_v26  ;;  %vm5315_vm15 = vcmp.eq.s32.totalorder %v5294_v5, 1 }
 0x552   :  { %v5046_v3 = vsel %vm5035_vm7, nan, %v5045_v36  ;;  %v5157_v54 = vsub.s32 32, %v5156_v56  ;;  %v5161_v40 = vsub.s32 4294967266, %v5156_v56  ;;  %v5158_v16 = vshll.u32 %v5149_v32, %v5156_v56 }
 0x553   :  { %v5221_v41 = vmul.f32 2.0, %v5046_v3  ;;  %v5366_v36 = vperm.slane %v10137_v30, 4 }
 0x554   :  { %v5159_v62 = vshrl.u32 %v5141_v17, %v5157_v54  ;;  %v5162_v23 = vadd.s32 127, %v5161_v40 }
 0x555   :  { %v5242_v57 = vmul.f32 %v5221_v41, %v5046_v3  ;;  %vm5387_vm2 = vcmp.eq.s32.totalorder %v5366_v36, 1 }
 0x556   :  { %v5160_v35 = vor.u32 %v5159_v62, %v5158_v16  ;;  %v5163_v60 = vshll.u32 %v5162_v23, 23 }
 0x557   :  { %v5263_v58 = vsub.f32 1.0, %v5242_v57 }
 0x558   :  { %v5164_v12 = vor.u32 4788187, %v5163_v60  ;;  %v5167_v37 = vcvt.s32.f32 %v5160_v35 }
 0x559   :  { %v5335_v63 = vsel %vm5314_vm6, %v5263_v58, %v5046_v3 }
 0x55a   :  { %v5407_v21 = vsel %vm5386_vm8, %v10129_v0, %v5335_v63  ;;  %v5165_v34 = vand.u32 2147483647, %v5164_v12 }
 0x55b   :  { %v5438_v20 = vrot.slane %v5407_v21, 4 }
 0x55c   :  { %v5168_v8 = vmul.f32 %v5167_v37, %v5165_v34 }
 0x55d   :  { %v5449_v4 = vsel %vm5439_vm10, %v5406_v53, %v5438_v20  ;;  %vm5194_vm10 = vcmp.eq.s32.totalorder %v5192_v49, 0 }
 0x55e   :  { %5469 = vst [vmem:[#allocation10 + $0x48] sm:$0xff] %v5449_v4  ;;  %v5169_v6 = vxor.u32 2147483648, %v5168_v8 }
 0x560   :  { %v5170_v0 = vsel %vm5049_vm9, %v5169_v6, %v5168_v8 }
 0x561   :  { %v5173_v55 = vsel %vm5048_vm14, %v10379_v15, %v5170_v0 }
 0x562   :  { %v5175_v42 = vmul.f32 %v5173_v55, %v5173_v55 }
 0x564   :  { %v5176_v61 = vmul.f32 -0.001358992, %v5175_v42  ;;  %v5183_v46 = vmul.f32 -0.00019511016, %v5175_v42 }
 0x566   :  { %v5177_v19 = vadd.f32 0.041655596, %v5176_v61  ;;  %v5184_v52 = vadd.f32 0.008332121, %v5183_v46 }
 0x568   :  { %v5178_v51 = vmul.f32 %v5177_v19, %v5175_v42  ;;  %v5185_v31 = vmul.f32 %v5184_v52, %v5175_v42 }
 0x56a   :  { %v5179_v39 = vadd.f32 -0.4999988, %v5178_v51  ;;  %v5186_v9 = vadd.f32 -0.16666654, %v5185_v31 }
 0x56c   :  { %v5180_v59 = vmul.f32 %v5179_v39, %v5175_v42  ;;  %v5187_v38 = vmul.f32 %v5186_v9, %v5175_v42 }
 0x56e   :  { %v5181_v48 = vadd.f32 1.0, %v5180_v59  ;;  %v5188_v47 = vadd.f32 1.0, %v5187_v38 }
 0x570   :  { %v5189_v1 = vmul.f32 %v5188_v47, %v5173_v55  ;;  %v5198_v33 = vxor.u32 2147483648, %v5181_v48 }
 0x572   :  { %v5195_v32 = vxor.u32 2147483648, %v5189_v1  ;;  %v5199_v50 = vsel %vm5197_vm0, %v5198_v33, %v5189_v1 }
 0x574   :  { %v5196_v44 = vsel %vm5194_vm10, %v5181_v48, %v5195_v32 }
 0x575   :  { %v5200_v45 = vsel %vm5193_vm12, %v5196_v44, %v5199_v50 }
 0x576   :  { %v5201_v22 = vsel %vm5190_vm13, nan, %v5200_v45 }
 0x577   :  { %v5222_v27 = vmul.f32 2.0, %v5201_v22 }
 0x579   :  { %v5243_v3 = vmul.f32 %v5222_v27, %v5201_v22 }
 0x57b   :  { %v5264_v2 = vsub.f32 1.0, %v5243_v3 }
 0x57d   :  { %v5336_v28 = vsel %vm5315_vm15, %v5264_v2, %v5201_v22 }
 0x57e   :  { %v5408_v41 = vsel %vm5387_vm2, %v10379_v15, %v5336_v28 }
 0x57f   :  { %5470 = vst [vmem:[#allocation10 + $0x50] sm:$0xf] %v5408_v41 }
 0x580   :  { %5481 = dma.vmem_to_hbm [thread:$0]  %s5477_s3, 1344, %s5479_s11, [#allocation4]  }
 0x581   :  { %6533 = dma.done.wait [#allocation4], 1344  }
 0x582   :  { %6534 = vsyncadd [#allocation4], 4294965952 }
 0x583   :  { %5486 = vsyncpa [#allocation3], 1 }
 0x584   :  { %5487 = vsyncpa [#allocation6], 1 }
 0x585   :  { %5488 = vsyncpa [#allocation9], 1 }
 0x586   :  { %5489 = vsyncpa [#allocation4], 1 }

</bundles_post_ra>
